<compile_context>
chip_gen: v5e
topology: v5e:2x2
jax: 0.10.0
libtpu: 0.0.40
codegen_flags: <defaults>
</compile_context>

<pallas_src>
import numpy as np
import jax
import jax.numpy as jnp
from jax.experimental import pallas as pl
from jax.experimental.pallas import tpu as pltpu

F32 = jnp.float32
BF16 = jnp.bfloat16
EPS = 1e-5          # nn.InstanceNorm2d default eps
NEG_SLOPE = 0.01    # nn.LeakyReLU default negative_slope


# ------------------------------ small helpers -------------------------------

def _leaky(x):
    return jnp.where(x >= 0, x, NEG_SLOPE * x)


def _instnorm_rows(y):
    # y: (C, HW) for one sample; per-channel (per-row) stats over the lane axis.
    m = jnp.mean(y, axis=-1, keepdims=True)
    d = y - m
    v = jnp.mean(d * d, axis=-1, keepdims=True)
    return d * jax.lax.rsqrt(v + EPS)


def _parallel_params():
    return pltpu.CompilerParams(dimension_semantics=("parallel",))


# ----------------- fused ReluConvBn (single im2col matmul) ------------------

def _make_conv_kernel(pre_act, norm, has_bias, n_res):
    def kernel(*refs):
        idx = 0
        x_ref = refs[idx]; idx += 1            # (1, K, HW) f32 patches
        w_ref = refs[idx]; idx += 1            # (Cout, K) bf16
        b_ref = None
        if has_bias:
            b_ref = refs[idx]; idx += 1        # (Cout, 1)
        res_refs = refs[idx:idx + n_res]; idx += n_res
        o_ref = refs[idx]                      # (1, Cout, HW)

        x = x_ref[0]
        if pre_act:
            x = _leaky(x)
        y = jnp.dot(w_ref[...], x.astype(BF16),
                    preferred_element_type=F32)          # (Cout, HW)
        if has_bias:
            y = y + b_ref[...]
        if norm:
            y = _instnorm_rows(y)
        for r in res_refs:
            y = y + r[0]
        o_ref[0] = y
    return kernel


def conv_lane(x, w, *, k, pad, dil=1, stride=1, pre_act=True, norm=True,
              residuals=(), bias=None):
    """(LeakyReLU ->) Conv2d (-> InstanceNorm) (+ sum of residuals) (+ bias).

    x: (N, Cin, H, W); w: (Cout, k*k*Cin) bf16; residuals/bias are f32.
    The im2col tap gather is XLA data prep; the matmul/norm run in Pallas on
    lane-dense (C, H*W) tiles.
    """
    N, Cin, H, W = x.shape
    Cout, K = w.shape
    assert K == k * k * Cin, (K, k, Cin)
    if k == 1 and stride == 1:
        OH, OW = H, W
        patches = x.reshape(N, Cin, H * W)
    else:
        xp = jnp.pad(x, ((0, 0), (0, 0), (pad, pad), (pad, pad)))
        Hp, Wp = H + 2 * pad, W + 2 * pad
        OH = (Hp - dil * (k - 1) - 1) // stride + 1
        OW = (Wp - dil * (k - 1) - 1) // stride + 1
        taps = []
        for i in range(k):
            for j in range(k):
                hs, ws = i * dil, j * dil
                taps.append(xp[:, :, hs:hs + (OH - 1) * stride + 1:stride,
                               ws:ws + (OW - 1) * stride + 1:stride])
        patches = jnp.concatenate(taps, axis=1).reshape(N, K, OH * OW)
    HW = OH * OW

    kernel = _make_conv_kernel(pre_act, norm, bias is not None, len(residuals))
    in_specs = [pl.BlockSpec((1, K, HW), lambda b: (b, 0, 0)),
                pl.BlockSpec((Cout, K), lambda b: (0, 0))]
    args = [patches, w]
    if bias is not None:
        in_specs.append(pl.BlockSpec((Cout, 1), lambda b: (0, 0)))
        args.append(bias)
    for r in residuals:
        in_specs.append(pl.BlockSpec((1, Cout, HW), lambda b: (b, 0, 0)))
        args.append(r.reshape(N, Cout, HW))
    out = pl.pallas_call(
        kernel,
        out_shape=jax.ShapeDtypeStruct((N, Cout, HW), F32),
        grid=(N,),
        in_specs=in_specs,
        out_specs=pl.BlockSpec((1, Cout, HW), lambda b: (b, 0, 0)),
        compiler_params=_parallel_params(),
    )(*args)
    return out.reshape(N, Cout, OH, OW)


# ------------------------ FactorizedReduce (fused) ---------------------------

def _fr_kernel(xa_ref, xb_ref, w1_ref, w2_ref, o_ref):
    a = _leaky(xa_ref[0]).astype(BF16)
    b = _leaky(xb_ref[0]).astype(BF16)
    ya = jnp.dot(w1_ref[...], a, preferred_element_type=F32)   # (Ch, HW)
    yb = jnp.dot(w2_ref[...], b, preferred_element_type=F32)
    # InstanceNorm is per-channel, so normalizing each half independently is
    # identical to normalizing the concatenation (no in-kernel concat needed).
    o_ref[0, 0] = _instnorm_rows(ya)
    o_ref[0, 1] = _instnorm_rows(yb)


def factorized_reduce(x, w1, w2):
    # TODO(synk): matches the PyTorch x[:, :, 1:, 1:] stride-2 branch only for
    # even H/W, which holds for every tensor in this model.
    N, Cin, H, W = x.shape
    xa = x[:, :, ::2, ::2]
    xb = x[:, :, 1::2, 1::2]
    OH, OW = xa.shape[2], xa.shape[3]
    HW = OH * OW
    Ch = w1.shape[0]
    xa = xa.reshape(N, Cin, HW)
    xb = xb.reshape(N, Cin, HW)
    out = pl.pallas_call(
        _fr_kernel,
        out_shape=jax.ShapeDtypeStruct((N, 2, Ch, HW), F32),
        grid=(N,),
        in_specs=[pl.BlockSpec((1, Cin, HW), lambda b: (b, 0, 0)),
                  pl.BlockSpec((1, Cin, HW), lambda b: (b, 0, 0)),
                  pl.BlockSpec((Ch, Cin), lambda b: (0, 0)),
                  pl.BlockSpec((Ch, Cin), lambda b: (0, 0))],
        out_specs=pl.BlockSpec((1, 2, Ch, HW), lambda b: (b, 0, 0, 0)),
        compiler_params=_parallel_params(),
    )(xa, xb, w1, w2)
    return out.reshape(N, 2 * Ch, OH, OW)


# --------------------------- AvgPool2d(3,1,1) --------------------------------

def _pool_taps(x):
    """(N, C, H, W) -> (N, 9, C, H*W) shifted taps (zero padded, incl. pad)."""
    N, C, H, W = x.shape
    xp = jnp.pad(x, ((0, 0), (0, 0), (1, 1), (1, 1)))
    taps = [xp[:, :, i:i + H, j:j + W] for i in range(3) for j in range(3)]
    return jnp.stack(taps, axis=1).reshape(N, 9, C, H * W)


def _make_pool_kernel(has_res):
    def kernel(*refs):
        t_ref = refs[0]
        r_ref = refs[1] if has_res else None
        o_ref = refs[-1]
        acc = t_ref[0, 0]
        for t in range(1, 9):
            acc = acc + t_ref[0, t]
        y = acc * (1.0 / 9.0)                 # count_include_pad=True
        if has_res:
            y = y + r_ref[0]
        o_ref[0] = y
    return kernel


def avg_pool3(x, residual=None):
    N, C, H, W = x.shape
    HW = H * W
    taps = _pool_taps(x)
    kernel = _make_pool_kernel(residual is not None)
    in_specs = [pl.BlockSpec((1, 9, C, HW), lambda b: (b, 0, 0, 0))]
    args = [taps]
    if residual is not None:
        in_specs.append(pl.BlockSpec((1, C, HW), lambda b: (b, 0, 0)))
        args.append(residual.reshape(N, C, HW))
    out = pl.pallas_call(
        kernel,
        out_shape=jax.ShapeDtypeStruct((N, C, HW), F32),
        grid=(N,),
        in_specs=in_specs,
        out_specs=pl.BlockSpec((1, C, HW), lambda b: (b, 0, 0)),
        compiler_params=_parallel_params(),
    )(*args)
    return out.reshape(N, C, H, W)


# ------------------------ generalized SE-block kernel ------------------------
# Each cell node is given as a sum of plain refs plus an optional 3x3 avg-pool
# term; the kernel builds the nodes in VMEM, runs the squeeze-excite MLP on
# per-node pooled means, gates each node, adds the decoder skip, and (for the
# stem) applies LeakyReLU before and InstanceNorm after.

def _make_se_kernel(struct, pre_leaky, post_norm, has_skip):
    n = len(struct)

    def kernel(*refs):
        idx = 0
        vals = []
        for cnt, has_pool in struct:
            v = refs[idx][0]; idx += 1                       # (C, HW)
            for _ in range(cnt - 1):
                v = v + refs[idx][0]; idx += 1
            if has_pool:
                t_ref = refs[idx]; idx += 1                  # (1, 9, C, HW)
                acc = t_ref[0, 0]
                for t in range(1, 9):
                    acc = acc + t_ref[0, t]
                v = v + acc * (1.0 / 9.0)
            vals.append(v)
        w1_refs = refs[idx:idx + n]; idx += n                # (Cr, C) each
        b1_ref = refs[idx]; idx += 1                         # (Cr, 1)
        w2_refs = refs[idx:idx + n]; idx += n                # (C, Cr) each
        b2_refs = refs[idx:idx + n]; idx += n                # (C, 1) each
        skip_ref = None
        if has_skip:
            skip_ref = refs[idx]; idx += 1                   # (1, n, C, HW)
        o_ref = refs[idx]                                    # (1, n, C, HW)

        if pre_leaky:
            vals = [_leaky(v) for v in vals]
        h = b1_ref[...]
        for i in range(n):
            p = jnp.mean(vals[i], axis=-1, keepdims=True)    # (C, 1)
            h = h + jnp.dot(w1_refs[i][...], p, preferred_element_type=F32)
        h = jnp.maximum(h, 0.0)
        for i in range(n):
            g = jax.nn.sigmoid(
                jnp.dot(w2_refs[i][...], h, preferred_element_type=F32)
                + b2_refs[i][...])                           # (C, 1)
            y = vals[i] * g
            if has_skip:
                y = y + skip_ref[0, i]
            if post_norm:
                y = _instnorm_rows(y)
            o_ref[0, i] = y
    return kernel


def se_block(nodes, se, *, skip=None, pre_leaky=False, post_norm=False):
    """nodes: list of (plain_tensor_list, pool_src_or_None), all (N, C, H, W)."""
    n = len(nodes)
    ref0 = nodes[0][0][0]
    N, C, H, W = ref0.shape
    HW = H * W
    Cr = se['w1'].shape[0]

    struct = []
    in_specs = []
    args = []
    for plains, pool_src in nodes:
        for a in plains:
            in_specs.append(pl.BlockSpec((1, C, HW), lambda b: (b, 0, 0)))
            args.append(a.reshape(N, C, HW))
        if pool_src is not None:
            in_specs.append(pl.BlockSpec((1, 9, C, HW), lambda b: (b, 0, 0, 0)))
            args.append(_pool_taps(pool_src))
        struct.append((len(plains), pool_src is not None))
    for i in range(n):
        in_specs.append(pl.BlockSpec((Cr, C), lambda b: (0, 0)))
        args.append(se['w1'][:, i * C:(i + 1) * C])
    in_specs.append(pl.BlockSpec((Cr, 1), lambda b: (0, 0)))
    args.append(se['b1'])
    for i in range(n):
        in_specs.append(pl.BlockSpec((C, Cr), lambda b: (0, 0)))
        args.append(se['w2'][i * C:(i + 1) * C, :])
    for i in range(n):
        in_specs.append(pl.BlockSpec((C, 1), lambda b: (0, 0)))
        args.append(se['b2'][i * C:(i + 1) * C, :])
    if skip is not None:
        in_specs.append(pl.BlockSpec((1, n, C, HW), lambda b: (b, 0, 0, 0)))
        args.append(skip.reshape(N, n, C, HW))

    kernel = _make_se_kernel(struct, pre_leaky, post_norm, skip is not None)
    out = pl.pallas_call(
        kernel,
        out_shape=jax.ShapeDtypeStruct((N, n, C, HW), F32),
        grid=(N,),
        in_specs=in_specs,
        out_specs=pl.BlockSpec((1, n, C, HW), lambda b: (b, 0, 0, 0)),
        compiler_params=_parallel_params(),
    )(*args)
    return out.reshape(N, n * C, H, W)


# ------------------- UpReLUConvBN (separable bilinear x2) --------------------

def _interp_matrix(n_in):
    # 1-D factor of F.interpolate(scale=2, mode='bilinear', align_corners=True)
    n_out = 2 * n_in
    m = np.zeros((n_out, n_in), np.float64)
    if n_in == 1:
        m[:, 0] = 1.0
        return m
    src = np.arange(n_out, dtype=np.float64) * (n_in - 1) / (n_out - 1)
    lo = np.clip(np.floor(src).astype(np.int64), 0, n_in - 2)
    frac = src - lo
    rows = np.arange(n_out)
    m[rows, lo] += 1.0 - frac
    m[rows, lo + 1] += frac
    return m


def up_rcb(x, w):
    """Bilinear x2 (align_corners) as two separable 1-D matmuls (XLA), then the
    fused LeakyReLU + 1x1 conv + InstanceNorm Pallas kernel."""
    N, Cin, H, W = x.shape
    ah = jnp.asarray(_interp_matrix(H), F32)          # (2H, H)
    aw = jnp.asarray(_interp_matrix(W), F32)          # (2W, W)
    xu = jnp.einsum('ph,nchw->ncpw', ah, x)
    xu = jnp.einsum('qw,ncpw->ncpq', aw, xu)          # (N, Cin, 2H, 2W)
    return conv_lane(xu, w, k=1, pad=0, pre_act=True, norm=True)


# ------------------------------ param builders -------------------------------

class ParamInit:
    def __init__(self, seed=0):
        self.key = jax.random.PRNGKey(seed)

    def next(self, shape, dtype=F32, scale=0.1):
        self.key, sub = jax.random.split(self.key)
        return (scale * jax.random.normal(sub, shape, F32)).astype(dtype)


def build_rcb(pi, cin, cout, k, stride, pad, dil=1):
    # weight stored in transposed matmul layout (Cout, k*k*Cin), bf16.
    return {'w': pi.next((cout, k * k * cin), BF16),
            'k': k, 'stride': stride, 'pad': pad, 'dil': dil}


def build_fr(pi, cin, cout):
    assert cout % 2 == 0
    ch = cout // 2
    return {'w1': pi.next((ch, cin), BF16), 'w2': pi.next((ch, cin), BF16)}


def build_se(pi, C, r=6):
    cr = max(1, C // r)
    return {'w1': pi.next((cr, C)), 'b1': pi.next((cr, 1)),
            'w2': pi.next((C, cr)), 'b2': pi.next((C, 1))}


def build_enc_normal(pi, C):
    return {'s0_02': build_rcb(pi, C, 2 * C, 3, 1, 1),   # batched e_s0_0|e_s0_2
            's1_0': build_rcb(pi, C, C, 3, 1, 2, 2)}


def build_reduction(pi, C):
    return {'fr_s0_0': build_fr(pi, C, C),
            's1_0': build_rcb(pi, C, C, 3, 2, 2, 2),
            'fr_s0_1': build_fr(pi, C, C),
            'e_1_2': build_rcb(pi, C, C, 3, 1, 1),
            'e_0_3': build_rcb(pi, C, C, 3, 1, 1)}


def build_dec_normal(pi, C):
    return {'s1_02': build_rcb(pi, C, 2 * C, 3, 1, 2, 2)}  # batched e_s1_0|e_s1_2


def build_expansion(pi, C):
    return {'s0_0': build_rcb(pi, C, C, 3, 1, 1),
            's1_0': build_rcb(pi, C, C, 3, 1, 3, 3),
            's1_2': build_rcb(pi, C, C, 3, 1, 2, 2)}


def build_cell_enc(pi, step, Cpp, Cp, C, reduction, prev_resized):
    p = {'reduction': reduction}
    p['pp0'] = (('fr', build_fr(pi, Cpp, C)) if prev_resized
                else ('rcb', build_rcb(pi, Cpp, C, 1, 1, 0)))
    p['pp1'] = ('rcb', build_rcb(pi, Cp, C, 1, 1, 0))
    p['ops'] = build_reduction(pi, C) if reduction else build_enc_normal(pi, C)
    p['se'] = build_se(pi, C * step, 6)
    return p


def build_cell_dec(pi, step, Cpp, Cp, C, increase, prev_resized):
    p = {'increase': increase}
    if prev_resized:
        p['pp0'] = ('up', build_rcb(pi, Cpp, C, 1, 1, 0))
        p['pp1'] = ('rcb', build_rcb(pi, Cp, C, 1, 1, 0))
    elif increase:
        p['pp0'] = ('up', build_rcb(pi, Cpp, C, 1, 1, 0))
        p['pp1'] = ('up', build_rcb(pi, Cp, C, 1, 1, 0))
    else:
        p['pp0'] = ('rcb', build_rcb(pi, Cpp, C, 1, 1, 0))
        p['pp1'] = ('rcb', build_rcb(pi, Cp, C, 1, 1, 0))
    p['ops'] = build_expansion(pi, C) if increase else build_dec_normal(pi, C)
    p['se'] = build_se(pi, C * step, 6)
    return p


def build_scnas(pi, input_channel, num_feature, num_layers,
                num_multiplier, num_classes):
    step = 3
    C = num_feature
    stem_feature = C * step
    params = {'stem_w': pi.next((stem_feature, 9 * input_channel), BF16),
              'stem_se': build_se(pi, stem_feature, 6)}
    resize = [1, 0] * num_layers
    C_prev_prev, C_prev, C_curr = stem_feature, stem_feature, C
    enc_cells = []
    reduction_prev = False
    for i in range(num_layers):
        if resize[i] == 1:
            C_curr *= num_multiplier
            reduction = True
        else:
            reduction = False
        enc_cells.append(build_cell_enc(pi, step, C_prev_prev, C_prev,
                                        C_curr, reduction, reduction_prev))
        reduction_prev = reduction
        C_prev_prev, C_prev = C_prev, step * C_curr
    params['enc_cells'] = enc_cells
    params['bridge'] = build_cell_enc(pi, step, C_prev_prev, C_prev,
                                      C_curr, False, False)
    dec_cells = []
    increase_prev = False
    for i in range(num_layers):
        if resize[len(resize) - 1 - i] == 1:
            C_curr //= num_multiplier
            increase = True
        else:
            increase = False
        dec_cells.append(build_cell_dec(pi, step, C_prev_prev, C_prev,
                                        C_curr, increase, increase_prev))
        C_prev_prev, C_prev = C_prev, step * C_curr
        increase_prev = increase
    params['dec_cells'] = dec_cells
    params['out_w'] = pi.next((num_classes, C_prev), BF16)
    params['out_b'] = pi.next((num_classes, 1))
    return params


# ------------------------------ forward passes -------------------------------

def f_rcb(p, x, residuals=()):
    return conv_lane(x, p['w'], k=p['k'], stride=p['stride'], pad=p['pad'],
                     dil=p['dil'], pre_act=True, norm=True, residuals=residuals)


def f_preproc(tagged, x):
    tag, pp = tagged
    if tag == 'fr':
        return factorized_reduce(x, pp['w1'], pp['w2'])
    if tag == 'up':
        return up_rcb(x, pp['w'])
    return f_rcb(pp, x)


def f_enc_normal(p, s0, s1, se):
    C = s0.shape[1]
    o = f_rcb(p['s0_02'], s0)                       # batched e_s0_0 | e_s0_2
    o00, o02 = o[:, :C], o[:, C:]
    n0 = f_rcb(p['s1_0'], s1, residuals=(o00,))     # node_0
    nodes = [([n0], s0),            # node_1 = avgpool(s0) + node_0
             ([o02, n0], None),     # node_2 = e_s0_2(s0) + node_0
             ([s0], None)]          # node_3 = s0
    return se_block(nodes, se)


def f_reduction(p, s0, s1, se):
    fr0 = factorized_reduce(s0, p['fr_s0_0']['w1'], p['fr_s0_0']['w2'])
    n0 = f_rcb(p['s1_0'], s1, residuals=(fr0,))     # node_0
    fr1 = factorized_reduce(s0, p['fr_s0_1']['w1'], p['fr_s0_1']['w2'])
    n1 = avg_pool3(n0, residual=fr1)                # node_1
    n2 = f_rcb(p['e_1_2'], n1, residuals=(n0,))     # node_2
    o03 = f_rcb(p['e_0_3'], n0)
    nodes = [([n1], None), ([n2], None), ([o03], n2)]   # node_3 = o03+pool(n2)
    return se_block(nodes, se)


def f_dec_normal(p, s0, s1, se, skip):
    C = s1.shape[1]
    o = f_rcb(p['s1_02'], s1)                       # batched e_s1_0 | e_s1_2
    o10, o12 = o[:, :C], o[:, C:]
    nodes = [([s1, o10], None),          # node_1 = s1 + node_0
             ([o12, s1, o10], None),     # node_2 = e_s1_2(s1) + node_1
             ([s0], o10)]                # node_3 = s0 + pool(node_0)
    return se_block(nodes, se, skip=skip)


def f_expansion(p, s0, s1, se, skip):
    o00 = f_rcb(p['s0_0'], s0)
    n0 = f_rcb(p['s1_0'], s1, residuals=(o00,))     # node_0
    n2 = f_rcb(p['s1_2'], s1, residuals=(s0, n0))   # node_2 = conv + node_1
    nodes = [([s0, n0], None),           # node_1 = s0 + node_0
             ([n2], None),
             ([s0], s1)]                 # node_3 = s0 + pool(s1)
    return se_block(nodes, se, skip=skip)


def f_cell_enc(p, s0, s1):
    s0p = f_preproc(p['pp0'], s0)
    s1p = f_preproc(p['pp1'], s1)
    if p['reduction']:
        return f_reduction(p['ops'], s0p, s1p, p['se'])
    return f_enc_normal(p['ops'], s0p, s1p, p['se'])


def f_cell_dec(p, s0, s1, low):
    s0p = f_preproc(p['pp0'], s0)
    s1p = f_preproc(p['pp1'], s1)
    if p['increase']:
        return f_expansion(p['ops'], s0p, s1p, p['se'], low)
    return f_dec_normal(p['ops'], s0p, s1p, p['se'], low)


def f_stem(params, x):
    y = conv_lane(x, params['stem_w'], k=3, pad=1, pre_act=False, norm=False)
    # LeakyReLU -> SE (pool/MLP/scale) -> InstanceNorm, fused in one kernel.
    return se_block([([y], None)], params['stem_se'],
                    pre_leaky=True, post_norm=True)


def scnas_forward(params, x_nchw):
    enc_feats = []
    s0 = s1 = f_stem(params, x_nchw)
    enc_feats.append(s1)
    for cell in params['enc_cells']:
        s0, s1 = s1, f_cell_enc(cell, s0, s1)
        enc_feats.append(s1)
    s0, s1 = enc_feats.pop(), f_cell_enc(params['bridge'], s0, s1)
    for cell in params['dec_cells']:
        low = enc_feats.pop()
        # decoder skip (s1 += low) is fused into the SE kernel
        s0, s1 = s1, f_cell_dec(cell, s0, s1, low)
    out = conv_lane(s1, params['out_w'], k=1, pad=0, pre_act=False, norm=False,
                    bias=params['out_b'])
    return out


# ---------------------------------- main -------------------------------------

if __name__ == "__main__":
    # ScNas(input_channel=3, num_feature=4, num_layers=2, num_multiplier=2,
    #       num_classes=2) on x of shape (2, 3, 16, 16)  [NCHW].
    x = jax.random.normal(jax.random.PRNGKey(0), (2, 3, 16, 16), jnp.float32)
    pi = ParamInit(seed=0)
    params = build_scnas(pi, input_channel=3, num_feature=4, num_layers=2,
                         num_multiplier=2, num_classes=2)
    fwd = jax.jit(lambda inp: scnas_forward(params, inp))
    out = jax.block_until_ready(fwd(x))
    assert out.shape == (2, 2, 16, 16), out.shape
    assert bool(jnp.all(jnp.isfinite(out)))
    print("KERNEL_OK")
</pallas_src>

<mosaic_0001>
module attributes {stable_mosaic.version = 11 : i64} {
  func.func @kernel(%arg0: i32, %arg1: memref<1x12x256xf32, #tpu.memory_space<vmem>>, %arg2: memref<2x12xf32, #tpu.memory_space<vmem>>, %arg3: memref<2x1xf32, #tpu.memory_space<vmem>>, %arg4: memref<12x2xf32, #tpu.memory_space<vmem>>, %arg5: memref<12x1xf32, #tpu.memory_space<vmem>>, %arg6: memref<1x1x12x256xf32, #tpu.memory_space<vmem>>) attributes {dimension_semantics = [#tpu.dimension_semantics<parallel>], iteration_bounds = array<i64: 2>, scalar_prefetch = 0 : i64, scratch_operands = 0 : i64, tpu.core_type = #tpu.core_type<tc>, window_params = [{transform_indices = @transform_0, window_bounds = array<i64: 1, 12, 256>}, {pipeline_mode = #tpu.pipeline_mode<synchronous>, transform_indices = @transform_1, window_bounds = array<i64: 2, 12>}, {pipeline_mode = #tpu.pipeline_mode<synchronous>, transform_indices = @transform_2, window_bounds = array<i64: 2, 1>}, {pipeline_mode = #tpu.pipeline_mode<synchronous>, transform_indices = @transform_3, window_bounds = array<i64: 12, 2>}, {pipeline_mode = #tpu.pipeline_mode<synchronous>, transform_indices = @transform_4, window_bounds = array<i64: 12, 1>}, {transform_indices = @transform_5, window_bounds = array<i64: 1, 1, 12, 256>}]} {
    %c0 = arith.constant 0 : index
    %c0_0 = arith.constant 0 : index
    %c0_1 = arith.constant 0 : index
    %0 = vector.load %arg1[%c0, %c0_0, %c0_1] : memref<1x12x256xf32, #tpu.memory_space<vmem>>, vector<1x12x256xf32>
    %1 = vector.shape_cast %0 : vector<1x12x256xf32> to vector<12x256xf32>
    %cst = arith.constant 0.000000e+00 : f32
    %2 = vector.broadcast %cst : f32 to vector<12x256xf32>
    %3 = arith.cmpf oge, %1, %2 : vector<12x256xf32>
    %cst_2 = arith.constant 0.00999999977 : f32
    %4 = vector.broadcast %cst_2 : f32 to vector<12x256xf32>
    %5 = arith.mulf %4, %1 : vector<12x256xf32>
    %6 = arith.select %3, %1, %5 : vector<12x256xi1>, vector<12x256xf32>
    %c0_3 = arith.constant 0 : index
    %c0_4 = arith.constant 0 : index
    %7 = vector.load %arg3[%c0_3, %c0_4] : memref<2x1xf32, #tpu.memory_space<vmem>>, vector<2x1xf32>
    %cst_5 = arith.constant dense<0.000000e+00> : vector<12xf32>
    %8 = vector.multi_reduction <add>, %6, %cst_5 [1] : vector<12x256xf32> to vector<12xf32>
    %9 = vector.shape_cast %8 : vector<12xf32> to vector<12x1xf32>
    %cst_6 = arith.constant 2.560000e+02 : f32
    %10 = vector.broadcast %cst_6 : f32 to vector<12x1xf32>
    %11 = arith.divf %9, %10 : vector<12x1xf32>
    %c0_7 = arith.constant 0 : index
    %c0_8 = arith.constant 0 : index
    %12 = vector.load %arg2[%c0_7, %c0_8] : memref<2x12xf32, #tpu.memory_space<vmem>>, vector<2x12xf32>
    %cst_9 = arith.constant dense<0.000000e+00> : vector<2x1xf32>
    %13 = tpu.matmul %12, %11, %cst_9 {dimension_numbers = #tpu.dot_dimension_numbers<[1], [0], [0], [1], [0, 0, 1, 1], [], []>} : vector<2x12xf32>, vector<12x1xf32>, vector<2x1xf32> -> vector<2x1xf32>
    %14 = arith.addf %7, %13 : vector<2x1xf32>
    %cst_10 = arith.constant 0.000000e+00 : f32
    %15 = vector.broadcast %cst_10 : f32 to vector<2x1xf32>
    %16 = arith.maximumf %14, %15 : vector<2x1xf32>
    %c0_11 = arith.constant 0 : index
    %c0_12 = arith.constant 0 : index
    %17 = vector.load %arg4[%c0_11, %c0_12] : memref<12x2xf32, #tpu.memory_space<vmem>>, vector<12x2xf32>
    %cst_13 = arith.constant dense<0.000000e+00> : vector<12x1xf32>
    %18 = tpu.matmul %17, %16, %cst_13 {dimension_numbers = #tpu.dot_dimension_numbers<[1], [0], [0], [1], [0, 0, 1, 1], [], []>} : vector<12x2xf32>, vector<2x1xf32>, vector<12x1xf32> -> vector<12x1xf32>
    %c0_14 = arith.constant 0 : index
    %c0_15 = arith.constant 0 : index
    %19 = vector.load %arg5[%c0_14, %c0_15] : memref<12x1xf32, #tpu.memory_space<vmem>>, vector<12x1xf32>
    %20 = arith.addf %18, %19 : vector<12x1xf32>
    %21 = arith.negf %20 : vector<12x1xf32>
    %22 = math.exp %21 : vector<12x1xf32>
    %cst_16 = arith.constant 1.000000e+00 : f32
    %23 = vector.broadcast %cst_16 : f32 to vector<12x1xf32>
    %24 = arith.addf %23, %22 : vector<12x1xf32>
    %25 = arith.divf %23, %24 : vector<12x1xf32>
    %26 = vector.broadcast %25 : vector<12x1xf32> to vector<12x256xf32>
    %27 = arith.mulf %6, %26 : vector<12x256xf32>
    %cst_17 = arith.constant dense<0.000000e+00> : vector<12xf32>
    %28 = vector.multi_reduction <add>, %27, %cst_17 [1] : vector<12x256xf32> to vector<12xf32>
    %29 = vector.shape_cast %28 : vector<12xf32> to vector<12x1xf32>
    %cst_18 = arith.constant 2.560000e+02 : f32
    %30 = vector.broadcast %cst_18 : f32 to vector<12x1xf32>
    %31 = arith.divf %29, %30 : vector<12x1xf32>
    %32 = vector.broadcast %31 : vector<12x1xf32> to vector<12x256xf32>
    %33 = arith.subf %27, %32 : vector<12x256xf32>
    %34 = arith.mulf %33, %33 : vector<12x256xf32>
    %cst_19 = arith.constant dense<0.000000e+00> : vector<12xf32>
    %35 = vector.multi_reduction <add>, %34, %cst_19 [1] : vector<12x256xf32> to vector<12xf32>
    %36 = vector.shape_cast %35 : vector<12xf32> to vector<12x1xf32>
    %cst_20 = arith.constant 2.560000e+02 : f32
    %37 = vector.broadcast %cst_20 : f32 to vector<12x1xf32>
    %38 = arith.divf %36, %37 : vector<12x1xf32>
    %cst_21 = arith.constant 9.99999974E-6 : f32
    %39 = vector.broadcast %cst_21 : f32 to vector<12x1xf32>
    %40 = arith.addf %38, %39 : vector<12x1xf32>
    %41 = math.rsqrt %40 : vector<12x1xf32>
    %42 = vector.broadcast %41 : vector<12x1xf32> to vector<12x256xf32>
    %43 = arith.mulf %33, %42 : vector<12x256xf32>
    %c0_22 = arith.constant 0 : index
    %c0_23 = arith.constant 0 : index
    %c0_24 = arith.constant 0 : index
    %c0_25 = arith.constant 0 : index
    %44 = vector.load %arg6[%c0_22, %c0_23, %c0_24, %c0_25] : memref<1x1x12x256xf32, #tpu.memory_space<vmem>>, vector<1x1x12x256xf32>
    %45 = vector.shape_cast %44 : vector<1x1x12x256xf32> to vector<12x256xf32>
    %46 = vector.shape_cast %43 : vector<12x256xf32> to vector<1x1x12x256xf32>
    tpu.vector_store %arg6[%c0_22, %c0_23, %c0_24, %c0_25], %46 {strides = array<i32>} : memref<1x1x12x256xf32, #tpu.memory_space<vmem>>, vector<1x1x12x256xf32>,
    return
  }
  func.func @transform_0(%arg0: i32) -> (i32, i32, i32) {
    %c0_i32 = arith.constant 0 : i32
    %c0_i32_0 = arith.constant 0 : i32
    %c0_i32_1 = arith.constant 0 : i32
    return %arg0, %c0_i32, %c0_i32_0 : i32, i32, i32
  }
  func.func @transform_1(%arg0: i32) -> (i32, i32) {
    %c0_i32 = arith.constant 0 : i32
    %c0_i32_0 = arith.constant 0 : i32
    %c0_i32_1 = arith.constant 0 : i32
    return %c0_i32, %c0_i32_0 : i32, i32
  }
  func.func @transform_2(%arg0: i32) -> (i32, i32) {
    %c0_i32 = arith.constant 0 : i32
    %c0_i32_0 = arith.constant 0 : i32
    %c0_i32_1 = arith.constant 0 : i32
    return %c0_i32, %c0_i32_0 : i32, i32
  }
  func.func @transform_3(%arg0: i32) -> (i32, i32) {
    %c0_i32 = arith.constant 0 : i32
    %c0_i32_0 = arith.constant 0 : i32
    %c0_i32_1 = arith.constant 0 : i32
    return %c0_i32, %c0_i32_0 : i32, i32
  }
  func.func @transform_4(%arg0: i32) -> (i32, i32) {
    %c0_i32 = arith.constant 0 : i32
    %c0_i32_0 = arith.constant 0 : i32
    %c0_i32_1 = arith.constant 0 : i32
    return %c0_i32, %c0_i32_0 : i32, i32
  }
  func.func @transform_5(%arg0: i32) -> (i32, i32, i32, i32) {
    %c0_i32 = arith.constant 0 : i32
    %c0_i32_0 = arith.constant 0 : i32
    %c0_i32_1 = arith.constant 0 : i32
    %c0_i32_2 = arith.constant 0 : i32
    return %arg0, %c0_i32, %c0_i32_0, %c0_i32_1 : i32, i32, i32, i32
  }
}

module attributes {stable_mosaic.version = 11 : i64} {
  func.func @kernel(%arg0: i32, %arg1: memref<1x27x256xf32, #tpu.memory_space<vmem>>, %arg2: memref<12x27xbf16, #tpu.memory_space<vmem>>, %arg3: memref<1x12x256xf32, #tpu.memory_space<vmem>>) attributes {dimension_semantics = [#tpu.dimension_semantics<parallel>], iteration_bounds = array<i64: 2>, scalar_prefetch = 0 : i64, scratch_operands = 0 : i64, tpu.core_type = #tpu.core_type<tc>, window_params = [{transform_indices = @transform_0, window_bounds = array<i64: 1, 27, 256>}, {pipeline_mode = #tpu.pipeline_mode<synchronous>, transform_indices = @transform_1, window_bounds = array<i64: 12, 27>}, {transform_indices = @transform_2, window_bounds = array<i64: 1, 12, 256>}]} {
    %c0 = arith.constant 0 : index
    %c0_0 = arith.constant 0 : index
    %c0_1 = arith.constant 0 : index
    %0 = vector.load %arg1[%c0, %c0_0, %c0_1] : memref<1x27x256xf32, #tpu.memory_space<vmem>>, vector<1x27x256xf32>
    %1 = vector.shape_cast %0 : vector<1x27x256xf32> to vector<27x256xf32>
    %c0_2 = arith.constant 0 : index
    %c0_3 = arith.constant 0 : index
    %2 = vector.load %arg2[%c0_2, %c0_3] : memref<12x27xbf16, #tpu.memory_space<vmem>>, vector<12x27xbf16>
    %3 = arith.truncf %1 : vector<27x256xf32> to vector<27x256xbf16>
    %cst = arith.constant dense<0.000000e+00> : vector<12x256xf32>
    %4 = tpu.matmul %2, %3, %cst {dimension_numbers = #tpu.dot_dimension_numbers<[1], [0], [0], [1], [0, 0, 1, 1], [], []>} : vector<12x27xbf16>, vector<27x256xbf16>, vector<12x256xf32> -> vector<12x256xf32>
    %c0_4 = arith.constant 0 : index
    %c0_5 = arith.constant 0 : index
    %c0_6 = arith.constant 0 : index
    %5 = vector.load %arg3[%c0_4, %c0_5, %c0_6] : memref<1x12x256xf32, #tpu.memory_space<vmem>>, vector<1x12x256xf32>
    %6 = vector.shape_cast %5 : vector<1x12x256xf32> to vector<12x256xf32>
    %7 = vector.shape_cast %4 : vector<12x256xf32> to vector<1x12x256xf32>
    tpu.vector_store %arg3[%c0_4, %c0_5, %c0_6], %7 {strides = array<i32>} : memref<1x12x256xf32, #tpu.memory_space<vmem>>, vector<1x12x256xf32>,
    return
  }
  func.func @transform_0(%arg0: i32) -> (i32, i32, i32) {
    %c0_i32 = arith.constant 0 : i32
    %c0_i32_0 = arith.constant 0 : i32
    %c0_i32_1 = arith.constant 0 : i32
    return %arg0, %c0_i32, %c0_i32_0 : i32, i32, i32
  }
  func.func @transform_1(%arg0: i32) -> (i32, i32) {
    %c0_i32 = arith.constant 0 : i32
    %c0_i32_0 = arith.constant 0 : i32
    %c0_i32_1 = arith.constant 0 : i32
    return %c0_i32, %c0_i32_0 : i32, i32
  }
  func.func @transform_2(%arg0: i32) -> (i32, i32, i32) {
    %c0_i32 = arith.constant 0 : i32
    %c0_i32_0 = arith.constant 0 : i32
    %c0_i32_1 = arith.constant 0 : i32
    return %arg0, %c0_i32, %c0_i32_0 : i32, i32, i32
  }
}

module attributes {stable_mosaic.version = 11 : i64} {
  func.func @kernel(%arg0: i32, %arg1: memref<1x12x256xf32, #tpu.memory_space<vmem>>, %arg2: memref<8x12xbf16, #tpu.memory_space<vmem>>, %arg3: memref<1x8x256xf32, #tpu.memory_space<vmem>>) attributes {dimension_semantics = [#tpu.dimension_semantics<parallel>], iteration_bounds = array<i64: 2>, scalar_prefetch = 0 : i64, scratch_operands = 0 : i64, tpu.core_type = #tpu.core_type<tc>, window_params = [{transform_indices = @transform_0, window_bounds = array<i64: 1, 12, 256>}, {pipeline_mode = #tpu.pipeline_mode<synchronous>, transform_indices = @transform_1, window_bounds = array<i64: 8, 12>}, {transform_indices = @transform_2, window_bounds = array<i64: 1, 8, 256>}]} {
    %c0 = arith.constant 0 : index
    %c0_0 = arith.constant 0 : index
    %c0_1 = arith.constant 0 : index
    %0 = vector.load %arg1[%c0, %c0_0, %c0_1] : memref<1x12x256xf32, #tpu.memory_space<vmem>>, vector<1x12x256xf32>
    %1 = vector.shape_cast %0 : vector<1x12x256xf32> to vector<12x256xf32>
    %cst = arith.constant 0.000000e+00 : f32
    %2 = vector.broadcast %cst : f32 to vector<12x256xf32>
    %3 = arith.cmpf oge, %1, %2 : vector<12x256xf32>
    %cst_2 = arith.constant 0.00999999977 : f32
    %4 = vector.broadcast %cst_2 : f32 to vector<12x256xf32>
    %5 = arith.mulf %4, %1 : vector<12x256xf32>
    %6 = arith.select %3, %1, %5 : vector<12x256xi1>, vector<12x256xf32>
    %c0_3 = arith.constant 0 : index
    %c0_4 = arith.constant 0 : index
    %7 = vector.load %arg2[%c0_3, %c0_4] : memref<8x12xbf16, #tpu.memory_space<vmem>>, vector<8x12xbf16>
    %8 = arith.truncf %6 : vector<12x256xf32> to vector<12x256xbf16>
    %cst_5 = arith.constant dense<0.000000e+00> : vector<8x256xf32>
    %9 = tpu.matmul %7, %8, %cst_5 {dimension_numbers = #tpu.dot_dimension_numbers<[1], [0], [0], [1], [0, 0, 1, 1], [], []>} : vector<8x12xbf16>, vector<12x256xbf16>, vector<8x256xf32> -> vector<8x256xf32>
    %cst_6 = arith.constant dense<0.000000e+00> : vector<8xf32>
    %10 = vector.multi_reduction <add>, %9, %cst_6 [1] : vector<8x256xf32> to vector<8xf32>
    %11 = vector.shape_cast %10 : vector<8xf32> to vector<8x1xf32>
    %cst_7 = arith.constant 2.560000e+02 : f32
    %12 = vector.broadcast %cst_7 : f32 to vector<8x1xf32>
    %13 = arith.divf %11, %12 : vector<8x1xf32>
    %14 = vector.broadcast %13 : vector<8x1xf32> to vector<8x256xf32>
    %15 = arith.subf %9, %14 : vector<8x256xf32>
    %16 = arith.mulf %15, %15 : vector<8x256xf32>
    %cst_8 = arith.constant dense<0.000000e+00> : vector<8xf32>
    %17 = vector.multi_reduction <add>, %16, %cst_8 [1] : vector<8x256xf32> to vector<8xf32>
    %18 = vector.shape_cast %17 : vector<8xf32> to vector<8x1xf32>
    %cst_9 = arith.constant 2.560000e+02 : f32
    %19 = vector.broadcast %cst_9 : f32 to vector<8x1xf32>
    %20 = arith.divf %18, %19 : vector<8x1xf32>
    %cst_10 = arith.constant 9.99999974E-6 : f32
    %21 = vector.broadcast %cst_10 : f32 to vector<8x1xf32>
    %22 = arith.addf %20, %21 : vector<8x1xf32>
    %23 = math.rsqrt %22 : vector<8x1xf32>
    %24 = vector.broadcast %23 : vector<8x1xf32> to vector<8x256xf32>
    %25 = arith.mulf %15, %24 : vector<8x256xf32>
    %c0_11 = arith.constant 0 : index
    %c0_12 = arith.constant 0 : index
    %c0_13 = arith.constant 0 : index
    %26 = vector.load %arg3[%c0_11, %c0_12, %c0_13] : memref<1x8x256xf32, #tpu.memory_space<vmem>>, vector<1x8x256xf32>
    %27 = vector.shape_cast %26 : vector<1x8x256xf32> to vector<8x256xf32>
    %28 = vector.shape_cast %25 : vector<8x256xf32> to vector<1x8x256xf32>
    tpu.vector_store %arg3[%c0_11, %c0_12, %c0_13], %28 {strides = array<i32>} : memref<1x8x256xf32, #tpu.memory_space<vmem>>, vector<1x8x256xf32>,
    return
  }
  func.func @transform_0(%arg0: i32) -> (i32, i32, i32) {
    %c0_i32 = arith.constant 0 : i32
    %c0_i32_0 = arith.constant 0 : i32
    %c0_i32_1 = arith.constant 0 : i32
    return %arg0, %c0_i32, %c0_i32_0 : i32, i32, i32
  }
  func.func @transform_1(%arg0: i32) -> (i32, i32) {
    %c0_i32 = arith.constant 0 : i32
    %c0_i32_0 = arith.constant 0 : i32
    %c0_i32_1 = arith.constant 0 : i32
    return %c0_i32, %c0_i32_0 : i32, i32
  }
  func.func @transform_2(%arg0: i32) -> (i32, i32, i32) {
    %c0_i32 = arith.constant 0 : i32
    %c0_i32_0 = arith.constant 0 : i32
    %c0_i32_1 = arith.constant 0 : i32
    return %arg0, %c0_i32, %c0_i32_0 : i32, i32, i32
  }
}

module attributes {stable_mosaic.version = 11 : i64} {
  func.func @_fr_kernel(%arg0: i32, %arg1: memref<1x8x64xf32, #tpu.memory_space<vmem>>, %arg2: memref<1x8x64xf32, #tpu.memory_space<vmem>>, %arg3: memref<4x8xbf16, #tpu.memory_space<vmem>>, %arg4: memref<4x8xbf16, #tpu.memory_space<vmem>>, %arg5: memref<1x2x4x64xf32, #tpu.memory_space<vmem>>) attributes {dimension_semantics = [#tpu.dimension_semantics<parallel>], iteration_bounds = array<i64: 2>, scalar_prefetch = 0 : i64, scratch_operands = 0 : i64, tpu.core_type = #tpu.core_type<tc>, window_params = [{transform_indices = @transform_0, window_bounds = array<i64: 1, 8, 64>}, {transform_indices = @transform_1, window_bounds = array<i64: 1, 8, 64>}, {pipeline_mode = #tpu.pipeline_mode<synchronous>, transform_indices = @transform_2, window_bounds = array<i64: 4, 8>}, {pipeline_mode = #tpu.pipeline_mode<synchronous>, transform_indices = @transform_3, window_bounds = array<i64: 4, 8>}, {transform_indices = @transform_4, window_bounds = array<i64: 1, 2, 4, 64>}]} {
    %c0 = arith.constant 0 : index
    %c0_0 = arith.constant 0 : index
    %c0_1 = arith.constant 0 : index
    %0 = vector.load %arg1[%c0, %c0_0, %c0_1] : memref<1x8x64xf32, #tpu.memory_space<vmem>>, vector<1x8x64xf32>
    %1 = vector.shape_cast %0 : vector<1x8x64xf32> to vector<8x64xf32>
    %cst = arith.constant 0.000000e+00 : f32
    %2 = vector.broadcast %cst : f32 to vector<8x64xf32>
    %3 = arith.cmpf oge, %1, %2 : vector<8x64xf32>
    %cst_2 = arith.constant 0.00999999977 : f32
    %4 = vector.broadcast %cst_2 : f32 to vector<8x64xf32>
    %5 = arith.mulf %4, %1 : vector<8x64xf32>
    %6 = arith.select %3, %1, %5 : vector<8x64xi1>, vector<8x64xf32>
    %7 = arith.truncf %6 : vector<8x64xf32> to vector<8x64xbf16>
    %c0_3 = arith.constant 0 : index
    %c0_4 = arith.constant 0 : index
    %c0_5 = arith.constant 0 : index
    %8 = vector.load %arg2[%c0_3, %c0_4, %c0_5] : memref<1x8x64xf32, #tpu.memory_space<vmem>>, vector<1x8x64xf32>
    %9 = vector.shape_cast %8 : vector<1x8x64xf32> to vector<8x64xf32>
    %cst_6 = arith.constant 0.000000e+00 : f32
    %10 = vector.broadcast %cst_6 : f32 to vector<8x64xf32>
    %11 = arith.cmpf oge, %9, %10 : vector<8x64xf32>
    %cst_7 = arith.constant 0.00999999977 : f32
    %12 = vector.broadcast %cst_7 : f32 to vector<8x64xf32>
    %13 = arith.mulf %12, %9 : vector<8x64xf32>
    %14 = arith.select %11, %9, %13 : vector<8x64xi1>, vector<8x64xf32>
    %15 = arith.truncf %14 : vector<8x64xf32> to vector<8x64xbf16>
    %c0_8 = arith.constant 0 : index
    %c0_9 = arith.constant 0 : index
    %16 = vector.load %arg3[%c0_8, %c0_9] : memref<4x8xbf16, #tpu.memory_space<vmem>>, vector<4x8xbf16>
    %cst_10 = arith.constant dense<0.000000e+00> : vector<4x64xf32>
    %17 = tpu.matmul %16, %7, %cst_10 {dimension_numbers = #tpu.dot_dimension_numbers<[1], [0], [0], [1], [0, 0, 1, 1], [], []>} : vector<4x8xbf16>, vector<8x64xbf16>, vector<4x64xf32> -> vector<4x64xf32>
    %c0_11 = arith.constant 0 : index
    %c0_12 = arith.constant 0 : index
    %18 = vector.load %arg4[%c0_11, %c0_12] : memref<4x8xbf16, #tpu.memory_space<vmem>>, vector<4x8xbf16>
    %cst_13 = arith.constant dense<0.000000e+00> : vector<4x64xf32>
    %19 = tpu.matmul %18, %15, %cst_13 {dimension_numbers = #tpu.dot_dimension_numbers<[1], [0], [0], [1], [0, 0, 1, 1], [], []>} : vector<4x8xbf16>, vector<8x64xbf16>, vector<4x64xf32> -> vector<4x64xf32>
    %cst_14 = arith.constant dense<0.000000e+00> : vector<4xf32>
    %20 = vector.multi_reduction <add>, %17, %cst_14 [1] : vector<4x64xf32> to vector<4xf32>
    %21 = vector.shape_cast %20 : vector<4xf32> to vector<4x1xf32>
    %cst_15 = arith.constant 6.400000e+01 : f32
    %22 = vector.broadcast %cst_15 : f32 to vector<4x1xf32>
    %23 = arith.divf %21, %22 : vector<4x1xf32>
    %24 = vector.broadcast %23 : vector<4x1xf32> to vector<4x64xf32>
    %25 = arith.subf %17, %24 : vector<4x64xf32>
    %26 = arith.mulf %25, %25 : vector<4x64xf32>
    %cst_16 = arith.constant dense<0.000000e+00> : vector<4xf32>
    %27 = vector.multi_reduction <add>, %26, %cst_16 [1] : vector<4x64xf32> to vector<4xf32>
    %28 = vector.shape_cast %27 : vector<4xf32> to vector<4x1xf32>
    %cst_17 = arith.constant 6.400000e+01 : f32
    %29 = vector.broadcast %cst_17 : f32 to vector<4x1xf32>
    %30 = arith.divf %28, %29 : vector<4x1xf32>
    %cst_18 = arith.constant 9.99999974E-6 : f32
    %31 = vector.broadcast %cst_18 : f32 to vector<4x1xf32>
    %32 = arith.addf %30, %31 : vector<4x1xf32>
    %33 = math.rsqrt %32 : vector<4x1xf32>
    %34 = vector.broadcast %33 : vector<4x1xf32> to vector<4x64xf32>
    %35 = arith.mulf %25, %34 : vector<4x64xf32>
    %c0_19 = arith.constant 0 : index
    %c0_20 = arith.constant 0 : index
    %c0_21 = arith.constant 0 : index
    %c0_22 = arith.constant 0 : index
    %36 = vector.load %arg5[%c0_19, %c0_20, %c0_21, %c0_22] : memref<1x2x4x64xf32, #tpu.memory_space<vmem>>, vector<1x1x4x64xf32>
    %37 = vector.shape_cast %36 : vector<1x1x4x64xf32> to vector<4x64xf32>
    %38 = vector.shape_cast %35 : vector<4x64xf32> to vector<1x1x4x64xf32>
    tpu.vector_store %arg5[%c0_19, %c0_20, %c0_21, %c0_22], %38 {strides = array<i32>} : memref<1x2x4x64xf32, #tpu.memory_space<vmem>>, vector<1x1x4x64xf32>,
    %cst_23 = arith.constant dense<0.000000e+00> : vector<4xf32>
    %39 = vector.multi_reduction <add>, %19, %cst_23 [1] : vector<4x64xf32> to vector<4xf32>
    %40 = vector.shape_cast %39 : vector<4xf32> to vector<4x1xf32>
    %cst_24 = arith.constant 6.400000e+01 : f32
    %41 = vector.broadcast %cst_24 : f32 to vector<4x1xf32>
    %42 = arith.divf %40, %41 : vector<4x1xf32>
    %43 = vector.broadcast %42 : vector<4x1xf32> to vector<4x64xf32>
    %44 = arith.subf %19, %43 : vector<4x64xf32>
    %45 = arith.mulf %44, %44 : vector<4x64xf32>
    %cst_25 = arith.constant dense<0.000000e+00> : vector<4xf32>
    %46 = vector.multi_reduction <add>, %45, %cst_25 [1] : vector<4x64xf32> to vector<4xf32>
    %47 = vector.shape_cast %46 : vector<4xf32> to vector<4x1xf32>
    %cst_26 = arith.constant 6.400000e+01 : f32
    %48 = vector.broadcast %cst_26 : f32 to vector<4x1xf32>
    %49 = arith.divf %47, %48 : vector<4x1xf32>
    %cst_27 = arith.constant 9.99999974E-6 : f32
    %50 = vector.broadcast %cst_27 : f32 to vector<4x1xf32>
    %51 = arith.addf %49, %50 : vector<4x1xf32>
    %52 = math.rsqrt %51 : vector<4x1xf32>
    %53 = vector.broadcast %52 : vector<4x1xf32> to vector<4x64xf32>
    %54 = arith.mulf %44, %53 : vector<4x64xf32>
    %c0_28 = arith.constant 0 : index
    %c1 = arith.constant 1 : index
    %c0_29 = arith.constant 0 : index
    %c0_30 = arith.constant 0 : index
    %55 = vector.load %arg5[%c0_28, %c1, %c0_29, %c0_30] : memref<1x2x4x64xf32, #tpu.memory_space<vmem>>, vector<1x1x4x64xf32>
    %56 = vector.shape_cast %55 : vector<1x1x4x64xf32> to vector<4x64xf32>
    %57 = vector.shape_cast %54 : vector<4x64xf32> to vector<1x1x4x64xf32>
    tpu.vector_store %arg5[%c0_28, %c1, %c0_29, %c0_30], %57 {strides = array<i32>} : memref<1x2x4x64xf32, #tpu.memory_space<vmem>>, vector<1x1x4x64xf32>,
    return
  }
  func.func @transform_0(%arg0: i32) -> (i32, i32, i32) {
    %c0_i32 = arith.constant 0 : i32
    %c0_i32_0 = arith.constant 0 : i32
    %c0_i32_1 = arith.constant 0 : i32
    return %arg0, %c0_i32, %c0_i32_0 : i32, i32, i32
  }
  func.func @transform_1(%arg0: i32) -> (i32, i32, i32) {
    %c0_i32 = arith.constant 0 : i32
    %c0_i32_0 = arith.constant 0 : i32
    %c0_i32_1 = arith.constant 0 : i32
    return %arg0, %c0_i32, %c0_i32_0 : i32, i32, i32
  }
  func.func @transform_2(%arg0: i32) -> (i32, i32) {
    %c0_i32 = arith.constant 0 : i32
    %c0_i32_0 = arith.constant 0 : i32
    %c0_i32_1 = arith.constant 0 : i32
    return %c0_i32, %c0_i32_0 : i32, i32
  }
  func.func @transform_3(%arg0: i32) -> (i32, i32) {
    %c0_i32 = arith.constant 0 : i32
    %c0_i32_0 = arith.constant 0 : i32
    %c0_i32_1 = arith.constant 0 : i32
    return %c0_i32, %c0_i32_0 : i32, i32
  }
  func.func @transform_4(%arg0: i32) -> (i32, i32, i32, i32) {
    %c0_i32 = arith.constant 0 : i32
    %c0_i32_0 = arith.constant 0 : i32
    %c0_i32_1 = arith.constant 0 : i32
    %c0_i32_2 = arith.constant 0 : i32
    return %arg0, %c0_i32, %c0_i32_0, %c0_i32_1 : i32, i32, i32, i32
  }
}

module attributes {stable_mosaic.version = 11 : i64} {
  func.func @_fr_kernel(%arg0: i32, %arg1: memref<1x12x64xf32, #tpu.memory_space<vmem>>, %arg2: memref<1x12x64xf32, #tpu.memory_space<vmem>>, %arg3: memref<4x12xbf16, #tpu.memory_space<vmem>>, %arg4: memref<4x12xbf16, #tpu.memory_space<vmem>>, %arg5: memref<1x2x4x64xf32, #tpu.memory_space<vmem>>) attributes {dimension_semantics = [#tpu.dimension_semantics<parallel>], iteration_bounds = array<i64: 2>, scalar_prefetch = 0 : i64, scratch_operands = 0 : i64, tpu.core_type = #tpu.core_type<tc>, window_params = [{transform_indices = @transform_0, window_bounds = array<i64: 1, 12, 64>}, {transform_indices = @transform_1, window_bounds = array<i64: 1, 12, 64>}, {pipeline_mode = #tpu.pipeline_mode<synchronous>, transform_indices = @transform_2, window_bounds = array<i64: 4, 12>}, {pipeline_mode = #tpu.pipeline_mode<synchronous>, transform_indices = @transform_3, window_bounds = array<i64: 4, 12>}, {transform_indices = @transform_4, window_bounds = array<i64: 1, 2, 4, 64>}]} {
    %c0 = arith.constant 0 : index
    %c0_0 = arith.constant 0 : index
    %c0_1 = arith.constant 0 : index
    %0 = vector.load %arg1[%c0, %c0_0, %c0_1] : memref<1x12x64xf32, #tpu.memory_space<vmem>>, vector<1x12x64xf32>
    %1 = vector.shape_cast %0 : vector<1x12x64xf32> to vector<12x64xf32>
    %cst = arith.constant 0.000000e+00 : f32
    %2 = vector.broadcast %cst : f32 to vector<12x64xf32>
    %3 = arith.cmpf oge, %1, %2 : vector<12x64xf32>
    %cst_2 = arith.constant 0.00999999977 : f32
    %4 = vector.broadcast %cst_2 : f32 to vector<12x64xf32>
    %5 = arith.mulf %4, %1 : vector<12x64xf32>
    %6 = arith.select %3, %1, %5 : vector<12x64xi1>, vector<12x64xf32>
    %7 = arith.truncf %6 : vector<12x64xf32> to vector<12x64xbf16>
    %c0_3 = arith.constant 0 : index
    %c0_4 = arith.constant 0 : index
    %c0_5 = arith.constant 0 : index
    %8 = vector.load %arg2[%c0_3, %c0_4, %c0_5] : memref<1x12x64xf32, #tpu.memory_space<vmem>>, vector<1x12x64xf32>
    %9 = vector.shape_cast %8 : vector<1x12x64xf32> to vector<12x64xf32>
    %cst_6 = arith.constant 0.000000e+00 : f32
    %10 = vector.broadcast %cst_6 : f32 to vector<12x64xf32>
    %11 = arith.cmpf oge, %9, %10 : vector<12x64xf32>
    %cst_7 = arith.constant 0.00999999977 : f32
    %12 = vector.broadcast %cst_7 : f32 to vector<12x64xf32>
    %13 = arith.mulf %12, %9 : vector<12x64xf32>
    %14 = arith.select %11, %9, %13 : vector<12x64xi1>, vector<12x64xf32>
    %15 = arith.truncf %14 : vector<12x64xf32> to vector<12x64xbf16>
    %c0_8 = arith.constant 0 : index
    %c0_9 = arith.constant 0 : index
    %16 = vector.load %arg3[%c0_8, %c0_9] : memref<4x12xbf16, #tpu.memory_space<vmem>>, vector<4x12xbf16>
    %cst_10 = arith.constant dense<0.000000e+00> : vector<4x64xf32>
    %17 = tpu.matmul %16, %7, %cst_10 {dimension_numbers = #tpu.dot_dimension_numbers<[1], [0], [0], [1], [0, 0, 1, 1], [], []>} : vector<4x12xbf16>, vector<12x64xbf16>, vector<4x64xf32> -> vector<4x64xf32>
    %c0_11 = arith.constant 0 : index
    %c0_12 = arith.constant 0 : index
    %18 = vector.load %arg4[%c0_11, %c0_12] : memref<4x12xbf16, #tpu.memory_space<vmem>>, vector<4x12xbf16>
    %cst_13 = arith.constant dense<0.000000e+00> : vector<4x64xf32>
    %19 = tpu.matmul %18, %15, %cst_13 {dimension_numbers = #tpu.dot_dimension_numbers<[1], [0], [0], [1], [0, 0, 1, 1], [], []>} : vector<4x12xbf16>, vector<12x64xbf16>, vector<4x64xf32> -> vector<4x64xf32>
    %cst_14 = arith.constant dense<0.000000e+00> : vector<4xf32>
    %20 = vector.multi_reduction <add>, %17, %cst_14 [1] : vector<4x64xf32> to vector<4xf32>
    %21 = vector.shape_cast %20 : vector<4xf32> to vector<4x1xf32>
    %cst_15 = arith.constant 6.400000e+01 : f32
    %22 = vector.broadcast %cst_15 : f32 to vector<4x1xf32>
    %23 = arith.divf %21, %22 : vector<4x1xf32>
    %24 = vector.broadcast %23 : vector<4x1xf32> to vector<4x64xf32>
    %25 = arith.subf %17, %24 : vector<4x64xf32>
    %26 = arith.mulf %25, %25 : vector<4x64xf32>
    %cst_16 = arith.constant dense<0.000000e+00> : vector<4xf32>
    %27 = vector.multi_reduction <add>, %26, %cst_16 [1] : vector<4x64xf32> to vector<4xf32>
    %28 = vector.shape_cast %27 : vector<4xf32> to vector<4x1xf32>
    %cst_17 = arith.constant 6.400000e+01 : f32
    %29 = vector.broadcast %cst_17 : f32 to vector<4x1xf32>
    %30 = arith.divf %28, %29 : vector<4x1xf32>
    %cst_18 = arith.constant 9.99999974E-6 : f32
    %31 = vector.broadcast %cst_18 : f32 to vector<4x1xf32>
    %32 = arith.addf %30, %31 : vector<4x1xf32>
    %33 = math.rsqrt %32 : vector<4x1xf32>
    %34 = vector.broadcast %33 : vector<4x1xf32> to vector<4x64xf32>
    %35 = arith.mulf %25, %34 : vector<4x64xf32>
    %c0_19 = arith.constant 0 : index
    %c0_20 = arith.constant 0 : index
    %c0_21 = arith.constant 0 : index
    %c0_22 = arith.constant 0 : index
    %36 = vector.load %arg5[%c0_19, %c0_20, %c0_21, %c0_22] : memref<1x2x4x64xf32, #tpu.memory_space<vmem>>, vector<1x1x4x64xf32>
    %37 = vector.shape_cast %36 : vector<1x1x4x64xf32> to vector<4x64xf32>
    %38 = vector.shape_cast %35 : vector<4x64xf32> to vector<1x1x4x64xf32>
    tpu.vector_store %arg5[%c0_19, %c0_20, %c0_21, %c0_22], %38 {strides = array<i32>} : memref<1x2x4x64xf32, #tpu.memory_space<vmem>>, vector<1x1x4x64xf32>,
    %cst_23 = arith.constant dense<0.000000e+00> : vector<4xf32>
    %39 = vector.multi_reduction <add>, %19, %cst_23 [1] : vector<4x64xf32> to vector<4xf32>
    %40 = vector.shape_cast %39 : vector<4xf32> to vector<4x1xf32>
    %cst_24 = arith.constant 6.400000e+01 : f32
    %41 = vector.broadcast %cst_24 : f32 to vector<4x1xf32>
    %42 = arith.divf %40, %41 : vector<4x1xf32>
    %43 = vector.broadcast %42 : vector<4x1xf32> to vector<4x64xf32>
    %44 = arith.subf %19, %43 : vector<4x64xf32>
    %45 = arith.mulf %44, %44 : vector<4x64xf32>
    %cst_25 = arith.constant dense<0.000000e+00> : vector<4xf32>
    %46 = vector.multi_reduction <add>, %45, %cst_25 [1] : vector<4x64xf32> to vector<4xf32>
    %47 = vector.shape_cast %46 : vector<4xf32> to vector<4x1xf32>
    %cst_26 = arith.constant 6.400000e+01 : f32
    %48 = vector.broadcast %cst_26 : f32 to vector<4x1xf32>
    %49 = arith.divf %47, %48 : vector<4x1xf32>
    %cst_27 = arith.constant 9.99999974E-6 : f32
    %50 = vector.broadcast %cst_27 : f32 to vector<4x1xf32>
    %51 = arith.addf %49, %50 : vector<4x1xf32>
    %52 = math.rsqrt %51 : vector<4x1xf32>
    %53 = vector.broadcast %52 : vector<4x1xf32> to vector<4x64xf32>
    %54 = arith.mulf %44, %53 : vector<4x64xf32>
    %c0_28 = arith.constant 0 : index
    %c1 = arith.constant 1 : index
    %c0_29 = arith.constant 0 : index
    %c0_30 = arith.constant 0 : index
    %55 = vector.load %arg5[%c0_28, %c1, %c0_29, %c0_30] : memref<1x2x4x64xf32, #tpu.memory_space<vmem>>, vector<1x1x4x64xf32>
    %56 = vector.shape_cast %55 : vector<1x1x4x64xf32> to vector<4x64xf32>
    %57 = vector.shape_cast %54 : vector<4x64xf32> to vector<1x1x4x64xf32>
    tpu.vector_store %arg5[%c0_28, %c1, %c0_29, %c0_30], %57 {strides = array<i32>} : memref<1x2x4x64xf32, #tpu.memory_space<vmem>>, vector<1x1x4x64xf32>,
    return
  }
  func.func @transform_0(%arg0: i32) -> (i32, i32, i32) {
    %c0_i32 = arith.constant 0 : i32
    %c0_i32_0 = arith.constant 0 : i32
    %c0_i32_1 = arith.constant 0 : i32
    return %arg0, %c0_i32, %c0_i32_0 : i32, i32, i32
  }
  func.func @transform_1(%arg0: i32) -> (i32, i32, i32) {
    %c0_i32 = arith.constant 0 : i32
    %c0_i32_0 = arith.constant 0 : i32
    %c0_i32_1 = arith.constant 0 : i32
    return %arg0, %c0_i32, %c0_i32_0 : i32, i32, i32
  }
  func.func @transform_2(%arg0: i32) -> (i32, i32) {
    %c0_i32 = arith.constant 0 : i32
    %c0_i32_0 = arith.constant 0 : i32
    %c0_i32_1 = arith.constant 0 : i32
    return %c0_i32, %c0_i32_0 : i32, i32
  }
  func.func @transform_3(%arg0: i32) -> (i32, i32) {
    %c0_i32 = arith.constant 0 : i32
    %c0_i32_0 = arith.constant 0 : i32
    %c0_i32_1 = arith.constant 0 : i32
    return %c0_i32, %c0_i32_0 : i32, i32
  }
  func.func @transform_4(%arg0: i32) -> (i32, i32, i32, i32) {
    %c0_i32 = arith.constant 0 : i32
    %c0_i32_0 = arith.constant 0 : i32
    %c0_i32_1 = arith.constant 0 : i32
    %c0_i32_2 = arith.constant 0 : i32
    return %arg0, %c0_i32, %c0_i32_0, %c0_i32_1 : i32, i32, i32, i32
  }
}

module attributes {stable_mosaic.version = 11 : i64} {
  func.func @kernel(%arg0: i32, %arg1: memref<1x72x64xf32, #tpu.memory_space<vmem>>, %arg2: memref<8x72xbf16, #tpu.memory_space<vmem>>, %arg3: memref<1x8x64xf32, #tpu.memory_space<vmem>>, %arg4: memref<1x8x64xf32, #tpu.memory_space<vmem>>) attributes {dimension_semantics = [#tpu.dimension_semantics<parallel>], iteration_bounds = array<i64: 2>, scalar_prefetch = 0 : i64, scratch_operands = 0 : i64, tpu.core_type = #tpu.core_type<tc>, window_params = [{transform_indices = @transform_0, window_bounds = array<i64: 1, 72, 64>}, {pipeline_mode = #tpu.pipeline_mode<synchronous>, transform_indices = @transform_1, window_bounds = array<i64: 8, 72>}, {transform_indices = @transform_2, window_bounds = array<i64: 1, 8, 64>}, {transform_indices = @transform_3, window_bounds = array<i64: 1, 8, 64>}]} {
    %c0 = arith.constant 0 : index
    %c0_0 = arith.constant 0 : index
    %c0_1 = arith.constant 0 : index
    %0 = vector.load %arg1[%c0, %c0_0, %c0_1] : memref<1x72x64xf32, #tpu.memory_space<vmem>>, vector<1x72x64xf32>
    %1 = vector.shape_cast %0 : vector<1x72x64xf32> to vector<72x64xf32>
    %cst = arith.constant 0.000000e+00 : f32
    %2 = vector.broadcast %cst : f32 to vector<72x64xf32>
    %3 = arith.cmpf oge, %1, %2 : vector<72x64xf32>
    %cst_2 = arith.constant 0.00999999977 : f32
    %4 = vector.broadcast %cst_2 : f32 to vector<72x64xf32>
    %5 = arith.mulf %4, %1 : vector<72x64xf32>
    %6 = arith.select %3, %1, %5 : vector<72x64xi1>, vector<72x64xf32>
    %c0_3 = arith.constant 0 : index
    %c0_4 = arith.constant 0 : index
    %7 = vector.load %arg2[%c0_3, %c0_4] : memref<8x72xbf16, #tpu.memory_space<vmem>>, vector<8x72xbf16>
    %8 = arith.truncf %6 : vector<72x64xf32> to vector<72x64xbf16>
    %cst_5 = arith.constant dense<0.000000e+00> : vector<8x64xf32>
    %9 = tpu.matmul %7, %8, %cst_5 {dimension_numbers = #tpu.dot_dimension_numbers<[1], [0], [0], [1], [0, 0, 1, 1], [], []>} : vector<8x72xbf16>, vector<72x64xbf16>, vector<8x64xf32> -> vector<8x64xf32>
    %cst_6 = arith.constant dense<0.000000e+00> : vector<8xf32>
    %10 = vector.multi_reduction <add>, %9, %cst_6 [1] : vector<8x64xf32> to vector<8xf32>
    %11 = vector.shape_cast %10 : vector<8xf32> to vector<8x1xf32>
    %cst_7 = arith.constant 6.400000e+01 : f32
    %12 = vector.broadcast %cst_7 : f32 to vector<8x1xf32>
    %13 = arith.divf %11, %12 : vector<8x1xf32>
    %14 = vector.broadcast %13 : vector<8x1xf32> to vector<8x64xf32>
    %15 = arith.subf %9, %14 : vector<8x64xf32>
    %16 = arith.mulf %15, %15 : vector<8x64xf32>
    %cst_8 = arith.constant dense<0.000000e+00> : vector<8xf32>
    %17 = vector.multi_reduction <add>, %16, %cst_8 [1] : vector<8x64xf32> to vector<8xf32>
    %18 = vector.shape_cast %17 : vector<8xf32> to vector<8x1xf32>
    %cst_9 = arith.constant 6.400000e+01 : f32
    %19 = vector.broadcast %cst_9 : f32 to vector<8x1xf32>
    %20 = arith.divf %18, %19 : vector<8x1xf32>
    %cst_10 = arith.constant 9.99999974E-6 : f32
    %21 = vector.broadcast %cst_10 : f32 to vector<8x1xf32>
    %22 = arith.addf %20, %21 : vector<8x1xf32>
    %23 = math.rsqrt %22 : vector<8x1xf32>
    %24 = vector.broadcast %23 : vector<8x1xf32> to vector<8x64xf32>
    %25 = arith.mulf %15, %24 : vector<8x64xf32>
    %c0_11 = arith.constant 0 : index
    %c0_12 = arith.constant 0 : index
    %c0_13 = arith.constant 0 : index
    %26 = vector.load %arg3[%c0_11, %c0_12, %c0_13] : memref<1x8x64xf32, #tpu.memory_space<vmem>>, vector<1x8x64xf32>
    %27 = vector.shape_cast %26 : vector<1x8x64xf32> to vector<8x64xf32>
    %28 = arith.addf %25, %27 : vector<8x64xf32>
    %c0_14 = arith.constant 0 : index
    %c0_15 = arith.constant 0 : index
    %c0_16 = arith.constant 0 : index
    %29 = vector.load %arg4[%c0_14, %c0_15, %c0_16] : memref<1x8x64xf32, #tpu.memory_space<vmem>>, vector<1x8x64xf32>
    %30 = vector.shape_cast %29 : vector<1x8x64xf32> to vector<8x64xf32>
    %31 = vector.shape_cast %28 : vector<8x64xf32> to vector<1x8x64xf32>
    tpu.vector_store %arg4[%c0_14, %c0_15, %c0_16], %31 {strides = array<i32>} : memref<1x8x64xf32, #tpu.memory_space<vmem>>, vector<1x8x64xf32>,
    return
  }
  func.func @transform_0(%arg0: i32) -> (i32, i32, i32) {
    %c0_i32 = arith.constant 0 : i32
    %c0_i32_0 = arith.constant 0 : i32
    %c0_i32_1 = arith.constant 0 : i32
    return %arg0, %c0_i32, %c0_i32_0 : i32, i32, i32
  }
  func.func @transform_1(%arg0: i32) -> (i32, i32) {
    %c0_i32 = arith.constant 0 : i32
    %c0_i32_0 = arith.constant 0 : i32
    %c0_i32_1 = arith.constant 0 : i32
    return %c0_i32, %c0_i32_0 : i32, i32
  }
  func.func @transform_2(%arg0: i32) -> (i32, i32, i32) {
    %c0_i32 = arith.constant 0 : i32
    %c0_i32_0 = arith.constant 0 : i32
    %c0_i32_1 = arith.constant 0 : i32
    return %arg0, %c0_i32, %c0_i32_0 : i32, i32, i32
  }
  func.func @transform_3(%arg0: i32) -> (i32, i32, i32) {
    %c0_i32 = arith.constant 0 : i32
    %c0_i32_0 = arith.constant 0 : i32
    %c0_i32_1 = arith.constant 0 : i32
    return %arg0, %c0_i32, %c0_i32_0 : i32, i32, i32
  }
}

module attributes {stable_mosaic.version = 11 : i64} {
  func.func @kernel(%arg0: i32, %arg1: memref<1x9x8x64xf32, #tpu.memory_space<vmem>>, %arg2: memref<1x8x64xf32, #tpu.memory_space<vmem>>, %arg3: memref<1x8x64xf32, #tpu.memory_space<vmem>>) attributes {dimension_semantics = [#tpu.dimension_semantics<parallel>], iteration_bounds = array<i64: 2>, scalar_prefetch = 0 : i64, scratch_operands = 0 : i64, tpu.core_type = #tpu.core_type<tc>, window_params = [{transform_indices = @transform_0, window_bounds = array<i64: 1, 9, 8, 64>}, {transform_indices = @transform_1, window_bounds = array<i64: 1, 8, 64>}, {transform_indices = @transform_2, window_bounds = array<i64: 1, 8, 64>}]} {
    %c0 = arith.constant 0 : index
    %c0_0 = arith.constant 0 : index
    %c0_1 = arith.constant 0 : index
    %c0_2 = arith.constant 0 : index
    %0 = vector.load %arg1[%c0, %c0_0, %c0_1, %c0_2] : memref<1x9x8x64xf32, #tpu.memory_space<vmem>>, vector<1x1x8x64xf32>
    %1 = vector.shape_cast %0 : vector<1x1x8x64xf32> to vector<8x64xf32>
    %c0_3 = arith.constant 0 : index
    %c1 = arith.constant 1 : index
    %c0_4 = arith.constant 0 : index
    %c0_5 = arith.constant 0 : index
    %2 = vector.load %arg1[%c0_3, %c1, %c0_4, %c0_5] : memref<1x9x8x64xf32, #tpu.memory_space<vmem>>, vector<1x1x8x64xf32>
    %3 = vector.shape_cast %2 : vector<1x1x8x64xf32> to vector<8x64xf32>
    %4 = arith.addf %1, %3 : vector<8x64xf32>
    %c0_6 = arith.constant 0 : index
    %c2 = arith.constant 2 : index
    %c0_7 = arith.constant 0 : index
    %c0_8 = arith.constant 0 : index
    %5 = vector.load %arg1[%c0_6, %c2, %c0_7, %c0_8] : memref<1x9x8x64xf32, #tpu.memory_space<vmem>>, vector<1x1x8x64xf32>
    %6 = vector.shape_cast %5 : vector<1x1x8x64xf32> to vector<8x64xf32>
    %7 = arith.addf %4, %6 : vector<8x64xf32>
    %c0_9 = arith.constant 0 : index
    %c3 = arith.constant 3 : index
    %c0_10 = arith.constant 0 : index
    %c0_11 = arith.constant 0 : index
    %8 = vector.load %arg1[%c0_9, %c3, %c0_10, %c0_11] : memref<1x9x8x64xf32, #tpu.memory_space<vmem>>, vector<1x1x8x64xf32>
    %9 = vector.shape_cast %8 : vector<1x1x8x64xf32> to vector<8x64xf32>
    %10 = arith.addf %7, %9 : vector<8x64xf32>
    %c0_12 = arith.constant 0 : index
    %c4 = arith.constant 4 : index
    %c0_13 = arith.constant 0 : index
    %c0_14 = arith.constant 0 : index
    %11 = vector.load %arg1[%c0_12, %c4, %c0_13, %c0_14] : memref<1x9x8x64xf32, #tpu.memory_space<vmem>>, vector<1x1x8x64xf32>
    %12 = vector.shape_cast %11 : vector<1x1x8x64xf32> to vector<8x64xf32>
    %13 = arith.addf %10, %12 : vector<8x64xf32>
    %c0_15 = arith.constant 0 : index
    %c5 = arith.constant 5 : index
    %c0_16 = arith.constant 0 : index
    %c0_17 = arith.constant 0 : index
    %14 = vector.load %arg1[%c0_15, %c5, %c0_16, %c0_17] : memref<1x9x8x64xf32, #tpu.memory_space<vmem>>, vector<1x1x8x64xf32>
    %15 = vector.shape_cast %14 : vector<1x1x8x64xf32> to vector<8x64xf32>
    %16 = arith.addf %13, %15 : vector<8x64xf32>
    %c0_18 = arith.constant 0 : index
    %c6 = arith.constant 6 : index
    %c0_19 = arith.constant 0 : index
    %c0_20 = arith.constant 0 : index
    %17 = vector.load %arg1[%c0_18, %c6, %c0_19, %c0_20] : memref<1x9x8x64xf32, #tpu.memory_space<vmem>>, vector<1x1x8x64xf32>
    %18 = vector.shape_cast %17 : vector<1x1x8x64xf32> to vector<8x64xf32>
    %19 = arith.addf %16, %18 : vector<8x64xf32>
    %c0_21 = arith.constant 0 : index
    %c7 = arith.constant 7 : index
    %c0_22 = arith.constant 0 : index
    %c0_23 = arith.constant 0 : index
    %20 = vector.load %arg1[%c0_21, %c7, %c0_22, %c0_23] : memref<1x9x8x64xf32, #tpu.memory_space<vmem>>, vector<1x1x8x64xf32>
    %21 = vector.shape_cast %20 : vector<1x1x8x64xf32> to vector<8x64xf32>
    %22 = arith.addf %19, %21 : vector<8x64xf32>
    %c0_24 = arith.constant 0 : index
    %c8 = arith.constant 8 : index
    %c0_25 = arith.constant 0 : index
    %c0_26 = arith.constant 0 : index
    %23 = vector.load %arg1[%c0_24, %c8, %c0_25, %c0_26] : memref<1x9x8x64xf32, #tpu.memory_space<vmem>>, vector<1x1x8x64xf32>
    %24 = vector.shape_cast %23 : vector<1x1x8x64xf32> to vector<8x64xf32>
    %25 = arith.addf %22, %24 : vector<8x64xf32>
    %cst = arith.constant 0.111111112 : f32
    %26 = vector.broadcast %cst : f32 to vector<8x64xf32>
    %27 = arith.mulf %25, %26 : vector<8x64xf32>
    %c0_27 = arith.constant 0 : index
    %c0_28 = arith.constant 0 : index
    %c0_29 = arith.constant 0 : index
    %28 = vector.load %arg2[%c0_27, %c0_28, %c0_29] : memref<1x8x64xf32, #tpu.memory_space<vmem>>, vector<1x8x64xf32>
    %29 = vector.shape_cast %28 : vector<1x8x64xf32> to vector<8x64xf32>
    %30 = arith.addf %27, %29 : vector<8x64xf32>
    %c0_30 = arith.constant 0 : index
    %c0_31 = arith.constant 0 : index
    %c0_32 = arith.constant 0 : index
    %31 = vector.load %arg3[%c0_30, %c0_31, %c0_32] : memref<1x8x64xf32, #tpu.memory_space<vmem>>, vector<1x8x64xf32>
    %32 = vector.shape_cast %31 : vector<1x8x64xf32> to vector<8x64xf32>
    %33 = vector.shape_cast %30 : vector<8x64xf32> to vector<1x8x64xf32>
    tpu.vector_store %arg3[%c0_30, %c0_31, %c0_32], %33 {strides = array<i32>} : memref<1x8x64xf32, #tpu.memory_space<vmem>>, vector<1x8x64xf32>,
    return
  }
  func.func @transform_0(%arg0: i32) -> (i32, i32, i32, i32) {
    %c0_i32 = arith.constant 0 : i32
    %c0_i32_0 = arith.constant 0 : i32
    %c0_i32_1 = arith.constant 0 : i32
    %c0_i32_2 = arith.constant 0 : i32
    return %arg0, %c0_i32, %c0_i32_0, %c0_i32_1 : i32, i32, i32, i32
  }
  func.func @transform_1(%arg0: i32) -> (i32, i32, i32) {
    %c0_i32 = arith.constant 0 : i32
    %c0_i32_0 = arith.constant 0 : i32
    %c0_i32_1 = arith.constant 0 : i32
    return %arg0, %c0_i32, %c0_i32_0 : i32, i32, i32
  }
  func.func @transform_2(%arg0: i32) -> (i32, i32, i32) {
    %c0_i32 = arith.constant 0 : i32
    %c0_i32_0 = arith.constant 0 : i32
    %c0_i32_1 = arith.constant 0 : i32
    return %arg0, %c0_i32, %c0_i32_0 : i32, i32, i32
  }
}

module attributes {stable_mosaic.version = 11 : i64} {
  func.func @kernel(%arg0: i32, %arg1: memref<1x72x64xf32, #tpu.memory_space<vmem>>, %arg2: memref<8x72xbf16, #tpu.memory_space<vmem>>, %arg3: memref<1x8x64xf32, #tpu.memory_space<vmem>>) attributes {dimension_semantics = [#tpu.dimension_semantics<parallel>], iteration_bounds = array<i64: 2>, scalar_prefetch = 0 : i64, scratch_operands = 0 : i64, tpu.core_type = #tpu.core_type<tc>, window_params = [{transform_indices = @transform_0, window_bounds = array<i64: 1, 72, 64>}, {pipeline_mode = #tpu.pipeline_mode<synchronous>, transform_indices = @transform_1, window_bounds = array<i64: 8, 72>}, {transform_indices = @transform_2, window_bounds = array<i64: 1, 8, 64>}]} {
    %c0 = arith.constant 0 : index
    %c0_0 = arith.constant 0 : index
    %c0_1 = arith.constant 0 : index
    %0 = vector.load %arg1[%c0, %c0_0, %c0_1] : memref<1x72x64xf32, #tpu.memory_space<vmem>>, vector<1x72x64xf32>
    %1 = vector.shape_cast %0 : vector<1x72x64xf32> to vector<72x64xf32>
    %cst = arith.constant 0.000000e+00 : f32
    %2 = vector.broadcast %cst : f32 to vector<72x64xf32>
    %3 = arith.cmpf oge, %1, %2 : vector<72x64xf32>
    %cst_2 = arith.constant 0.00999999977 : f32
    %4 = vector.broadcast %cst_2 : f32 to vector<72x64xf32>
    %5 = arith.mulf %4, %1 : vector<72x64xf32>
    %6 = arith.select %3, %1, %5 : vector<72x64xi1>, vector<72x64xf32>
    %c0_3 = arith.constant 0 : index
    %c0_4 = arith.constant 0 : index
    %7 = vector.load %arg2[%c0_3, %c0_4] : memref<8x72xbf16, #tpu.memory_space<vmem>>, vector<8x72xbf16>
    %8 = arith.truncf %6 : vector<72x64xf32> to vector<72x64xbf16>
    %cst_5 = arith.constant dense<0.000000e+00> : vector<8x64xf32>
    %9 = tpu.matmul %7, %8, %cst_5 {dimension_numbers = #tpu.dot_dimension_numbers<[1], [0], [0], [1], [0, 0, 1, 1], [], []>} : vector<8x72xbf16>, vector<72x64xbf16>, vector<8x64xf32> -> vector<8x64xf32>
    %cst_6 = arith.constant dense<0.000000e+00> : vector<8xf32>
    %10 = vector.multi_reduction <add>, %9, %cst_6 [1] : vector<8x64xf32> to vector<8xf32>
    %11 = vector.shape_cast %10 : vector<8xf32> to vector<8x1xf32>
    %cst_7 = arith.constant 6.400000e+01 : f32
    %12 = vector.broadcast %cst_7 : f32 to vector<8x1xf32>
    %13 = arith.divf %11, %12 : vector<8x1xf32>
    %14 = vector.broadcast %13 : vector<8x1xf32> to vector<8x64xf32>
    %15 = arith.subf %9, %14 : vector<8x64xf32>
    %16 = arith.mulf %15, %15 : vector<8x64xf32>
    %cst_8 = arith.constant dense<0.000000e+00> : vector<8xf32>
    %17 = vector.multi_reduction <add>, %16, %cst_8 [1] : vector<8x64xf32> to vector<8xf32>
    %18 = vector.shape_cast %17 : vector<8xf32> to vector<8x1xf32>
    %cst_9 = arith.constant 6.400000e+01 : f32
    %19 = vector.broadcast %cst_9 : f32 to vector<8x1xf32>
    %20 = arith.divf %18, %19 : vector<8x1xf32>
    %cst_10 = arith.constant 9.99999974E-6 : f32
    %21 = vector.broadcast %cst_10 : f32 to vector<8x1xf32>
    %22 = arith.addf %20, %21 : vector<8x1xf32>
    %23 = math.rsqrt %22 : vector<8x1xf32>
    %24 = vector.broadcast %23 : vector<8x1xf32> to vector<8x64xf32>
    %25 = arith.mulf %15, %24 : vector<8x64xf32>
    %c0_11 = arith.constant 0 : index
    %c0_12 = arith.constant 0 : index
    %c0_13 = arith.constant 0 : index
    %26 = vector.load %arg3[%c0_11, %c0_12, %c0_13] : memref<1x8x64xf32, #tpu.memory_space<vmem>>, vector<1x8x64xf32>
    %27 = vector.shape_cast %26 : vector<1x8x64xf32> to vector<8x64xf32>
    %28 = vector.shape_cast %25 : vector<8x64xf32> to vector<1x8x64xf32>
    tpu.vector_store %arg3[%c0_11, %c0_12, %c0_13], %28 {strides = array<i32>} : memref<1x8x64xf32, #tpu.memory_space<vmem>>, vector<1x8x64xf32>,
    return
  }
  func.func @transform_0(%arg0: i32) -> (i32, i32, i32) {
    %c0_i32 = arith.constant 0 : i32
    %c0_i32_0 = arith.constant 0 : i32
    %c0_i32_1 = arith.constant 0 : i32
    return %arg0, %c0_i32, %c0_i32_0 : i32, i32, i32
  }
  func.func @transform_1(%arg0: i32) -> (i32, i32) {
    %c0_i32 = arith.constant 0 : i32
    %c0_i32_0 = arith.constant 0 : i32
    %c0_i32_1 = arith.constant 0 : i32
    return %c0_i32, %c0_i32_0 : i32, i32
  }
  func.func @transform_2(%arg0: i32) -> (i32, i32, i32) {
    %c0_i32 = arith.constant 0 : i32
    %c0_i32_0 = arith.constant 0 : i32
    %c0_i32_1 = arith.constant 0 : i32
    return %arg0, %c0_i32, %c0_i32_0 : i32, i32, i32
  }
}

module attributes {stable_mosaic.version = 11 : i64} {
  func.func @kernel(%arg0: i32, %arg1: memref<1x8x64xf32, #tpu.memory_space<vmem>>, %arg2: memref<1x8x64xf32, #tpu.memory_space<vmem>>, %arg3: memref<1x8x64xf32, #tpu.memory_space<vmem>>, %arg4: memref<1x9x8x64xf32, #tpu.memory_space<vmem>>, %arg5: memref<4x8xf32, #tpu.memory_space<vmem>>, %arg6: memref<4x8xf32, #tpu.memory_space<vmem>>, %arg7: memref<4x8xf32, #tpu.memory_space<vmem>>, %arg8: memref<4x1xf32, #tpu.memory_space<vmem>>, %arg9: memref<8x4xf32, #tpu.memory_space<vmem>>, %arg10: memref<8x4xf32, #tpu.memory_space<vmem>>, %arg11: memref<8x4xf32, #tpu.memory_space<vmem>>, %arg12: memref<8x1xf32, #tpu.memory_space<vmem>>, %arg13: memref<8x1xf32, #tpu.memory_space<vmem>>, %arg14: memref<8x1xf32, #tpu.memory_space<vmem>>, %arg15: memref<1x3x8x64xf32, #tpu.memory_space<vmem>>) attributes {dimension_semantics = [#tpu.dimension_semantics<parallel>], iteration_bounds = array<i64: 2>, scalar_prefetch = 0 : i64, scratch_operands = 0 : i64, tpu.core_type = #tpu.core_type<tc>, window_params = [{transform_indices = @transform_0, window_bounds = array<i64: 1, 8, 64>}, {transform_indices = @transform_1, window_bounds = array<i64: 1, 8, 64>}, {transform_indices = @transform_2, window_bounds = array<i64: 1, 8, 64>}, {transform_indices = @transform_3, window_bounds = array<i64: 1, 9, 8, 64>}, {pipeline_mode = #tpu.pipeline_mode<synchronous>, transform_indices = @transform_4, window_bounds = array<i64: 4, 8>}, {pipeline_mode = #tpu.pipeline_mode<synchronous>, transform_indices = @transform_5, window_bounds = array<i64: 4, 8>}, {pipeline_mode = #tpu.pipeline_mode<synchronous>, transform_indices = @transform_6, window_bounds = array<i64: 4, 8>}, {pipeline_mode = #tpu.pipeline_mode<synchronous>, transform_indices = @transform_7, window_bounds = array<i64: 4, 1>}, {pipeline_mode = #tpu.pipeline_mode<synchronous>, transform_indices = @transform_8, window_bounds = array<i64: 8, 4>}, {pipeline_mode = #tpu.pipeline_mode<synchronous>, transform_indices = @transform_9, window_bounds = array<i64: 8, 4>}, {pipeline_mode = #tpu.pipeline_mode<synchronous>, transform_indices = @transform_10, window_bounds = array<i64: 8, 4>}, {pipeline_mode = #tpu.pipeline_mode<synchronous>, transform_indices = @transform_11, window_bounds = array<i64: 8, 1>}, {pipeline_mode = #tpu.pipeline_mode<synchronous>, transform_indices = @transform_12, window_bounds = array<i64: 8, 1>}, {pipeline_mode = #tpu.pipeline_mode<synchronous>, transform_indices = @transform_13, window_bounds = array<i64: 8, 1>}, {transform_indices = @transform_14, window_bounds = array<i64: 1, 3, 8, 64>}]} {
    %c0 = arith.constant 0 : index
    %c0_0 = arith.constant 0 : index
    %c0_1 = arith.constant 0 : index
    %0 = vector.load %arg1[%c0, %c0_0, %c0_1] : memref<1x8x64xf32, #tpu.memory_space<vmem>>, vector<1x8x64xf32>
    %1 = vector.shape_cast %0 : vector<1x8x64xf32> to vector<8x64xf32>
    %c0_2 = arith.constant 0 : index
    %c0_3 = arith.constant 0 : index
    %c0_4 = arith.constant 0 : index
    %2 = vector.load %arg2[%c0_2, %c0_3, %c0_4] : memref<1x8x64xf32, #tpu.memory_space<vmem>>, vector<1x8x64xf32>
    %3 = vector.shape_cast %2 : vector<1x8x64xf32> to vector<8x64xf32>
    %c0_5 = arith.constant 0 : index
    %c0_6 = arith.constant 0 : index
    %c0_7 = arith.constant 0 : index
    %4 = vector.load %arg3[%c0_5, %c0_6, %c0_7] : memref<1x8x64xf32, #tpu.memory_space<vmem>>, vector<1x8x64xf32>
    %5 = vector.shape_cast %4 : vector<1x8x64xf32> to vector<8x64xf32>
    %c0_8 = arith.constant 0 : index
    %c0_9 = arith.constant 0 : index
    %c0_10 = arith.constant 0 : index
    %c0_11 = arith.constant 0 : index
    %6 = vector.load %arg4[%c0_8, %c0_9, %c0_10, %c0_11] : memref<1x9x8x64xf32, #tpu.memory_space<vmem>>, vector<1x1x8x64xf32>
    %7 = vector.shape_cast %6 : vector<1x1x8x64xf32> to vector<8x64xf32>
    %c0_12 = arith.constant 0 : index
    %c1 = arith.constant 1 : index
    %c0_13 = arith.constant 0 : index
    %c0_14 = arith.constant 0 : index
    %8 = vector.load %arg4[%c0_12, %c1, %c0_13, %c0_14] : memref<1x9x8x64xf32, #tpu.memory_space<vmem>>, vector<1x1x8x64xf32>
    %9 = vector.shape_cast %8 : vector<1x1x8x64xf32> to vector<8x64xf32>
    %10 = arith.addf %7, %9 : vector<8x64xf32>
    %c0_15 = arith.constant 0 : index
    %c2 = arith.constant 2 : index
    %c0_16 = arith.constant 0 : index
    %c0_17 = arith.constant 0 : index
    %11 = vector.load %arg4[%c0_15, %c2, %c0_16, %c0_17] : memref<1x9x8x64xf32, #tpu.memory_space<vmem>>, vector<1x1x8x64xf32>
    %12 = vector.shape_cast %11 : vector<1x1x8x64xf32> to vector<8x64xf32>
    %13 = arith.addf %10, %12 : vector<8x64xf32>
    %c0_18 = arith.constant 0 : index
    %c3 = arith.constant 3 : index
    %c0_19 = arith.constant 0 : index
    %c0_20 = arith.constant 0 : index
    %14 = vector.load %arg4[%c0_18, %c3, %c0_19, %c0_20] : memref<1x9x8x64xf32, #tpu.memory_space<vmem>>, vector<1x1x8x64xf32>
    %15 = vector.shape_cast %14 : vector<1x1x8x64xf32> to vector<8x64xf32>
    %16 = arith.addf %13, %15 : vector<8x64xf32>
    %c0_21 = arith.constant 0 : index
    %c4 = arith.constant 4 : index
    %c0_22 = arith.constant 0 : index
    %c0_23 = arith.constant 0 : index
    %17 = vector.load %arg4[%c0_21, %c4, %c0_22, %c0_23] : memref<1x9x8x64xf32, #tpu.memory_space<vmem>>, vector<1x1x8x64xf32>
    %18 = vector.shape_cast %17 : vector<1x1x8x64xf32> to vector<8x64xf32>
    %19 = arith.addf %16, %18 : vector<8x64xf32>
    %c0_24 = arith.constant 0 : index
    %c5 = arith.constant 5 : index
    %c0_25 = arith.constant 0 : index
    %c0_26 = arith.constant 0 : index
    %20 = vector.load %arg4[%c0_24, %c5, %c0_25, %c0_26] : memref<1x9x8x64xf32, #tpu.memory_space<vmem>>, vector<1x1x8x64xf32>
    %21 = vector.shape_cast %20 : vector<1x1x8x64xf32> to vector<8x64xf32>
    %22 = arith.addf %19, %21 : vector<8x64xf32>
    %c0_27 = arith.constant 0 : index
    %c6 = arith.constant 6 : index
    %c0_28 = arith.constant 0 : index
    %c0_29 = arith.constant 0 : index
    %23 = vector.load %arg4[%c0_27, %c6, %c0_28, %c0_29] : memref<1x9x8x64xf32, #tpu.memory_space<vmem>>, vector<1x1x8x64xf32>
    %24 = vector.shape_cast %23 : vector<1x1x8x64xf32> to vector<8x64xf32>
    %25 = arith.addf %22, %24 : vector<8x64xf32>
    %c0_30 = arith.constant 0 : index
    %c7 = arith.constant 7 : index
    %c0_31 = arith.constant 0 : index
    %c0_32 = arith.constant 0 : index
    %26 = vector.load %arg4[%c0_30, %c7, %c0_31, %c0_32] : memref<1x9x8x64xf32, #tpu.memory_space<vmem>>, vector<1x1x8x64xf32>
    %27 = vector.shape_cast %26 : vector<1x1x8x64xf32> to vector<8x64xf32>
    %28 = arith.addf %25, %27 : vector<8x64xf32>
    %c0_33 = arith.constant 0 : index
    %c8 = arith.constant 8 : index
    %c0_34 = arith.constant 0 : index
    %c0_35 = arith.constant 0 : index
    %29 = vector.load %arg4[%c0_33, %c8, %c0_34, %c0_35] : memref<1x9x8x64xf32, #tpu.memory_space<vmem>>, vector<1x1x8x64xf32>
    %30 = vector.shape_cast %29 : vector<1x1x8x64xf32> to vector<8x64xf32>
    %31 = arith.addf %28, %30 : vector<8x64xf32>
    %cst = arith.constant 0.111111112 : f32
    %32 = vector.broadcast %cst : f32 to vector<8x64xf32>
    %33 = arith.mulf %31, %32 : vector<8x64xf32>
    %34 = arith.addf %5, %33 : vector<8x64xf32>
    %c0_36 = arith.constant 0 : index
    %c0_37 = arith.constant 0 : index
    %35 = vector.load %arg8[%c0_36, %c0_37] : memref<4x1xf32, #tpu.memory_space<vmem>>, vector<4x1xf32>
    %cst_38 = arith.constant dense<0.000000e+00> : vector<8xf32>
    %36 = vector.multi_reduction <add>, %1, %cst_38 [1] : vector<8x64xf32> to vector<8xf32>
    %37 = vector.shape_cast %36 : vector<8xf32> to vector<8x1xf32>
    %cst_39 = arith.constant 6.400000e+01 : f32
    %38 = vector.broadcast %cst_39 : f32 to vector<8x1xf32>
    %39 = arith.divf %37, %38 : vector<8x1xf32>
    %c0_40 = arith.constant 0 : index
    %c0_41 = arith.constant 0 : index
    %40 = vector.load %arg5[%c0_40, %c0_41] : memref<4x8xf32, #tpu.memory_space<vmem>>, vector<4x8xf32>
    %cst_42 = arith.constant dense<0.000000e+00> : vector<4x1xf32>
    %41 = tpu.matmul %40, %39, %cst_42 {dimension_numbers = #tpu.dot_dimension_numbers<[1], [0], [0], [1], [0, 0, 1, 1], [], []>} : vector<4x8xf32>, vector<8x1xf32>, vector<4x1xf32> -> vector<4x1xf32>
    %42 = arith.addf %35, %41 : vector<4x1xf32>
    %cst_43 = arith.constant dense<0.000000e+00> : vector<8xf32>
    %43 = vector.multi_reduction <add>, %3, %cst_43 [1] : vector<8x64xf32> to vector<8xf32>
    %44 = vector.shape_cast %43 : vector<8xf32> to vector<8x1xf32>
    %cst_44 = arith.constant 6.400000e+01 : f32
    %45 = vector.broadcast %cst_44 : f32 to vector<8x1xf32>
    %46 = arith.divf %44, %45 : vector<8x1xf32>
    %c0_45 = arith.constant 0 : index
    %c0_46 = arith.constant 0 : index
    %47 = vector.load %arg6[%c0_45, %c0_46] : memref<4x8xf32, #tpu.memory_space<vmem>>, vector<4x8xf32>
    %cst_47 = arith.constant dense<0.000000e+00> : vector<4x1xf32>
    %48 = tpu.matmul %47, %46, %cst_47 {dimension_numbers = #tpu.dot_dimension_numbers<[1], [0], [0], [1], [0, 0, 1, 1], [], []>} : vector<4x8xf32>, vector<8x1xf32>, vector<4x1xf32> -> vector<4x1xf32>
    %49 = arith.addf %42, %48 : vector<4x1xf32>
    %cst_48 = arith.constant dense<0.000000e+00> : vector<8xf32>
    %50 = vector.multi_reduction <add>, %34, %cst_48 [1] : vector<8x64xf32> to vector<8xf32>
    %51 = vector.shape_cast %50 : vector<8xf32> to vector<8x1xf32>
    %cst_49 = arith.constant 6.400000e+01 : f32
    %52 = vector.broadcast %cst_49 : f32 to vector<8x1xf32>
    %53 = arith.divf %51, %52 : vector<8x1xf32>
    %c0_50 = arith.constant 0 : index
    %c0_51 = arith.constant 0 : index
    %54 = vector.load %arg7[%c0_50, %c0_51] : memref<4x8xf32, #tpu.memory_space<vmem>>, vector<4x8xf32>
    %cst_52 = arith.constant dense<0.000000e+00> : vector<4x1xf32>
    %55 = tpu.matmul %54, %53, %cst_52 {dimension_numbers = #tpu.dot_dimension_numbers<[1], [0], [0], [1], [0, 0, 1, 1], [], []>} : vector<4x8xf32>, vector<8x1xf32>, vector<4x1xf32> -> vector<4x1xf32>
    %56 = arith.addf %49, %55 : vector<4x1xf32>
    %cst_53 = arith.constant 0.000000e+00 : f32
    %57 = vector.broadcast %cst_53 : f32 to vector<4x1xf32>
    %58 = arith.maximumf %56, %57 : vector<4x1xf32>
    %c0_54 = arith.constant 0 : index
    %c0_55 = arith.constant 0 : index
    %59 = vector.load %arg9[%c0_54, %c0_55] : memref<8x4xf32, #tpu.memory_space<vmem>>, vector<8x4xf32>
    %cst_56 = arith.constant dense<0.000000e+00> : vector<8x1xf32>
    %60 = tpu.matmul %59, %58, %cst_56 {dimension_numbers = #tpu.dot_dimension_numbers<[1], [0], [0], [1], [0, 0, 1, 1], [], []>} : vector<8x4xf32>, vector<4x1xf32>, vector<8x1xf32> -> vector<8x1xf32>
    %c0_57 = arith.constant 0 : index
    %c0_58 = arith.constant 0 : index
    %61 = vector.load %arg12[%c0_57, %c0_58] : memref<8x1xf32, #tpu.memory_space<vmem>>, vector<8x1xf32>
    %62 = arith.addf %60, %61 : vector<8x1xf32>
    %63 = arith.negf %62 : vector<8x1xf32>
    %64 = math.exp %63 : vector<8x1xf32>
    %cst_59 = arith.constant 1.000000e+00 : f32
    %65 = vector.broadcast %cst_59 : f32 to vector<8x1xf32>
    %66 = arith.addf %65, %64 : vector<8x1xf32>
    %67 = arith.divf %65, %66 : vector<8x1xf32>
    %68 = vector.broadcast %67 : vector<8x1xf32> to vector<8x64xf32>
    %69 = arith.mulf %1, %68 : vector<8x64xf32>
    %c0_60 = arith.constant 0 : index
    %c0_61 = arith.constant 0 : index
    %c0_62 = arith.constant 0 : index
    %c0_63 = arith.constant 0 : index
    %70 = vector.load %arg15[%c0_60, %c0_61, %c0_62, %c0_63] : memref<1x3x8x64xf32, #tpu.memory_space<vmem>>, vector<1x1x8x64xf32>
    %71 = vector.shape_cast %70 : vector<1x1x8x64xf32> to vector<8x64xf32>
    %72 = vector.shape_cast %69 : vector<8x64xf32> to vector<1x1x8x64xf32>
    tpu.vector_store %arg15[%c0_60, %c0_61, %c0_62, %c0_63], %72 {strides = array<i32>} : memref<1x3x8x64xf32, #tpu.memory_space<vmem>>, vector<1x1x8x64xf32>,
    %c0_64 = arith.constant 0 : index
    %c0_65 = arith.constant 0 : index
    %73 = vector.load %arg10[%c0_64, %c0_65] : memref<8x4xf32, #tpu.memory_space<vmem>>, vector<8x4xf32>
    %cst_66 = arith.constant dense<0.000000e+00> : vector<8x1xf32>
    %74 = tpu.matmul %73, %58, %cst_66 {dimension_numbers = #tpu.dot_dimension_numbers<[1], [0], [0], [1], [0, 0, 1, 1], [], []>} : vector<8x4xf32>, vector<4x1xf32>, vector<8x1xf32> -> vector<8x1xf32>
    %c0_67 = arith.constant 0 : index
    %c0_68 = arith.constant 0 : index
    %75 = vector.load %arg13[%c0_67, %c0_68] : memref<8x1xf32, #tpu.memory_space<vmem>>, vector<8x1xf32>
    %76 = arith.addf %74, %75 : vector<8x1xf32>
    %77 = arith.negf %76 : vector<8x1xf32>
    %78 = math.exp %77 : vector<8x1xf32>
    %cst_69 = arith.constant 1.000000e+00 : f32
    %79 = vector.broadcast %cst_69 : f32 to vector<8x1xf32>
    %80 = arith.addf %79, %78 : vector<8x1xf32>
    %81 = arith.divf %79, %80 : vector<8x1xf32>
    %82 = vector.broadcast %81 : vector<8x1xf32> to vector<8x64xf32>
    %83 = arith.mulf %3, %82 : vector<8x64xf32>
    %c0_70 = arith.constant 0 : index
    %c1_71 = arith.constant 1 : index
    %c0_72 = arith.constant 0 : index
    %c0_73 = arith.constant 0 : index
    %84 = vector.load %arg15[%c0_70, %c1_71, %c0_72, %c0_73] : memref<1x3x8x64xf32, #tpu.memory_space<vmem>>, vector<1x1x8x64xf32>
    %85 = vector.shape_cast %84 : vector<1x1x8x64xf32> to vector<8x64xf32>
    %86 = vector.shape_cast %83 : vector<8x64xf32> to vector<1x1x8x64xf32>
    tpu.vector_store %arg15[%c0_70, %c1_71, %c0_72, %c0_73], %86 {strides = array<i32>} : memref<1x3x8x64xf32, #tpu.memory_space<vmem>>, vector<1x1x8x64xf32>,
    %c0_74 = arith.constant 0 : index
    %c0_75 = arith.constant 0 : index
    %87 = vector.load %arg11[%c0_74, %c0_75] : memref<8x4xf32, #tpu.memory_space<vmem>>, vector<8x4xf32>
    %cst_76 = arith.constant dense<0.000000e+00> : vector<8x1xf32>
    %88 = tpu.matmul %87, %58, %cst_76 {dimension_numbers = #tpu.dot_dimension_numbers<[1], [0], [0], [1], [0, 0, 1, 1], [], []>} : vector<8x4xf32>, vector<4x1xf32>, vector<8x1xf32> -> vector<8x1xf32>
    %c0_77 = arith.constant 0 : index
    %c0_78 = arith.constant 0 : index
    %89 = vector.load %arg14[%c0_77, %c0_78] : memref<8x1xf32, #tpu.memory_space<vmem>>, vector<8x1xf32>
    %90 = arith.addf %88, %89 : vector<8x1xf32>
    %91 = arith.negf %90 : vector<8x1xf32>
    %92 = math.exp %91 : vector<8x1xf32>
    %cst_79 = arith.constant 1.000000e+00 : f32
    %93 = vector.broadcast %cst_79 : f32 to vector<8x1xf32>
    %94 = arith.addf %93, %92 : vector<8x1xf32>
    %95 = arith.divf %93, %94 : vector<8x1xf32>
    %96 = vector.broadcast %95 : vector<8x1xf32> to vector<8x64xf32>
    %97 = arith.mulf %34, %96 : vector<8x64xf32>
    %c0_80 = arith.constant 0 : index
    %c2_81 = arith.constant 2 : index
    %c0_82 = arith.constant 0 : index
    %c0_83 = arith.constant 0 : index
    %98 = vector.load %arg15[%c0_80, %c2_81, %c0_82, %c0_83] : memref<1x3x8x64xf32, #tpu.memory_space<vmem>>, vector<1x1x8x64xf32>
    %99 = vector.shape_cast %98 : vector<1x1x8x64xf32> to vector<8x64xf32>
    %100 = vector.shape_cast %97 : vector<8x64xf32> to vector<1x1x8x64xf32>
    tpu.vector_store %arg15[%c0_80, %c2_81, %c0_82, %c0_83], %100 {strides = array<i32>} : memref<1x3x8x64xf32, #tpu.memory_space<vmem>>, vector<1x1x8x64xf32>,
    return
  }
  func.func @transform_0(%arg0: i32) -> (i32, i32, i32) {
    %c0_i32 = arith.constant 0 : i32
    %c0_i32_0 = arith.constant 0 : i32
    %c0_i32_1 = arith.constant 0 : i32
    return %arg0, %c0_i32, %c0_i32_0 : i32, i32, i32
  }
  func.func @transform_1(%arg0: i32) -> (i32, i32, i32) {
    %c0_i32 = arith.constant 0 : i32
    %c0_i32_0 = arith.constant 0 : i32
    %c0_i32_1 = arith.constant 0 : i32
    return %arg0, %c0_i32, %c0_i32_0 : i32, i32, i32
  }
  func.func @transform_2(%arg0: i32) -> (i32, i32, i32) {
    %c0_i32 = arith.constant 0 : i32
    %c0_i32_0 = arith.constant 0 : i32
    %c0_i32_1 = arith.constant 0 : i32
    return %arg0, %c0_i32, %c0_i32_0 : i32, i32, i32
  }
  func.func @transform_3(%arg0: i32) -> (i32, i32, i32, i32) {
    %c0_i32 = arith.constant 0 : i32
    %c0_i32_0 = arith.constant 0 : i32
    %c0_i32_1 = arith.constant 0 : i32
    %c0_i32_2 = arith.constant 0 : i32
    return %arg0, %c0_i32, %c0_i32_0, %c0_i32_1 : i32, i32, i32, i32
  }
  func.func @transform_4(%arg0: i32) -> (i32, i32) {
    %c0_i32 = arith.constant 0 : i32
    %c0_i32_0 = arith.constant 0 : i32
    %c0_i32_1 = arith.constant 0 : i32
    return %c0_i32, %c0_i32_0 : i32, i32
  }
  func.func @transform_5(%arg0: i32) -> (i32, i32) {
    %c0_i32 = arith.constant 0 : i32
    %c0_i32_0 = arith.constant 0 : i32
    %c0_i32_1 = arith.constant 0 : i32
    return %c0_i32, %c0_i32_0 : i32, i32
  }
  func.func @transform_6(%arg0: i32) -> (i32, i32) {
    %c0_i32 = arith.constant 0 : i32
    %c0_i32_0 = arith.constant 0 : i32
    %c0_i32_1 = arith.constant 0 : i32
    return %c0_i32, %c0_i32_0 : i32, i32
  }
  func.func @transform_7(%arg0: i32) -> (i32, i32) {
    %c0_i32 = arith.constant 0 : i32
    %c0_i32_0 = arith.constant 0 : i32
    %c0_i32_1 = arith.constant 0 : i32
    return %c0_i32, %c0_i32_0 : i32, i32
  }
  func.func @transform_8(%arg0: i32) -> (i32, i32) {
    %c0_i32 = arith.constant 0 : i32
    %c0_i32_0 = arith.constant 0 : i32
    %c0_i32_1 = arith.constant 0 : i32
    return %c0_i32, %c0_i32_0 : i32, i32
  }
  func.func @transform_9(%arg0: i32) -> (i32, i32) {
    %c0_i32 = arith.constant 0 : i32
    %c0_i32_0 = arith.constant 0 : i32
    %c0_i32_1 = arith.constant 0 : i32
    return %c0_i32, %c0_i32_0 : i32, i32
  }
  func.func @transform_10(%arg0: i32) -> (i32, i32) {
    %c0_i32 = arith.constant 0 : i32
    %c0_i32_0 = arith.constant 0 : i32
    %c0_i32_1 = arith.constant 0 : i32
    return %c0_i32, %c0_i32_0 : i32, i32
  }
  func.func @transform_11(%arg0: i32) -> (i32, i32) {
    %c0_i32 = arith.constant 0 : i32
    %c0_i32_0 = arith.constant 0 : i32
    %c0_i32_1 = arith.constant 0 : i32
    return %c0_i32, %c0_i32_0 : i32, i32
  }
  func.func @transform_12(%arg0: i32) -> (i32, i32) {
    %c0_i32 = arith.constant 0 : i32
    %c0_i32_0 = arith.constant 0 : i32
    %c0_i32_1 = arith.constant 0 : i32
    return %c0_i32, %c0_i32_0 : i32, i32
  }
  func.func @transform_13(%arg0: i32) -> (i32, i32) {
    %c0_i32 = arith.constant 0 : i32
    %c0_i32_0 = arith.constant 0 : i32
    %c0_i32_1 = arith.constant 0 : i32
    return %c0_i32, %c0_i32_0 : i32, i32
  }
  func.func @transform_14(%arg0: i32) -> (i32, i32, i32, i32) {
    %c0_i32 = arith.constant 0 : i32
    %c0_i32_0 = arith.constant 0 : i32
    %c0_i32_1 = arith.constant 0 : i32
    %c0_i32_2 = arith.constant 0 : i32
    return %arg0, %c0_i32, %c0_i32_0, %c0_i32_1 : i32, i32, i32, i32
  }
}

module attributes {stable_mosaic.version = 11 : i64} {
  func.func @kernel(%arg0: i32, %arg1: memref<1x24x64xf32, #tpu.memory_space<vmem>>, %arg2: memref<8x24xbf16, #tpu.memory_space<vmem>>, %arg3: memref<1x8x64xf32, #tpu.memory_space<vmem>>) attributes {dimension_semantics = [#tpu.dimension_semantics<parallel>], iteration_bounds = array<i64: 2>, scalar_prefetch = 0 : i64, scratch_operands = 0 : i64, tpu.core_type = #tpu.core_type<tc>, window_params = [{transform_indices = @transform_0, window_bounds = array<i64: 1, 24, 64>}, {pipeline_mode = #tpu.pipeline_mode<synchronous>, transform_indices = @transform_1, window_bounds = array<i64: 8, 24>}, {transform_indices = @transform_2, window_bounds = array<i64: 1, 8, 64>}]} {
    %c0 = arith.constant 0 : index
    %c0_0 = arith.constant 0 : index
    %c0_1 = arith.constant 0 : index
    %0 = vector.load %arg1[%c0, %c0_0, %c0_1] : memref<1x24x64xf32, #tpu.memory_space<vmem>>, vector<1x24x64xf32>
    %1 = vector.shape_cast %0 : vector<1x24x64xf32> to vector<24x64xf32>
    %cst = arith.constant 0.000000e+00 : f32
    %2 = vector.broadcast %cst : f32 to vector<24x64xf32>
    %3 = arith.cmpf oge, %1, %2 : vector<24x64xf32>
    %cst_2 = arith.constant 0.00999999977 : f32
    %4 = vector.broadcast %cst_2 : f32 to vector<24x64xf32>
    %5 = arith.mulf %4, %1 : vector<24x64xf32>
    %6 = arith.select %3, %1, %5 : vector<24x64xi1>, vector<24x64xf32>
    %c0_3 = arith.constant 0 : index
    %c0_4 = arith.constant 0 : index
    %7 = vector.load %arg2[%c0_3, %c0_4] : memref<8x24xbf16, #tpu.memory_space<vmem>>, vector<8x24xbf16>
    %8 = arith.truncf %6 : vector<24x64xf32> to vector<24x64xbf16>
    %cst_5 = arith.constant dense<0.000000e+00> : vector<8x64xf32>
    %9 = tpu.matmul %7, %8, %cst_5 {dimension_numbers = #tpu.dot_dimension_numbers<[1], [0], [0], [1], [0, 0, 1, 1], [], []>} : vector<8x24xbf16>, vector<24x64xbf16>, vector<8x64xf32> -> vector<8x64xf32>
    %cst_6 = arith.constant dense<0.000000e+00> : vector<8xf32>
    %10 = vector.multi_reduction <add>, %9, %cst_6 [1] : vector<8x64xf32> to vector<8xf32>
    %11 = vector.shape_cast %10 : vector<8xf32> to vector<8x1xf32>
    %cst_7 = arith.constant 6.400000e+01 : f32
    %12 = vector.broadcast %cst_7 : f32 to vector<8x1xf32>
    %13 = arith.divf %11, %12 : vector<8x1xf32>
    %14 = vector.broadcast %13 : vector<8x1xf32> to vector<8x64xf32>
    %15 = arith.subf %9, %14 : vector<8x64xf32>
    %16 = arith.mulf %15, %15 : vector<8x64xf32>
    %cst_8 = arith.constant dense<0.000000e+00> : vector<8xf32>
    %17 = vector.multi_reduction <add>, %16, %cst_8 [1] : vector<8x64xf32> to vector<8xf32>
    %18 = vector.shape_cast %17 : vector<8xf32> to vector<8x1xf32>
    %cst_9 = arith.constant 6.400000e+01 : f32
    %19 = vector.broadcast %cst_9 : f32 to vector<8x1xf32>
    %20 = arith.divf %18, %19 : vector<8x1xf32>
    %cst_10 = arith.constant 9.99999974E-6 : f32
    %21 = vector.broadcast %cst_10 : f32 to vector<8x1xf32>
    %22 = arith.addf %20, %21 : vector<8x1xf32>
    %23 = math.rsqrt %22 : vector<8x1xf32>
    %24 = vector.broadcast %23 : vector<8x1xf32> to vector<8x64xf32>
    %25 = arith.mulf %15, %24 : vector<8x64xf32>
    %c0_11 = arith.constant 0 : index
    %c0_12 = arith.constant 0 : index
    %c0_13 = arith.constant 0 : index
    %26 = vector.load %arg3[%c0_11, %c0_12, %c0_13] : memref<1x8x64xf32, #tpu.memory_space<vmem>>, vector<1x8x64xf32>
    %27 = vector.shape_cast %26 : vector<1x8x64xf32> to vector<8x64xf32>
    %28 = vector.shape_cast %25 : vector<8x64xf32> to vector<1x8x64xf32>
    tpu.vector_store %arg3[%c0_11, %c0_12, %c0_13], %28 {strides = array<i32>} : memref<1x8x64xf32, #tpu.memory_space<vmem>>, vector<1x8x64xf32>,
    return
  }
  func.func @transform_0(%arg0: i32) -> (i32, i32, i32) {
    %c0_i32 = arith.constant 0 : i32
    %c0_i32_0 = arith.constant 0 : i32
    %c0_i32_1 = arith.constant 0 : i32
    return %arg0, %c0_i32, %c0_i32_0 : i32, i32, i32
  }
  func.func @transform_1(%arg0: i32) -> (i32, i32) {
    %c0_i32 = arith.constant 0 : i32
    %c0_i32_0 = arith.constant 0 : i32
    %c0_i32_1 = arith.constant 0 : i32
    return %c0_i32, %c0_i32_0 : i32, i32
  }
  func.func @transform_2(%arg0: i32) -> (i32, i32, i32) {
    %c0_i32 = arith.constant 0 : i32
    %c0_i32_0 = arith.constant 0 : i32
    %c0_i32_1 = arith.constant 0 : i32
    return %arg0, %c0_i32, %c0_i32_0 : i32, i32, i32
  }
}

module attributes {stable_mosaic.version = 11 : i64} {
  func.func @kernel(%arg0: i32, %arg1: memref<1x72x64xf32, #tpu.memory_space<vmem>>, %arg2: memref<16x72xbf16, #tpu.memory_space<vmem>>, %arg3: memref<1x16x64xf32, #tpu.memory_space<vmem>>) attributes {dimension_semantics = [#tpu.dimension_semantics<parallel>], iteration_bounds = array<i64: 2>, scalar_prefetch = 0 : i64, scratch_operands = 0 : i64, tpu.core_type = #tpu.core_type<tc>, window_params = [{transform_indices = @transform_0, window_bounds = array<i64: 1, 72, 64>}, {pipeline_mode = #tpu.pipeline_mode<synchronous>, transform_indices = @transform_1, window_bounds = array<i64: 16, 72>}, {transform_indices = @transform_2, window_bounds = array<i64: 1, 16, 64>}]} {
    %c0 = arith.constant 0 : index
    %c0_0 = arith.constant 0 : index
    %c0_1 = arith.constant 0 : index
    %0 = vector.load %arg1[%c0, %c0_0, %c0_1] : memref<1x72x64xf32, #tpu.memory_space<vmem>>, vector<1x72x64xf32>
    %1 = vector.shape_cast %0 : vector<1x72x64xf32> to vector<72x64xf32>
    %cst = arith.constant 0.000000e+00 : f32
    %2 = vector.broadcast %cst : f32 to vector<72x64xf32>
    %3 = arith.cmpf oge, %1, %2 : vector<72x64xf32>
    %cst_2 = arith.constant 0.00999999977 : f32
    %4 = vector.broadcast %cst_2 : f32 to vector<72x64xf32>
    %5 = arith.mulf %4, %1 : vector<72x64xf32>
    %6 = arith.select %3, %1, %5 : vector<72x64xi1>, vector<72x64xf32>
    %c0_3 = arith.constant 0 : index
    %c0_4 = arith.constant 0 : index
    %7 = vector.load %arg2[%c0_3, %c0_4] : memref<16x72xbf16, #tpu.memory_space<vmem>>, vector<16x72xbf16>
    %8 = arith.truncf %6 : vector<72x64xf32> to vector<72x64xbf16>
    %cst_5 = arith.constant dense<0.000000e+00> : vector<16x64xf32>
    %9 = tpu.matmul %7, %8, %cst_5 {dimension_numbers = #tpu.dot_dimension_numbers<[1], [0], [0], [1], [0, 0, 1, 1], [], []>} : vector<16x72xbf16>, vector<72x64xbf16>, vector<16x64xf32> -> vector<16x64xf32>
    %cst_6 = arith.constant dense<0.000000e+00> : vector<16xf32>
    %10 = vector.multi_reduction <add>, %9, %cst_6 [1] : vector<16x64xf32> to vector<16xf32>
    %11 = vector.shape_cast %10 : vector<16xf32> to vector<16x1xf32>
    %cst_7 = arith.constant 6.400000e+01 : f32
    %12 = vector.broadcast %cst_7 : f32 to vector<16x1xf32>
    %13 = arith.divf %11, %12 : vector<16x1xf32>
    %14 = vector.broadcast %13 : vector<16x1xf32> to vector<16x64xf32>
    %15 = arith.subf %9, %14 : vector<16x64xf32>
    %16 = arith.mulf %15, %15 : vector<16x64xf32>
    %cst_8 = arith.constant dense<0.000000e+00> : vector<16xf32>
    %17 = vector.multi_reduction <add>, %16, %cst_8 [1] : vector<16x64xf32> to vector<16xf32>
    %18 = vector.shape_cast %17 : vector<16xf32> to vector<16x1xf32>
    %cst_9 = arith.constant 6.400000e+01 : f32
    %19 = vector.broadcast %cst_9 : f32 to vector<16x1xf32>
    %20 = arith.divf %18, %19 : vector<16x1xf32>
    %cst_10 = arith.constant 9.99999974E-6 : f32
    %21 = vector.broadcast %cst_10 : f32 to vector<16x1xf32>
    %22 = arith.addf %20, %21 : vector<16x1xf32>
    %23 = math.rsqrt %22 : vector<16x1xf32>
    %24 = vector.broadcast %23 : vector<16x1xf32> to vector<16x64xf32>
    %25 = arith.mulf %15, %24 : vector<16x64xf32>
    %c0_11 = arith.constant 0 : index
    %c0_12 = arith.constant 0 : index
    %c0_13 = arith.constant 0 : index
    %26 = vector.load %arg3[%c0_11, %c0_12, %c0_13] : memref<1x16x64xf32, #tpu.memory_space<vmem>>, vector<1x16x64xf32>
    %27 = vector.shape_cast %26 : vector<1x16x64xf32> to vector<16x64xf32>
    %28 = vector.shape_cast %25 : vector<16x64xf32> to vector<1x16x64xf32>
    tpu.vector_store %arg3[%c0_11, %c0_12, %c0_13], %28 {strides = array<i32>} : memref<1x16x64xf32, #tpu.memory_space<vmem>>, vector<1x16x64xf32>,
    return
  }
  func.func @transform_0(%arg0: i32) -> (i32, i32, i32) {
    %c0_i32 = arith.constant 0 : i32
    %c0_i32_0 = arith.constant 0 : i32
    %c0_i32_1 = arith.constant 0 : i32
    return %arg0, %c0_i32, %c0_i32_0 : i32, i32, i32
  }
  func.func @transform_1(%arg0: i32) -> (i32, i32) {
    %c0_i32 = arith.constant 0 : i32
    %c0_i32_0 = arith.constant 0 : i32
    %c0_i32_1 = arith.constant 0 : i32
    return %c0_i32, %c0_i32_0 : i32, i32
  }
  func.func @transform_2(%arg0: i32) -> (i32, i32, i32) {
    %c0_i32 = arith.constant 0 : i32
    %c0_i32_0 = arith.constant 0 : i32
    %c0_i32_1 = arith.constant 0 : i32
    return %arg0, %c0_i32, %c0_i32_0 : i32, i32, i32
  }
}

module attributes {stable_mosaic.version = 11 : i64} {
  func.func @kernel(%arg0: i32, %arg1: memref<1x8x64xf32, #tpu.memory_space<vmem>>, %arg2: memref<1x9x8x64xf32, #tpu.memory_space<vmem>>, %arg3: memref<1x8x64xf32, #tpu.memory_space<vmem>>, %arg4: memref<1x8x64xf32, #tpu.memory_space<vmem>>, %arg5: memref<1x8x64xf32, #tpu.memory_space<vmem>>, %arg6: memref<4x8xf32, #tpu.memory_space<vmem>>, %arg7: memref<4x8xf32, #tpu.memory_space<vmem>>, %arg8: memref<4x8xf32, #tpu.memory_space<vmem>>, %arg9: memref<4x1xf32, #tpu.memory_space<vmem>>, %arg10: memref<8x4xf32, #tpu.memory_space<vmem>>, %arg11: memref<8x4xf32, #tpu.memory_space<vmem>>, %arg12: memref<8x4xf32, #tpu.memory_space<vmem>>, %arg13: memref<8x1xf32, #tpu.memory_space<vmem>>, %arg14: memref<8x1xf32, #tpu.memory_space<vmem>>, %arg15: memref<8x1xf32, #tpu.memory_space<vmem>>, %arg16: memref<1x3x8x64xf32, #tpu.memory_space<vmem>>) attributes {dimension_semantics = [#tpu.dimension_semantics<parallel>], iteration_bounds = array<i64: 2>, scalar_prefetch = 0 : i64, scratch_operands = 0 : i64, tpu.core_type = #tpu.core_type<tc>, window_params = [{transform_indices = @transform_0, window_bounds = array<i64: 1, 8, 64>}, {transform_indices = @transform_1, window_bounds = array<i64: 1, 9, 8, 64>}, {transform_indices = @transform_2, window_bounds = array<i64: 1, 8, 64>}, {transform_indices = @transform_3, window_bounds = array<i64: 1, 8, 64>}, {transform_indices = @transform_4, window_bounds = array<i64: 1, 8, 64>}, {pipeline_mode = #tpu.pipeline_mode<synchronous>, transform_indices = @transform_5, window_bounds = array<i64: 4, 8>}, {pipeline_mode = #tpu.pipeline_mode<synchronous>, transform_indices = @transform_6, window_bounds = array<i64: 4, 8>}, {pipeline_mode = #tpu.pipeline_mode<synchronous>, transform_indices = @transform_7, window_bounds = array<i64: 4, 8>}, {pipeline_mode = #tpu.pipeline_mode<synchronous>, transform_indices = @transform_8, window_bounds = array<i64: 4, 1>}, {pipeline_mode = #tpu.pipeline_mode<synchronous>, transform_indices = @transform_9, window_bounds = array<i64: 8, 4>}, {pipeline_mode = #tpu.pipeline_mode<synchronous>, transform_indices = @transform_10, window_bounds = array<i64: 8, 4>}, {pipeline_mode = #tpu.pipeline_mode<synchronous>, transform_indices = @transform_11, window_bounds = array<i64: 8, 4>}, {pipeline_mode = #tpu.pipeline_mode<synchronous>, transform_indices = @transform_12, window_bounds = array<i64: 8, 1>}, {pipeline_mode = #tpu.pipeline_mode<synchronous>, transform_indices = @transform_13, window_bounds = array<i64: 8, 1>}, {pipeline_mode = #tpu.pipeline_mode<synchronous>, transform_indices = @transform_14, window_bounds = array<i64: 8, 1>}, {transform_indices = @transform_15, window_bounds = array<i64: 1, 3, 8, 64>}]} {
    %c0 = arith.constant 0 : index
    %c0_0 = arith.constant 0 : index
    %c0_1 = arith.constant 0 : index
    %0 = vector.load %arg1[%c0, %c0_0, %c0_1] : memref<1x8x64xf32, #tpu.memory_space<vmem>>, vector<1x8x64xf32>
    %1 = vector.shape_cast %0 : vector<1x8x64xf32> to vector<8x64xf32>
    %c0_2 = arith.constant 0 : index
    %c0_3 = arith.constant 0 : index
    %c0_4 = arith.constant 0 : index
    %c0_5 = arith.constant 0 : index
    %2 = vector.load %arg2[%c0_2, %c0_3, %c0_4, %c0_5] : memref<1x9x8x64xf32, #tpu.memory_space<vmem>>, vector<1x1x8x64xf32>
    %3 = vector.shape_cast %2 : vector<1x1x8x64xf32> to vector<8x64xf32>
    %c0_6 = arith.constant 0 : index
    %c1 = arith.constant 1 : index
    %c0_7 = arith.constant 0 : index
    %c0_8 = arith.constant 0 : index
    %4 = vector.load %arg2[%c0_6, %c1, %c0_7, %c0_8] : memref<1x9x8x64xf32, #tpu.memory_space<vmem>>, vector<1x1x8x64xf32>
    %5 = vector.shape_cast %4 : vector<1x1x8x64xf32> to vector<8x64xf32>
    %6 = arith.addf %3, %5 : vector<8x64xf32>
    %c0_9 = arith.constant 0 : index
    %c2 = arith.constant 2 : index
    %c0_10 = arith.constant 0 : index
    %c0_11 = arith.constant 0 : index
    %7 = vector.load %arg2[%c0_9, %c2, %c0_10, %c0_11] : memref<1x9x8x64xf32, #tpu.memory_space<vmem>>, vector<1x1x8x64xf32>
    %8 = vector.shape_cast %7 : vector<1x1x8x64xf32> to vector<8x64xf32>
    %9 = arith.addf %6, %8 : vector<8x64xf32>
    %c0_12 = arith.constant 0 : index
    %c3 = arith.constant 3 : index
    %c0_13 = arith.constant 0 : index
    %c0_14 = arith.constant 0 : index
    %10 = vector.load %arg2[%c0_12, %c3, %c0_13, %c0_14] : memref<1x9x8x64xf32, #tpu.memory_space<vmem>>, vector<1x1x8x64xf32>
    %11 = vector.shape_cast %10 : vector<1x1x8x64xf32> to vector<8x64xf32>
    %12 = arith.addf %9, %11 : vector<8x64xf32>
    %c0_15 = arith.constant 0 : index
    %c4 = arith.constant 4 : index
    %c0_16 = arith.constant 0 : index
    %c0_17 = arith.constant 0 : index
    %13 = vector.load %arg2[%c0_15, %c4, %c0_16, %c0_17] : memref<1x9x8x64xf32, #tpu.memory_space<vmem>>, vector<1x1x8x64xf32>
    %14 = vector.shape_cast %13 : vector<1x1x8x64xf32> to vector<8x64xf32>
    %15 = arith.addf %12, %14 : vector<8x64xf32>
    %c0_18 = arith.constant 0 : index
    %c5 = arith.constant 5 : index
    %c0_19 = arith.constant 0 : index
    %c0_20 = arith.constant 0 : index
    %16 = vector.load %arg2[%c0_18, %c5, %c0_19, %c0_20] : memref<1x9x8x64xf32, #tpu.memory_space<vmem>>, vector<1x1x8x64xf32>
    %17 = vector.shape_cast %16 : vector<1x1x8x64xf32> to vector<8x64xf32>
    %18 = arith.addf %15, %17 : vector<8x64xf32>
    %c0_21 = arith.constant 0 : index
    %c6 = arith.constant 6 : index
    %c0_22 = arith.constant 0 : index
    %c0_23 = arith.constant 0 : index
    %19 = vector.load %arg2[%c0_21, %c6, %c0_22, %c0_23] : memref<1x9x8x64xf32, #tpu.memory_space<vmem>>, vector<1x1x8x64xf32>
    %20 = vector.shape_cast %19 : vector<1x1x8x64xf32> to vector<8x64xf32>
    %21 = arith.addf %18, %20 : vector<8x64xf32>
    %c0_24 = arith.constant 0 : index
    %c7 = arith.constant 7 : index
    %c0_25 = arith.constant 0 : index
    %c0_26 = arith.constant 0 : index
    %22 = vector.load %arg2[%c0_24, %c7, %c0_25, %c0_26] : memref<1x9x8x64xf32, #tpu.memory_space<vmem>>, vector<1x1x8x64xf32>
    %23 = vector.shape_cast %22 : vector<1x1x8x64xf32> to vector<8x64xf32>
    %24 = arith.addf %21, %23 : vector<8x64xf32>
    %c0_27 = arith.constant 0 : index
    %c8 = arith.constant 8 : index
    %c0_28 = arith.constant 0 : index
    %c0_29 = arith.constant 0 : index
    %25 = vector.load %arg2[%c0_27, %c8, %c0_28, %c0_29] : memref<1x9x8x64xf32, #tpu.memory_space<vmem>>, vector<1x1x8x64xf32>
    %26 = vector.shape_cast %25 : vector<1x1x8x64xf32> to vector<8x64xf32>
    %27 = arith.addf %24, %26 : vector<8x64xf32>
    %cst = arith.constant 0.111111112 : f32
    %28 = vector.broadcast %cst : f32 to vector<8x64xf32>
    %29 = arith.mulf %27, %28 : vector<8x64xf32>
    %30 = arith.addf %1, %29 : vector<8x64xf32>
    %c0_30 = arith.constant 0 : index
    %c0_31 = arith.constant 0 : index
    %c0_32 = arith.constant 0 : index
    %31 = vector.load %arg3[%c0_30, %c0_31, %c0_32] : memref<1x8x64xf32, #tpu.memory_space<vmem>>, vector<1x8x64xf32>
    %32 = vector.shape_cast %31 : vector<1x8x64xf32> to vector<8x64xf32>
    %c0_33 = arith.constant 0 : index
    %c0_34 = arith.constant 0 : index
    %c0_35 = arith.constant 0 : index
    %33 = vector.load %arg4[%c0_33, %c0_34, %c0_35] : memref<1x8x64xf32, #tpu.memory_space<vmem>>, vector<1x8x64xf32>
    %34 = vector.shape_cast %33 : vector<1x8x64xf32> to vector<8x64xf32>
    %35 = arith.addf %32, %34 : vector<8x64xf32>
    %c0_36 = arith.constant 0 : index
    %c0_37 = arith.constant 0 : index
    %c0_38 = arith.constant 0 : index
    %36 = vector.load %arg5[%c0_36, %c0_37, %c0_38] : memref<1x8x64xf32, #tpu.memory_space<vmem>>, vector<1x8x64xf32>
    %37 = vector.shape_cast %36 : vector<1x8x64xf32> to vector<8x64xf32>
    %c0_39 = arith.constant 0 : index
    %c0_40 = arith.constant 0 : index
    %38 = vector.load %arg9[%c0_39, %c0_40] : memref<4x1xf32, #tpu.memory_space<vmem>>, vector<4x1xf32>
    %cst_41 = arith.constant dense<0.000000e+00> : vector<8xf32>
    %39 = vector.multi_reduction <add>, %30, %cst_41 [1] : vector<8x64xf32> to vector<8xf32>
    %40 = vector.shape_cast %39 : vector<8xf32> to vector<8x1xf32>
    %cst_42 = arith.constant 6.400000e+01 : f32
    %41 = vector.broadcast %cst_42 : f32 to vector<8x1xf32>
    %42 = arith.divf %40, %41 : vector<8x1xf32>
    %c0_43 = arith.constant 0 : index
    %c0_44 = arith.constant 0 : index
    %43 = vector.load %arg6[%c0_43, %c0_44] : memref<4x8xf32, #tpu.memory_space<vmem>>, vector<4x8xf32>
    %cst_45 = arith.constant dense<0.000000e+00> : vector<4x1xf32>
    %44 = tpu.matmul %43, %42, %cst_45 {dimension_numbers = #tpu.dot_dimension_numbers<[1], [0], [0], [1], [0, 0, 1, 1], [], []>} : vector<4x8xf32>, vector<8x1xf32>, vector<4x1xf32> -> vector<4x1xf32>
    %45 = arith.addf %38, %44 : vector<4x1xf32>
    %cst_46 = arith.constant dense<0.000000e+00> : vector<8xf32>
    %46 = vector.multi_reduction <add>, %35, %cst_46 [1] : vector<8x64xf32> to vector<8xf32>
    %47 = vector.shape_cast %46 : vector<8xf32> to vector<8x1xf32>
    %cst_47 = arith.constant 6.400000e+01 : f32
    %48 = vector.broadcast %cst_47 : f32 to vector<8x1xf32>
    %49 = arith.divf %47, %48 : vector<8x1xf32>
    %c0_48 = arith.constant 0 : index
    %c0_49 = arith.constant 0 : index
    %50 = vector.load %arg7[%c0_48, %c0_49] : memref<4x8xf32, #tpu.memory_space<vmem>>, vector<4x8xf32>
    %cst_50 = arith.constant dense<0.000000e+00> : vector<4x1xf32>
    %51 = tpu.matmul %50, %49, %cst_50 {dimension_numbers = #tpu.dot_dimension_numbers<[1], [0], [0], [1], [0, 0, 1, 1], [], []>} : vector<4x8xf32>, vector<8x1xf32>, vector<4x1xf32> -> vector<4x1xf32>
    %52 = arith.addf %45, %51 : vector<4x1xf32>
    %cst_51 = arith.constant dense<0.000000e+00> : vector<8xf32>
    %53 = vector.multi_reduction <add>, %37, %cst_51 [1] : vector<8x64xf32> to vector<8xf32>
    %54 = vector.shape_cast %53 : vector<8xf32> to vector<8x1xf32>
    %cst_52 = arith.constant 6.400000e+01 : f32
    %55 = vector.broadcast %cst_52 : f32 to vector<8x1xf32>
    %56 = arith.divf %54, %55 : vector<8x1xf32>
    %c0_53 = arith.constant 0 : index
    %c0_54 = arith.constant 0 : index
    %57 = vector.load %arg8[%c0_53, %c0_54] : memref<4x8xf32, #tpu.memory_space<vmem>>, vector<4x8xf32>
    %cst_55 = arith.constant dense<0.000000e+00> : vector<4x1xf32>
    %58 = tpu.matmul %57, %56, %cst_55 {dimension_numbers = #tpu.dot_dimension_numbers<[1], [0], [0], [1], [0, 0, 1, 1], [], []>} : vector<4x8xf32>, vector<8x1xf32>, vector<4x1xf32> -> vector<4x1xf32>
    %59 = arith.addf %52, %58 : vector<4x1xf32>
    %cst_56 = arith.constant 0.000000e+00 : f32
    %60 = vector.broadcast %cst_56 : f32 to vector<4x1xf32>
    %61 = arith.maximumf %59, %60 : vector<4x1xf32>
    %c0_57 = arith.constant 0 : index
    %c0_58 = arith.constant 0 : index
    %62 = vector.load %arg10[%c0_57, %c0_58] : memref<8x4xf32, #tpu.memory_space<vmem>>, vector<8x4xf32>
    %cst_59 = arith.constant dense<0.000000e+00> : vector<8x1xf32>
    %63 = tpu.matmul %62, %61, %cst_59 {dimension_numbers = #tpu.dot_dimension_numbers<[1], [0], [0], [1], [0, 0, 1, 1], [], []>} : vector<8x4xf32>, vector<4x1xf32>, vector<8x1xf32> -> vector<8x1xf32>
    %c0_60 = arith.constant 0 : index
    %c0_61 = arith.constant 0 : index
    %64 = vector.load %arg13[%c0_60, %c0_61] : memref<8x1xf32, #tpu.memory_space<vmem>>, vector<8x1xf32>
    %65 = arith.addf %63, %64 : vector<8x1xf32>
    %66 = arith.negf %65 : vector<8x1xf32>
    %67 = math.exp %66 : vector<8x1xf32>
    %cst_62 = arith.constant 1.000000e+00 : f32
    %68 = vector.broadcast %cst_62 : f32 to vector<8x1xf32>
    %69 = arith.addf %68, %67 : vector<8x1xf32>
    %70 = arith.divf %68, %69 : vector<8x1xf32>
    %71 = vector.broadcast %70 : vector<8x1xf32> to vector<8x64xf32>
    %72 = arith.mulf %30, %71 : vector<8x64xf32>
    %c0_63 = arith.constant 0 : index
    %c0_64 = arith.constant 0 : index
    %c0_65 = arith.constant 0 : index
    %c0_66 = arith.constant 0 : index
    %73 = vector.load %arg16[%c0_63, %c0_64, %c0_65, %c0_66] : memref<1x3x8x64xf32, #tpu.memory_space<vmem>>, vector<1x1x8x64xf32>
    %74 = vector.shape_cast %73 : vector<1x1x8x64xf32> to vector<8x64xf32>
    %75 = vector.shape_cast %72 : vector<8x64xf32> to vector<1x1x8x64xf32>
    tpu.vector_store %arg16[%c0_63, %c0_64, %c0_65, %c0_66], %75 {strides = array<i32>} : memref<1x3x8x64xf32, #tpu.memory_space<vmem>>, vector<1x1x8x64xf32>,
    %c0_67 = arith.constant 0 : index
    %c0_68 = arith.constant 0 : index
    %76 = vector.load %arg11[%c0_67, %c0_68] : memref<8x4xf32, #tpu.memory_space<vmem>>, vector<8x4xf32>
    %cst_69 = arith.constant dense<0.000000e+00> : vector<8x1xf32>
    %77 = tpu.matmul %76, %61, %cst_69 {dimension_numbers = #tpu.dot_dimension_numbers<[1], [0], [0], [1], [0, 0, 1, 1], [], []>} : vector<8x4xf32>, vector<4x1xf32>, vector<8x1xf32> -> vector<8x1xf32>
    %c0_70 = arith.constant 0 : index
    %c0_71 = arith.constant 0 : index
    %78 = vector.load %arg14[%c0_70, %c0_71] : memref<8x1xf32, #tpu.memory_space<vmem>>, vector<8x1xf32>
    %79 = arith.addf %77, %78 : vector<8x1xf32>
    %80 = arith.negf %79 : vector<8x1xf32>
    %81 = math.exp %80 : vector<8x1xf32>
    %cst_72 = arith.constant 1.000000e+00 : f32
    %82 = vector.broadcast %cst_72 : f32 to vector<8x1xf32>
    %83 = arith.addf %82, %81 : vector<8x1xf32>
    %84 = arith.divf %82, %83 : vector<8x1xf32>
    %85 = vector.broadcast %84 : vector<8x1xf32> to vector<8x64xf32>
    %86 = arith.mulf %35, %85 : vector<8x64xf32>
    %c0_73 = arith.constant 0 : index
    %c1_74 = arith.constant 1 : index
    %c0_75 = arith.constant 0 : index
    %c0_76 = arith.constant 0 : index
    %87 = vector.load %arg16[%c0_73, %c1_74, %c0_75, %c0_76] : memref<1x3x8x64xf32, #tpu.memory_space<vmem>>, vector<1x1x8x64xf32>
    %88 = vector.shape_cast %87 : vector<1x1x8x64xf32> to vector<8x64xf32>
    %89 = vector.shape_cast %86 : vector<8x64xf32> to vector<1x1x8x64xf32>
    tpu.vector_store %arg16[%c0_73, %c1_74, %c0_75, %c0_76], %89 {strides = array<i32>} : memref<1x3x8x64xf32, #tpu.memory_space<vmem>>, vector<1x1x8x64xf32>,
    %c0_77 = arith.constant 0 : index
    %c0_78 = arith.constant 0 : index
    %90 = vector.load %arg12[%c0_77, %c0_78] : memref<8x4xf32, #tpu.memory_space<vmem>>, vector<8x4xf32>
    %cst_79 = arith.constant dense<0.000000e+00> : vector<8x1xf32>
    %91 = tpu.matmul %90, %61, %cst_79 {dimension_numbers = #tpu.dot_dimension_numbers<[1], [0], [0], [1], [0, 0, 1, 1], [], []>} : vector<8x4xf32>, vector<4x1xf32>, vector<8x1xf32> -> vector<8x1xf32>
    %c0_80 = arith.constant 0 : index
    %c0_81 = arith.constant 0 : index
    %92 = vector.load %arg15[%c0_80, %c0_81] : memref<8x1xf32, #tpu.memory_space<vmem>>, vector<8x1xf32>
    %93 = arith.addf %91, %92 : vector<8x1xf32>
    %94 = arith.negf %93 : vector<8x1xf32>
    %95 = math.exp %94 : vector<8x1xf32>
    %cst_82 = arith.constant 1.000000e+00 : f32
    %96 = vector.broadcast %cst_82 : f32 to vector<8x1xf32>
    %97 = arith.addf %96, %95 : vector<8x1xf32>
    %98 = arith.divf %96, %97 : vector<8x1xf32>
    %99 = vector.broadcast %98 : vector<8x1xf32> to vector<8x64xf32>
    %100 = arith.mulf %37, %99 : vector<8x64xf32>
    %c0_83 = arith.constant 0 : index
    %c2_84 = arith.constant 2 : index
    %c0_85 = arith.constant 0 : index
    %c0_86 = arith.constant 0 : index
    %101 = vector.load %arg16[%c0_83, %c2_84, %c0_85, %c0_86] : memref<1x3x8x64xf32, #tpu.memory_space<vmem>>, vector<1x1x8x64xf32>
    %102 = vector.shape_cast %101 : vector<1x1x8x64xf32> to vector<8x64xf32>
    %103 = vector.shape_cast %100 : vector<8x64xf32> to vector<1x1x8x64xf32>
    tpu.vector_store %arg16[%c0_83, %c2_84, %c0_85, %c0_86], %103 {strides = array<i32>} : memref<1x3x8x64xf32, #tpu.memory_space<vmem>>, vector<1x1x8x64xf32>,
    return
  }
  func.func @transform_0(%arg0: i32) -> (i32, i32, i32) {
    %c0_i32 = arith.constant 0 : i32
    %c0_i32_0 = arith.constant 0 : i32
    %c0_i32_1 = arith.constant 0 : i32
    return %arg0, %c0_i32, %c0_i32_0 : i32, i32, i32
  }
  func.func @transform_1(%arg0: i32) -> (i32, i32, i32, i32) {
    %c0_i32 = arith.constant 0 : i32
    %c0_i32_0 = arith.constant 0 : i32
    %c0_i32_1 = arith.constant 0 : i32
    %c0_i32_2 = arith.constant 0 : i32
    return %arg0, %c0_i32, %c0_i32_0, %c0_i32_1 : i32, i32, i32, i32
  }
  func.func @transform_2(%arg0: i32) -> (i32, i32, i32) {
    %c0_i32 = arith.constant 0 : i32
    %c0_i32_0 = arith.constant 0 : i32
    %c0_i32_1 = arith.constant 0 : i32
    return %arg0, %c0_i32, %c0_i32_0 : i32, i32, i32
  }
  func.func @transform_3(%arg0: i32) -> (i32, i32, i32) {
    %c0_i32 = arith.constant 0 : i32
    %c0_i32_0 = arith.constant 0 : i32
    %c0_i32_1 = arith.constant 0 : i32
    return %arg0, %c0_i32, %c0_i32_0 : i32, i32, i32
  }
  func.func @transform_4(%arg0: i32) -> (i32, i32, i32) {
    %c0_i32 = arith.constant 0 : i32
    %c0_i32_0 = arith.constant 0 : i32
    %c0_i32_1 = arith.constant 0 : i32
    return %arg0, %c0_i32, %c0_i32_0 : i32, i32, i32
  }
  func.func @transform_5(%arg0: i32) -> (i32, i32) {
    %c0_i32 = arith.constant 0 : i32
    %c0_i32_0 = arith.constant 0 : i32
    %c0_i32_1 = arith.constant 0 : i32
    return %c0_i32, %c0_i32_0 : i32, i32
  }
  func.func @transform_6(%arg0: i32) -> (i32, i32) {
    %c0_i32 = arith.constant 0 : i32
    %c0_i32_0 = arith.constant 0 : i32
    %c0_i32_1 = arith.constant 0 : i32
    return %c0_i32, %c0_i32_0 : i32, i32
  }
  func.func @transform_7(%arg0: i32) -> (i32, i32) {
    %c0_i32 = arith.constant 0 : i32
    %c0_i32_0 = arith.constant 0 : i32
    %c0_i32_1 = arith.constant 0 : i32
    return %c0_i32, %c0_i32_0 : i32, i32
  }
  func.func @transform_8(%arg0: i32) -> (i32, i32) {
    %c0_i32 = arith.constant 0 : i32
    %c0_i32_0 = arith.constant 0 : i32
    %c0_i32_1 = arith.constant 0 : i32
    return %c0_i32, %c0_i32_0 : i32, i32
  }
  func.func @transform_9(%arg0: i32) -> (i32, i32) {
    %c0_i32 = arith.constant 0 : i32
    %c0_i32_0 = arith.constant 0 : i32
    %c0_i32_1 = arith.constant 0 : i32
    return %c0_i32, %c0_i32_0 : i32, i32
  }
  func.func @transform_10(%arg0: i32) -> (i32, i32) {
    %c0_i32 = arith.constant 0 : i32
    %c0_i32_0 = arith.constant 0 : i32
    %c0_i32_1 = arith.constant 0 : i32
    return %c0_i32, %c0_i32_0 : i32, i32
  }
  func.func @transform_11(%arg0: i32) -> (i32, i32) {
    %c0_i32 = arith.constant 0 : i32
    %c0_i32_0 = arith.constant 0 : i32
    %c0_i32_1 = arith.constant 0 : i32
    return %c0_i32, %c0_i32_0 : i32, i32
  }
  func.func @transform_12(%arg0: i32) -> (i32, i32) {
    %c0_i32 = arith.constant 0 : i32
    %c0_i32_0 = arith.constant 0 : i32
    %c0_i32_1 = arith.constant 0 : i32
    return %c0_i32, %c0_i32_0 : i32, i32
  }
  func.func @transform_13(%arg0: i32) -> (i32, i32) {
    %c0_i32 = arith.constant 0 : i32
    %c0_i32_0 = arith.constant 0 : i32
    %c0_i32_1 = arith.constant 0 : i32
    return %c0_i32, %c0_i32_0 : i32, i32
  }
  func.func @transform_14(%arg0: i32) -> (i32, i32) {
    %c0_i32 = arith.constant 0 : i32
    %c0_i32_0 = arith.constant 0 : i32
    %c0_i32_1 = arith.constant 0 : i32
    return %c0_i32, %c0_i32_0 : i32, i32
  }
  func.func @transform_15(%arg0: i32) -> (i32, i32, i32, i32) {
    %c0_i32 = arith.constant 0 : i32
    %c0_i32_0 = arith.constant 0 : i32
    %c0_i32_1 = arith.constant 0 : i32
    %c0_i32_2 = arith.constant 0 : i32
    return %arg0, %c0_i32, %c0_i32_0, %c0_i32_1 : i32, i32, i32, i32
  }
}

module attributes {stable_mosaic.version = 11 : i64} {
  func.func @kernel(%arg0: i32, %arg1: memref<1x24x256xf32, #tpu.memory_space<vmem>>, %arg2: memref<4x24xbf16, #tpu.memory_space<vmem>>, %arg3: memref<1x4x256xf32, #tpu.memory_space<vmem>>) attributes {dimension_semantics = [#tpu.dimension_semantics<parallel>], iteration_bounds = array<i64: 2>, scalar_prefetch = 0 : i64, scratch_operands = 0 : i64, tpu.core_type = #tpu.core_type<tc>, window_params = [{transform_indices = @transform_0, window_bounds = array<i64: 1, 24, 256>}, {pipeline_mode = #tpu.pipeline_mode<synchronous>, transform_indices = @transform_1, window_bounds = array<i64: 4, 24>}, {transform_indices = @transform_2, window_bounds = array<i64: 1, 4, 256>}]} {
    %c0 = arith.constant 0 : index
    %c0_0 = arith.constant 0 : index
    %c0_1 = arith.constant 0 : index
    %0 = vector.load %arg1[%c0, %c0_0, %c0_1] : memref<1x24x256xf32, #tpu.memory_space<vmem>>, vector<1x24x256xf32>
    %1 = vector.shape_cast %0 : vector<1x24x256xf32> to vector<24x256xf32>
    %cst = arith.constant 0.000000e+00 : f32
    %2 = vector.broadcast %cst : f32 to vector<24x256xf32>
    %3 = arith.cmpf oge, %1, %2 : vector<24x256xf32>
    %cst_2 = arith.constant 0.00999999977 : f32
    %4 = vector.broadcast %cst_2 : f32 to vector<24x256xf32>
    %5 = arith.mulf %4, %1 : vector<24x256xf32>
    %6 = arith.select %3, %1, %5 : vector<24x256xi1>, vector<24x256xf32>
    %c0_3 = arith.constant 0 : index
    %c0_4 = arith.constant 0 : index
    %7 = vector.load %arg2[%c0_3, %c0_4] : memref<4x24xbf16, #tpu.memory_space<vmem>>, vector<4x24xbf16>
    %8 = arith.truncf %6 : vector<24x256xf32> to vector<24x256xbf16>
    %cst_5 = arith.constant dense<0.000000e+00> : vector<4x256xf32>
    %9 = tpu.matmul %7, %8, %cst_5 {dimension_numbers = #tpu.dot_dimension_numbers<[1], [0], [0], [1], [0, 0, 1, 1], [], []>} : vector<4x24xbf16>, vector<24x256xbf16>, vector<4x256xf32> -> vector<4x256xf32>
    %cst_6 = arith.constant dense<0.000000e+00> : vector<4xf32>
    %10 = vector.multi_reduction <add>, %9, %cst_6 [1] : vector<4x256xf32> to vector<4xf32>
    %11 = vector.shape_cast %10 : vector<4xf32> to vector<4x1xf32>
    %cst_7 = arith.constant 2.560000e+02 : f32
    %12 = vector.broadcast %cst_7 : f32 to vector<4x1xf32>
    %13 = arith.divf %11, %12 : vector<4x1xf32>
    %14 = vector.broadcast %13 : vector<4x1xf32> to vector<4x256xf32>
    %15 = arith.subf %9, %14 : vector<4x256xf32>
    %16 = arith.mulf %15, %15 : vector<4x256xf32>
    %cst_8 = arith.constant dense<0.000000e+00> : vector<4xf32>
    %17 = vector.multi_reduction <add>, %16, %cst_8 [1] : vector<4x256xf32> to vector<4xf32>
    %18 = vector.shape_cast %17 : vector<4xf32> to vector<4x1xf32>
    %cst_9 = arith.constant 2.560000e+02 : f32
    %19 = vector.broadcast %cst_9 : f32 to vector<4x1xf32>
    %20 = arith.divf %18, %19 : vector<4x1xf32>
    %cst_10 = arith.constant 9.99999974E-6 : f32
    %21 = vector.broadcast %cst_10 : f32 to vector<4x1xf32>
    %22 = arith.addf %20, %21 : vector<4x1xf32>
    %23 = math.rsqrt %22 : vector<4x1xf32>
    %24 = vector.broadcast %23 : vector<4x1xf32> to vector<4x256xf32>
    %25 = arith.mulf %15, %24 : vector<4x256xf32>
    %c0_11 = arith.constant 0 : index
    %c0_12 = arith.constant 0 : index
    %c0_13 = arith.constant 0 : index
    %26 = vector.load %arg3[%c0_11, %c0_12, %c0_13] : memref<1x4x256xf32, #tpu.memory_space<vmem>>, vector<1x4x256xf32>
    %27 = vector.shape_cast %26 : vector<1x4x256xf32> to vector<4x256xf32>
    %28 = vector.shape_cast %25 : vector<4x256xf32> to vector<1x4x256xf32>
    tpu.vector_store %arg3[%c0_11, %c0_12, %c0_13], %28 {strides = array<i32>} : memref<1x4x256xf32, #tpu.memory_space<vmem>>, vector<1x4x256xf32>,
    return
  }
  func.func @transform_0(%arg0: i32) -> (i32, i32, i32) {
    %c0_i32 = arith.constant 0 : i32
    %c0_i32_0 = arith.constant 0 : i32
    %c0_i32_1 = arith.constant 0 : i32
    return %arg0, %c0_i32, %c0_i32_0 : i32, i32, i32
  }
  func.func @transform_1(%arg0: i32) -> (i32, i32) {
    %c0_i32 = arith.constant 0 : i32
    %c0_i32_0 = arith.constant 0 : i32
    %c0_i32_1 = arith.constant 0 : i32
    return %c0_i32, %c0_i32_0 : i32, i32
  }
  func.func @transform_2(%arg0: i32) -> (i32, i32, i32) {
    %c0_i32 = arith.constant 0 : i32
    %c0_i32_0 = arith.constant 0 : i32
    %c0_i32_1 = arith.constant 0 : i32
    return %arg0, %c0_i32, %c0_i32_0 : i32, i32, i32
  }
}

module attributes {stable_mosaic.version = 11 : i64} {
  func.func @kernel(%arg0: i32, %arg1: memref<1x36x256xf32, #tpu.memory_space<vmem>>, %arg2: memref<4x36xbf16, #tpu.memory_space<vmem>>, %arg3: memref<1x4x256xf32, #tpu.memory_space<vmem>>) attributes {dimension_semantics = [#tpu.dimension_semantics<parallel>], iteration_bounds = array<i64: 2>, scalar_prefetch = 0 : i64, scratch_operands = 0 : i64, tpu.core_type = #tpu.core_type<tc>, window_params = [{transform_indices = @transform_0, window_bounds = array<i64: 1, 36, 256>}, {pipeline_mode = #tpu.pipeline_mode<synchronous>, transform_indices = @transform_1, window_bounds = array<i64: 4, 36>}, {transform_indices = @transform_2, window_bounds = array<i64: 1, 4, 256>}]} {
    %c0 = arith.constant 0 : index
    %c0_0 = arith.constant 0 : index
    %c0_1 = arith.constant 0 : index
    %0 = vector.load %arg1[%c0, %c0_0, %c0_1] : memref<1x36x256xf32, #tpu.memory_space<vmem>>, vector<1x36x256xf32>
    %1 = vector.shape_cast %0 : vector<1x36x256xf32> to vector<36x256xf32>
    %cst = arith.constant 0.000000e+00 : f32
    %2 = vector.broadcast %cst : f32 to vector<36x256xf32>
    %3 = arith.cmpf oge, %1, %2 : vector<36x256xf32>
    %cst_2 = arith.constant 0.00999999977 : f32
    %4 = vector.broadcast %cst_2 : f32 to vector<36x256xf32>
    %5 = arith.mulf %4, %1 : vector<36x256xf32>
    %6 = arith.select %3, %1, %5 : vector<36x256xi1>, vector<36x256xf32>
    %c0_3 = arith.constant 0 : index
    %c0_4 = arith.constant 0 : index
    %7 = vector.load %arg2[%c0_3, %c0_4] : memref<4x36xbf16, #tpu.memory_space<vmem>>, vector<4x36xbf16>
    %8 = arith.truncf %6 : vector<36x256xf32> to vector<36x256xbf16>
    %cst_5 = arith.constant dense<0.000000e+00> : vector<4x256xf32>
    %9 = tpu.matmul %7, %8, %cst_5 {dimension_numbers = #tpu.dot_dimension_numbers<[1], [0], [0], [1], [0, 0, 1, 1], [], []>} : vector<4x36xbf16>, vector<36x256xbf16>, vector<4x256xf32> -> vector<4x256xf32>
    %cst_6 = arith.constant dense<0.000000e+00> : vector<4xf32>
    %10 = vector.multi_reduction <add>, %9, %cst_6 [1] : vector<4x256xf32> to vector<4xf32>
    %11 = vector.shape_cast %10 : vector<4xf32> to vector<4x1xf32>
    %cst_7 = arith.constant 2.560000e+02 : f32
    %12 = vector.broadcast %cst_7 : f32 to vector<4x1xf32>
    %13 = arith.divf %11, %12 : vector<4x1xf32>
    %14 = vector.broadcast %13 : vector<4x1xf32> to vector<4x256xf32>
    %15 = arith.subf %9, %14 : vector<4x256xf32>
    %16 = arith.mulf %15, %15 : vector<4x256xf32>
    %cst_8 = arith.constant dense<0.000000e+00> : vector<4xf32>
    %17 = vector.multi_reduction <add>, %16, %cst_8 [1] : vector<4x256xf32> to vector<4xf32>
    %18 = vector.shape_cast %17 : vector<4xf32> to vector<4x1xf32>
    %cst_9 = arith.constant 2.560000e+02 : f32
    %19 = vector.broadcast %cst_9 : f32 to vector<4x1xf32>
    %20 = arith.divf %18, %19 : vector<4x1xf32>
    %cst_10 = arith.constant 9.99999974E-6 : f32
    %21 = vector.broadcast %cst_10 : f32 to vector<4x1xf32>
    %22 = arith.addf %20, %21 : vector<4x1xf32>
    %23 = math.rsqrt %22 : vector<4x1xf32>
    %24 = vector.broadcast %23 : vector<4x1xf32> to vector<4x256xf32>
    %25 = arith.mulf %15, %24 : vector<4x256xf32>
    %c0_11 = arith.constant 0 : index
    %c0_12 = arith.constant 0 : index
    %c0_13 = arith.constant 0 : index
    %26 = vector.load %arg3[%c0_11, %c0_12, %c0_13] : memref<1x4x256xf32, #tpu.memory_space<vmem>>, vector<1x4x256xf32>
    %27 = vector.shape_cast %26 : vector<1x4x256xf32> to vector<4x256xf32>
    %28 = vector.shape_cast %25 : vector<4x256xf32> to vector<1x4x256xf32>
    tpu.vector_store %arg3[%c0_11, %c0_12, %c0_13], %28 {strides = array<i32>} : memref<1x4x256xf32, #tpu.memory_space<vmem>>, vector<1x4x256xf32>,
    return
  }
  func.func @transform_0(%arg0: i32) -> (i32, i32, i32) {
    %c0_i32 = arith.constant 0 : i32
    %c0_i32_0 = arith.constant 0 : i32
    %c0_i32_1 = arith.constant 0 : i32
    return %arg0, %c0_i32, %c0_i32_0 : i32, i32, i32
  }
  func.func @transform_1(%arg0: i32) -> (i32, i32) {
    %c0_i32 = arith.constant 0 : i32
    %c0_i32_0 = arith.constant 0 : i32
    %c0_i32_1 = arith.constant 0 : i32
    return %c0_i32, %c0_i32_0 : i32, i32
  }
  func.func @transform_2(%arg0: i32) -> (i32, i32, i32) {
    %c0_i32 = arith.constant 0 : i32
    %c0_i32_0 = arith.constant 0 : i32
    %c0_i32_1 = arith.constant 0 : i32
    return %arg0, %c0_i32, %c0_i32_0 : i32, i32, i32
  }
}

module attributes {stable_mosaic.version = 11 : i64} {
  func.func @kernel(%arg0: i32, %arg1: memref<1x8x64xf32, #tpu.memory_space<vmem>>, %arg2: memref<1x8x64xf32, #tpu.memory_space<vmem>>, %arg3: memref<1x8x64xf32, #tpu.memory_space<vmem>>, %arg4: memref<1x8x64xf32, #tpu.memory_space<vmem>>, %arg5: memref<1x8x64xf32, #tpu.memory_space<vmem>>, %arg6: memref<1x8x64xf32, #tpu.memory_space<vmem>>, %arg7: memref<1x9x8x64xf32, #tpu.memory_space<vmem>>, %arg8: memref<4x8xf32, #tpu.memory_space<vmem>>, %arg9: memref<4x8xf32, #tpu.memory_space<vmem>>, %arg10: memref<4x8xf32, #tpu.memory_space<vmem>>, %arg11: memref<4x1xf32, #tpu.memory_space<vmem>>, %arg12: memref<8x4xf32, #tpu.memory_space<vmem>>, %arg13: memref<8x4xf32, #tpu.memory_space<vmem>>, %arg14: memref<8x4xf32, #tpu.memory_space<vmem>>, %arg15: memref<8x1xf32, #tpu.memory_space<vmem>>, %arg16: memref<8x1xf32, #tpu.memory_space<vmem>>, %arg17: memref<8x1xf32, #tpu.memory_space<vmem>>, %arg18: memref<1x3x8x64xf32, #tpu.memory_space<vmem>>, %arg19: memref<1x3x8x64xf32, #tpu.memory_space<vmem>>) attributes {dimension_semantics = [#tpu.dimension_semantics<parallel>], iteration_bounds = array<i64: 2>, scalar_prefetch = 0 : i64, scratch_operands = 0 : i64, tpu.core_type = #tpu.core_type<tc>, window_params = [{transform_indices = @transform_0, window_bounds = array<i64: 1, 8, 64>}, {transform_indices = @transform_1, window_bounds = array<i64: 1, 8, 64>}, {transform_indices = @transform_2, window_bounds = array<i64: 1, 8, 64>}, {transform_indices = @transform_3, window_bounds = array<i64: 1, 8, 64>}, {transform_indices = @transform_4, window_bounds = array<i64: 1, 8, 64>}, {transform_indices = @transform_5, window_bounds = array<i64: 1, 8, 64>}, {transform_indices = @transform_6, window_bounds = array<i64: 1, 9, 8, 64>}, {pipeline_mode = #tpu.pipeline_mode<synchronous>, transform_indices = @transform_7, window_bounds = array<i64: 4, 8>}, {pipeline_mode = #tpu.pipeline_mode<synchronous>, transform_indices = @transform_8, window_bounds = array<i64: 4, 8>}, {pipeline_mode = #tpu.pipeline_mode<synchronous>, transform_indices = @transform_9, window_bounds = array<i64: 4, 8>}, {pipeline_mode = #tpu.pipeline_mode<synchronous>, transform_indices = @transform_10, window_bounds = array<i64: 4, 1>}, {pipeline_mode = #tpu.pipeline_mode<synchronous>, transform_indices = @transform_11, window_bounds = array<i64: 8, 4>}, {pipeline_mode = #tpu.pipeline_mode<synchronous>, transform_indices = @transform_12, window_bounds = array<i64: 8, 4>}, {pipeline_mode = #tpu.pipeline_mode<synchronous>, transform_indices = @transform_13, window_bounds = array<i64: 8, 4>}, {pipeline_mode = #tpu.pipeline_mode<synchronous>, transform_indices = @transform_14, window_bounds = array<i64: 8, 1>}, {pipeline_mode = #tpu.pipeline_mode<synchronous>, transform_indices = @transform_15, window_bounds = array<i64: 8, 1>}, {pipeline_mode = #tpu.pipeline_mode<synchronous>, transform_indices = @transform_16, window_bounds = array<i64: 8, 1>}, {transform_indices = @transform_17, window_bounds = array<i64: 1, 3, 8, 64>}, {transform_indices = @transform_18, window_bounds = array<i64: 1, 3, 8, 64>}]} {
    %c0 = arith.constant 0 : index
    %c0_0 = arith.constant 0 : index
    %c0_1 = arith.constant 0 : index
    %0 = vector.load %arg1[%c0, %c0_0, %c0_1] : memref<1x8x64xf32, #tpu.memory_space<vmem>>, vector<1x8x64xf32>
    %1 = vector.shape_cast %0 : vector<1x8x64xf32> to vector<8x64xf32>
    %c0_2 = arith.constant 0 : index
    %c0_3 = arith.constant 0 : index
    %c0_4 = arith.constant 0 : index
    %2 = vector.load %arg2[%c0_2, %c0_3, %c0_4] : memref<1x8x64xf32, #tpu.memory_space<vmem>>, vector<1x8x64xf32>
    %3 = vector.shape_cast %2 : vector<1x8x64xf32> to vector<8x64xf32>
    %4 = arith.addf %1, %3 : vector<8x64xf32>
    %c0_5 = arith.constant 0 : index
    %c0_6 = arith.constant 0 : index
    %c0_7 = arith.constant 0 : index
    %5 = vector.load %arg3[%c0_5, %c0_6, %c0_7] : memref<1x8x64xf32, #tpu.memory_space<vmem>>, vector<1x8x64xf32>
    %6 = vector.shape_cast %5 : vector<1x8x64xf32> to vector<8x64xf32>
    %c0_8 = arith.constant 0 : index
    %c0_9 = arith.constant 0 : index
    %c0_10 = arith.constant 0 : index
    %7 = vector.load %arg4[%c0_8, %c0_9, %c0_10] : memref<1x8x64xf32, #tpu.memory_space<vmem>>, vector<1x8x64xf32>
    %8 = vector.shape_cast %7 : vector<1x8x64xf32> to vector<8x64xf32>
    %9 = arith.addf %6, %8 : vector<8x64xf32>
    %c0_11 = arith.constant 0 : index
    %c0_12 = arith.constant 0 : index
    %c0_13 = arith.constant 0 : index
    %10 = vector.load %arg5[%c0_11, %c0_12, %c0_13] : memref<1x8x64xf32, #tpu.memory_space<vmem>>, vector<1x8x64xf32>
    %11 = vector.shape_cast %10 : vector<1x8x64xf32> to vector<8x64xf32>
    %12 = arith.addf %9, %11 : vector<8x64xf32>
    %c0_14 = arith.constant 0 : index
    %c0_15 = arith.constant 0 : index
    %c0_16 = arith.constant 0 : index
    %13 = vector.load %arg6[%c0_14, %c0_15, %c0_16] : memref<1x8x64xf32, #tpu.memory_space<vmem>>, vector<1x8x64xf32>
    %14 = vector.shape_cast %13 : vector<1x8x64xf32> to vector<8x64xf32>
    %c0_17 = arith.constant 0 : index
    %c0_18 = arith.constant 0 : index
    %c0_19 = arith.constant 0 : index
    %c0_20 = arith.constant 0 : index
    %15 = vector.load %arg7[%c0_17, %c0_18, %c0_19, %c0_20] : memref<1x9x8x64xf32, #tpu.memory_space<vmem>>, vector<1x1x8x64xf32>
    %16 = vector.shape_cast %15 : vector<1x1x8x64xf32> to vector<8x64xf32>
    %c0_21 = arith.constant 0 : index
    %c1 = arith.constant 1 : index
    %c0_22 = arith.constant 0 : index
    %c0_23 = arith.constant 0 : index
    %17 = vector.load %arg7[%c0_21, %c1, %c0_22, %c0_23] : memref<1x9x8x64xf32, #tpu.memory_space<vmem>>, vector<1x1x8x64xf32>
    %18 = vector.shape_cast %17 : vector<1x1x8x64xf32> to vector<8x64xf32>
    %19 = arith.addf %16, %18 : vector<8x64xf32>
    %c0_24 = arith.constant 0 : index
    %c2 = arith.constant 2 : index
    %c0_25 = arith.constant 0 : index
    %c0_26 = arith.constant 0 : index
    %20 = vector.load %arg7[%c0_24, %c2, %c0_25, %c0_26] : memref<1x9x8x64xf32, #tpu.memory_space<vmem>>, vector<1x1x8x64xf32>
    %21 = vector.shape_cast %20 : vector<1x1x8x64xf32> to vector<8x64xf32>
    %22 = arith.addf %19, %21 : vector<8x64xf32>
    %c0_27 = arith.constant 0 : index
    %c3 = arith.constant 3 : index
    %c0_28 = arith.constant 0 : index
    %c0_29 = arith.constant 0 : index
    %23 = vector.load %arg7[%c0_27, %c3, %c0_28, %c0_29] : memref<1x9x8x64xf32, #tpu.memory_space<vmem>>, vector<1x1x8x64xf32>
    %24 = vector.shape_cast %23 : vector<1x1x8x64xf32> to vector<8x64xf32>
    %25 = arith.addf %22, %24 : vector<8x64xf32>
    %c0_30 = arith.constant 0 : index
    %c4 = arith.constant 4 : index
    %c0_31 = arith.constant 0 : index
    %c0_32 = arith.constant 0 : index
    %26 = vector.load %arg7[%c0_30, %c4, %c0_31, %c0_32] : memref<1x9x8x64xf32, #tpu.memory_space<vmem>>, vector<1x1x8x64xf32>
    %27 = vector.shape_cast %26 : vector<1x1x8x64xf32> to vector<8x64xf32>
    %28 = arith.addf %25, %27 : vector<8x64xf32>
    %c0_33 = arith.constant 0 : index
    %c5 = arith.constant 5 : index
    %c0_34 = arith.constant 0 : index
    %c0_35 = arith.constant 0 : index
    %29 = vector.load %arg7[%c0_33, %c5, %c0_34, %c0_35] : memref<1x9x8x64xf32, #tpu.memory_space<vmem>>, vector<1x1x8x64xf32>
    %30 = vector.shape_cast %29 : vector<1x1x8x64xf32> to vector<8x64xf32>
    %31 = arith.addf %28, %30 : vector<8x64xf32>
    %c0_36 = arith.constant 0 : index
    %c6 = arith.constant 6 : index
    %c0_37 = arith.constant 0 : index
    %c0_38 = arith.constant 0 : index
    %32 = vector.load %arg7[%c0_36, %c6, %c0_37, %c0_38] : memref<1x9x8x64xf32, #tpu.memory_space<vmem>>, vector<1x1x8x64xf32>
    %33 = vector.shape_cast %32 : vector<1x1x8x64xf32> to vector<8x64xf32>
    %34 = arith.addf %31, %33 : vector<8x64xf32>
    %c0_39 = arith.constant 0 : index
    %c7 = arith.constant 7 : index
    %c0_40 = arith.constant 0 : index
    %c0_41 = arith.constant 0 : index
    %35 = vector.load %arg7[%c0_39, %c7, %c0_40, %c0_41] : memref<1x9x8x64xf32, #tpu.memory_space<vmem>>, vector<1x1x8x64xf32>
    %36 = vector.shape_cast %35 : vector<1x1x8x64xf32> to vector<8x64xf32>
    %37 = arith.addf %34, %36 : vector<8x64xf32>
    %c0_42 = arith.constant 0 : index
    %c8 = arith.constant 8 : index
    %c0_43 = arith.constant 0 : index
    %c0_44 = arith.constant 0 : index
    %38 = vector.load %arg7[%c0_42, %c8, %c0_43, %c0_44] : memref<1x9x8x64xf32, #tpu.memory_space<vmem>>, vector<1x1x8x64xf32>
    %39 = vector.shape_cast %38 : vector<1x1x8x64xf32> to vector<8x64xf32>
    %40 = arith.addf %37, %39 : vector<8x64xf32>
    %cst = arith.constant 0.111111112 : f32
    %41 = vector.broadcast %cst : f32 to vector<8x64xf32>
    %42 = arith.mulf %40, %41 : vector<8x64xf32>
    %43 = arith.addf %14, %42 : vector<8x64xf32>
    %c0_45 = arith.constant 0 : index
    %c0_46 = arith.constant 0 : index
    %44 = vector.load %arg11[%c0_45, %c0_46] : memref<4x1xf32, #tpu.memory_space<vmem>>, vector<4x1xf32>
    %cst_47 = arith.constant dense<0.000000e+00> : vector<8xf32>
    %45 = vector.multi_reduction <add>, %4, %cst_47 [1] : vector<8x64xf32> to vector<8xf32>
    %46 = vector.shape_cast %45 : vector<8xf32> to vector<8x1xf32>
    %cst_48 = arith.constant 6.400000e+01 : f32
    %47 = vector.broadcast %cst_48 : f32 to vector<8x1xf32>
    %48 = arith.divf %46, %47 : vector<8x1xf32>
    %c0_49 = arith.constant 0 : index
    %c0_50 = arith.constant 0 : index
    %49 = vector.load %arg8[%c0_49, %c0_50] : memref<4x8xf32, #tpu.memory_space<vmem>>, vector<4x8xf32>
    %cst_51 = arith.constant dense<0.000000e+00> : vector<4x1xf32>
    %50 = tpu.matmul %49, %48, %cst_51 {dimension_numbers = #tpu.dot_dimension_numbers<[1], [0], [0], [1], [0, 0, 1, 1], [], []>} : vector<4x8xf32>, vector<8x1xf32>, vector<4x1xf32> -> vector<4x1xf32>
    %51 = arith.addf %44, %50 : vector<4x1xf32>
    %cst_52 = arith.constant dense<0.000000e+00> : vector<8xf32>
    %52 = vector.multi_reduction <add>, %12, %cst_52 [1] : vector<8x64xf32> to vector<8xf32>
    %53 = vector.shape_cast %52 : vector<8xf32> to vector<8x1xf32>
    %cst_53 = arith.constant 6.400000e+01 : f32
    %54 = vector.broadcast %cst_53 : f32 to vector<8x1xf32>
    %55 = arith.divf %53, %54 : vector<8x1xf32>
    %c0_54 = arith.constant 0 : index
    %c0_55 = arith.constant 0 : index
    %56 = vector.load %arg9[%c0_54, %c0_55] : memref<4x8xf32, #tpu.memory_space<vmem>>, vector<4x8xf32>
    %cst_56 = arith.constant dense<0.000000e+00> : vector<4x1xf32>
    %57 = tpu.matmul %56, %55, %cst_56 {dimension_numbers = #tpu.dot_dimension_numbers<[1], [0], [0], [1], [0, 0, 1, 1], [], []>} : vector<4x8xf32>, vector<8x1xf32>, vector<4x1xf32> -> vector<4x1xf32>
    %58 = arith.addf %51, %57 : vector<4x1xf32>
    %cst_57 = arith.constant dense<0.000000e+00> : vector<8xf32>
    %59 = vector.multi_reduction <add>, %43, %cst_57 [1] : vector<8x64xf32> to vector<8xf32>
    %60 = vector.shape_cast %59 : vector<8xf32> to vector<8x1xf32>
    %cst_58 = arith.constant 6.400000e+01 : f32
    %61 = vector.broadcast %cst_58 : f32 to vector<8x1xf32>
    %62 = arith.divf %60, %61 : vector<8x1xf32>
    %c0_59 = arith.constant 0 : index
    %c0_60 = arith.constant 0 : index
    %63 = vector.load %arg10[%c0_59, %c0_60] : memref<4x8xf32, #tpu.memory_space<vmem>>, vector<4x8xf32>
    %cst_61 = arith.constant dense<0.000000e+00> : vector<4x1xf32>
    %64 = tpu.matmul %63, %62, %cst_61 {dimension_numbers = #tpu.dot_dimension_numbers<[1], [0], [0], [1], [0, 0, 1, 1], [], []>} : vector<4x8xf32>, vector<8x1xf32>, vector<4x1xf32> -> vector<4x1xf32>
    %65 = arith.addf %58, %64 : vector<4x1xf32>
    %cst_62 = arith.constant 0.000000e+00 : f32
    %66 = vector.broadcast %cst_62 : f32 to vector<4x1xf32>
    %67 = arith.maximumf %65, %66 : vector<4x1xf32>
    %c0_63 = arith.constant 0 : index
    %c0_64 = arith.constant 0 : index
    %68 = vector.load %arg12[%c0_63, %c0_64] : memref<8x4xf32, #tpu.memory_space<vmem>>, vector<8x4xf32>
    %cst_65 = arith.constant dense<0.000000e+00> : vector<8x1xf32>
    %69 = tpu.matmul %68, %67, %cst_65 {dimension_numbers = #tpu.dot_dimension_numbers<[1], [0], [0], [1], [0, 0, 1, 1], [], []>} : vector<8x4xf32>, vector<4x1xf32>, vector<8x1xf32> -> vector<8x1xf32>
    %c0_66 = arith.constant 0 : index
    %c0_67 = arith.constant 0 : index
    %70 = vector.load %arg15[%c0_66, %c0_67] : memref<8x1xf32, #tpu.memory_space<vmem>>, vector<8x1xf32>
    %71 = arith.addf %69, %70 : vector<8x1xf32>
    %72 = arith.negf %71 : vector<8x1xf32>
    %73 = math.exp %72 : vector<8x1xf32>
    %cst_68 = arith.constant 1.000000e+00 : f32
    %74 = vector.broadcast %cst_68 : f32 to vector<8x1xf32>
    %75 = arith.addf %74, %73 : vector<8x1xf32>
    %76 = arith.divf %74, %75 : vector<8x1xf32>
    %77 = vector.broadcast %76 : vector<8x1xf32> to vector<8x64xf32>
    %78 = arith.mulf %4, %77 : vector<8x64xf32>
    %c0_69 = arith.constant 0 : index
    %c0_70 = arith.constant 0 : index
    %c0_71 = arith.constant 0 : index
    %c0_72 = arith.constant 0 : index
    %79 = vector.load %arg18[%c0_69, %c0_70, %c0_71, %c0_72] : memref<1x3x8x64xf32, #tpu.memory_space<vmem>>, vector<1x1x8x64xf32>
    %80 = vector.shape_cast %79 : vector<1x1x8x64xf32> to vector<8x64xf32>
    %81 = arith.addf %78, %80 : vector<8x64xf32>
    %c0_73 = arith.constant 0 : index
    %c0_74 = arith.constant 0 : index
    %c0_75 = arith.constant 0 : index
    %c0_76 = arith.constant 0 : index
    %82 = vector.load %arg19[%c0_73, %c0_74, %c0_75, %c0_76] : memref<1x3x8x64xf32, #tpu.memory_space<vmem>>, vector<1x1x8x64xf32>
    %83 = vector.shape_cast %82 : vector<1x1x8x64xf32> to vector<8x64xf32>
    %84 = vector.shape_cast %81 : vector<8x64xf32> to vector<1x1x8x64xf32>
    tpu.vector_store %arg19[%c0_73, %c0_74, %c0_75, %c0_76], %84 {strides = array<i32>} : memref<1x3x8x64xf32, #tpu.memory_space<vmem>>, vector<1x1x8x64xf32>,
    %c0_77 = arith.constant 0 : index
    %c0_78 = arith.constant 0 : index
    %85 = vector.load %arg13[%c0_77, %c0_78] : memref<8x4xf32, #tpu.memory_space<vmem>>, vector<8x4xf32>
    %cst_79 = arith.constant dense<0.000000e+00> : vector<8x1xf32>
    %86 = tpu.matmul %85, %67, %cst_79 {dimension_numbers = #tpu.dot_dimension_numbers<[1], [0], [0], [1], [0, 0, 1, 1], [], []>} : vector<8x4xf32>, vector<4x1xf32>, vector<8x1xf32> -> vector<8x1xf32>
    %c0_80 = arith.constant 0 : index
    %c0_81 = arith.constant 0 : index
    %87 = vector.load %arg16[%c0_80, %c0_81] : memref<8x1xf32, #tpu.memory_space<vmem>>, vector<8x1xf32>
    %88 = arith.addf %86, %87 : vector<8x1xf32>
    %89 = arith.negf %88 : vector<8x1xf32>
    %90 = math.exp %89 : vector<8x1xf32>
    %cst_82 = arith.constant 1.000000e+00 : f32
    %91 = vector.broadcast %cst_82 : f32 to vector<8x1xf32>
    %92 = arith.addf %91, %90 : vector<8x1xf32>
    %93 = arith.divf %91, %92 : vector<8x1xf32>
    %94 = vector.broadcast %93 : vector<8x1xf32> to vector<8x64xf32>
    %95 = arith.mulf %12, %94 : vector<8x64xf32>
    %c0_83 = arith.constant 0 : index
    %c1_84 = arith.constant 1 : index
    %c0_85 = arith.constant 0 : index
    %c0_86 = arith.constant 0 : index
    %96 = vector.load %arg18[%c0_83, %c1_84, %c0_85, %c0_86] : memref<1x3x8x64xf32, #tpu.memory_space<vmem>>, vector<1x1x8x64xf32>
    %97 = vector.shape_cast %96 : vector<1x1x8x64xf32> to vector<8x64xf32>
    %98 = arith.addf %95, %97 : vector<8x64xf32>
    %c0_87 = arith.constant 0 : index
    %c1_88 = arith.constant 1 : index
    %c0_89 = arith.constant 0 : index
    %c0_90 = arith.constant 0 : index
    %99 = vector.load %arg19[%c0_87, %c1_88, %c0_89, %c0_90] : memref<1x3x8x64xf32, #tpu.memory_space<vmem>>, vector<1x1x8x64xf32>
    %100 = vector.shape_cast %99 : vector<1x1x8x64xf32> to vector<8x64xf32>
    %101 = vector.shape_cast %98 : vector<8x64xf32> to vector<1x1x8x64xf32>
    tpu.vector_store %arg19[%c0_87, %c1_88, %c0_89, %c0_90], %101 {strides = array<i32>} : memref<1x3x8x64xf32, #tpu.memory_space<vmem>>, vector<1x1x8x64xf32>,
    %c0_91 = arith.constant 0 : index
    %c0_92 = arith.constant 0 : index
    %102 = vector.load %arg14[%c0_91, %c0_92] : memref<8x4xf32, #tpu.memory_space<vmem>>, vector<8x4xf32>
    %cst_93 = arith.constant dense<0.000000e+00> : vector<8x1xf32>
    %103 = tpu.matmul %102, %67, %cst_93 {dimension_numbers = #tpu.dot_dimension_numbers<[1], [0], [0], [1], [0, 0, 1, 1], [], []>} : vector<8x4xf32>, vector<4x1xf32>, vector<8x1xf32> -> vector<8x1xf32>
    %c0_94 = arith.constant 0 : index
    %c0_95 = arith.constant 0 : index
    %104 = vector.load %arg17[%c0_94, %c0_95] : memref<8x1xf32, #tpu.memory_space<vmem>>, vector<8x1xf32>
    %105 = arith.addf %103, %104 : vector<8x1xf32>
    %106 = arith.negf %105 : vector<8x1xf32>
    %107 = math.exp %106 : vector<8x1xf32>
    %cst_96 = arith.constant 1.000000e+00 : f32
    %108 = vector.broadcast %cst_96 : f32 to vector<8x1xf32>
    %109 = arith.addf %108, %107 : vector<8x1xf32>
    %110 = arith.divf %108, %109 : vector<8x1xf32>
    %111 = vector.broadcast %110 : vector<8x1xf32> to vector<8x64xf32>
    %112 = arith.mulf %43, %111 : vector<8x64xf32>
    %c0_97 = arith.constant 0 : index
    %c2_98 = arith.constant 2 : index
    %c0_99 = arith.constant 0 : index
    %c0_100 = arith.constant 0 : index
    %113 = vector.load %arg18[%c0_97, %c2_98, %c0_99, %c0_100] : memref<1x3x8x64xf32, #tpu.memory_space<vmem>>, vector<1x1x8x64xf32>
    %114 = vector.shape_cast %113 : vector<1x1x8x64xf32> to vector<8x64xf32>
    %115 = arith.addf %112, %114 : vector<8x64xf32>
    %c0_101 = arith.constant 0 : index
    %c2_102 = arith.constant 2 : index
    %c0_103 = arith.constant 0 : index
    %c0_104 = arith.constant 0 : index
    %116 = vector.load %arg19[%c0_101, %c2_102, %c0_103, %c0_104] : memref<1x3x8x64xf32, #tpu.memory_space<vmem>>, vector<1x1x8x64xf32>
    %117 = vector.shape_cast %116 : vector<1x1x8x64xf32> to vector<8x64xf32>
    %118 = vector.shape_cast %115 : vector<8x64xf32> to vector<1x1x8x64xf32>
    tpu.vector_store %arg19[%c0_101, %c2_102, %c0_103, %c0_104], %118 {strides = array<i32>} : memref<1x3x8x64xf32, #tpu.memory_space<vmem>>, vector<1x1x8x64xf32>,
    return
  }
  func.func @transform_0(%arg0: i32) -> (i32, i32, i32) {
    %c0_i32 = arith.constant 0 : i32
    %c0_i32_0 = arith.constant 0 : i32
    %c0_i32_1 = arith.constant 0 : i32
    return %arg0, %c0_i32, %c0_i32_0 : i32, i32, i32
  }
  func.func @transform_1(%arg0: i32) -> (i32, i32, i32) {
    %c0_i32 = arith.constant 0 : i32
    %c0_i32_0 = arith.constant 0 : i32
    %c0_i32_1 = arith.constant 0 : i32
    return %arg0, %c0_i32, %c0_i32_0 : i32, i32, i32
  }
  func.func @transform_2(%arg0: i32) -> (i32, i32, i32) {
    %c0_i32 = arith.constant 0 : i32
    %c0_i32_0 = arith.constant 0 : i32
    %c0_i32_1 = arith.constant 0 : i32
    return %arg0, %c0_i32, %c0_i32_0 : i32, i32, i32
  }
  func.func @transform_3(%arg0: i32) -> (i32, i32, i32) {
    %c0_i32 = arith.constant 0 : i32
    %c0_i32_0 = arith.constant 0 : i32
    %c0_i32_1 = arith.constant 0 : i32
    return %arg0, %c0_i32, %c0_i32_0 : i32, i32, i32
  }
  func.func @transform_4(%arg0: i32) -> (i32, i32, i32) {
    %c0_i32 = arith.constant 0 : i32
    %c0_i32_0 = arith.constant 0 : i32
    %c0_i32_1 = arith.constant 0 : i32
    return %arg0, %c0_i32, %c0_i32_0 : i32, i32, i32
  }
  func.func @transform_5(%arg0: i32) -> (i32, i32, i32) {
    %c0_i32 = arith.constant 0 : i32
    %c0_i32_0 = arith.constant 0 : i32
    %c0_i32_1 = arith.constant 0 : i32
    return %arg0, %c0_i32, %c0_i32_0 : i32, i32, i32
  }
  func.func @transform_6(%arg0: i32) -> (i32, i32, i32, i32) {
    %c0_i32 = arith.constant 0 : i32
    %c0_i32_0 = arith.constant 0 : i32
    %c0_i32_1 = arith.constant 0 : i32
    %c0_i32_2 = arith.constant 0 : i32
    return %arg0, %c0_i32, %c0_i32_0, %c0_i32_1 : i32, i32, i32, i32
  }
  func.func @transform_7(%arg0: i32) -> (i32, i32) {
    %c0_i32 = arith.constant 0 : i32
    %c0_i32_0 = arith.constant 0 : i32
    %c0_i32_1 = arith.constant 0 : i32
    return %c0_i32, %c0_i32_0 : i32, i32
  }
  func.func @transform_8(%arg0: i32) -> (i32, i32) {
    %c0_i32 = arith.constant 0 : i32
    %c0_i32_0 = arith.constant 0 : i32
    %c0_i32_1 = arith.constant 0 : i32
    return %c0_i32, %c0_i32_0 : i32, i32
  }
  func.func @transform_9(%arg0: i32) -> (i32, i32) {
    %c0_i32 = arith.constant 0 : i32
    %c0_i32_0 = arith.constant 0 : i32
    %c0_i32_1 = arith.constant 0 : i32
    return %c0_i32, %c0_i32_0 : i32, i32
  }
  func.func @transform_10(%arg0: i32) -> (i32, i32) {
    %c0_i32 = arith.constant 0 : i32
    %c0_i32_0 = arith.constant 0 : i32
    %c0_i32_1 = arith.constant 0 : i32
    return %c0_i32, %c0_i32_0 : i32, i32
  }
  func.func @transform_11(%arg0: i32) -> (i32, i32) {
    %c0_i32 = arith.constant 0 : i32
    %c0_i32_0 = arith.constant 0 : i32
    %c0_i32_1 = arith.constant 0 : i32
    return %c0_i32, %c0_i32_0 : i32, i32
  }
  func.func @transform_12(%arg0: i32) -> (i32, i32) {
    %c0_i32 = arith.constant 0 : i32
    %c0_i32_0 = arith.constant 0 : i32
    %c0_i32_1 = arith.constant 0 : i32
    return %c0_i32, %c0_i32_0 : i32, i32
  }
  func.func @transform_13(%arg0: i32) -> (i32, i32) {
    %c0_i32 = arith.constant 0 : i32
    %c0_i32_0 = arith.constant 0 : i32
    %c0_i32_1 = arith.constant 0 : i32
    return %c0_i32, %c0_i32_0 : i32, i32
  }
  func.func @transform_14(%arg0: i32) -> (i32, i32) {
    %c0_i32 = arith.constant 0 : i32
    %c0_i32_0 = arith.constant 0 : i32
    %c0_i32_1 = arith.constant 0 : i32
    return %c0_i32, %c0_i32_0 : i32, i32
  }
  func.func @transform_15(%arg0: i32) -> (i32, i32) {
    %c0_i32 = arith.constant 0 : i32
    %c0_i32_0 = arith.constant 0 : i32
    %c0_i32_1 = arith.constant 0 : i32
    return %c0_i32, %c0_i32_0 : i32, i32
  }
  func.func @transform_16(%arg0: i32) -> (i32, i32) {
    %c0_i32 = arith.constant 0 : i32
    %c0_i32_0 = arith.constant 0 : i32
    %c0_i32_1 = arith.constant 0 : i32
    return %c0_i32, %c0_i32_0 : i32, i32
  }
  func.func @transform_17(%arg0: i32) -> (i32, i32, i32, i32) {
    %c0_i32 = arith.constant 0 : i32
    %c0_i32_0 = arith.constant 0 : i32
    %c0_i32_1 = arith.constant 0 : i32
    %c0_i32_2 = arith.constant 0 : i32
    return %arg0, %c0_i32, %c0_i32_0, %c0_i32_1 : i32, i32, i32, i32
  }
  func.func @transform_18(%arg0: i32) -> (i32, i32, i32, i32) {
    %c0_i32 = arith.constant 0 : i32
    %c0_i32_0 = arith.constant 0 : i32
    %c0_i32_1 = arith.constant 0 : i32
    %c0_i32_2 = arith.constant 0 : i32
    return %arg0, %c0_i32, %c0_i32_0, %c0_i32_1 : i32, i32, i32, i32
  }
}

module attributes {stable_mosaic.version = 11 : i64} {
  func.func @kernel(%arg0: i32, %arg1: memref<1x36x256xf32, #tpu.memory_space<vmem>>, %arg2: memref<4x36xbf16, #tpu.memory_space<vmem>>, %arg3: memref<1x4x256xf32, #tpu.memory_space<vmem>>, %arg4: memref<1x4x256xf32, #tpu.memory_space<vmem>>) attributes {dimension_semantics = [#tpu.dimension_semantics<parallel>], iteration_bounds = array<i64: 2>, scalar_prefetch = 0 : i64, scratch_operands = 0 : i64, tpu.core_type = #tpu.core_type<tc>, window_params = [{transform_indices = @transform_0, window_bounds = array<i64: 1, 36, 256>}, {pipeline_mode = #tpu.pipeline_mode<synchronous>, transform_indices = @transform_1, window_bounds = array<i64: 4, 36>}, {transform_indices = @transform_2, window_bounds = array<i64: 1, 4, 256>}, {transform_indices = @transform_3, window_bounds = array<i64: 1, 4, 256>}]} {
    %c0 = arith.constant 0 : index
    %c0_0 = arith.constant 0 : index
    %c0_1 = arith.constant 0 : index
    %0 = vector.load %arg1[%c0, %c0_0, %c0_1] : memref<1x36x256xf32, #tpu.memory_space<vmem>>, vector<1x36x256xf32>
    %1 = vector.shape_cast %0 : vector<1x36x256xf32> to vector<36x256xf32>
    %cst = arith.constant 0.000000e+00 : f32
    %2 = vector.broadcast %cst : f32 to vector<36x256xf32>
    %3 = arith.cmpf oge, %1, %2 : vector<36x256xf32>
    %cst_2 = arith.constant 0.00999999977 : f32
    %4 = vector.broadcast %cst_2 : f32 to vector<36x256xf32>
    %5 = arith.mulf %4, %1 : vector<36x256xf32>
    %6 = arith.select %3, %1, %5 : vector<36x256xi1>, vector<36x256xf32>
    %c0_3 = arith.constant 0 : index
    %c0_4 = arith.constant 0 : index
    %7 = vector.load %arg2[%c0_3, %c0_4] : memref<4x36xbf16, #tpu.memory_space<vmem>>, vector<4x36xbf16>
    %8 = arith.truncf %6 : vector<36x256xf32> to vector<36x256xbf16>
    %cst_5 = arith.constant dense<0.000000e+00> : vector<4x256xf32>
    %9 = tpu.matmul %7, %8, %cst_5 {dimension_numbers = #tpu.dot_dimension_numbers<[1], [0], [0], [1], [0, 0, 1, 1], [], []>} : vector<4x36xbf16>, vector<36x256xbf16>, vector<4x256xf32> -> vector<4x256xf32>
    %cst_6 = arith.constant dense<0.000000e+00> : vector<4xf32>
    %10 = vector.multi_reduction <add>, %9, %cst_6 [1] : vector<4x256xf32> to vector<4xf32>
    %11 = vector.shape_cast %10 : vector<4xf32> to vector<4x1xf32>
    %cst_7 = arith.constant 2.560000e+02 : f32
    %12 = vector.broadcast %cst_7 : f32 to vector<4x1xf32>
    %13 = arith.divf %11, %12 : vector<4x1xf32>
    %14 = vector.broadcast %13 : vector<4x1xf32> to vector<4x256xf32>
    %15 = arith.subf %9, %14 : vector<4x256xf32>
    %16 = arith.mulf %15, %15 : vector<4x256xf32>
    %cst_8 = arith.constant dense<0.000000e+00> : vector<4xf32>
    %17 = vector.multi_reduction <add>, %16, %cst_8 [1] : vector<4x256xf32> to vector<4xf32>
    %18 = vector.shape_cast %17 : vector<4xf32> to vector<4x1xf32>
    %cst_9 = arith.constant 2.560000e+02 : f32
    %19 = vector.broadcast %cst_9 : f32 to vector<4x1xf32>
    %20 = arith.divf %18, %19 : vector<4x1xf32>
    %cst_10 = arith.constant 9.99999974E-6 : f32
    %21 = vector.broadcast %cst_10 : f32 to vector<4x1xf32>
    %22 = arith.addf %20, %21 : vector<4x1xf32>
    %23 = math.rsqrt %22 : vector<4x1xf32>
    %24 = vector.broadcast %23 : vector<4x1xf32> to vector<4x256xf32>
    %25 = arith.mulf %15, %24 : vector<4x256xf32>
    %c0_11 = arith.constant 0 : index
    %c0_12 = arith.constant 0 : index
    %c0_13 = arith.constant 0 : index
    %26 = vector.load %arg3[%c0_11, %c0_12, %c0_13] : memref<1x4x256xf32, #tpu.memory_space<vmem>>, vector<1x4x256xf32>
    %27 = vector.shape_cast %26 : vector<1x4x256xf32> to vector<4x256xf32>
    %28 = arith.addf %25, %27 : vector<4x256xf32>
    %c0_14 = arith.constant 0 : index
    %c0_15 = arith.constant 0 : index
    %c0_16 = arith.constant 0 : index
    %29 = vector.load %arg4[%c0_14, %c0_15, %c0_16] : memref<1x4x256xf32, #tpu.memory_space<vmem>>, vector<1x4x256xf32>
    %30 = vector.shape_cast %29 : vector<1x4x256xf32> to vector<4x256xf32>
    %31 = vector.shape_cast %28 : vector<4x256xf32> to vector<1x4x256xf32>
    tpu.vector_store %arg4[%c0_14, %c0_15, %c0_16], %31 {strides = array<i32>} : memref<1x4x256xf32, #tpu.memory_space<vmem>>, vector<1x4x256xf32>,
    return
  }
  func.func @transform_0(%arg0: i32) -> (i32, i32, i32) {
    %c0_i32 = arith.constant 0 : i32
    %c0_i32_0 = arith.constant 0 : i32
    %c0_i32_1 = arith.constant 0 : i32
    return %arg0, %c0_i32, %c0_i32_0 : i32, i32, i32
  }
  func.func @transform_1(%arg0: i32) -> (i32, i32) {
    %c0_i32 = arith.constant 0 : i32
    %c0_i32_0 = arith.constant 0 : i32
    %c0_i32_1 = arith.constant 0 : i32
    return %c0_i32, %c0_i32_0 : i32, i32
  }
  func.func @transform_2(%arg0: i32) -> (i32, i32, i32) {
    %c0_i32 = arith.constant 0 : i32
    %c0_i32_0 = arith.constant 0 : i32
    %c0_i32_1 = arith.constant 0 : i32
    return %arg0, %c0_i32, %c0_i32_0 : i32, i32, i32
  }
  func.func @transform_3(%arg0: i32) -> (i32, i32, i32) {
    %c0_i32 = arith.constant 0 : i32
    %c0_i32_0 = arith.constant 0 : i32
    %c0_i32_1 = arith.constant 0 : i32
    return %arg0, %c0_i32, %c0_i32_0 : i32, i32, i32
  }
}

module attributes {stable_mosaic.version = 11 : i64} {
  func.func @kernel(%arg0: i32, %arg1: memref<1x36x256xf32, #tpu.memory_space<vmem>>, %arg2: memref<4x36xbf16, #tpu.memory_space<vmem>>, %arg3: memref<1x4x256xf32, #tpu.memory_space<vmem>>, %arg4: memref<1x4x256xf32, #tpu.memory_space<vmem>>, %arg5: memref<1x4x256xf32, #tpu.memory_space<vmem>>) attributes {dimension_semantics = [#tpu.dimension_semantics<parallel>], iteration_bounds = array<i64: 2>, scalar_prefetch = 0 : i64, scratch_operands = 0 : i64, tpu.core_type = #tpu.core_type<tc>, window_params = [{transform_indices = @transform_0, window_bounds = array<i64: 1, 36, 256>}, {pipeline_mode = #tpu.pipeline_mode<synchronous>, transform_indices = @transform_1, window_bounds = array<i64: 4, 36>}, {transform_indices = @transform_2, window_bounds = array<i64: 1, 4, 256>}, {transform_indices = @transform_3, window_bounds = array<i64: 1, 4, 256>}, {transform_indices = @transform_4, window_bounds = array<i64: 1, 4, 256>}]} {
    %c0 = arith.constant 0 : index
    %c0_0 = arith.constant 0 : index
    %c0_1 = arith.constant 0 : index
    %0 = vector.load %arg1[%c0, %c0_0, %c0_1] : memref<1x36x256xf32, #tpu.memory_space<vmem>>, vector<1x36x256xf32>
    %1 = vector.shape_cast %0 : vector<1x36x256xf32> to vector<36x256xf32>
    %cst = arith.constant 0.000000e+00 : f32
    %2 = vector.broadcast %cst : f32 to vector<36x256xf32>
    %3 = arith.cmpf oge, %1, %2 : vector<36x256xf32>
    %cst_2 = arith.constant 0.00999999977 : f32
    %4 = vector.broadcast %cst_2 : f32 to vector<36x256xf32>
    %5 = arith.mulf %4, %1 : vector<36x256xf32>
    %6 = arith.select %3, %1, %5 : vector<36x256xi1>, vector<36x256xf32>
    %c0_3 = arith.constant 0 : index
    %c0_4 = arith.constant 0 : index
    %7 = vector.load %arg2[%c0_3, %c0_4] : memref<4x36xbf16, #tpu.memory_space<vmem>>, vector<4x36xbf16>
    %8 = arith.truncf %6 : vector<36x256xf32> to vector<36x256xbf16>
    %cst_5 = arith.constant dense<0.000000e+00> : vector<4x256xf32>
    %9 = tpu.matmul %7, %8, %cst_5 {dimension_numbers = #tpu.dot_dimension_numbers<[1], [0], [0], [1], [0, 0, 1, 1], [], []>} : vector<4x36xbf16>, vector<36x256xbf16>, vector<4x256xf32> -> vector<4x256xf32>
    %cst_6 = arith.constant dense<0.000000e+00> : vector<4xf32>
    %10 = vector.multi_reduction <add>, %9, %cst_6 [1] : vector<4x256xf32> to vector<4xf32>
    %11 = vector.shape_cast %10 : vector<4xf32> to vector<4x1xf32>
    %cst_7 = arith.constant 2.560000e+02 : f32
    %12 = vector.broadcast %cst_7 : f32 to vector<4x1xf32>
    %13 = arith.divf %11, %12 : vector<4x1xf32>
    %14 = vector.broadcast %13 : vector<4x1xf32> to vector<4x256xf32>
    %15 = arith.subf %9, %14 : vector<4x256xf32>
    %16 = arith.mulf %15, %15 : vector<4x256xf32>
    %cst_8 = arith.constant dense<0.000000e+00> : vector<4xf32>
    %17 = vector.multi_reduction <add>, %16, %cst_8 [1] : vector<4x256xf32> to vector<4xf32>
    %18 = vector.shape_cast %17 : vector<4xf32> to vector<4x1xf32>
    %cst_9 = arith.constant 2.560000e+02 : f32
    %19 = vector.broadcast %cst_9 : f32 to vector<4x1xf32>
    %20 = arith.divf %18, %19 : vector<4x1xf32>
    %cst_10 = arith.constant 9.99999974E-6 : f32
    %21 = vector.broadcast %cst_10 : f32 to vector<4x1xf32>
    %22 = arith.addf %20, %21 : vector<4x1xf32>
    %23 = math.rsqrt %22 : vector<4x1xf32>
    %24 = vector.broadcast %23 : vector<4x1xf32> to vector<4x256xf32>
    %25 = arith.mulf %15, %24 : vector<4x256xf32>
    %c0_11 = arith.constant 0 : index
    %c0_12 = arith.constant 0 : index
    %c0_13 = arith.constant 0 : index
    %26 = vector.load %arg3[%c0_11, %c0_12, %c0_13] : memref<1x4x256xf32, #tpu.memory_space<vmem>>, vector<1x4x256xf32>
    %27 = vector.shape_cast %26 : vector<1x4x256xf32> to vector<4x256xf32>
    %28 = arith.addf %25, %27 : vector<4x256xf32>
    %c0_14 = arith.constant 0 : index
    %c0_15 = arith.constant 0 : index
    %c0_16 = arith.constant 0 : index
    %29 = vector.load %arg4[%c0_14, %c0_15, %c0_16] : memref<1x4x256xf32, #tpu.memory_space<vmem>>, vector<1x4x256xf32>
    %30 = vector.shape_cast %29 : vector<1x4x256xf32> to vector<4x256xf32>
    %31 = arith.addf %28, %30 : vector<4x256xf32>
    %c0_17 = arith.constant 0 : index
    %c0_18 = arith.constant 0 : index
    %c0_19 = arith.constant 0 : index
    %32 = vector.load %arg5[%c0_17, %c0_18, %c0_19] : memref<1x4x256xf32, #tpu.memory_space<vmem>>, vector<1x4x256xf32>
    %33 = vector.shape_cast %32 : vector<1x4x256xf32> to vector<4x256xf32>
    %34 = vector.shape_cast %31 : vector<4x256xf32> to vector<1x4x256xf32>
    tpu.vector_store %arg5[%c0_17, %c0_18, %c0_19], %34 {strides = array<i32>} : memref<1x4x256xf32, #tpu.memory_space<vmem>>, vector<1x4x256xf32>,
    return
  }
  func.func @transform_0(%arg0: i32) -> (i32, i32, i32) {
    %c0_i32 = arith.constant 0 : i32
    %c0_i32_0 = arith.constant 0 : i32
    %c0_i32_1 = arith.constant 0 : i32
    return %arg0, %c0_i32, %c0_i32_0 : i32, i32, i32
  }
  func.func @transform_1(%arg0: i32) -> (i32, i32) {
    %c0_i32 = arith.constant 0 : i32
    %c0_i32_0 = arith.constant 0 : i32
    %c0_i32_1 = arith.constant 0 : i32
    return %c0_i32, %c0_i32_0 : i32, i32
  }
  func.func @transform_2(%arg0: i32) -> (i32, i32, i32) {
    %c0_i32 = arith.constant 0 : i32
    %c0_i32_0 = arith.constant 0 : i32
    %c0_i32_1 = arith.constant 0 : i32
    return %arg0, %c0_i32, %c0_i32_0 : i32, i32, i32
  }
  func.func @transform_3(%arg0: i32) -> (i32, i32, i32) {
    %c0_i32 = arith.constant 0 : i32
    %c0_i32_0 = arith.constant 0 : i32
    %c0_i32_1 = arith.constant 0 : i32
    return %arg0, %c0_i32, %c0_i32_0 : i32, i32, i32
  }
  func.func @transform_4(%arg0: i32) -> (i32, i32, i32) {
    %c0_i32 = arith.constant 0 : i32
    %c0_i32_0 = arith.constant 0 : i32
    %c0_i32_1 = arith.constant 0 : i32
    return %arg0, %c0_i32, %c0_i32_0 : i32, i32, i32
  }
}

module attributes {stable_mosaic.version = 11 : i64} {
  func.func @kernel(%arg0: i32, %arg1: memref<1x4x256xf32, #tpu.memory_space<vmem>>, %arg2: memref<1x4x256xf32, #tpu.memory_space<vmem>>, %arg3: memref<1x4x256xf32, #tpu.memory_space<vmem>>, %arg4: memref<1x4x256xf32, #tpu.memory_space<vmem>>, %arg5: memref<1x9x4x256xf32, #tpu.memory_space<vmem>>, %arg6: memref<2x4xf32, #tpu.memory_space<vmem>>, %arg7: memref<2x4xf32, #tpu.memory_space<vmem>>, %arg8: memref<2x4xf32, #tpu.memory_space<vmem>>, %arg9: memref<2x1xf32, #tpu.memory_space<vmem>>, %arg10: memref<4x2xf32, #tpu.memory_space<vmem>>, %arg11: memref<4x2xf32, #tpu.memory_space<vmem>>, %arg12: memref<4x2xf32, #tpu.memory_space<vmem>>, %arg13: memref<4x1xf32, #tpu.memory_space<vmem>>, %arg14: memref<4x1xf32, #tpu.memory_space<vmem>>, %arg15: memref<4x1xf32, #tpu.memory_space<vmem>>, %arg16: memref<1x3x4x256xf32, #tpu.memory_space<vmem>>, %arg17: memref<1x3x4x256xf32, #tpu.memory_space<vmem>>) attributes {dimension_semantics = [#tpu.dimension_semantics<parallel>], iteration_bounds = array<i64: 2>, scalar_prefetch = 0 : i64, scratch_operands = 0 : i64, tpu.core_type = #tpu.core_type<tc>, window_params = [{transform_indices = @transform_0, window_bounds = array<i64: 1, 4, 256>}, {transform_indices = @transform_1, window_bounds = array<i64: 1, 4, 256>}, {transform_indices = @transform_2, window_bounds = array<i64: 1, 4, 256>}, {transform_indices = @transform_3, window_bounds = array<i64: 1, 4, 256>}, {transform_indices = @transform_4, window_bounds = array<i64: 1, 9, 4, 256>}, {pipeline_mode = #tpu.pipeline_mode<synchronous>, transform_indices = @transform_5, window_bounds = array<i64: 2, 4>}, {pipeline_mode = #tpu.pipeline_mode<synchronous>, transform_indices = @transform_6, window_bounds = array<i64: 2, 4>}, {pipeline_mode = #tpu.pipeline_mode<synchronous>, transform_indices = @transform_7, window_bounds = array<i64: 2, 4>}, {pipeline_mode = #tpu.pipeline_mode<synchronous>, transform_indices = @transform_8, window_bounds = array<i64: 2, 1>}, {pipeline_mode = #tpu.pipeline_mode<synchronous>, transform_indices = @transform_9, window_bounds = array<i64: 4, 2>}, {pipeline_mode = #tpu.pipeline_mode<synchronous>, transform_indices = @transform_10, window_bounds = array<i64: 4, 2>}, {pipeline_mode = #tpu.pipeline_mode<synchronous>, transform_indices = @transform_11, window_bounds = array<i64: 4, 2>}, {pipeline_mode = #tpu.pipeline_mode<synchronous>, transform_indices = @transform_12, window_bounds = array<i64: 4, 1>}, {pipeline_mode = #tpu.pipeline_mode<synchronous>, transform_indices = @transform_13, window_bounds = array<i64: 4, 1>}, {pipeline_mode = #tpu.pipeline_mode<synchronous>, transform_indices = @transform_14, window_bounds = array<i64: 4, 1>}, {transform_indices = @transform_15, window_bounds = array<i64: 1, 3, 4, 256>}, {transform_indices = @transform_16, window_bounds = array<i64: 1, 3, 4, 256>}]} {
    %c0 = arith.constant 0 : index
    %c0_0 = arith.constant 0 : index
    %c0_1 = arith.constant 0 : index
    %0 = vector.load %arg1[%c0, %c0_0, %c0_1] : memref<1x4x256xf32, #tpu.memory_space<vmem>>, vector<1x4x256xf32>
    %1 = vector.shape_cast %0 : vector<1x4x256xf32> to vector<4x256xf32>
    %c0_2 = arith.constant 0 : index
    %c0_3 = arith.constant 0 : index
    %c0_4 = arith.constant 0 : index
    %2 = vector.load %arg2[%c0_2, %c0_3, %c0_4] : memref<1x4x256xf32, #tpu.memory_space<vmem>>, vector<1x4x256xf32>
    %3 = vector.shape_cast %2 : vector<1x4x256xf32> to vector<4x256xf32>
    %4 = arith.addf %1, %3 : vector<4x256xf32>
    %c0_5 = arith.constant 0 : index
    %c0_6 = arith.constant 0 : index
    %c0_7 = arith.constant 0 : index
    %5 = vector.load %arg3[%c0_5, %c0_6, %c0_7] : memref<1x4x256xf32, #tpu.memory_space<vmem>>, vector<1x4x256xf32>
    %6 = vector.shape_cast %5 : vector<1x4x256xf32> to vector<4x256xf32>
    %c0_8 = arith.constant 0 : index
    %c0_9 = arith.constant 0 : index
    %c0_10 = arith.constant 0 : index
    %7 = vector.load %arg4[%c0_8, %c0_9, %c0_10] : memref<1x4x256xf32, #tpu.memory_space<vmem>>, vector<1x4x256xf32>
    %8 = vector.shape_cast %7 : vector<1x4x256xf32> to vector<4x256xf32>
    %c0_11 = arith.constant 0 : index
    %c0_12 = arith.constant 0 : index
    %c0_13 = arith.constant 0 : index
    %c0_14 = arith.constant 0 : index
    %9 = vector.load %arg5[%c0_11, %c0_12, %c0_13, %c0_14] : memref<1x9x4x256xf32, #tpu.memory_space<vmem>>, vector<1x1x4x256xf32>
    %10 = vector.shape_cast %9 : vector<1x1x4x256xf32> to vector<4x256xf32>
    %c0_15 = arith.constant 0 : index
    %c1 = arith.constant 1 : index
    %c0_16 = arith.constant 0 : index
    %c0_17 = arith.constant 0 : index
    %11 = vector.load %arg5[%c0_15, %c1, %c0_16, %c0_17] : memref<1x9x4x256xf32, #tpu.memory_space<vmem>>, vector<1x1x4x256xf32>
    %12 = vector.shape_cast %11 : vector<1x1x4x256xf32> to vector<4x256xf32>
    %13 = arith.addf %10, %12 : vector<4x256xf32>
    %c0_18 = arith.constant 0 : index
    %c2 = arith.constant 2 : index
    %c0_19 = arith.constant 0 : index
    %c0_20 = arith.constant 0 : index
    %14 = vector.load %arg5[%c0_18, %c2, %c0_19, %c0_20] : memref<1x9x4x256xf32, #tpu.memory_space<vmem>>, vector<1x1x4x256xf32>
    %15 = vector.shape_cast %14 : vector<1x1x4x256xf32> to vector<4x256xf32>
    %16 = arith.addf %13, %15 : vector<4x256xf32>
    %c0_21 = arith.constant 0 : index
    %c3 = arith.constant 3 : index
    %c0_22 = arith.constant 0 : index
    %c0_23 = arith.constant 0 : index
    %17 = vector.load %arg5[%c0_21, %c3, %c0_22, %c0_23] : memref<1x9x4x256xf32, #tpu.memory_space<vmem>>, vector<1x1x4x256xf32>
    %18 = vector.shape_cast %17 : vector<1x1x4x256xf32> to vector<4x256xf32>
    %19 = arith.addf %16, %18 : vector<4x256xf32>
    %c0_24 = arith.constant 0 : index
    %c4 = arith.constant 4 : index
    %c0_25 = arith.constant 0 : index
    %c0_26 = arith.constant 0 : index
    %20 = vector.load %arg5[%c0_24, %c4, %c0_25, %c0_26] : memref<1x9x4x256xf32, #tpu.memory_space<vmem>>, vector<1x1x4x256xf32>
    %21 = vector.shape_cast %20 : vector<1x1x4x256xf32> to vector<4x256xf32>
    %22 = arith.addf %19, %21 : vector<4x256xf32>
    %c0_27 = arith.constant 0 : index
    %c5 = arith.constant 5 : index
    %c0_28 = arith.constant 0 : index
    %c0_29 = arith.constant 0 : index
    %23 = vector.load %arg5[%c0_27, %c5, %c0_28, %c0_29] : memref<1x9x4x256xf32, #tpu.memory_space<vmem>>, vector<1x1x4x256xf32>
    %24 = vector.shape_cast %23 : vector<1x1x4x256xf32> to vector<4x256xf32>
    %25 = arith.addf %22, %24 : vector<4x256xf32>
    %c0_30 = arith.constant 0 : index
    %c6 = arith.constant 6 : index
    %c0_31 = arith.constant 0 : index
    %c0_32 = arith.constant 0 : index
    %26 = vector.load %arg5[%c0_30, %c6, %c0_31, %c0_32] : memref<1x9x4x256xf32, #tpu.memory_space<vmem>>, vector<1x1x4x256xf32>
    %27 = vector.shape_cast %26 : vector<1x1x4x256xf32> to vector<4x256xf32>
    %28 = arith.addf %25, %27 : vector<4x256xf32>
    %c0_33 = arith.constant 0 : index
    %c7 = arith.constant 7 : index
    %c0_34 = arith.constant 0 : index
    %c0_35 = arith.constant 0 : index
    %29 = vector.load %arg5[%c0_33, %c7, %c0_34, %c0_35] : memref<1x9x4x256xf32, #tpu.memory_space<vmem>>, vector<1x1x4x256xf32>
    %30 = vector.shape_cast %29 : vector<1x1x4x256xf32> to vector<4x256xf32>
    %31 = arith.addf %28, %30 : vector<4x256xf32>
    %c0_36 = arith.constant 0 : index
    %c8 = arith.constant 8 : index
    %c0_37 = arith.constant 0 : index
    %c0_38 = arith.constant 0 : index
    %32 = vector.load %arg5[%c0_36, %c8, %c0_37, %c0_38] : memref<1x9x4x256xf32, #tpu.memory_space<vmem>>, vector<1x1x4x256xf32>
    %33 = vector.shape_cast %32 : vector<1x1x4x256xf32> to vector<4x256xf32>
    %34 = arith.addf %31, %33 : vector<4x256xf32>
    %cst = arith.constant 0.111111112 : f32
    %35 = vector.broadcast %cst : f32 to vector<4x256xf32>
    %36 = arith.mulf %34, %35 : vector<4x256xf32>
    %37 = arith.addf %8, %36 : vector<4x256xf32>
    %c0_39 = arith.constant 0 : index
    %c0_40 = arith.constant 0 : index
    %38 = vector.load %arg9[%c0_39, %c0_40] : memref<2x1xf32, #tpu.memory_space<vmem>>, vector<2x1xf32>
    %cst_41 = arith.constant dense<0.000000e+00> : vector<4xf32>
    %39 = vector.multi_reduction <add>, %4, %cst_41 [1] : vector<4x256xf32> to vector<4xf32>
    %40 = vector.shape_cast %39 : vector<4xf32> to vector<4x1xf32>
    %cst_42 = arith.constant 2.560000e+02 : f32
    %41 = vector.broadcast %cst_42 : f32 to vector<4x1xf32>
    %42 = arith.divf %40, %41 : vector<4x1xf32>
    %c0_43 = arith.constant 0 : index
    %c0_44 = arith.constant 0 : index
    %43 = vector.load %arg6[%c0_43, %c0_44] : memref<2x4xf32, #tpu.memory_space<vmem>>, vector<2x4xf32>
    %cst_45 = arith.constant dense<0.000000e+00> : vector<2x1xf32>
    %44 = tpu.matmul %43, %42, %cst_45 {dimension_numbers = #tpu.dot_dimension_numbers<[1], [0], [0], [1], [0, 0, 1, 1], [], []>} : vector<2x4xf32>, vector<4x1xf32>, vector<2x1xf32> -> vector<2x1xf32>
    %45 = arith.addf %38, %44 : vector<2x1xf32>
    %cst_46 = arith.constant dense<0.000000e+00> : vector<4xf32>
    %46 = vector.multi_reduction <add>, %6, %cst_46 [1] : vector<4x256xf32> to vector<4xf32>
    %47 = vector.shape_cast %46 : vector<4xf32> to vector<4x1xf32>
    %cst_47 = arith.constant 2.560000e+02 : f32
    %48 = vector.broadcast %cst_47 : f32 to vector<4x1xf32>
    %49 = arith.divf %47, %48 : vector<4x1xf32>
    %c0_48 = arith.constant 0 : index
    %c0_49 = arith.constant 0 : index
    %50 = vector.load %arg7[%c0_48, %c0_49] : memref<2x4xf32, #tpu.memory_space<vmem>>, vector<2x4xf32>
    %cst_50 = arith.constant dense<0.000000e+00> : vector<2x1xf32>
    %51 = tpu.matmul %50, %49, %cst_50 {dimension_numbers = #tpu.dot_dimension_numbers<[1], [0], [0], [1], [0, 0, 1, 1], [], []>} : vector<2x4xf32>, vector<4x1xf32>, vector<2x1xf32> -> vector<2x1xf32>
    %52 = arith.addf %45, %51 : vector<2x1xf32>
    %cst_51 = arith.constant dense<0.000000e+00> : vector<4xf32>
    %53 = vector.multi_reduction <add>, %37, %cst_51 [1] : vector<4x256xf32> to vector<4xf32>
    %54 = vector.shape_cast %53 : vector<4xf32> to vector<4x1xf32>
    %cst_52 = arith.constant 2.560000e+02 : f32
    %55 = vector.broadcast %cst_52 : f32 to vector<4x1xf32>
    %56 = arith.divf %54, %55 : vector<4x1xf32>
    %c0_53 = arith.constant 0 : index
    %c0_54 = arith.constant 0 : index
    %57 = vector.load %arg8[%c0_53, %c0_54] : memref<2x4xf32, #tpu.memory_space<vmem>>, vector<2x4xf32>
    %cst_55 = arith.constant dense<0.000000e+00> : vector<2x1xf32>
    %58 = tpu.matmul %57, %56, %cst_55 {dimension_numbers = #tpu.dot_dimension_numbers<[1], [0], [0], [1], [0, 0, 1, 1], [], []>} : vector<2x4xf32>, vector<4x1xf32>, vector<2x1xf32> -> vector<2x1xf32>
    %59 = arith.addf %52, %58 : vector<2x1xf32>
    %cst_56 = arith.constant 0.000000e+00 : f32
    %60 = vector.broadcast %cst_56 : f32 to vector<2x1xf32>
    %61 = arith.maximumf %59, %60 : vector<2x1xf32>
    %c0_57 = arith.constant 0 : index
    %c0_58 = arith.constant 0 : index
    %62 = vector.load %arg10[%c0_57, %c0_58] : memref<4x2xf32, #tpu.memory_space<vmem>>, vector<4x2xf32>
    %cst_59 = arith.constant dense<0.000000e+00> : vector<4x1xf32>
    %63 = tpu.matmul %62, %61, %cst_59 {dimension_numbers = #tpu.dot_dimension_numbers<[1], [0], [0], [1], [0, 0, 1, 1], [], []>} : vector<4x2xf32>, vector<2x1xf32>, vector<4x1xf32> -> vector<4x1xf32>
    %c0_60 = arith.constant 0 : index
    %c0_61 = arith.constant 0 : index
    %64 = vector.load %arg13[%c0_60, %c0_61] : memref<4x1xf32, #tpu.memory_space<vmem>>, vector<4x1xf32>
    %65 = arith.addf %63, %64 : vector<4x1xf32>
    %66 = arith.negf %65 : vector<4x1xf32>
    %67 = math.exp %66 : vector<4x1xf32>
    %cst_62 = arith.constant 1.000000e+00 : f32
    %68 = vector.broadcast %cst_62 : f32 to vector<4x1xf32>
    %69 = arith.addf %68, %67 : vector<4x1xf32>
    %70 = arith.divf %68, %69 : vector<4x1xf32>
    %71 = vector.broadcast %70 : vector<4x1xf32> to vector<4x256xf32>
    %72 = arith.mulf %4, %71 : vector<4x256xf32>
    %c0_63 = arith.constant 0 : index
    %c0_64 = arith.constant 0 : index
    %c0_65 = arith.constant 0 : index
    %c0_66 = arith.constant 0 : index
    %73 = vector.load %arg16[%c0_63, %c0_64, %c0_65, %c0_66] : memref<1x3x4x256xf32, #tpu.memory_space<vmem>>, vector<1x1x4x256xf32>
    %74 = vector.shape_cast %73 : vector<1x1x4x256xf32> to vector<4x256xf32>
    %75 = arith.addf %72, %74 : vector<4x256xf32>
    %c0_67 = arith.constant 0 : index
    %c0_68 = arith.constant 0 : index
    %c0_69 = arith.constant 0 : index
    %c0_70 = arith.constant 0 : index
    %76 = vector.load %arg17[%c0_67, %c0_68, %c0_69, %c0_70] : memref<1x3x4x256xf32, #tpu.memory_space<vmem>>, vector<1x1x4x256xf32>
    %77 = vector.shape_cast %76 : vector<1x1x4x256xf32> to vector<4x256xf32>
    %78 = vector.shape_cast %75 : vector<4x256xf32> to vector<1x1x4x256xf32>
    tpu.vector_store %arg17[%c0_67, %c0_68, %c0_69, %c0_70], %78 {strides = array<i32>} : memref<1x3x4x256xf32, #tpu.memory_space<vmem>>, vector<1x1x4x256xf32>,
    %c0_71 = arith.constant 0 : index
    %c0_72 = arith.constant 0 : index
    %79 = vector.load %arg11[%c0_71, %c0_72] : memref<4x2xf32, #tpu.memory_space<vmem>>, vector<4x2xf32>
    %cst_73 = arith.constant dense<0.000000e+00> : vector<4x1xf32>
    %80 = tpu.matmul %79, %61, %cst_73 {dimension_numbers = #tpu.dot_dimension_numbers<[1], [0], [0], [1], [0, 0, 1, 1], [], []>} : vector<4x2xf32>, vector<2x1xf32>, vector<4x1xf32> -> vector<4x1xf32>
    %c0_74 = arith.constant 0 : index
    %c0_75 = arith.constant 0 : index
    %81 = vector.load %arg14[%c0_74, %c0_75] : memref<4x1xf32, #tpu.memory_space<vmem>>, vector<4x1xf32>
    %82 = arith.addf %80, %81 : vector<4x1xf32>
    %83 = arith.negf %82 : vector<4x1xf32>
    %84 = math.exp %83 : vector<4x1xf32>
    %cst_76 = arith.constant 1.000000e+00 : f32
    %85 = vector.broadcast %cst_76 : f32 to vector<4x1xf32>
    %86 = arith.addf %85, %84 : vector<4x1xf32>
    %87 = arith.divf %85, %86 : vector<4x1xf32>
    %88 = vector.broadcast %87 : vector<4x1xf32> to vector<4x256xf32>
    %89 = arith.mulf %6, %88 : vector<4x256xf32>
    %c0_77 = arith.constant 0 : index
    %c1_78 = arith.constant 1 : index
    %c0_79 = arith.constant 0 : index
    %c0_80 = arith.constant 0 : index
    %90 = vector.load %arg16[%c0_77, %c1_78, %c0_79, %c0_80] : memref<1x3x4x256xf32, #tpu.memory_space<vmem>>, vector<1x1x4x256xf32>
    %91 = vector.shape_cast %90 : vector<1x1x4x256xf32> to vector<4x256xf32>
    %92 = arith.addf %89, %91 : vector<4x256xf32>
    %c0_81 = arith.constant 0 : index
    %c1_82 = arith.constant 1 : index
    %c0_83 = arith.constant 0 : index
    %c0_84 = arith.constant 0 : index
    %93 = vector.load %arg17[%c0_81, %c1_82, %c0_83, %c0_84] : memref<1x3x4x256xf32, #tpu.memory_space<vmem>>, vector<1x1x4x256xf32>
    %94 = vector.shape_cast %93 : vector<1x1x4x256xf32> to vector<4x256xf32>
    %95 = vector.shape_cast %92 : vector<4x256xf32> to vector<1x1x4x256xf32>
    tpu.vector_store %arg17[%c0_81, %c1_82, %c0_83, %c0_84], %95 {strides = array<i32>} : memref<1x3x4x256xf32, #tpu.memory_space<vmem>>, vector<1x1x4x256xf32>,
    %c0_85 = arith.constant 0 : index
    %c0_86 = arith.constant 0 : index
    %96 = vector.load %arg12[%c0_85, %c0_86] : memref<4x2xf32, #tpu.memory_space<vmem>>, vector<4x2xf32>
    %cst_87 = arith.constant dense<0.000000e+00> : vector<4x1xf32>
    %97 = tpu.matmul %96, %61, %cst_87 {dimension_numbers = #tpu.dot_dimension_numbers<[1], [0], [0], [1], [0, 0, 1, 1], [], []>} : vector<4x2xf32>, vector<2x1xf32>, vector<4x1xf32> -> vector<4x1xf32>
    %c0_88 = arith.constant 0 : index
    %c0_89 = arith.constant 0 : index
    %98 = vector.load %arg15[%c0_88, %c0_89] : memref<4x1xf32, #tpu.memory_space<vmem>>, vector<4x1xf32>
    %99 = arith.addf %97, %98 : vector<4x1xf32>
    %100 = arith.negf %99 : vector<4x1xf32>
    %101 = math.exp %100 : vector<4x1xf32>
    %cst_90 = arith.constant 1.000000e+00 : f32
    %102 = vector.broadcast %cst_90 : f32 to vector<4x1xf32>
    %103 = arith.addf %102, %101 : vector<4x1xf32>
    %104 = arith.divf %102, %103 : vector<4x1xf32>
    %105 = vector.broadcast %104 : vector<4x1xf32> to vector<4x256xf32>
    %106 = arith.mulf %37, %105 : vector<4x256xf32>
    %c0_91 = arith.constant 0 : index
    %c2_92 = arith.constant 2 : index
    %c0_93 = arith.constant 0 : index
    %c0_94 = arith.constant 0 : index
    %107 = vector.load %arg16[%c0_91, %c2_92, %c0_93, %c0_94] : memref<1x3x4x256xf32, #tpu.memory_space<vmem>>, vector<1x1x4x256xf32>
    %108 = vector.shape_cast %107 : vector<1x1x4x256xf32> to vector<4x256xf32>
    %109 = arith.addf %106, %108 : vector<4x256xf32>
    %c0_95 = arith.constant 0 : index
    %c2_96 = arith.constant 2 : index
    %c0_97 = arith.constant 0 : index
    %c0_98 = arith.constant 0 : index
    %110 = vector.load %arg17[%c0_95, %c2_96, %c0_97, %c0_98] : memref<1x3x4x256xf32, #tpu.memory_space<vmem>>, vector<1x1x4x256xf32>
    %111 = vector.shape_cast %110 : vector<1x1x4x256xf32> to vector<4x256xf32>
    %112 = vector.shape_cast %109 : vector<4x256xf32> to vector<1x1x4x256xf32>
    tpu.vector_store %arg17[%c0_95, %c2_96, %c0_97, %c0_98], %112 {strides = array<i32>} : memref<1x3x4x256xf32, #tpu.memory_space<vmem>>, vector<1x1x4x256xf32>,
    return
  }
  func.func @transform_0(%arg0: i32) -> (i32, i32, i32) {
    %c0_i32 = arith.constant 0 : i32
    %c0_i32_0 = arith.constant 0 : i32
    %c0_i32_1 = arith.constant 0 : i32
    return %arg0, %c0_i32, %c0_i32_0 : i32, i32, i32
  }
  func.func @transform_1(%arg0: i32) -> (i32, i32, i32) {
    %c0_i32 = arith.constant 0 : i32
    %c0_i32_0 = arith.constant 0 : i32
    %c0_i32_1 = arith.constant 0 : i32
    return %arg0, %c0_i32, %c0_i32_0 : i32, i32, i32
  }
  func.func @transform_2(%arg0: i32) -> (i32, i32, i32) {
    %c0_i32 = arith.constant 0 : i32
    %c0_i32_0 = arith.constant 0 : i32
    %c0_i32_1 = arith.constant 0 : i32
    return %arg0, %c0_i32, %c0_i32_0 : i32, i32, i32
  }
  func.func @transform_3(%arg0: i32) -> (i32, i32, i32) {
    %c0_i32 = arith.constant 0 : i32
    %c0_i32_0 = arith.constant 0 : i32
    %c0_i32_1 = arith.constant 0 : i32
    return %arg0, %c0_i32, %c0_i32_0 : i32, i32, i32
  }
  func.func @transform_4(%arg0: i32) -> (i32, i32, i32, i32) {
    %c0_i32 = arith.constant 0 : i32
    %c0_i32_0 = arith.constant 0 : i32
    %c0_i32_1 = arith.constant 0 : i32
    %c0_i32_2 = arith.constant 0 : i32
    return %arg0, %c0_i32, %c0_i32_0, %c0_i32_1 : i32, i32, i32, i32
  }
  func.func @transform_5(%arg0: i32) -> (i32, i32) {
    %c0_i32 = arith.constant 0 : i32
    %c0_i32_0 = arith.constant 0 : i32
    %c0_i32_1 = arith.constant 0 : i32
    return %c0_i32, %c0_i32_0 : i32, i32
  }
  func.func @transform_6(%arg0: i32) -> (i32, i32) {
    %c0_i32 = arith.constant 0 : i32
    %c0_i32_0 = arith.constant 0 : i32
    %c0_i32_1 = arith.constant 0 : i32
    return %c0_i32, %c0_i32_0 : i32, i32
  }
  func.func @transform_7(%arg0: i32) -> (i32, i32) {
    %c0_i32 = arith.constant 0 : i32
    %c0_i32_0 = arith.constant 0 : i32
    %c0_i32_1 = arith.constant 0 : i32
    return %c0_i32, %c0_i32_0 : i32, i32
  }
  func.func @transform_8(%arg0: i32) -> (i32, i32) {
    %c0_i32 = arith.constant 0 : i32
    %c0_i32_0 = arith.constant 0 : i32
    %c0_i32_1 = arith.constant 0 : i32
    return %c0_i32, %c0_i32_0 : i32, i32
  }
  func.func @transform_9(%arg0: i32) -> (i32, i32) {
    %c0_i32 = arith.constant 0 : i32
    %c0_i32_0 = arith.constant 0 : i32
    %c0_i32_1 = arith.constant 0 : i32
    return %c0_i32, %c0_i32_0 : i32, i32
  }
  func.func @transform_10(%arg0: i32) -> (i32, i32) {
    %c0_i32 = arith.constant 0 : i32
    %c0_i32_0 = arith.constant 0 : i32
    %c0_i32_1 = arith.constant 0 : i32
    return %c0_i32, %c0_i32_0 : i32, i32
  }
  func.func @transform_11(%arg0: i32) -> (i32, i32) {
    %c0_i32 = arith.constant 0 : i32
    %c0_i32_0 = arith.constant 0 : i32
    %c0_i32_1 = arith.constant 0 : i32
    return %c0_i32, %c0_i32_0 : i32, i32
  }
  func.func @transform_12(%arg0: i32) -> (i32, i32) {
    %c0_i32 = arith.constant 0 : i32
    %c0_i32_0 = arith.constant 0 : i32
    %c0_i32_1 = arith.constant 0 : i32
    return %c0_i32, %c0_i32_0 : i32, i32
  }
  func.func @transform_13(%arg0: i32) -> (i32, i32) {
    %c0_i32 = arith.constant 0 : i32
    %c0_i32_0 = arith.constant 0 : i32
    %c0_i32_1 = arith.constant 0 : i32
    return %c0_i32, %c0_i32_0 : i32, i32
  }
  func.func @transform_14(%arg0: i32) -> (i32, i32) {
    %c0_i32 = arith.constant 0 : i32
    %c0_i32_0 = arith.constant 0 : i32
    %c0_i32_1 = arith.constant 0 : i32
    return %c0_i32, %c0_i32_0 : i32, i32
  }
  func.func @transform_15(%arg0: i32) -> (i32, i32, i32, i32) {
    %c0_i32 = arith.constant 0 : i32
    %c0_i32_0 = arith.constant 0 : i32
    %c0_i32_1 = arith.constant 0 : i32
    %c0_i32_2 = arith.constant 0 : i32
    return %arg0, %c0_i32, %c0_i32_0, %c0_i32_1 : i32, i32, i32, i32
  }
  func.func @transform_16(%arg0: i32) -> (i32, i32, i32, i32) {
    %c0_i32 = arith.constant 0 : i32
    %c0_i32_0 = arith.constant 0 : i32
    %c0_i32_1 = arith.constant 0 : i32
    %c0_i32_2 = arith.constant 0 : i32
    return %arg0, %c0_i32, %c0_i32_0, %c0_i32_1 : i32, i32, i32, i32
  }
}

module attributes {stable_mosaic.version = 11 : i64} {
  func.func @kernel(%arg0: i32, %arg1: memref<1x12x256xf32, #tpu.memory_space<vmem>>, %arg2: memref<2x12xbf16, #tpu.memory_space<vmem>>, %arg3: memref<2x1xf32, #tpu.memory_space<vmem>>, %arg4: memref<1x2x256xf32, #tpu.memory_space<vmem>>) attributes {dimension_semantics = [#tpu.dimension_semantics<parallel>], iteration_bounds = array<i64: 2>, scalar_prefetch = 0 : i64, scratch_operands = 0 : i64, tpu.core_type = #tpu.core_type<tc>, window_params = [{transform_indices = @transform_0, window_bounds = array<i64: 1, 12, 256>}, {pipeline_mode = #tpu.pipeline_mode<synchronous>, transform_indices = @transform_1, window_bounds = array<i64: 2, 12>}, {pipeline_mode = #tpu.pipeline_mode<synchronous>, transform_indices = @transform_2, window_bounds = array<i64: 2, 1>}, {transform_indices = @transform_3, window_bounds = array<i64: 1, 2, 256>}]} {
    %c0 = arith.constant 0 : index
    %c0_0 = arith.constant 0 : index
    %c0_1 = arith.constant 0 : index
    %0 = vector.load %arg1[%c0, %c0_0, %c0_1] : memref<1x12x256xf32, #tpu.memory_space<vmem>>, vector<1x12x256xf32>
    %1 = vector.shape_cast %0 : vector<1x12x256xf32> to vector<12x256xf32>
    %c0_2 = arith.constant 0 : index
    %c0_3 = arith.constant 0 : index
    %2 = vector.load %arg2[%c0_2, %c0_3] : memref<2x12xbf16, #tpu.memory_space<vmem>>, vector<2x12xbf16>
    %3 = arith.truncf %1 : vector<12x256xf32> to vector<12x256xbf16>
    %cst = arith.constant dense<0.000000e+00> : vector<2x256xf32>
    %4 = tpu.matmul %2, %3, %cst {dimension_numbers = #tpu.dot_dimension_numbers<[1], [0], [0], [1], [0, 0, 1, 1], [], []>} : vector<2x12xbf16>, vector<12x256xbf16>, vector<2x256xf32> -> vector<2x256xf32>
    %c0_4 = arith.constant 0 : index
    %c0_5 = arith.constant 0 : index
    %5 = vector.load %arg3[%c0_4, %c0_5] : memref<2x1xf32, #tpu.memory_space<vmem>>, vector<2x1xf32>
    %6 = vector.broadcast %5 : vector<2x1xf32> to vector<2x256xf32>
    %7 = arith.addf %4, %6 : vector<2x256xf32>
    %c0_6 = arith.constant 0 : index
    %c0_7 = arith.constant 0 : index
    %c0_8 = arith.constant 0 : index
    %8 = vector.load %arg4[%c0_6, %c0_7, %c0_8] : memref<1x2x256xf32, #tpu.memory_space<vmem>>, vector<1x2x256xf32>
    %9 = vector.shape_cast %8 : vector<1x2x256xf32> to vector<2x256xf32>
    %10 = vector.shape_cast %7 : vector<2x256xf32> to vector<1x2x256xf32>
    tpu.vector_store %arg4[%c0_6, %c0_7, %c0_8], %10 {strides = array<i32>} : memref<1x2x256xf32, #tpu.memory_space<vmem>>, vector<1x2x256xf32>,
    return
  }
  func.func @transform_0(%arg0: i32) -> (i32, i32, i32) {
    %c0_i32 = arith.constant 0 : i32
    %c0_i32_0 = arith.constant 0 : i32
    %c0_i32_1 = arith.constant 0 : i32
    return %arg0, %c0_i32, %c0_i32_0 : i32, i32, i32
  }
  func.func @transform_1(%arg0: i32) -> (i32, i32) {
    %c0_i32 = arith.constant 0 : i32
    %c0_i32_0 = arith.constant 0 : i32
    %c0_i32_1 = arith.constant 0 : i32
    return %c0_i32, %c0_i32_0 : i32, i32
  }
  func.func @transform_2(%arg0: i32) -> (i32, i32) {
    %c0_i32 = arith.constant 0 : i32
    %c0_i32_0 = arith.constant 0 : i32
    %c0_i32_1 = arith.constant 0 : i32
    return %c0_i32, %c0_i32_0 : i32, i32
  }
  func.func @transform_3(%arg0: i32) -> (i32, i32, i32) {
    %c0_i32 = arith.constant 0 : i32
    %c0_i32_0 = arith.constant 0 : i32
    %c0_i32_1 = arith.constant 0 : i32
    return %arg0, %c0_i32, %c0_i32_0 : i32, i32, i32
  }
}

</mosaic_0001>

<bundles_post_ra>
// kernel: _lambda_.33
= control target key start
LH: loop header
LB: loop body
LE: loop exit
PB: predicated region body
PF: predicated region fallthrough
CT: control target
= control target key end

     0   :  { %s580_s18 = smov 0   ;;  %s653_s0 = inlined_call_operand.vmem [shape: f32[2,12,256], index: 0, kind: input, shape index: {}]   ;;  %s654_s1 = inlined_call_operand.vmem [shape: f32[2,12], index: 1, kind: input, shape index: {}]   ;;  %s655_s2 = inlined_call_operand.vmem [shape: f32[2,1], index: 2, kind: input, shape index: {}]   ;;  %s656_s3 = inlined_call_operand.vmem [shape: f32[12,2], index: 3, kind: input, shape index: {}]   ;;  %s657_s4 = inlined_call_operand.vmem [shape: f32[12,1], index: 4, kind: input, shape index: {}]   ;;  %s658_s5 = inlined_call_operand.vmem [shape: f32[2,1,12,256], index: 5, kind: output, shape index: {}]  }
   0x1 LB: > { %s493_s19 = sadd.s32 4294967295, %s546_s18   ;;  %p497_p0 = scmp.ge.s32.totalorder %s546_s18, 1  ;;  %s546_s18 = sphi %s580_s18, %s15_s18  }
   0x2   : > { %p187_p1 = scmp.lt.s32.totalorder %s546_s18, 3 }
   0x4   : > { %p188_p2 = pnand %p497_p0, %p187_p1 }
   0x5   : > { %p215_p3 = scmp.lt.s32.totalorder (!%p188_p2), %s493_s19, 1 }
   0x6   : > { %191 = sbr.rel (%p188_p2) target bundleno = 835 (0x343), region = 40 }
   0xb   : > { %s660_s19 = smov (!%p215_p3, %s493_s19), 1  ;;  %vm245_vm0 = vcmask 1043456   ;;  %v548_v16 = vmov 256.0   ;;  %v260_v27 = vld [vmem:[%s654_s1] sm:$0x3]  ;;  %vm261_vm6 = vcmask 97280  }
   0xc   : > { %s511_s20 = sshll.u32 %s660_s19, 5  ;;  %526 = vrcp.f32 %v548_v16  ;;  %v241_v28 = vld [vmem:[%s655_s2] sm:$0x3]  ;;  %vm301_vm7 = vcmask 1041408   ;;  %v291_v32 = vld [vmem:[%s656_s3 + $0x8] sm:$0xf] }
   0xd   : > { %s219_s23 = scalar_lea.vmem %s653_s0, %s511_s20  ;;  %vm294_vm8 = vcmask 15360   ;;  %v290_v33 = vld [vmem:[%s656_s3] sm:$0xff]  ;;  %v549_v34 = vmov 0   ;;  %v293_v39 = vld [vmem:[%s657_s4 + $0x8] sm:$0xf]  ;;  %s224_s13 = scalar_lea.vmem %s658_s5, %s511_s20 }
   0xe   : > { %v227_v0 = vld [vmem:[%s219_s23 + $0x10] sm:$0xf]  ;;  %v228_v1 = vld [vmem:[%s219_s23 + $0x18] sm:$0xf]  ;;  %v225_v2 = vld [vmem:[%s219_s23] sm:$0xff]  ;;  %524 = vset.pattern.permute.xlu1 %v549_v34  ;;  %525 = vset.pattern.permute.xlu0 %v549_v34 }
   0xf   : > { %vm231_vm1 = vcmp.ge.f32.partialorder %v227_v0, 0.0  ;;  %vm232_vm2 = vcmp.ge.f32.partialorder %v228_v1, 0.0  ;;  %v235_v3 = vmul.f32 0.01, %v227_v0  ;;  %v236_v4 = vmul.f32 0.01, %v228_v1 }
  0x10   : > { %v226_v5 = vld [vmem:[%s219_s23 + $0x8] sm:$0xff]  ;;  %v233_v10 = vmul.f32 0.01, %v225_v2  ;;  %vm229_vm3 = vcmp.ge.f32.partialorder %v225_v2, 0.0  ;;  %v292_v35 = vld [vmem:[%s657_s4] sm:$0xff] }
  0x11   : > { %v596_v6 = vsel %vm231_vm1, %v227_v0, %v235_v3  ;;  %v598_v7 = vsel %vm232_vm2, %v228_v1, %v236_v4  ;;  %v234_v11 = vmul.f32 0.01, %v226_v5  ;;  %vm230_vm4 = vcmp.ge.f32.partialorder %v226_v5, 0.0 }
  0x12   : > { %v246_v8 = vsel %vm245_vm0, %v596_v6, 0.0  ;;  %v247_v9 = vsel %vm245_vm0, %v598_v7, 0.0  ;;  %v604_v13 = vsel %vm229_vm3, %v225_v2, %v233_v10  ;;  %v527_v17 = vpop.eup %526 }
  0x13   : > { %v248_v12 = vadd.f32 %v247_v9, %v246_v8  ;;  %v606_v14 = vsel %vm230_vm4, %v226_v5, %v234_v11  ;;  %v252_v18 = vmul.f32 256.0, %v527_v17  ;;  %vm256_vm5 = vweird.f32 %v527_v17 }
  0x14   : > { %v242_v15 = vadd.f32 %v606_v14, %v604_v13 }
  0x15   : > { %249 = vadd.xlane.f32.xlu0 %v248_v12  ;;  %v253_v19 = vsub.f32 1.0, %v252_v18 }
  0x17   : > { %v254_v20 = vmul.f32 %v527_v17, %v253_v19 }
  0x19   : > { %v255_v21 = vadd.f32 %v527_v17, %v254_v20 }
  0x1b   : > { %v610_v22 = vsel %vm256_vm5, %v527_v17, %v255_v21 }
  0x1d   : > { %243 = vadd.xlane.f32.xlu0 %v242_v15 }
  0x88   : > { %v250_v23 = vpop.xlane.xlu0 %249 }
  0x89   : > { %v259_v24 = vmul.f32 %v610_v22, %v250_v23 }
  0x8b   : > { %502 = vmatpush.msk.msra.mxu0 %vm245_vm0, %v259_v24 }
  0x90   : > { %v244_v25 = vpop.xlane.xlu0 %243 }
  0x91   : > { %v258_v26 = vmul.f32 %v610_v22, %v244_v25 }
  0x93   : > { %283 = vmatpush.msra.mxu0 %v258_v26 }
  0x94   : > { %503 = vmatmul.msk.f32.vlgmr.msra.gmra.mxu0 %vm261_vm6, %v260_v27 }
 0x111   : > { %v285_v29 = vpop.f32.mrf.mxu0 }
 0x112   : > { %v288_v30 = vadd.f32 %v285_v29, %v241_v28 }
 0x114   : > { %v289_v31 = vmax.f32 %v288_v30, 0.0 }
 0x116   : > { %504 = vmatpush.msk.msra.mxu1 %vm301_vm7, %v289_v31  ;;  %513 = vmatpush.msk.msra.mxu2 %vm301_vm7, %v289_v31 }
 0x117   : > { %506 = vmatmul.msk.f32.vlgmr.msra.gmra.mxu2 %vm294_vm8, %v291_v32  ;;  %505 = vmatmul.msk.f32.vlgmr.msra.gmra.mxu1 %vm294_vm8, %v290_v33 }
 0x194   : > { %v322_v36 = vpop.f32.mrf.mxu1 }
 0x195   : > { %v323_v37 = vadd.f32 %v322_v36, %v292_v35 }
 0x197   : > { %v507_v38 = vmul.f32 -1.442695, %v323_v37 }
 0x199   : > { %528 = vpow2.f32 %v507_v38 }
 0x19a   : > { %v325_v40 = vpop.f32.mrf.mxu2 }
 0x19b   : > { %v326_v41 = vadd.f32 %v325_v40, %v293_v39 }
 0x19d   : > { %v508_v42 = vmul.f32 -1.442695, %v326_v41 }
 0x19f   : > { %v529_v43 = vpop.eup %528  ;;  %530 = vpow2.f32 %v508_v42 }
 0x1a0   : > { %v334_v44 = vadd.f32 1.0, %v529_v43 }
 0x1a2   : > { %532 = vrcp.f32 %v334_v44  ;;  %vm341_vm13 = vweird.f32 %v334_v44  ;;  %v347_v61 = vand.u32 2147483648, %v334_v44  ;;  %v345_v63 = vand.u32 2147483647, %v334_v44 }
 0x1a4   : > { %v348_v0 = vor.u32 1.1754944e-38, %v347_v61  ;;  %vm346_vm1 = vcmp.eq.f32.partialorder %v345_v63, 8.507059e+37 }
 0x1a5   : > { %v531_v45 = vpop.eup %530 }
 0x1a6   : > { %v335_v46 = vadd.f32 1.0, %v531_v45 }
 0x1a8   : > { %534 = vrcp.f32 %v335_v46  ;;  %v533_v47 = vpop.eup %532  ;;  %v362_v53 = vand.u32 2147483648, %v335_v46  ;;  %v360_v55 = vand.u32 2147483647, %v335_v46  ;;  %vm356_vm10 = vweird.f32 %v335_v46 }
 0x1a9   : > { %v337_v48 = vmul.f32 %v533_v47, %v334_v44  ;;  %vm342_vm14 = vweird.f32 %v533_v47 }
 0x1aa   : > { %v363_v58 = vor.u32 1.1754944e-38, %v362_v53  ;;  %vm361_vm12 = vcmp.eq.f32.partialorder %v360_v55, 8.507059e+37  ;;  %vm343_vm15 = vmor %vm341_vm13, %vm342_vm14 }
 0x1ab   : > { %v338_v52 = vsub.f32 1.0, %v337_v48 }
 0x1ad   : > { %v339_v57 = vmul.f32 %v533_v47, %v338_v52 }
 0x1ae   : > { %v535_v49 = vpop.eup %534 }
 0x1af   : > { %v352_v50 = vmul.f32 %v535_v49, %v335_v46  ;;  %vm357_vm9 = vweird.f32 %v535_v49  ;;  %v340_v62 = vadd.f32 %v533_v47, %v339_v57 }
 0x1b0   : > { %vm358_vm11 = vmor %vm356_vm10, %vm357_vm9 }
 0x1b1   : > { %v353_v51 = vsub.f32 1.0, %v352_v50  ;;  %v344_v1 = vsel %vm343_vm15, %v533_v47, %v340_v62 }
 0x1b2   : > { %v349_v2 = vsel %vm346_vm1, %v348_v0, %v344_v1 }
 0x1b3   : > { %v354_v54 = vmul.f32 %v535_v49, %v353_v51 }
 0x1b5   : > { %v355_v56 = vadd.f32 %v535_v49, %v354_v54 }
 0x1b7   : > { %v359_v59 = vsel %vm358_vm11, %v535_v49, %v355_v56 }
 0x1b8   : > { %v364_v60 = vsel %vm361_vm12, %v363_v58, %v359_v59 }
 0x1b9   : > { %373 = vperm.xlu1 %524, %v364_v60  }
 0x1c1   : > { %368 = vperm.xlu1 %524, %v349_v2  }
 0x22b   : > { %v374_v3 = vpop.permute.xlu1 %373 }
 0x22c   : > { %v378_v4 = vmul.f32 %v374_v3, %v596_v6  ;;  %v379_v5 = vmul.f32 %v374_v3, %v598_v7 }
 0x22e   : > { %v383_v8 = vsel %vm245_vm0, %v378_v4, 0.0  ;;  %v384_v9 = vsel %vm245_vm0, %v379_v5, 0.0 }
 0x22f   : > { %v385_v10 = vadd.f32 %v384_v9, %v383_v8 }
 0x231   : > { %386 = vadd.xlane.f32.xlu2 %v385_v10 }
 0x233   : > { %v369_v11 = vpop.permute.xlu1 %368 }
 0x234   : > { %v376_v12 = vmul.f32 %v369_v11, %v604_v13  ;;  %v377_v15 = vmul.f32 %v369_v11, %v606_v14 }
 0x236   : > { %v380_v16 = vadd.f32 %v377_v15, %v376_v12 }
 0x239   : > { %381 = vadd.xlane.f32.xlu2 %v380_v16 }
 0x2a4   : > { %v387_v17 = vpop.xlane.xlu2 %386 }
 0x2a5   : > { %v389_v18 = vmul.f32 %v387_v17, %v610_v22 }
 0x2a7   : > { %v392_v19 = vsub.f32 %v378_v4, %v389_v18  ;;  %v393_v6 = vsub.f32 %v379_v5, %v389_v18 }
 0x2a9   : > { %v396_v20 = vmul.f32 %v392_v19, %v392_v19  ;;  %v397_v7 = vmul.f32 %v393_v6, %v393_v6 }
 0x2ab   : > { %v401_v21 = vsel %vm245_vm0, %v396_v20, 0.0  ;;  %v402_v23 = vsel %vm245_vm0, %v397_v7, 0.0 }
 0x2ac   : > { %v382_v24 = vpop.xlane.xlu2 %381  ;;  %v403_v25 = vadd.f32 %v402_v23, %v401_v21 }
 0x2ad   : > { %v388_v26 = vmul.f32 %v382_v24, %v610_v22 }
 0x2ae   : > { %404 = vadd.xlane.f32.xlu1 %v403_v25 }
 0x2af   : > { %v390_v13 = vsub.f32 %v376_v12, %v388_v26  ;;  %v391_v14 = vsub.f32 %v377_v15, %v388_v26 }
 0x2b1   : > { %v394_v27 = vmul.f32 %v390_v13, %v390_v13  ;;  %v395_v28 = vmul.f32 %v391_v14, %v391_v14 }
 0x2b3   : > { %v398_v29 = vadd.f32 %v395_v28, %v394_v27 }
 0x2b5   : > { %399 = vadd.xlane.f32.xlu0 %v398_v29 }
 0x321   : > { %v405_v30 = vpop.xlane.xlu1 %404 }
 0x322   : > { %v407_v31 = vmul.f32 %v405_v30, %v610_v22 }
 0x324   : > { %v409_v32 = vadd.f32 1e-05, %v407_v31 }
 0x326   : > { %536 = vrsqrt.f32 %v409_v32  ;;  %vm426_vm2 = vweird.f32 %v409_v32 }
 0x328   : > { %v400_v33 = vpop.xlane.xlu0 %399 }
 0x329   : > { %v406_v34 = vmul.f32 %v400_v33, %v610_v22 }
 0x32b   : > { %v408_v35 = vadd.f32 1e-05, %v406_v34 }
 0x32c   : > { %v537_v36 = vpop.eup %536 }
 0x32d   : > { %v421_v37 = vmul.f32 %v537_v36, %v409_v32  ;;  %538 = vrsqrt.f32 %v408_v35  ;;  %vm427_vm0 = vweird.f32 %v537_v36  ;;  %vm416_vm5 = vweird.f32 %v408_v35 }
 0x32e   : > { %vm428_vm3 = vmor %vm426_vm2, %vm427_vm0 }
 0x32f   : > { %v422_v38 = vmul.f32 %v537_v36, %v421_v37 }
 0x331   : > { %v423_v39 = vmul.f32 0.5, %v422_v38 }
 0x333   : > { %v539_v40 = vpop.eup %538  ;;  %v424_v41 = vsub.f32 1.5, %v423_v39 }
 0x334   : > { %v411_v42 = vmul.f32 %v539_v40, %v408_v35  ;;  %vm417_vm4 = vweird.f32 %v539_v40 }
 0x335   : > { %v425_v43 = vmul.f32 %v537_v36, %v424_v41  ;;  %vm418_vm6 = vmor %vm416_vm5, %vm417_vm4 }
 0x336   : > { %v412_v44 = vmul.f32 %v539_v40, %v411_v42 }
 0x337   : > { %v429_v22 = vsel %vm428_vm3, %v537_v36, %v425_v43 }
 0x338   : > { %v432_v45 = vmul.f32 %v429_v22, %v392_v19  ;;  %v433_v46 = vmul.f32 %v429_v22, %v393_v6  ;;  %v413_v47 = vmul.f32 0.5, %v412_v44 }
 0x33a   : > { %436 = vst [vmem:[%s224_s13 + $0x10] sm:$0xf] %v432_v45  ;;  %v414_v48 = vsub.f32 1.5, %v413_v47 }
 0x33b   : > { %437 = vst [vmem:[%s224_s13 + $0x18] sm:$0xf] %v433_v46 }
 0x33c   : > { %v415_v49 = vmul.f32 %v539_v40, %v414_v48 }
 0x33e   : > { %v419_v50 = vsel %vm418_vm6, %v539_v40, %v415_v49 }
 0x33f   : > { %v430_v51 = vmul.f32 %v419_v50, %v390_v13  ;;  %v431_v52 = vmul.f32 %v419_v50, %v391_v14 }
 0x341   : > { %434 = vst [vmem:[%s224_s13] sm:$0xff] %v430_v51 }
 0x342   : > { %435 = vst [vmem:[%s224_s13 + $0x8] sm:$0xff] %v431_v52 }
 0x343 PF: > { %s15_s18 = sadd.s32 1, %s546_s18  }
 0x344   : > { %p12_p4 = scmp.ge.s32.totalorder %s15_s18, 4  }
 0x346   :  { %14 = sbr.rel (!%p12_p4) target bundleno = 1 (0x1), region = 70 }

// kernel: _lambda_.32
= control target key start
LH: loop header
LB: loop body
LE: loop exit
PB: predicated region body
PF: predicated region fallthrough
CT: control target
= control target key end

     0   :  { %s318_s9 = smov 0   ;;  %s345_s0 = inlined_call_operand.vmem [shape: f32[2,27,256], index: 0, kind: input, shape index: {}]   ;;  %s346_s1 = inlined_call_operand.vmem [shape: bf16[12,27], index: 1, kind: input, shape index: {}]   ;;  %s347_s2 = inlined_call_operand.vmem [shape: f32[2,12,256], index: 2, kind: output, shape index: {}]  }
   0x1 LB: > { %s265_s10 = sadd.s32 4294967295, %s300_s9   ;;  %p269_p0 = scmp.ge.s32.totalorder %s300_s9, 1  ;;  %s300_s9 = sphi %s318_s9, %s12_s9  }
   0x2   : > { %p112_p1 = scmp.lt.s32.totalorder %s300_s9, 3 }
   0x4   : > { %p113_p2 = pnand %p269_p0, %p112_p1 }
   0x5   : > { %p134_p3 = scmp.lt.s32.totalorder (!%p113_p2), %s265_s10, 1 }
   0x6   : > { %116 = sbr.rel (%p113_p2) target bundleno = 162 (0xa2), region = 28 }
   0xb   : > { %vm168_vm0 = vcmask 1044480   ;;  %s349_s10 = smov (!%p134_p3, %s265_s10), 1  ;;  %vm169_vm1 = vcmask 1045504   ;;  %v302_v0 = vmov 65535   ;;  %v276_v16 = vld [vmem:[%s346_s1] sm:$0xf] }
   0xc   : > { %v170_v1 = vsel %vm168_vm0, 4294967295, %v302_v0  ;;  %s282_s11 = sshll.u32 %s349_s10, 6  ;;  %v284_v17 = vld [vmem:[%s346_s1] sm:$0x30]  ;;  %vm164_vm2 = vcmask 220160   ;;  %s283_s19 = sshll.u32 %s349_s10, 5 }
   0xd   : > { %s138_s14 = scalar_lea.vmem %s345_s0, %s282_s11  ;;  %v171_v4 = vsel %vm169_vm1, %v170_v1, 0  ;;  %v277_v19 = vor.u32 %v284_v17, %v276_v16  ;;  %s143_s22 = scalar_lea.vmem %s347_s2, %s283_s19 }
   0xe   : > { %v149_v2 = vld [vmem:[%s138_s14 + $0x20] sm:$0xff]  ;;  %v151_v3 = vld [vmem:[%s138_s14 + $0x30] sm:$0x7]  ;;  %v150_v5 = vld [vmem:[%s138_s14 + $0x28] sm:$0xff] }
   0xf   : > { %v157_v6 = vpack.c.bf16 %v151_v3, %v149_v2  ;;  %v152_v7 = vld [vmem:[%s138_s14 + $0x38] sm:$0x7]  ;;  %v145_v9 = vld [vmem:[%s138_s14] sm:$0xff]  ;;  %v147_v10 = vld [vmem:[%s138_s14 + $0x10] sm:$0xff] }
  0x10   : > { %v158_v8 = vpack.c.bf16 %v152_v7, %v150_v5  ;;  %v146_v12 = vld [vmem:[%s138_s14 + $0x8] sm:$0xff]  ;;  %v148_v13 = vld [vmem:[%s138_s14 + $0x18] sm:$0xff]  ;;  %v155_v15 = vpack.c.bf16 %v147_v10, %v145_v9 }
  0x11   : > { %v173_v11 = vand.u32 %v171_v4, %v157_v6  ;;  %v156_v18 = vpack.c.bf16 %v148_v13, %v146_v12 }
  0x12   : > { %v176_v14 = vand.u32 %v171_v4, %v158_v8 }
  0x13   : > { %184 = vmatpush.bf16.msra.mxu0 %v173_v11 }
  0x14   : > { %198 = vmatpush.bf16.msra.mxu1 %v176_v14 }
  0x17   : > { %185 = vmatpush.bf16.msra.mxu0 %v155_v15 }
  0x18   : > { %199 = vmatpush.bf16.msra.mxu1 %v156_v18 }
  0x1a   : > { %278 = vmatmul.msk.bf16.vlgmr.msra.gmra.mxu0 %vm164_vm2, %v277_v19 }
  0x1b   : > { %279 = vmatmul.msk.bf16.vlgmr.msra.gmra.mxu1 %vm164_vm2, %v277_v19 }
  0x97   : > { %v187_v20 = vpop.f32.mrf.mxu0 }
  0x98   : > { %206 = vst [vmem:[%s143_s22] sm:$0xff] %v187_v20  ;;  %v201_v21 = vpop.f32.mrf.mxu1 }
  0x99   : > { %207 = vst [vmem:[%s143_s22 + $0x8] sm:$0xff] %v201_v21 }
  0x9f   : > { %v189_v22 = vpop.f32.mrf.mxu0 }
  0xa0   : > { %208 = vst [vmem:[%s143_s22 + $0x10] sm:$0xf] %v189_v22  ;;  %v203_v23 = vpop.f32.mrf.mxu1 }
  0xa1   : > { %209 = vst [vmem:[%s143_s22 + $0x18] sm:$0xf] %v203_v23 }
  0xa2 PF: > { %s12_s9 = sadd.s32 1, %s300_s9  }
  0xa3   : > { %p9_p4 = scmp.ge.s32.totalorder %s12_s9, 4  }
  0xa5   :  { %11 = sbr.rel (!%p9_p4) target bundleno = 1 (0x1), region = 58 }

// kernel: _lambda_.34
= control target key start
LH: loop header
LB: loop body
LE: loop exit
PB: predicated region body
PF: predicated region fallthrough
CT: control target
= control target key end

     0   :  { %s342_s9 = smov 0   ;;  %s368_s0 = inlined_call_operand.vmem [shape: f32[2,12,256], index: 0, kind: input, shape index: {}]   ;;  %s369_s1 = inlined_call_operand.vmem [shape: bf16[8,12], index: 1, kind: input, shape index: {}]   ;;  %s370_s2 = inlined_call_operand.vmem [shape: f32[2,8,256], index: 2, kind: output, shape index: {}]  }
   0x1 LB: > { %s290_s10 = sadd.s32 4294967295, %s324_s9   ;;  %p294_p0 = scmp.ge.s32.totalorder %s324_s9, 1  ;;  %s324_s9 = sphi %s342_s9, %s12_s9  }
   0x2   : > { %p112_p1 = scmp.lt.s32.totalorder %s324_s9, 3 }
   0x4   : > { %p113_p2 = pnand %p294_p0, %p112_p1 }
   0x5   : > { %p134_p3 = scmp.lt.s32.totalorder (!%p113_p2), %s290_s10, 1 }
   0x6   : > { %116 = sbr.rel (%p113_p2) target bundleno = 420 (0x1a4), region = 28 }
   0xb   : > { %s372_s10 = smov (!%p134_p3, %s290_s10), 1  ;;  %vm168_vm2 = vcmask 1045504   ;;  %v161_v15 = vld [vmem:[%s369_s1] sm:$0xf]  ;;  %vm164_vm5 = vcmask 97280   ;;  %v326_v22 = vmov 256.0  }
   0xc   : > { %s303_s11 = sshll.u32 %s372_s10, 5  ;;  %314 = vrcp.f32 %v326_v22  ;;  %s304_s17 = sshll.u32 %s372_s10, 4 }
   0xd   : > { %s138_s14 = scalar_lea.vmem %s368_s0, %s303_s11  ;;  %s143_s20 = scalar_lea.vmem %s370_s2, %s304_s17 }
   0xe   : > { %v145_v0 = vld [vmem:[%s138_s14] sm:$0xff]  ;;  %v147_v1 = vld [vmem:[%s138_s14 + $0x10] sm:$0xf]  ;;  %v146_v2 = vld [vmem:[%s138_s14 + $0x8] sm:$0xff] }
   0xf   : > { %vm149_vm0 = vcmp.ge.f32.partialorder %v145_v0, 0.0  ;;  %vm151_vm1 = vcmp.ge.f32.partialorder %v147_v1, 0.0  ;;  %v153_v3 = vmul.f32 0.01, %v145_v0  ;;  %v155_v4 = vmul.f32 0.01, %v147_v1 }
  0x10   : > { %v148_v5 = vld [vmem:[%s138_s14 + $0x18] sm:$0xf]  ;;  %vm150_vm3 = vcmp.ge.f32.partialorder %v146_v2, 0.0  ;;  %v154_v6 = vmul.f32 0.01, %v146_v2 }
  0x11   : > { %v157_v7 = vsel %vm149_vm0, %v145_v0, %v153_v3  ;;  %v159_v8 = vsel %vm151_vm1, %v147_v1, %v155_v4  ;;  %vm152_vm4 = vcmp.ge.f32.partialorder %v148_v5, 0.0  ;;  %v156_v9 = vmul.f32 0.01, %v148_v5 }
  0x12   : > { %v162_v10 = vpack.c.bf16 %v159_v8, %v157_v7  ;;  %v158_v11 = vsel %vm150_vm3, %v146_v2, %v154_v6  ;;  %v315_v23 = vpop.eup %314 }
  0x13   : > { %v160_v12 = vsel %vm152_vm4, %v148_v5, %v156_v9  ;;  %v205_v24 = vmul.f32 256.0, %v315_v23  ;;  %vm209_vm6 = vweird.f32 %v315_v23 }
  0x14   : > { %v170_v13 = vsel %vm168_vm2, %v162_v10, 0  ;;  %v163_v14 = vpack.c.bf16 %v160_v12, %v158_v11 }
  0x15   : > { %182 = vmatpush.bf16.msra.mxu0 %v170_v13  ;;  %v206_v25 = vsub.f32 1.0, %v205_v24 }
  0x16   : > { %v173_v16 = vsel %vm168_vm2, %v163_v14, 0 }
  0x17   : > { %195 = vmatpush.bf16.msra.mxu1 %v173_v16  ;;  %v207_v26 = vmul.f32 %v315_v23, %v206_v25 }
  0x18   : > { %299 = vmatmul.msk.bf16.vlgmr.msra.gmra.mxu0 %vm164_vm5, %v161_v15 }
  0x19   : > { %v208_v27 = vadd.f32 %v315_v23, %v207_v26 }
  0x1a   : > { %300 = vmatmul.msk.bf16.vlgmr.msra.gmra.mxu1 %vm164_vm5, %v161_v15 }
  0x1b   : > { %v210_v28 = vsel %vm209_vm6, %v315_v23, %v208_v27 }
  0x95   : > { %v184_v17 = vpop.f32.mrf.mxu0 }
  0x97   : > { %v197_v18 = vpop.f32.mrf.mxu1 }
  0x98   : > { %v201_v19 = vadd.f32 %v197_v18, %v184_v17 }
  0x9a   : > { %202 = vadd.xlane.f32.xlu0 %v201_v19 }
  0x9d   : > { %v186_v20 = vpop.f32.mrf.mxu0 }
  0x9f   : > { %v199_v21 = vpop.f32.mrf.mxu1 }
 0x10d   : > { %v203_v29 = vpop.xlane.xlu0 %202 }
 0x10e   : > { %v211_v30 = vmul.f32 %v210_v28, %v203_v29 }
 0x110   : > { %v212_v31 = vsub.f32 %v184_v17, %v211_v30  ;;  %v213_v32 = vsub.f32 %v197_v18, %v211_v30 }
 0x112   : > { %v214_v33 = vmul.f32 %v212_v31, %v212_v31  ;;  %v215_v34 = vmul.f32 %v213_v32, %v213_v32 }
 0x114   : > { %v216_v35 = vadd.f32 %v215_v34, %v214_v33 }
 0x116   : > { %217 = vadd.xlane.f32.xlu0 %v216_v35 }
 0x189   : > { %v218_v36 = vpop.xlane.xlu0 %217 }
 0x18a   : > { %v219_v37 = vmul.f32 %v218_v36, %v210_v28 }
 0x18c   : > { %v220_v38 = vadd.f32 1e-05, %v219_v37 }
 0x18e   : > { %316 = vrsqrt.f32 %v220_v38  ;;  %vm227_vm8 = vweird.f32 %v220_v38 }
 0x194   : > { %v317_v39 = vpop.eup %316 }
 0x195   : > { %v222_v40 = vmul.f32 %v317_v39, %v220_v38  ;;  %vm228_vm7 = vweird.f32 %v317_v39 }
 0x196   : > { %vm229_vm9 = vmor %vm227_vm8, %vm228_vm7 }
 0x197   : > { %v223_v41 = vmul.f32 %v317_v39, %v222_v40 }
 0x199   : > { %v224_v42 = vmul.f32 0.5, %v223_v41 }
 0x19b   : > { %v225_v43 = vsub.f32 1.5, %v224_v42 }
 0x19d   : > { %v226_v44 = vmul.f32 %v317_v39, %v225_v43 }
 0x19f   : > { %v230_v45 = vsel %vm229_vm9, %v317_v39, %v226_v44 }
 0x1a0   : > { %v231_v46 = vmul.f32 %v230_v45, %v212_v31  ;;  %v232_v47 = vmul.f32 %v230_v45, %v213_v32 }
 0x1a2   : > { %233 = vst [vmem:[%s143_s20] sm:$0xff] %v231_v46 }
 0x1a3   : > { %234 = vst [vmem:[%s143_s20 + $0x8] sm:$0xff] %v232_v47 }
 0x1a4 PF: > { %s12_s9 = sadd.s32 1, %s324_s9  }
 0x1a5   : > { %p9_p4 = scmp.ge.s32.totalorder %s12_s9, 4  }
 0x1a7   :  { %11 = sbr.rel (!%p9_p4) target bundleno = 1 (0x1), region = 58 }

// kernel: _lambda_.38
= control target key start
LH: loop header
LB: loop body
LE: loop exit
PB: predicated region body
PF: predicated region fallthrough
CT: control target
= control target key end

     0   :  { %s451_s15 = smov 0   ;;  %s488_s0 = inlined_call_operand.vmem [shape: f32[2,8,64], index: 0, kind: input, shape index: {}]   ;;  %s489_s1 = inlined_call_operand.vmem [shape: f32[2,8,64], index: 1, kind: input, shape index: {}]   ;;  %s490_s2 = inlined_call_operand.vmem [shape: bf16[4,8], index: 2, kind: input, shape index: {}]   ;;  %s491_s3 = inlined_call_operand.vmem [shape: bf16[4,8], index: 3, kind: input, shape index: {}]   ;;  %s492_s4 = inlined_call_operand.vmem [shape: f32[2,2,4,64], index: 4, kind: output, shape index: {}]  }
   0x1 LB: > { %s387_s16 = sadd.s32 4294967295, %s423_s15   ;;  %p391_p0 = scmp.ge.s32.totalorder %s423_s15, 1  ;;  %s423_s15 = sphi %s451_s15, %s14_s15  }
   0x2   : > { %p170_p1 = scmp.lt.s32.totalorder %s423_s15, 3 }
   0x4   : > { %p171_p2 = pnand %p391_p0, %p170_p1 }
   0x5   : > { %p199_p3 = scmp.lt.s32.totalorder (!%p171_p2), %s387_s16, 1 }
   0x6   : > { %174 = sbr.rel (%p171_p2) target bundleno = 423 (0x1a7), region = 36 }
   0xb   : > { %s494_s16 = smov (!%p199_p3, %s387_s16), 1  ;;  %vm228_vm2 = vcmask 1043456   ;;  %v223_v10 = vld [vmem:[%s490_s2] sm:$0x3]  ;;  %vm224_vm3 = vcmask 64512   ;;  %vm265_vm4 = vcmask 519168  }
   0xc   : > { %s459_s17 = sshll.u32 %s494_s16, 3  ;;  %v245_v11 = vld [vmem:[%s491_s3] sm:$0x3]  ;;  %v425_v18 = vmov 64.0  }
   0xd   : > { %s202_s20 = scalar_lea.vmem %s488_s0, %s459_s17  ;;  %s206_s23 = scalar_lea.vmem %s489_s1, %s459_s17  ;;  %411 = vrcp.f32 %v425_v18 }
   0xe   : > { %v213_v0 = vld [vmem:[%s202_s20] sm:$0xff]  ;;  %s211_s30 = scalar_lea.vmem %s492_s4, %s459_s17 }
   0xf   : > { %vm214_vm0 = vcmp.ge.f32.partialorder %v213_v0, 0.0  ;;  %v215_v1 = vmul.f32 0.01, %v213_v0  ;;  %v218_v2 = vld [vmem:[%s206_s23] sm:$0xff] }
  0x10   : > { %vm219_vm1 = vcmp.ge.f32.partialorder %v218_v2, 0.0  ;;  %v220_v3 = vmul.f32 0.01, %v218_v2 }
  0x11   : > { %v216_v4 = vsel %vm214_vm0, %v213_v0, %v215_v1 }
  0x12   : > { %v217_v5 = vpack.c.bf16 %v216_v4, %v216_v4  ;;  %v221_v6 = vsel %vm219_vm1, %v218_v2, %v220_v3 }
  0x13   : > { %v222_v7 = vpack.c.bf16 %v221_v6, %v221_v6  ;;  %v412_v19 = vpop.eup %411 }
  0x14   : > { %v230_v8 = vsel %vm228_vm2, %v217_v5, 0  ;;  %v270_v20 = vmul.f32 64.0, %v412_v19  ;;  %vm274_vm5 = vweird.f32 %v412_v19 }
  0x15   : > { %239 = vmatpush.bf16.msra.mxu0 %v230_v8  ;;  %v250_v9 = vsel %vm228_vm2, %v222_v7, 0 }
  0x16   : > { %259 = vmatpush.bf16.msra.mxu1 %v250_v9  ;;  %v271_v21 = vsub.f32 1.0, %v270_v20 }
  0x18   : > { %396 = vmatmul.msk.bf16.vlgmr.msra.gmra.mxu0 %vm224_vm3, %v223_v10  ;;  %v272_v22 = vmul.f32 %v412_v19, %v271_v21 }
  0x19   : > { %397 = vmatmul.msk.bf16.vlgmr.msra.gmra.mxu1 %vm224_vm3, %v245_v11 }
  0x1a   : > { %v273_v23 = vadd.f32 %v412_v19, %v272_v22 }
  0x1c   : > { %v275_v24 = vsel %vm274_vm5, %v412_v19, %v273_v23 }
  0x95   : > { %v241_v12 = vpop.f32.mrf.mxu0 }
  0x96   : > { %v261_v13 = vpop.f32.mrf.mxu1  ;;  %v266_v14 = vsel %vm265_vm4, %v241_v12, 0.0 }
  0x97   : > { %267 = vadd.xlane.f32.xlu0 %v266_v14  ;;  %v296_v15 = vsel %vm265_vm4, %v261_v13, 0.0 }
  0x9d   : > { %v243_v16 = vpop.f32.mrf.mxu0 }
  0x9e   : > { %v263_v17 = vpop.f32.mrf.mxu1 }
  0x9f   : > { %297 = vadd.xlane.f32.xlu0 %v296_v15 }
 0x10a   : > { %v268_v25 = vpop.xlane.xlu0 %267 }
 0x10b   : > { %v276_v26 = vmul.f32 %v275_v24, %v268_v25 }
 0x10d   : > { %v277_v27 = vsub.f32 %v241_v12, %v276_v26 }
 0x10f   : > { %v278_v28 = vmul.f32 %v277_v27, %v277_v27 }
 0x111   : > { %v279_v29 = vsel %vm265_vm4, %v278_v28, 0.0 }
 0x112   : > { %280 = vadd.xlane.f32.xlu1 %v279_v29  ;;  %v298_v30 = vpop.xlane.xlu0 %297 }
 0x113   : > { %v299_v31 = vmul.f32 %v298_v30, %v275_v24 }
 0x115   : > { %v300_v32 = vsub.f32 %v261_v13, %v299_v31 }
 0x117   : > { %v301_v33 = vmul.f32 %v300_v32, %v300_v32 }
 0x119   : > { %v302_v34 = vsel %vm265_vm4, %v301_v33, 0.0 }
 0x11a   : > { %303 = vadd.xlane.f32.xlu1 %v302_v34 }
 0x185   : > { %v281_v35 = vpop.xlane.xlu1 %280 }
 0x186   : > { %v282_v36 = vmul.f32 %v281_v35, %v275_v24 }
 0x188   : > { %v283_v37 = vadd.f32 1e-05, %v282_v36 }
 0x18a   : > { %413 = vrsqrt.f32 %v283_v37  ;;  %vm290_vm7 = vweird.f32 %v283_v37 }
 0x18d   : > { %v304_v38 = vpop.xlane.xlu1 %303 }
 0x18e   : > { %v305_v39 = vmul.f32 %v304_v38, %v275_v24 }
 0x190   : > { %v414_v40 = vpop.eup %413  ;;  %v306_v41 = vadd.f32 1e-05, %v305_v39 }
 0x191   : > { %v285_v42 = vmul.f32 %v414_v40, %v283_v37  ;;  %vm291_vm6 = vweird.f32 %v414_v40 }
 0x192   : > { %415 = vrsqrt.f32 %v306_v41  ;;  %vm292_vm8 = vmor %vm290_vm7, %vm291_vm6  ;;  %vm313_vm10 = vweird.f32 %v306_v41 }
 0x193   : > { %v286_v43 = vmul.f32 %v414_v40, %v285_v42 }
 0x195   : > { %v287_v44 = vmul.f32 0.5, %v286_v43 }
 0x197   : > { %v288_v45 = vsub.f32 1.5, %v287_v44 }
 0x198   : > { %v416_v46 = vpop.eup %415 }
 0x199   : > { %v289_v47 = vmul.f32 %v414_v40, %v288_v45  ;;  %v308_v48 = vmul.f32 %v416_v46, %v306_v41  ;;  %vm314_vm9 = vweird.f32 %v416_v46 }
 0x19a   : > { %vm315_vm11 = vmor %vm313_vm10, %vm314_vm9 }
 0x19b   : > { %v293_v49 = vsel %vm292_vm8, %v414_v40, %v289_v47  ;;  %v309_v50 = vmul.f32 %v416_v46, %v308_v48 }
 0x19c   : > { %v294_v51 = vmul.f32 %v293_v49, %v277_v27 }
 0x19d   : > { %v310_v52 = vmul.f32 0.5, %v309_v50 }
 0x19e   : > { %295 = vst.msk [vmem:[%s211_s30] sm:$0xf] %vm265_vm4, %v294_v51 }
 0x19f   : > { %v311_v53 = vsub.f32 1.5, %v310_v52 }
 0x1a1   : > { %v312_v54 = vmul.f32 %v416_v46, %v311_v53 }
 0x1a3   : > { %v316_v55 = vsel %vm315_vm11, %v416_v46, %v312_v54 }
 0x1a4   : > { %v317_v56 = vmul.f32 %v316_v55, %v300_v32 }
 0x1a6   : > { %398 = vst.msk [vmem:[%s211_s30 + $0x4] sm:$0xf] %vm265_vm4, %v317_v56 }
 0x1a7 PF: > { %s14_s15 = sadd.s32 1, %s423_s15  }
 0x1a8   : > { %p11_p4 = scmp.ge.s32.totalorder %s14_s15, 4  }
 0x1aa   :  { %13 = sbr.rel (!%p11_p4) target bundleno = 1 (0x1), region = 70 }

// kernel: _lambda_.43
= control target key start
LH: loop header
LB: loop body
LE: loop exit
PB: predicated region body
PF: predicated region fallthrough
CT: control target
= control target key end

     0   :  { %s469_s15 = smov 0   ;;  %s507_s0 = inlined_call_operand.vmem [shape: f32[2,12,64], index: 0, kind: input, shape index: {}]   ;;  %s508_s1 = inlined_call_operand.vmem [shape: f32[2,12,64], index: 1, kind: input, shape index: {}]   ;;  %s509_s2 = inlined_call_operand.vmem [shape: bf16[4,12], index: 2, kind: input, shape index: {}]   ;;  %s510_s3 = inlined_call_operand.vmem [shape: bf16[4,12], index: 3, kind: input, shape index: {}]   ;;  %s511_s4 = inlined_call_operand.vmem [shape: f32[2,2,4,64], index: 4, kind: output, shape index: {}]  }
   0x1 LB: > { %s401_s16 = sadd.s32 4294967295, %s441_s15   ;;  %p405_p0 = scmp.ge.s32.totalorder %s441_s15, 1  ;;  %s441_s15 = sphi %s469_s15, %s14_s15  }
   0x2   : > { %p172_p1 = scmp.lt.s32.totalorder %s441_s15, 3 }
   0x4   : > { %p173_p2 = pnand %p405_p0, %p172_p1 }
   0x5   : > { %p203_p3 = scmp.lt.s32.totalorder (!%p173_p2), %s401_s16, 1 }
   0x6   : > { %176 = sbr.rel (%p173_p2) target bundleno = 423 (0x1a7), region = 36 }
   0xb   : > { %s513_s16 = smov (!%p203_p3, %s401_s16), 1  ;;  %vm242_vm2 = vcmask 1045504   ;;  %v237_v15 = vld [vmem:[%s509_s2] sm:$0x3]  ;;  %vm238_vm5 = vcmask 97280   ;;  %vm279_vm6 = vcmask 519168  }
   0xc   : > { %s417_s17 = sshll.u32 %s513_s16, 4  ;;  %v259_v17 = vld [vmem:[%s510_s3] sm:$0x3]  ;;  %v443_v24 = vmov 64.0   ;;  %s419_s28 = sshll.u32 %s513_s16, 3 }
   0xd   : > { %s207_s20 = scalar_lea.vmem %s507_s0, %s417_s17  ;;  %s212_s23 = scalar_lea.vmem %s508_s1, %s417_s17  ;;  %429 = vrcp.f32 %v443_v24 }
   0xe   : > { %v219_v0 = vld [vmem:[%s207_s20] sm:$0xff]  ;;  %v220_v1 = vld [vmem:[%s207_s20 + $0x8] sm:$0xf]  ;;  %s217_s5 = scalar_lea.vmem %s511_s4, %s419_s28 }
   0xf   : > { %vm221_vm0 = vcmp.ge.f32.partialorder %v219_v0, 0.0  ;;  %vm222_vm1 = vcmp.ge.f32.partialorder %v220_v1, 0.0  ;;  %v223_v2 = vmul.f32 0.01, %v219_v0  ;;  %v224_v3 = vmul.f32 0.01, %v220_v1 }
  0x10   : > { %v228_v4 = vld [vmem:[%s212_s23] sm:$0xff]  ;;  %v229_v5 = vld [vmem:[%s212_s23 + $0x8] sm:$0xf] }
  0x11   : > { %v225_v6 = vsel %vm221_vm0, %v219_v0, %v223_v2  ;;  %v226_v7 = vsel %vm222_vm1, %v220_v1, %v224_v3  ;;  %vm230_vm3 = vcmp.ge.f32.partialorder %v228_v4, 0.0  ;;  %vm231_vm4 = vcmp.ge.f32.partialorder %v229_v5, 0.0 }
  0x12   : > { %v227_v8 = vpack.c.bf16 %v226_v7, %v225_v6  ;;  %v232_v9 = vmul.f32 0.01, %v228_v4  ;;  %v233_v10 = vmul.f32 0.01, %v229_v5 }
  0x13   : > { %v430_v25 = vpop.eup %429 }
  0x14   : > { %v244_v11 = vsel %vm242_vm2, %v227_v8, 0  ;;  %v234_v12 = vsel %vm230_vm3, %v228_v4, %v232_v9  ;;  %v235_v13 = vsel %vm231_vm4, %v229_v5, %v233_v10  ;;  %v284_v26 = vmul.f32 64.0, %v430_v25 }
  0x15   : > { %253 = vmatpush.bf16.msra.mxu0 %v244_v11  ;;  %v236_v14 = vpack.c.bf16 %v235_v13, %v234_v12  ;;  %vm288_vm7 = vweird.f32 %v430_v25 }
  0x16   : > { %v285_v27 = vsub.f32 1.0, %v284_v26 }
  0x17   : > { %v264_v16 = vsel %vm242_vm2, %v236_v14, 0 }
  0x18   : > { %273 = vmatpush.bf16.msra.mxu1 %v264_v16  ;;  %412 = vmatmul.msk.bf16.vlgmr.msra.gmra.mxu0 %vm238_vm5, %v237_v15  ;;  %v286_v28 = vmul.f32 %v430_v25, %v285_v27 }
  0x1a   : > { %v287_v29 = vadd.f32 %v430_v25, %v286_v28 }
  0x1b   : > { %413 = vmatmul.msk.bf16.vlgmr.msra.gmra.mxu1 %vm238_vm5, %v259_v17 }
  0x1c   : > { %v289_v30 = vsel %vm288_vm7, %v430_v25, %v287_v29 }
  0x95   : > { %v255_v18 = vpop.f32.mrf.mxu0 }
  0x96   : > { %v280_v19 = vsel %vm279_vm6, %v255_v18, 0.0 }
  0x97   : > { %281 = vadd.xlane.f32.xlu0 %v280_v19 }
  0x98   : > { %v275_v20 = vpop.f32.mrf.mxu1 }
  0x99   : > { %v310_v21 = vsel %vm279_vm6, %v275_v20, 0.0 }
  0x9d   : > { %v257_v22 = vpop.f32.mrf.mxu0 }
  0x9f   : > { %311 = vadd.xlane.f32.xlu0 %v310_v21 }
  0xa0   : > { %v277_v23 = vpop.f32.mrf.mxu1 }
 0x10a   : > { %v282_v31 = vpop.xlane.xlu0 %281 }
 0x10b   : > { %v290_v32 = vmul.f32 %v289_v30, %v282_v31 }
 0x10d   : > { %v291_v33 = vsub.f32 %v255_v18, %v290_v32 }
 0x10f   : > { %v292_v34 = vmul.f32 %v291_v33, %v291_v33 }
 0x111   : > { %v293_v35 = vsel %vm279_vm6, %v292_v34, 0.0 }
 0x112   : > { %294 = vadd.xlane.f32.xlu1 %v293_v35  ;;  %v312_v36 = vpop.xlane.xlu0 %311 }
 0x113   : > { %v313_v37 = vmul.f32 %v312_v36, %v289_v30 }
 0x115   : > { %v314_v38 = vsub.f32 %v275_v20, %v313_v37 }
 0x117   : > { %v315_v39 = vmul.f32 %v314_v38, %v314_v38 }
 0x119   : > { %v316_v40 = vsel %vm279_vm6, %v315_v39, 0.0 }
 0x11a   : > { %317 = vadd.xlane.f32.xlu1 %v316_v40 }
 0x185   : > { %v295_v41 = vpop.xlane.xlu1 %294 }
 0x186   : > { %v296_v42 = vmul.f32 %v295_v41, %v289_v30 }
 0x188   : > { %v297_v43 = vadd.f32 1e-05, %v296_v42 }
 0x18a   : > { %431 = vrsqrt.f32 %v297_v43  ;;  %vm304_vm9 = vweird.f32 %v297_v43 }
 0x18d   : > { %v318_v44 = vpop.xlane.xlu1 %317 }
 0x18e   : > { %v319_v45 = vmul.f32 %v318_v44, %v289_v30 }
 0x190   : > { %v432_v46 = vpop.eup %431  ;;  %v320_v47 = vadd.f32 1e-05, %v319_v45 }
 0x191   : > { %v299_v48 = vmul.f32 %v432_v46, %v297_v43  ;;  %vm305_vm8 = vweird.f32 %v432_v46 }
 0x192   : > { %433 = vrsqrt.f32 %v320_v47  ;;  %vm306_vm10 = vmor %vm304_vm9, %vm305_vm8  ;;  %vm327_vm12 = vweird.f32 %v320_v47 }
 0x193   : > { %v300_v49 = vmul.f32 %v432_v46, %v299_v48 }
 0x195   : > { %v301_v50 = vmul.f32 0.5, %v300_v49 }
 0x197   : > { %v302_v51 = vsub.f32 1.5, %v301_v50 }
 0x198   : > { %v434_v52 = vpop.eup %433 }
 0x199   : > { %v303_v53 = vmul.f32 %v432_v46, %v302_v51  ;;  %v322_v54 = vmul.f32 %v434_v52, %v320_v47  ;;  %vm328_vm11 = vweird.f32 %v434_v52 }
 0x19a   : > { %vm329_vm13 = vmor %vm327_vm12, %vm328_vm11 }
 0x19b   : > { %v307_v55 = vsel %vm306_vm10, %v432_v46, %v303_v53  ;;  %v323_v56 = vmul.f32 %v434_v52, %v322_v54 }
 0x19c   : > { %v308_v57 = vmul.f32 %v307_v55, %v291_v33 }
 0x19d   : > { %v324_v58 = vmul.f32 0.5, %v323_v56 }
 0x19e   : > { %309 = vst.msk [vmem:[%s217_s5] sm:$0xf] %vm279_vm6, %v308_v57 }
 0x19f   : > { %v325_v59 = vsub.f32 1.5, %v324_v58 }
 0x1a1   : > { %v326_v60 = vmul.f32 %v434_v52, %v325_v59 }
 0x1a3   : > { %v330_v61 = vsel %vm329_vm13, %v434_v52, %v326_v60 }
 0x1a4   : > { %v331_v62 = vmul.f32 %v330_v61, %v314_v38 }
 0x1a6   : > { %414 = vst.msk [vmem:[%s217_s5 + $0x4] sm:$0xf] %vm279_vm6, %v331_v62 }
 0x1a7 PF: > { %s14_s15 = sadd.s32 1, %s441_s15  }
 0x1a8   : > { %p11_p4 = scmp.ge.s32.totalorder %s14_s15, 4  }
 0x1aa   :  { %13 = sbr.rel (!%p11_p4) target bundleno = 1 (0x1), region = 70 }

// kernel: _lambda_.37
= control target key start
LH: loop header
LB: loop body
LE: loop exit
PB: predicated region body
PF: predicated region fallthrough
CT: control target
= control target key end

     0   :  { %s402_s12 = smov 0   ;;  %s443_s0 = inlined_call_operand.vmem [shape: f32[2,72,64], index: 0, kind: input, shape index: {}]   ;;  %s444_s1 = inlined_call_operand.vmem [shape: bf16[8,72], index: 1, kind: input, shape index: {}]   ;;  %s445_s2 = inlined_call_operand.vmem [shape: f32[2,8,64], index: 2, kind: input, shape index: {}]   ;;  %s446_s3 = inlined_call_operand.vmem [shape: f32[2,8,64], index: 3, kind: output, shape index: {}]  }
   0x1 LB: > { %s348_s13 = sadd.s32 4294967295, %s379_s12   ;;  %p352_p0 = scmp.ge.s32.totalorder %s379_s12, 1  ;;  %s379_s12 = sphi %s402_s12, %s13_s12  }
   0x2   : > { %p146_p1 = scmp.lt.s32.totalorder %s379_s12, 3 }
   0x4   : > { %p147_p2 = pnand %p352_p0, %p146_p1 }
   0x5   : > { %p173_p3 = scmp.lt.s32.totalorder (!%p147_p2), %s348_s13, 1 }
   0x6   : > { %150 = sbr.rel (%p147_p2) target bundleno = 434 (0x1b2), region = 32 }
   0xb   : > { %s448_s13 = smov (!%p173_p3, %s348_s13), 1  ;;  %vm233_vm3 = vcmask 1043456   ;;  %v223_v33 = vld [vmem:[%s444_s1] sm:$0xf]  ;;  %vm229_vm10 = vcmask 588800   ;;  %vm250_vm11 = vcmask 523264  }
   0xc   : > { %s359_s14 = smul.u32 72, %s448_s13  ;;  %v381_v37 = vmov 64.0   ;;  %s354_s20 = sshll.u32 %s448_s13, 3 }
   0xd   : > { %369 = vrcp.f32 %v381_v37  ;;  %s181_s23 = scalar_lea.vmem %s445_s2, %s354_s20  ;;  %s185_s26 = scalar_lea.vmem %s446_s3, %s354_s20 }
   0xe   : > { %s416_s17 = scalar_lea.vmem %s443_s0, %s359_s14  ;;  %v280_v58 = vld [vmem:[%s181_s23] sm:$0xff] }
   0xf   : > { %v195_v0 = vld [vmem:[%s416_s17 + $0x40] sm:$0xff]  ;;  %v193_v1 = vld [vmem:[%s416_s17 + $0x30] sm:$0xff]  ;;  %v194_v2 = vld [vmem:[%s416_s17 + $0x38] sm:$0xff] }
  0x10   : > { %vm204_vm0 = vcmp.ge.f32.partialorder %v195_v0, 0.0  ;;  %v213_v3 = vmul.f32 0.01, %v195_v0  ;;  %vm202_vm1 = vcmp.ge.f32.partialorder %v193_v1, 0.0  ;;  %vm203_vm2 = vcmp.ge.f32.partialorder %v194_v2, 0.0  ;;  %v191_v4 = vld [vmem:[%s416_s17 + $0x20] sm:$0xff] }
  0x11   : > { %v211_v5 = vmul.f32 0.01, %v193_v1  ;;  %v212_v6 = vmul.f32 0.01, %v194_v2  ;;  %v192_v7 = vld [vmem:[%s416_s17 + $0x28] sm:$0xff]  ;;  %vm200_vm4 = vcmp.ge.f32.partialorder %v191_v4, 0.0 }
  0x12   : > { %v222_v8 = vsel %vm204_vm0, %v195_v0, %v213_v3  ;;  %v209_v9 = vmul.f32 0.01, %v191_v4  ;;  %v210_v13 = vmul.f32 0.01, %v192_v7  ;;  %vm201_vm5 = vcmp.ge.f32.partialorder %v192_v7, 0.0  ;;  %v189_v14 = vld [vmem:[%s416_s17 + $0x10] sm:$0xff] }
  0x13   : > { %v228_v10 = vpack.c.bf16 %v222_v8, %v222_v8  ;;  %v220_v11 = vsel %vm202_vm1, %v193_v1, %v211_v5  ;;  %v221_v12 = vsel %vm203_vm2, %v194_v2, %v212_v6  ;;  %v190_v15 = vld [vmem:[%s416_s17 + $0x18] sm:$0xff]  ;;  %v207_v20 = vmul.f32 0.01, %v189_v14  ;;  %v187_v22 = vld [vmem:[%s416_s17] sm:$0xff]  ;;  %v188_v23 = vld [vmem:[%s416_s17 + $0x8] sm:$0xff]  ;;  %v370_v38 = vpop.eup %369 }
  0x14   : > { %v227_v17 = vpack.c.bf16 %v221_v12, %v220_v11  ;;  %v218_v18 = vsel %vm200_vm4, %v191_v4, %v209_v9  ;;  %v219_v19 = vsel %vm201_vm5, %v192_v7, %v210_v13  ;;  %v208_v21 = vmul.f32 0.01, %v190_v15 }
  0x15   : > { %v235_v16 = vsel %vm233_vm3, %v228_v10, 0  ;;  %vm198_vm6 = vcmp.ge.f32.partialorder %v189_v14, 0.0  ;;  %vm199_vm7 = vcmp.ge.f32.partialorder %v190_v15, 0.0  ;;  %v226_v24 = vpack.c.bf16 %v219_v19, %v218_v18 }
  0x16   : > { %240 = vmatpush.bf16.msra.mxu0 %v235_v16  ;;  %v216_v25 = vsel %vm198_vm6, %v189_v14, %v207_v20  ;;  %v217_v26 = vsel %vm199_vm7, %v190_v15, %v208_v21  ;;  %v205_v27 = vmul.f32 0.01, %v187_v22  ;;  %v206_v28 = vmul.f32 0.01, %v188_v23 }
  0x17   : > { %vm196_vm8 = vcmp.ge.f32.partialorder %v187_v22, 0.0  ;;  %vm197_vm9 = vcmp.ge.f32.partialorder %v188_v23, 0.0  ;;  %v225_v29 = vpack.c.bf16 %v217_v26, %v216_v25  ;;  %v255_v39 = vmul.f32 64.0, %v370_v38 }
  0x18   : > { %v214_v30 = vsel %vm196_vm8, %v187_v22, %v205_v27  ;;  %v215_v31 = vsel %vm197_vm9, %v188_v23, %v206_v28  ;;  %vm259_vm12 = vweird.f32 %v370_v38 }
  0x19   : > { %v224_v32 = vpack.c.bf16 %v215_v31, %v214_v30  ;;  %v256_v40 = vsub.f32 1.0, %v255_v39 }
  0x1a   : > { %241 = vmatpush.bf16.msra.mxu0 %v227_v17 }
  0x1b   : > { %v257_v41 = vmul.f32 %v370_v38, %v256_v40 }
  0x1d   : > { %v258_v42 = vadd.f32 %v370_v38, %v257_v41 }
  0x1e   : > { %242 = vmatpush.bf16.msra.mxu0 %v226_v24 }
  0x1f   : > { %v260_v43 = vsel %vm259_vm12, %v370_v38, %v258_v42 }
  0x22   : > { %243 = vmatpush.bf16.msra.mxu0 %v225_v29 }
  0x26   : > { %244 = vmatpush.bf16.msra.mxu0 %v224_v32 }
  0x29   : > { %356 = vmatmul.msk.bf16.vlgmr.msra.gmra.mxu0 %vm229_vm10, %v223_v33 }
  0xa6   : > { %v246_v34 = vpop.f32.mrf.mxu0 }
  0xa7   : > { %v251_v35 = vsel %vm250_vm11, %v246_v34, 0.0 }
  0xa8   : > { %252 = vadd.xlane.f32.xlu0 %v251_v35 }
  0xae   : > { %v248_v36 = vpop.f32.mrf.mxu0 }
 0x11b   : > { %v253_v44 = vpop.xlane.xlu0 %252 }
 0x11c   : > { %v261_v45 = vmul.f32 %v260_v43, %v253_v44 }
 0x11e   : > { %v262_v46 = vsub.f32 %v246_v34, %v261_v45 }
 0x120   : > { %v263_v47 = vmul.f32 %v262_v46, %v262_v46 }
 0x122   : > { %v264_v48 = vsel %vm250_vm11, %v263_v47, 0.0 }
 0x123   : > { %265 = vadd.xlane.f32.xlu0 %v264_v48 }
 0x196   : > { %v266_v49 = vpop.xlane.xlu0 %265 }
 0x197   : > { %v267_v50 = vmul.f32 %v266_v49, %v260_v43 }
 0x199   : > { %v268_v51 = vadd.f32 1e-05, %v267_v50 }
 0x19b   : > { %371 = vrsqrt.f32 %v268_v51  ;;  %vm275_vm14 = vweird.f32 %v268_v51 }
 0x1a1   : > { %v372_v52 = vpop.eup %371 }
 0x1a2   : > { %v270_v53 = vmul.f32 %v372_v52, %v268_v51  ;;  %vm276_vm13 = vweird.f32 %v372_v52 }
 0x1a3   : > { %vm277_vm15 = vmor %vm275_vm14, %vm276_vm13 }
 0x1a4   : > { %v271_v54 = vmul.f32 %v372_v52, %v270_v53 }
 0x1a6   : > { %v272_v55 = vmul.f32 0.5, %v271_v54 }
 0x1a8   : > { %v273_v56 = vsub.f32 1.5, %v272_v55 }
 0x1aa   : > { %v274_v57 = vmul.f32 %v372_v52, %v273_v56 }
 0x1ac   : > { %v278_v59 = vsel %vm277_vm15, %v372_v52, %v274_v57 }
 0x1ad   : > { %v279_v60 = vmul.f32 %v278_v59, %v262_v46 }
 0x1af   : > { %v281_v61 = vadd.f32 %v280_v58, %v279_v60 }
 0x1b1   : > { %282 = vst.msk [vmem:[%s185_s26] sm:$0xff] %vm250_vm11, %v281_v61 }
 0x1b2 PF: > { %s13_s12 = sadd.s32 1, %s379_s12  }
 0x1b3   : > { %p10_p4 = scmp.ge.s32.totalorder %s13_s12, 4  }
 0x1b5   :  { %12 = sbr.rel (!%p10_p4) target bundleno = 1 (0x1), region = 65 }

// kernel: _lambda_.39
= control target key start
LH: loop header
LB: loop body
LE: loop exit
PB: predicated region body
PF: predicated region fallthrough
CT: control target
= control target key end

     0   :  { %s304_s9 = smov 0   ;;  %s324_s0 = inlined_call_operand.vmem [shape: f32[2,9,8,64], index: 0, kind: input, shape index: {}]   ;;  %s325_s1 = inlined_call_operand.vmem [shape: f32[2,8,64], index: 1, kind: input, shape index: {}]   ;;  %s326_s2 = inlined_call_operand.vmem [shape: f32[2,8,64], index: 2, kind: output, shape index: {}]  }
   0x1 LB: > { %s254_s10 = sadd.s32 4294967295, %s287_s9   ;;  %p258_p0 = scmp.ge.s32.totalorder %s287_s9, 1  ;;  %s287_s9 = sphi %s304_s9, %s12_s9  }
   0x2   : > { %p121_p1 = scmp.lt.s32.totalorder %s287_s9, 3 }
   0x4   : > { %p122_p2 = pnand %p258_p0, %p121_p1 }
   0x5   : > { %p146_p3 = scmp.lt.s32.totalorder (!%p122_p2), %s254_s10, 1 }
   0x6   : > { %125 = sbr.rel (%p122_p2) target bundleno = 37 (0x25), region = 28 }
   0xb   : > { %s328_s10 = smov (!%p146_p3, %s254_s10), 1  ;;  %vm187_vm0 = vcmask 523264  }
   0xc   : > { %s272_s11 = smul.u32 72, %s328_s10  ;;  %s260_s15 = sshll.u32 %s328_s10, 3 }
   0xd   : > { %s154_s18 = scalar_lea.vmem %s325_s1, %s260_s15  ;;  %s158_s21 = scalar_lea.vmem %s326_s2, %s260_s15 }
   0xe   : > { %s150_s14 = scalar_lea.vmem %s324_s0, %s272_s11  ;;  %v185_v17 = vld [vmem:[%s154_s18] sm:$0xff] }
   0xf   : > { %v159_v0 = vld [vmem:[%s150_s14] sm:$0xff]  ;;  %v262_v1 = vld [vmem:[%s150_s14 + $0x8] sm:$0xff]  ;;  %v263_v2 = vld [vmem:[%s150_s14 + $0x10] sm:$0xff] }
  0x10   : > { %v162_v3 = vadd.f32 %v262_v1, %v159_v0  ;;  %v264_v4 = vld [vmem:[%s150_s14 + $0x18] sm:$0xff]  ;;  %v265_v6 = vld [vmem:[%s150_s14 + $0x20] sm:$0xff]  ;;  %v266_v8 = vld [vmem:[%s150_s14 + $0x28] sm:$0xff] }
  0x11   : > { %v267_v10 = vld [vmem:[%s150_s14 + $0x30] sm:$0xff]  ;;  %v268_v12 = vld [vmem:[%s150_s14 + $0x38] sm:$0xff]  ;;  %v269_v14 = vld [vmem:[%s150_s14 + $0x40] sm:$0xff] }
  0x12   : > { %v165_v5 = vadd.f32 %v263_v2, %v162_v3 }
  0x14   : > { %v168_v7 = vadd.f32 %v264_v4, %v165_v5 }
  0x16   : > { %v171_v9 = vadd.f32 %v265_v6, %v168_v7 }
  0x18   : > { %v174_v11 = vadd.f32 %v266_v8, %v171_v9 }
  0x1a   : > { %v177_v13 = vadd.f32 %v267_v10, %v174_v11 }
  0x1c   : > { %v180_v15 = vadd.f32 %v268_v12, %v177_v13 }
  0x1e   : > { %v183_v16 = vadd.f32 %v269_v14, %v180_v15 }
  0x20   : > { %v184_v18 = vmul.f32 0.11111111, %v183_v16 }
  0x22   : > { %v186_v19 = vadd.f32 %v185_v17, %v184_v18 }
  0x24   : > { %188 = vst.msk [vmem:[%s158_s21] sm:$0xff] %vm187_vm0, %v186_v19 }
  0x25 PF: > { %s12_s9 = sadd.s32 1, %s287_s9  }
  0x26   : > { %p9_p4 = scmp.ge.s32.totalorder %s12_s9, 4  }
  0x28   :  { %11 = sbr.rel (!%p9_p4) target bundleno = 1 (0x1), region = 69 }

// kernel: _lambda_.41
= control target key start
LH: loop header
LB: loop body
LE: loop exit
PB: predicated region body
PF: predicated region fallthrough
CT: control target
= control target key end

     0   :  { %s338_s9 = smov 0   ;;  %s376_s0 = inlined_call_operand.vmem [shape: f32[2,72,64], index: 0, kind: input, shape index: {}]   ;;  %s377_s1 = inlined_call_operand.vmem [shape: bf16[8,72], index: 1, kind: input, shape index: {}]   ;;  %s378_s2 = inlined_call_operand.vmem [shape: f32[2,8,64], index: 2, kind: output, shape index: {}]  }
   0x1 LB: > { %s290_s10 = sadd.s32 4294967295, %s320_s9   ;;  %p294_p0 = scmp.ge.s32.totalorder %s320_s9, 1  ;;  %s320_s9 = sphi %s338_s9, %s12_s9  }
   0x2   : > { %p112_p1 = scmp.lt.s32.totalorder %s320_s9, 3 }
   0x4   : > { %p113_p2 = pnand %p294_p0, %p112_p1 }
   0x5   : > { %p133_p3 = scmp.lt.s32.totalorder (!%p113_p2), %s290_s10, 1 }
   0x6   : > { %116 = sbr.rel (%p113_p2) target bundleno = 432 (0x1b0), region = 28 }
   0xb   : > { %s380_s10 = smov (!%p133_p3, %s290_s10), 1  ;;  %vm189_vm3 = vcmask 1043456   ;;  %v179_v33 = vld [vmem:[%s377_s1] sm:$0xf]  ;;  %vm185_vm10 = vcmask 588800   ;;  %vm206_vm11 = vcmask 523264  }
   0xc   : > { %s300_s11 = smul.u32 72, %s380_s10  ;;  %v322_v37 = vmov 64.0   ;;  %s296_s17 = sshll.u32 %s380_s10, 3 }
   0xd   : > { %310 = vrcp.f32 %v322_v37  ;;  %s141_s20 = scalar_lea.vmem %s378_s2, %s296_s17 }
   0xe   : > { %s352_s14 = scalar_lea.vmem %s376_s0, %s300_s11 }
   0xf   : > { %v151_v0 = vld [vmem:[%s352_s14 + $0x40] sm:$0xff]  ;;  %v149_v1 = vld [vmem:[%s352_s14 + $0x30] sm:$0xff]  ;;  %v150_v2 = vld [vmem:[%s352_s14 + $0x38] sm:$0xff] }
  0x10   : > { %vm160_vm0 = vcmp.ge.f32.partialorder %v151_v0, 0.0  ;;  %v169_v3 = vmul.f32 0.01, %v151_v0  ;;  %vm158_vm1 = vcmp.ge.f32.partialorder %v149_v1, 0.0  ;;  %vm159_vm2 = vcmp.ge.f32.partialorder %v150_v2, 0.0  ;;  %v147_v4 = vld [vmem:[%s352_s14 + $0x20] sm:$0xff] }
  0x11   : > { %v167_v5 = vmul.f32 0.01, %v149_v1  ;;  %v168_v6 = vmul.f32 0.01, %v150_v2  ;;  %v148_v7 = vld [vmem:[%s352_s14 + $0x28] sm:$0xff]  ;;  %vm156_vm4 = vcmp.ge.f32.partialorder %v147_v4, 0.0 }
  0x12   : > { %v178_v8 = vsel %vm160_vm0, %v151_v0, %v169_v3  ;;  %v165_v9 = vmul.f32 0.01, %v147_v4  ;;  %v166_v13 = vmul.f32 0.01, %v148_v7  ;;  %vm157_vm5 = vcmp.ge.f32.partialorder %v148_v7, 0.0  ;;  %v145_v14 = vld [vmem:[%s352_s14 + $0x10] sm:$0xff] }
  0x13   : > { %v184_v10 = vpack.c.bf16 %v178_v8, %v178_v8  ;;  %v176_v11 = vsel %vm158_vm1, %v149_v1, %v167_v5  ;;  %v177_v12 = vsel %vm159_vm2, %v150_v2, %v168_v6  ;;  %v146_v15 = vld [vmem:[%s352_s14 + $0x18] sm:$0xff]  ;;  %v163_v20 = vmul.f32 0.01, %v145_v14  ;;  %v143_v22 = vld [vmem:[%s352_s14] sm:$0xff]  ;;  %v144_v23 = vld [vmem:[%s352_s14 + $0x8] sm:$0xff]  ;;  %v311_v38 = vpop.eup %310 }
  0x14   : > { %v183_v17 = vpack.c.bf16 %v177_v12, %v176_v11  ;;  %v174_v18 = vsel %vm156_vm4, %v147_v4, %v165_v9  ;;  %v175_v19 = vsel %vm157_vm5, %v148_v7, %v166_v13  ;;  %v164_v21 = vmul.f32 0.01, %v146_v15 }
  0x15   : > { %v191_v16 = vsel %vm189_vm3, %v184_v10, 0  ;;  %vm154_vm6 = vcmp.ge.f32.partialorder %v145_v14, 0.0  ;;  %vm155_vm7 = vcmp.ge.f32.partialorder %v146_v15, 0.0  ;;  %v182_v24 = vpack.c.bf16 %v175_v19, %v174_v18 }
  0x16   : > { %196 = vmatpush.bf16.msra.mxu0 %v191_v16  ;;  %v172_v25 = vsel %vm154_vm6, %v145_v14, %v163_v20  ;;  %v173_v26 = vsel %vm155_vm7, %v146_v15, %v164_v21  ;;  %v161_v27 = vmul.f32 0.01, %v143_v22  ;;  %v162_v28 = vmul.f32 0.01, %v144_v23 }
  0x17   : > { %vm152_vm8 = vcmp.ge.f32.partialorder %v143_v22, 0.0  ;;  %vm153_vm9 = vcmp.ge.f32.partialorder %v144_v23, 0.0  ;;  %v181_v29 = vpack.c.bf16 %v173_v26, %v172_v25  ;;  %v211_v39 = vmul.f32 64.0, %v311_v38 }
  0x18   : > { %v170_v30 = vsel %vm152_vm8, %v143_v22, %v161_v27  ;;  %v171_v31 = vsel %vm153_vm9, %v144_v23, %v162_v28  ;;  %vm215_vm12 = vweird.f32 %v311_v38 }
  0x19   : > { %v180_v32 = vpack.c.bf16 %v171_v31, %v170_v30  ;;  %v212_v40 = vsub.f32 1.0, %v211_v39 }
  0x1a   : > { %197 = vmatpush.bf16.msra.mxu0 %v183_v17 }
  0x1b   : > { %v213_v41 = vmul.f32 %v311_v38, %v212_v40 }
  0x1d   : > { %v214_v42 = vadd.f32 %v311_v38, %v213_v41 }
  0x1e   : > { %198 = vmatpush.bf16.msra.mxu0 %v182_v24 }
  0x1f   : > { %v216_v43 = vsel %vm215_vm12, %v311_v38, %v214_v42 }
  0x22   : > { %199 = vmatpush.bf16.msra.mxu0 %v181_v29 }
  0x26   : > { %200 = vmatpush.bf16.msra.mxu0 %v180_v32 }
  0x29   : > { %297 = vmatmul.msk.bf16.vlgmr.msra.gmra.mxu0 %vm185_vm10, %v179_v33 }
  0xa6   : > { %v202_v34 = vpop.f32.mrf.mxu0 }
  0xa7   : > { %v207_v35 = vsel %vm206_vm11, %v202_v34, 0.0 }
  0xa8   : > { %208 = vadd.xlane.f32.xlu0 %v207_v35 }
  0xae   : > { %v204_v36 = vpop.f32.mrf.mxu0 }
 0x11b   : > { %v209_v44 = vpop.xlane.xlu0 %208 }
 0x11c   : > { %v217_v45 = vmul.f32 %v216_v43, %v209_v44 }
 0x11e   : > { %v218_v46 = vsub.f32 %v202_v34, %v217_v45 }
 0x120   : > { %v219_v47 = vmul.f32 %v218_v46, %v218_v46 }
 0x122   : > { %v220_v48 = vsel %vm206_vm11, %v219_v47, 0.0 }
 0x123   : > { %221 = vadd.xlane.f32.xlu0 %v220_v48 }
 0x196   : > { %v222_v49 = vpop.xlane.xlu0 %221 }
 0x197   : > { %v223_v50 = vmul.f32 %v222_v49, %v216_v43 }
 0x199   : > { %v224_v51 = vadd.f32 1e-05, %v223_v50 }
 0x19b   : > { %312 = vrsqrt.f32 %v224_v51  ;;  %vm231_vm14 = vweird.f32 %v224_v51 }
 0x1a1   : > { %v313_v52 = vpop.eup %312 }
 0x1a2   : > { %v226_v53 = vmul.f32 %v313_v52, %v224_v51  ;;  %vm232_vm13 = vweird.f32 %v313_v52 }
 0x1a3   : > { %vm233_vm15 = vmor %vm231_vm14, %vm232_vm13 }
 0x1a4   : > { %v227_v54 = vmul.f32 %v313_v52, %v226_v53 }
 0x1a6   : > { %v228_v55 = vmul.f32 0.5, %v227_v54 }
 0x1a8   : > { %v229_v56 = vsub.f32 1.5, %v228_v55 }
 0x1aa   : > { %v230_v57 = vmul.f32 %v313_v52, %v229_v56 }
 0x1ac   : > { %v234_v58 = vsel %vm233_vm15, %v313_v52, %v230_v57 }
 0x1ad   : > { %v235_v59 = vmul.f32 %v234_v58, %v218_v46 }
 0x1af   : > { %236 = vst.msk [vmem:[%s141_s20] sm:$0xff] %vm206_vm11, %v235_v59 }
 0x1b0 PF: > { %s12_s9 = sadd.s32 1, %s320_s9  }
 0x1b1   : > { %p9_p4 = scmp.ge.s32.totalorder %s12_s9, 4  }
 0x1b3   :  { %11 = sbr.rel (!%p9_p4) target bundleno = 1 (0x1), region = 58 }

// kernel: _lambda_.48
= control target key start
LH: loop header
LB: loop body
LE: loop exit
PB: predicated region body
PF: predicated region fallthrough
CT: control target
= control target key end

     0   :  { %s311_s9 = smov 0   ;;  %s338_s0 = inlined_call_operand.vmem [shape: f32[2,24,64], index: 0, kind: input, shape index: {}]   ;;  %s339_s1 = inlined_call_operand.vmem [shape: bf16[8,24], index: 1, kind: input, shape index: {}]   ;;  %s340_s2 = inlined_call_operand.vmem [shape: f32[2,8,64], index: 2, kind: output, shape index: {}]  }
   0x1 LB: > { %s263_s10 = sadd.s32 4294967295, %s293_s9   ;;  %p267_p0 = scmp.ge.s32.totalorder %s293_s9, 1  ;;  %s293_s9 = sphi %s311_s9, %s12_s9  }
   0x2   : > { %p112_p1 = scmp.lt.s32.totalorder %s293_s9, 3 }
   0x4   : > { %p113_p2 = pnand %p267_p0, %p112_p1 }
   0x5   : > { %p133_p3 = scmp.lt.s32.totalorder (!%p113_p2), %s263_s10, 1 }
   0x6   : > { %116 = sbr.rel (%p113_p2) target bundleno = 420 (0x1a4), region = 28 }
   0xb   : > { %s342_s10 = smov (!%p133_p3, %s263_s10), 1  ;;  %vm162_vm3 = vcmask 1043456   ;;  %v155_v12 = vld [vmem:[%s339_s1] sm:$0xf]  ;;  %vm158_vm4 = vcmask 195584   ;;  %vm179_vm5 = vcmask 523264  }
   0xc   : > { %s273_s11 = smul.u32 24, %s342_s10  ;;  %v295_v16 = vmov 64.0   ;;  %s269_s17 = sshll.u32 %s342_s10, 3 }
   0xd   : > { %283 = vrcp.f32 %v295_v16  ;;  %s141_s20 = scalar_lea.vmem %s340_s2, %s269_s17 }
   0xe   : > { %s137_s14 = scalar_lea.vmem %s338_s0, %s273_s11 }
   0xf   : > { %v145_v0 = vld [vmem:[%s137_s14 + $0x10] sm:$0xff]  ;;  %v143_v1 = vld [vmem:[%s137_s14] sm:$0xff]  ;;  %v144_v2 = vld [vmem:[%s137_s14 + $0x8] sm:$0xff] }
  0x10   : > { %vm148_vm0 = vcmp.ge.f32.partialorder %v145_v0, 0.0  ;;  %v151_v3 = vmul.f32 0.01, %v145_v0  ;;  %vm146_vm1 = vcmp.ge.f32.partialorder %v143_v1, 0.0  ;;  %vm147_vm2 = vcmp.ge.f32.partialorder %v144_v2, 0.0 }
  0x11   : > { %v149_v4 = vmul.f32 0.01, %v143_v1  ;;  %v150_v5 = vmul.f32 0.01, %v144_v2 }
  0x12   : > { %v154_v6 = vsel %vm148_vm0, %v145_v0, %v151_v3 }
  0x13   : > { %v157_v7 = vpack.c.bf16 %v154_v6, %v154_v6  ;;  %v152_v8 = vsel %vm146_vm1, %v143_v1, %v149_v4  ;;  %v153_v9 = vsel %vm147_vm2, %v144_v2, %v150_v5  ;;  %v284_v17 = vpop.eup %283 }
  0x14   : > { %v156_v11 = vpack.c.bf16 %v153_v9, %v152_v8  ;;  %v184_v18 = vmul.f32 64.0, %v284_v17  ;;  %vm188_vm6 = vweird.f32 %v284_v17 }
  0x15   : > { %v164_v10 = vsel %vm162_vm3, %v157_v7, 0 }
  0x16   : > { %172 = vmatpush.bf16.msra.mxu0 %v164_v10  ;;  %v185_v19 = vsub.f32 1.0, %v184_v18 }
  0x18   : > { %v186_v20 = vmul.f32 %v284_v17, %v185_v19 }
  0x1a   : > { %173 = vmatpush.bf16.msra.mxu0 %v156_v11  ;;  %v187_v21 = vadd.f32 %v284_v17, %v186_v20 }
  0x1c   : > { %v189_v22 = vsel %vm188_vm6, %v284_v17, %v187_v21 }
  0x1d   : > { %270 = vmatmul.msk.bf16.vlgmr.msra.gmra.mxu0 %vm158_vm4, %v155_v12 }
  0x9a   : > { %v175_v13 = vpop.f32.mrf.mxu0 }
  0x9b   : > { %v180_v14 = vsel %vm179_vm5, %v175_v13, 0.0 }
  0x9c   : > { %181 = vadd.xlane.f32.xlu0 %v180_v14 }
  0xa2   : > { %v177_v15 = vpop.f32.mrf.mxu0 }
 0x10f   : > { %v182_v23 = vpop.xlane.xlu0 %181 }
 0x110   : > { %v190_v24 = vmul.f32 %v189_v22, %v182_v23 }
 0x112   : > { %v191_v25 = vsub.f32 %v175_v13, %v190_v24 }
 0x114   : > { %v192_v26 = vmul.f32 %v191_v25, %v191_v25 }
 0x116   : > { %v193_v27 = vsel %vm179_vm5, %v192_v26, 0.0 }
 0x117   : > { %194 = vadd.xlane.f32.xlu0 %v193_v27 }
 0x18a   : > { %v195_v28 = vpop.xlane.xlu0 %194 }
 0x18b   : > { %v196_v29 = vmul.f32 %v195_v28, %v189_v22 }
 0x18d   : > { %v197_v30 = vadd.f32 1e-05, %v196_v29 }
 0x18f   : > { %285 = vrsqrt.f32 %v197_v30  ;;  %vm204_vm8 = vweird.f32 %v197_v30 }
 0x195   : > { %v286_v31 = vpop.eup %285 }
 0x196   : > { %v199_v32 = vmul.f32 %v286_v31, %v197_v30  ;;  %vm205_vm7 = vweird.f32 %v286_v31 }
 0x197   : > { %vm206_vm9 = vmor %vm204_vm8, %vm205_vm7 }
 0x198   : > { %v200_v33 = vmul.f32 %v286_v31, %v199_v32 }
 0x19a   : > { %v201_v34 = vmul.f32 0.5, %v200_v33 }
 0x19c   : > { %v202_v35 = vsub.f32 1.5, %v201_v34 }
 0x19e   : > { %v203_v36 = vmul.f32 %v286_v31, %v202_v35 }
 0x1a0   : > { %v207_v37 = vsel %vm206_vm9, %v286_v31, %v203_v36 }
 0x1a1   : > { %v208_v38 = vmul.f32 %v207_v37, %v191_v25 }
 0x1a3   : > { %209 = vst.msk [vmem:[%s141_s20] sm:$0xff] %vm179_vm5, %v208_v38 }
 0x1a4 PF: > { %s12_s9 = sadd.s32 1, %s293_s9  }
 0x1a5   : > { %p9_p4 = scmp.ge.s32.totalorder %s12_s9, 4  }
 0x1a7   :  { %11 = sbr.rel (!%p9_p4) target bundleno = 1 (0x1), region = 58 }

// kernel: _lambda_.42
= control target key start
LH: loop header
LB: loop body
LE: loop exit
PB: predicated region body
PF: predicated region fallthrough
CT: control target
= control target key end

     0   :  { %s1046_s29 = smov 0   ;;  %s1136_s0 = inlined_call_operand.vmem [shape: f32[2,8,64], index: 0, kind: input, shape index: {}]   ;;  %s1137_s1 = inlined_call_operand.vmem [shape: f32[2,8,64], index: 1, kind: input, shape index: {}]   ;;  %s1138_s2 = inlined_call_operand.vmem [shape: f32[2,8,64], index: 2, kind: input, shape index: {}]   ;;  %s1139_s3 = inlined_call_operand.vmem [shape: f32[2,9,8,64], index: 3, kind: input, shape index: {}]   ;;  %s1140_s4 = inlined_call_operand.vmem [shape: f32[4,8], index: 4, kind: input, shape index: {}]   ;;  %s1141_s5 = inlined_call_operand.vmem [shape: f32[4,8], index: 5, kind: input, shape index: {}]   ;;  %s1142_s6 = inlined_call_operand.vmem [shape: f32[4,8], index: 6, kind: input, shape index: {}]   ;;  %s1143_s7 = inlined_call_operand.vmem [shape: f32[4,1], index: 7, kind: input, shape index: {}]   ;;  %s1144_s8 = inlined_call_operand.vmem [shape: f32[8,4], index: 8, kind: input, shape index: {}]   ;;  %s1145_s9 = inlined_call_operand.vmem [shape: f32[8,4], index: 9, kind: input, shape index: {}]   ;;  %s1146_s10 = inlined_call_operand.vmem [shape: f32[8,4], index: 10, kind: input, shape index: {}]   ;;  %s1147_s11 = inlined_call_operand.vmem [shape: f32[8,1], index: 11, kind: input, shape index: {}]   ;;  %s1148_s12 = inlined_call_operand.vmem [shape: f32[8,1], index: 12, kind: input, shape index: {}]   ;;  %s1149_s13 = inlined_call_operand.vmem [shape: f32[8,1], index: 13, kind: input, shape index: {}]   ;;  %s1150_s14 = inlined_call_operand.vmem [shape: f32[2,3,8,64], index: 14, kind: output, shape index: {}]  }
   0x1 LB: > { %s898_s30 = sadd.s32 4294967295, %s967_s29   ;;  %p902_p0 = scmp.ge.s32.totalorder %s967_s29, 1  ;;  %s967_s29 = sphi %s1046_s29, %s24_s29  }
   0x2   : > { %p439_p1 = scmp.lt.s32.totalorder %s967_s29, 3 }
   0x4   : > { %p440_p2 = pnand %p902_p0, %p439_p1 }
   0x5   : > { %p497_p3 = scmp.lt.s32.totalorder (!%p440_p2), %s898_s30, 1 }
   0x6   : > { %443 = sbr.rel (%p440_p2) target bundleno = 579 (0x243), region = 76 }
   0xb   : > { %s1154_s30 = smov (!%p497_p3, %s898_s30), 1  ;;  %vm550_vm0 = vcmask 523264   ;;  %v969_v25 = vmov 64.0   ;;  %v592_v34 = vld [vmem:[%s1141_s5] sm:$0xf]  ;;  %vm563_vm2 = vcmask 64512  }
   0xc   : > { %s932_s15 = smul.u32 72, %s1154_s30  ;;  %s1058_s16 = sshll.u32 %s1154_s30, 3  ;;  %947 = vrcp.f32 %v969_v25  ;;  %v621_v37 = vld [vmem:[%s1142_s6] sm:$0xf]  ;;  %vm653_vm3 = vcmask 1043456   ;;  %vm649_vm4 = vcmask 31744  }
   0xd   : > { %s504_s22 = scalar_lea.vmem %s1137_s1, %s1058_s16  ;;  %s508_s25 = scalar_lea.vmem %s1138_s2, %s1058_s16  ;;  %v562_v40 = vld [vmem:[%s1140_s4] sm:$0xf]  ;;  %v970_v52 = vmov 0  }
   0xe   : > { %s513_s19 = scalar_lea.vmem %s1139_s3, %s932_s15  ;;  %v1067_v6 = vld [vmem:[%s504_s22] sm:$0xff]  ;;  %s500_s28 = scalar_lea.vmem %s1136_s0, %s1058_s16  ;;  %944 = vset.pattern.permute.xlu1 %v970_v52  ;;  %945 = vset.pattern.permute.xlu2 %v970_v52 }
   0xf   : > { %v522_v0 = vld [vmem:[%s513_s19] sm:$0xff]  ;;  %v908_v1 = vld [vmem:[%s513_s19 + $0x8] sm:$0xff]  ;;  %v909_v2 = vld [vmem:[%s513_s19 + $0x10] sm:$0xff]  ;;  %v588_v8 = vsel %vm550_vm0, %v1067_v6, 0.0  ;;  %946 = vset.pattern.permute.xlu0 %v970_v52  ;;  %s933_s21 = smul.u32 24, %s1154_s30 }
  0x10   : > { %v525_v3 = vadd.f32 %v908_v1, %v522_v0  ;;  %v910_v4 = vld [vmem:[%s513_s19 + $0x18] sm:$0xff]  ;;  %v911_v7 = vld [vmem:[%s513_s19 + $0x20] sm:$0xff]  ;;  %589 = vadd.xlane.f32.xlu1 %v588_v8  ;;  %v912_v10 = vld [vmem:[%s513_s19 + $0x28] sm:$0xff] }
  0x11   : > { %v913_v12 = vld [vmem:[%s513_s19 + $0x30] sm:$0xff]  ;;  %v914_v14 = vld [vmem:[%s513_s19 + $0x38] sm:$0xff]  ;;  %v915_v16 = vld [vmem:[%s513_s19 + $0x40] sm:$0xff]  ;;  %s518_s24 = scalar_lea.vmem %s1150_s14, %s933_s21 }
  0x12   : > { %v528_v5 = vadd.f32 %v909_v2, %v525_v3  ;;  %v521_v19 = vld [vmem:[%s508_s25] sm:$0xff]  ;;  %v948_v26 = vpop.eup %947 }
  0x13   : > { %v1083_v23 = vld [vmem:[%s500_s28] sm:$0xff]  ;;  %v555_v27 = vmul.f32 64.0, %v948_v26  ;;  %vm559_vm1 = vweird.f32 %v948_v26 }
  0x14   : > { %v531_v9 = vadd.f32 %v910_v4, %v528_v5  ;;  %v551_v24 = vsel %vm550_vm0, %v1083_v23, 0.0  ;;  %v549_v41 = vld [vmem:[%s1143_s7] sm:$0xf] }
  0x15   : > { %v556_v28 = vsub.f32 1.0, %v555_v27  ;;  %v647_v49 = vld [vmem:[%s1144_s8] sm:$0xff] }
  0x16   : > { %v534_v11 = vadd.f32 %v911_v7, %v531_v9  ;;  %v703_v50 = vld [vmem:[%s1145_s9] sm:$0xff] }
  0x17   : > { %v557_v29 = vmul.f32 %v948_v26, %v556_v28  ;;  %v755_v51 = vld [vmem:[%s1146_s10] sm:$0xff] }
  0x18   : > { %v537_v13 = vadd.f32 %v912_v10, %v534_v11  ;;  %v704_v53 = vld [vmem:[%s1148_s12] sm:$0xff] }
  0x19   : > { %v558_v30 = vadd.f32 %v948_v26, %v557_v29  ;;  %v756_v54 = vld [vmem:[%s1149_s13] sm:$0xff] }
  0x1a   : > { %v540_v15 = vadd.f32 %v913_v12, %v537_v13  ;;  %v648_v59 = vld [vmem:[%s1147_s11] sm:$0xff] }
  0x1b   : > { %v560_v31 = vsel %vm559_vm1, %v948_v26, %v558_v30 }
  0x1c   : > { %v543_v17 = vadd.f32 %v914_v14, %v540_v15 }
  0x1e   : > { %v546_v18 = vadd.f32 %v915_v16, %v543_v17 }
  0x20   : > { %v547_v20 = vmul.f32 0.11111111, %v546_v18 }
  0x22   : > { %v1075_v21 = vadd.f32 %v547_v20, %v521_v19 }
  0x24   : > { %v617_v22 = vsel %vm550_vm0, %v1075_v21, 0.0 }
  0x25   : > { %618 = vadd.xlane.f32.xlu0 %v617_v22 }
  0x2d   : > { %552 = vadd.xlane.f32.xlu0 %v551_v24 }
  0x83   : > { %v590_v32 = vpop.xlane.xlu1 %589 }
  0x84   : > { %v591_v33 = vmul.f32 %v590_v32, %v560_v31 }
  0x86   : > { %611 = vmatpush.msra.mxu1 %v591_v33 }
  0x87   : > { %917 = vmatmul.msk.f32.vlgmr.msra.gmra.mxu1 %vm563_vm2, %v592_v34 }
  0x98   : > { %v619_v35 = vpop.xlane.xlu0 %618 }
  0x99   : > { %v620_v36 = vmul.f32 %v619_v35, %v560_v31 }
  0x9b   : > { %640 = vmatpush.msra.mxu2 %v620_v36 }
  0x9c   : > { %918 = vmatmul.msk.f32.vlgmr.msra.gmra.mxu2 %vm563_vm2, %v621_v37 }
  0xa0   : > { %v553_v38 = vpop.xlane.xlu0 %552 }
  0xa1   : > { %v561_v39 = vmul.f32 %v560_v31, %v553_v38 }
  0xa3   : > { %582 = vmatpush.msra.mxu0 %v561_v39 }
  0xa4   : > { %916 = vmatmul.msk.f32.vlgmr.msra.gmra.mxu0 %vm563_vm2, %v562_v40 }
 0x104   : > { %v613_v43 = vpop.f32.mrf.mxu1 }
 0x11f   : > { %v642_v45 = vpop.f32.mrf.mxu2 }
 0x121   : > { %v584_v42 = vpop.f32.mrf.mxu0 }
 0x122   : > { %v587_v44 = vadd.f32 %v584_v42, %v549_v41 }
 0x124   : > { %v616_v46 = vadd.f32 %v613_v43, %v587_v44 }
 0x126   : > { %v645_v47 = vadd.f32 %v642_v45, %v616_v46 }
 0x128   : > { %v646_v48 = vmax.f32 %v645_v47, 0.0 }
 0x12a   : > { %919 = vmatpush.msk.msra.mxu3 %vm653_vm3, %v646_v48  ;;  %922 = vmatpush.msk.msrb.mxu0 %vm653_vm3, %v646_v48 }
 0x12b   : > { %926 = vmatpush.msk.msrb.mxu1 %vm653_vm3, %v646_v48  ;;  %920 = vmatmul.msk.f32.vlgmr.msra.gmra.mxu3 %vm649_vm4, %v647_v49 }
 0x12c   : > { %923 = vmatmul.msk.f32.vlgmr.msrb.gmra.mxu0 %vm649_vm4, %v703_v50  ;;  %927 = vmatmul.msk.f32.vlgmr.msrb.gmra.mxu1 %vm649_vm4, %v755_v51 }
 0x1a9   : > { %v725_v55 = vpop.f32.mrf.mxu0  ;;  %v777_v56 = vpop.f32.mrf.mxu1 }
 0x1aa   : > { %v726_v57 = vadd.f32 %v725_v55, %v704_v53  ;;  %v778_v58 = vadd.f32 %v777_v56, %v756_v54 }
 0x1ac   : > { %v924_v60 = vmul.f32 -1.442695, %v726_v57  ;;  %v928_v61 = vmul.f32 -1.442695, %v778_v58 }
 0x1ae   : > { %v674_v62 = vpop.f32.mrf.mxu3  ;;  %949 = vpow2.f32 %v924_v60 }
 0x1af   : > { %v675_v63 = vadd.f32 %v674_v62, %v648_v59  ;;  %951 = vpow2.f32 %v928_v61 }
 0x1b1   : > { %v921_v0 = vmul.f32 -1.442695, %v675_v63 }
 0x1b3   : > { %953 = vpow2.f32 %v921_v0 }
 0x1b4   : > { %v950_v1 = vpop.eup %949 }
 0x1b5   : > { %v952_v2 = vpop.eup %951  ;;  %v731_v3 = vadd.f32 1.0, %v950_v1 }
 0x1b6   : > { %v783_v4 = vadd.f32 1.0, %v952_v2 }
 0x1b7   : > { %955 = vrcp.f32 %v731_v3  ;;  %v743_v11 = vand.u32 2147483648, %v731_v3  ;;  %vm737_vm5 = vweird.f32 %v731_v3  ;;  %v741_v14 = vand.u32 2147483647, %v731_v3 }
 0x1b8   : > { %957 = vrcp.f32 %v783_v4  ;;  %vm789_vm9 = vweird.f32 %v783_v4  ;;  %v795_v26 = vand.u32 2147483648, %v783_v4  ;;  %v793_v30 = vand.u32 2147483647, %v783_v4 }
 0x1b9   : > { %v954_v5 = vpop.eup %953  ;;  %v744_v20 = vor.u32 1.1754944e-38, %v743_v11  ;;  %vm742_vm8 = vcmp.eq.f32.partialorder %v741_v14, 8.507059e+37 }
 0x1ba   : > { %v680_v7 = vadd.f32 1.0, %v954_v5  ;;  %v796_v35 = vor.u32 1.1754944e-38, %v795_v26  ;;  %vm794_vm15 = vcmp.eq.f32.partialorder %v793_v30, 8.507059e+37 }
 0x1bc   : > { %959 = vrcp.f32 %v680_v7  ;;  %v692_v27 = vand.u32 2147483648, %v680_v7  ;;  %v690_v32 = vand.u32 2147483647, %v680_v7  ;;  %vm686_vm13 = vweird.f32 %v680_v7 }
 0x1bd   : > { %v956_v8 = vpop.eup %955 }
 0x1be   : > { %v958_v9 = vpop.eup %957  ;;  %v733_v10 = vmul.f32 %v956_v8, %v731_v3  ;;  %vm738_vm6 = vweird.f32 %v956_v8  ;;  %v693_v36 = vor.u32 1.1754944e-38, %v692_v27  ;;  %vm691_vm1 = vcmp.eq.f32.partialorder %v690_v32, 8.507059e+37 }
 0x1bf   : > { %v785_v12 = vmul.f32 %v958_v9, %v783_v4  ;;  %vm1117_vm7 = vmor %vm737_vm5, %vm738_vm6  ;;  %vm790_vm10 = vweird.f32 %v958_v9 }
 0x1c0   : > { %v734_v13 = vsub.f32 1.0, %v733_v10  ;;  %vm791_vm12 = vmor %vm789_vm9, %vm790_vm10 }
 0x1c1   : > { %v786_v15 = vsub.f32 1.0, %v785_v12 }
 0x1c2   : > { %v960_v16 = vpop.eup %959  ;;  %v735_v17 = vmul.f32 %v956_v8, %v734_v13 }
 0x1c3   : > { %v682_v18 = vmul.f32 %v960_v16, %v680_v7  ;;  %v787_v22 = vmul.f32 %v958_v9, %v786_v15  ;;  %vm687_vm11 = vweird.f32 %v960_v16 }
 0x1c4   : > { %v736_v24 = vadd.f32 %v956_v8, %v735_v17  ;;  %vm688_vm14 = vmor %vm686_vm13, %vm687_vm11 }
 0x1c5   : > { %v683_v25 = vsub.f32 1.0, %v682_v18  ;;  %v788_v29 = vadd.f32 %v958_v9, %v787_v22 }
 0x1c6   : > { %v740_v28 = vsel %vm1117_vm7, %v956_v8, %v736_v24 }
 0x1c7   : > { %v684_v31 = vmul.f32 %v960_v16, %v683_v25  ;;  %v745_v33 = vsel %vm742_vm8, %v744_v20, %v740_v28  ;;  %v792_v37 = vsel %vm791_vm12, %v958_v9, %v788_v29 }
 0x1c8   : > { %749 = vperm.xlu2 %945, %v745_v33   ;;  %v797_v40 = vsel %vm794_vm15, %v796_v35, %v792_v37 }
 0x1c9   : > { %v685_v34 = vadd.f32 %v960_v16, %v684_v31 }
 0x1cb   : > { %v689_v38 = vsel %vm688_vm14, %v960_v16, %v685_v34 }
 0x1cc   : > { %v694_v39 = vsel %vm691_vm1, %v693_v36, %v689_v38 }
 0x1cd   : > { %698 = vperm.xlu1 %944, %v694_v39  }
 0x1d0   : > { %801 = vperm.xlu2 %945, %v797_v40  }
 0x222   : > { %v750_v41 = vpop.permute.xlu2 %749 }
 0x223   : > { %v752_v42 = vmul.f32 %v750_v41, %v1067_v6 }
 0x225   : > { %925 = vst.msk [vmem:[%s518_s24 + $0x8] sm:$0xff] %vm550_vm0, %v752_v42 }
 0x22a   : > { %v802_v43 = vpop.permute.xlu2 %801 }
 0x22b   : > { %v804_v44 = vmul.f32 %v802_v43, %v1075_v21 }
 0x22d   : > { %929 = vst.msk [vmem:[%s518_s24 + $0x10] sm:$0xff] %vm550_vm0, %v804_v44 }
 0x23f   : > { %v699_v45 = vpop.permute.xlu1 %698 }
 0x240   : > { %v701_v46 = vmul.f32 %v699_v45, %v1083_v23 }
 0x242   : > { %702 = vst.msk [vmem:[%s518_s24] sm:$0xff] %vm550_vm0, %v701_v46 }
 0x243 PF: > { %s24_s29 = sadd.s32 1, %s967_s29  }
 0x244   : > { %p21_p4 = scmp.ge.s32.totalorder %s24_s29, 4  }
 0x246   :  { %23 = sbr.rel (!%p21_p4) target bundleno = 1 (0x1), region = 125 }

// kernel: _lambda_.50
= control target key start
LH: loop header
LB: loop body
LE: loop exit
PB: predicated region body
PF: predicated region fallthrough
CT: control target
= control target key end

     0   :  { %s381_s9 = smov 0   ;;  %s422_s0 = inlined_call_operand.vmem [shape: f32[2,72,64], index: 0, kind: input, shape index: {}]   ;;  %s423_s1 = inlined_call_operand.vmem [shape: bf16[16,72], index: 1, kind: input, shape index: {}]   ;;  %s424_s2 = inlined_call_operand.vmem [shape: f32[2,16,64], index: 2, kind: output, shape index: {}]  }
   0x1 LB: > { %s324_s10 = sadd.s32 4294967295, %s363_s9   ;;  %p328_p0 = scmp.ge.s32.totalorder %s363_s9, 1  ;;  %s363_s9 = sphi %s381_s9, %s12_s9  }
   0x2   : > { %p112_p1 = scmp.lt.s32.totalorder %s363_s9, 3 }
   0x4   : > { %p113_p2 = pnand %p328_p0, %p112_p1 }
   0x5   : > { %p134_p3 = scmp.lt.s32.totalorder (!%p113_p2), %s324_s10, 1 }
   0x6   : > { %116 = sbr.rel (%p113_p2) target bundleno = 440 (0x1b8), region = 28 }
   0xb   : > { %s426_s10 = smov (!%p134_p3, %s324_s10), 1  ;;  %vm197_vm3 = vcmask 1043456   ;;  %v340_v33 = vld [vmem:[%s423_s1] sm:$0xff]  ;;  %vm193_vm10 = vcmask 588800   ;;  %vm215_vm11 = vcmask 523264   ;;  %v365_v38 = vmov 64.0  }
   0xc   : > { %s341_s11 = smul.u32 72, %s426_s10  ;;  %351 = vrcp.f32 %v365_v38  ;;  %s339_s17 = sshll.u32 %s426_s10, 4 }
   0xd   : > { %s143_s20 = scalar_lea.vmem %s424_s2, %s339_s17 }
   0xe   : > { %s395_s14 = scalar_lea.vmem %s422_s0, %s341_s11 }
   0xf   : > { %v153_v0 = vld [vmem:[%s395_s14 + $0x40] sm:$0xff]  ;;  %v151_v1 = vld [vmem:[%s395_s14 + $0x30] sm:$0xff]  ;;  %v152_v2 = vld [vmem:[%s395_s14 + $0x38] sm:$0xff] }
  0x10   : > { %vm162_vm0 = vcmp.ge.f32.partialorder %v153_v0, 0.0  ;;  %v171_v3 = vmul.f32 0.01, %v153_v0  ;;  %vm160_vm1 = vcmp.ge.f32.partialorder %v151_v1, 0.0  ;;  %vm161_vm2 = vcmp.ge.f32.partialorder %v152_v2, 0.0  ;;  %v149_v4 = vld [vmem:[%s395_s14 + $0x20] sm:$0xff] }
  0x11   : > { %v169_v5 = vmul.f32 0.01, %v151_v1  ;;  %v170_v6 = vmul.f32 0.01, %v152_v2  ;;  %v150_v7 = vld [vmem:[%s395_s14 + $0x28] sm:$0xff]  ;;  %vm158_vm4 = vcmp.ge.f32.partialorder %v149_v4, 0.0 }
  0x12   : > { %v180_v8 = vsel %vm162_vm0, %v153_v0, %v171_v3  ;;  %v167_v9 = vmul.f32 0.01, %v149_v4  ;;  %v168_v13 = vmul.f32 0.01, %v150_v7  ;;  %vm159_vm5 = vcmp.ge.f32.partialorder %v150_v7, 0.0  ;;  %v147_v14 = vld [vmem:[%s395_s14 + $0x10] sm:$0xff]  ;;  %v352_v39 = vpop.eup %351 }
  0x13   : > { %v187_v10 = vpack.c.bf16 %v180_v8, %v180_v8  ;;  %v178_v11 = vsel %vm160_vm1, %v151_v1, %v169_v5  ;;  %v179_v12 = vsel %vm161_vm2, %v152_v2, %v170_v6  ;;  %v148_v15 = vld [vmem:[%s395_s14 + $0x18] sm:$0xff]  ;;  %v165_v20 = vmul.f32 0.01, %v147_v14  ;;  %v145_v22 = vld [vmem:[%s395_s14] sm:$0xff]  ;;  %v146_v23 = vld [vmem:[%s395_s14 + $0x8] sm:$0xff] }
  0x14   : > { %v186_v17 = vpack.c.bf16 %v179_v12, %v178_v11  ;;  %v176_v18 = vsel %vm158_vm4, %v149_v4, %v167_v9  ;;  %v177_v19 = vsel %vm159_vm5, %v150_v7, %v168_v13  ;;  %v166_v21 = vmul.f32 0.01, %v148_v15 }
  0x15   : > { %v199_v16 = vsel %vm197_vm3, %v187_v10, 0  ;;  %vm156_vm6 = vcmp.ge.f32.partialorder %v147_v14, 0.0  ;;  %vm157_vm7 = vcmp.ge.f32.partialorder %v148_v15, 0.0  ;;  %v185_v24 = vpack.c.bf16 %v177_v19, %v176_v18 }
  0x16   : > { %204 = vmatpush.bf16.msra.mxu0 %v199_v16  ;;  %v174_v25 = vsel %vm156_vm6, %v147_v14, %v165_v20  ;;  %v175_v26 = vsel %vm157_vm7, %v148_v15, %v166_v21  ;;  %v163_v27 = vmul.f32 0.01, %v145_v22  ;;  %v164_v28 = vmul.f32 0.01, %v146_v23 }
  0x17   : > { %vm154_vm8 = vcmp.ge.f32.partialorder %v145_v22, 0.0  ;;  %vm155_vm9 = vcmp.ge.f32.partialorder %v146_v23, 0.0  ;;  %v184_v29 = vpack.c.bf16 %v175_v26, %v174_v25  ;;  %v223_v40 = vmul.f32 64.0, %v352_v39 }
  0x18   : > { %v172_v30 = vsel %vm154_vm8, %v145_v22, %v163_v27  ;;  %v173_v31 = vsel %vm155_vm9, %v146_v23, %v164_v28  ;;  %vm227_vm12 = vweird.f32 %v352_v39 }
  0x19   : > { %v183_v32 = vpack.c.bf16 %v173_v31, %v172_v30  ;;  %v224_v41 = vsub.f32 1.0, %v223_v40 }
  0x1a   : > { %205 = vmatpush.bf16.msra.mxu0 %v186_v17 }
  0x1b   : > { %v225_v42 = vmul.f32 %v352_v39, %v224_v41 }
  0x1d   : > { %v226_v43 = vadd.f32 %v352_v39, %v225_v42 }
  0x1e   : > { %206 = vmatpush.bf16.msra.mxu0 %v185_v24 }
  0x1f   : > { %v228_v44 = vsel %vm227_vm12, %v352_v39, %v226_v43 }
  0x22   : > { %207 = vmatpush.bf16.msra.mxu0 %v184_v29 }
  0x26   : > { %208 = vmatpush.bf16.msra.mxu0 %v183_v32 }
  0x29   : > { %336 = vmatmul.msk.bf16.vlgmr.msra.gmra.mxu0 %vm193_vm10, %v340_v33 }
  0xa6   : > { %v210_v34 = vpop.f32.mrf.mxu0 }
  0xa7   : > { %v216_v35 = vsel %vm215_vm11, %v210_v34, 0.0 }
  0xa8   : > { %217 = vadd.xlane.f32.xlu0 %v216_v35 }
  0xae   : > { %v212_v36 = vpop.f32.mrf.mxu0 }
  0xaf   : > { %v219_v37 = vsel %vm215_vm11, %v212_v36, 0.0 }
  0xb0   : > { %220 = vadd.xlane.f32.xlu0 %v219_v37 }
 0x11b   : > { %v218_v45 = vpop.xlane.xlu0 %217 }
 0x11c   : > { %v229_v46 = vmul.f32 %v228_v44, %v218_v45 }
 0x11e   : > { %v231_v47 = vsub.f32 %v210_v34, %v229_v46 }
 0x120   : > { %v233_v48 = vmul.f32 %v231_v47, %v231_v47 }
 0x122   : > { %v235_v49 = vsel %vm215_vm11, %v233_v48, 0.0 }
 0x123   : > { %236 = vadd.xlane.f32.xlu1 %v235_v49  ;;  %v221_v50 = vpop.xlane.xlu0 %220 }
 0x124   : > { %v230_v51 = vmul.f32 %v228_v44, %v221_v50 }
 0x126   : > { %v232_v52 = vsub.f32 %v212_v36, %v230_v51 }
 0x128   : > { %v234_v53 = vmul.f32 %v232_v52, %v232_v52 }
 0x12a   : > { %v238_v54 = vsel %vm215_vm11, %v234_v53, 0.0 }
 0x12b   : > { %239 = vadd.xlane.f32.xlu1 %v238_v54 }
 0x196   : > { %v237_v55 = vpop.xlane.xlu1 %236 }
 0x197   : > { %v241_v56 = vmul.f32 %v237_v55, %v228_v44 }
 0x199   : > { %v243_v57 = vadd.f32 1e-05, %v241_v56 }
 0x19b   : > { %353 = vrsqrt.f32 %v243_v57  ;;  %vm251_vm14 = vweird.f32 %v243_v57 }
 0x19e   : > { %v240_v58 = vpop.xlane.xlu1 %239 }
 0x19f   : > { %v242_v59 = vmul.f32 %v240_v58, %v228_v44 }
 0x1a1   : > { %v354_v60 = vpop.eup %353  ;;  %v244_v61 = vadd.f32 1e-05, %v242_v59 }
 0x1a2   : > { %v246_v62 = vmul.f32 %v354_v60, %v243_v57  ;;  %vm252_vm13 = vweird.f32 %v354_v60 }
 0x1a3   : > { %355 = vrsqrt.f32 %v244_v61  ;;  %vm253_vm15 = vmor %vm251_vm14, %vm252_vm13  ;;  %vm261_vm1 = vweird.f32 %v244_v61 }
 0x1a4   : > { %v247_v63 = vmul.f32 %v354_v60, %v246_v62 }
 0x1a6   : > { %v248_v0 = vmul.f32 0.5, %v247_v63 }
 0x1a8   : > { %v249_v1 = vsub.f32 1.5, %v248_v0 }
 0x1a9   : > { %v356_v2 = vpop.eup %355 }
 0x1aa   : > { %v250_v3 = vmul.f32 %v354_v60, %v249_v1  ;;  %v256_v4 = vmul.f32 %v356_v2, %v244_v61  ;;  %vm262_vm0 = vweird.f32 %v356_v2 }
 0x1ab   : > { %vm263_vm2 = vmor %vm261_vm1, %vm262_vm0 }
 0x1ac   : > { %v254_v5 = vsel %vm253_vm15, %v354_v60, %v250_v3  ;;  %v257_v6 = vmul.f32 %v356_v2, %v256_v4 }
 0x1ad   : > { %v265_v7 = vmul.f32 %v254_v5, %v231_v47 }
 0x1ae   : > { %v258_v8 = vmul.f32 0.5, %v257_v6 }
 0x1af   : > { %267 = vst.msk [vmem:[%s143_s20] sm:$0xff] %vm215_vm11, %v265_v7 }
 0x1b0   : > { %v259_v9 = vsub.f32 1.5, %v258_v8 }
 0x1b2   : > { %v260_v10 = vmul.f32 %v356_v2, %v259_v9 }
 0x1b4   : > { %v264_v11 = vsel %vm263_vm2, %v356_v2, %v260_v10 }
 0x1b5   : > { %v266_v12 = vmul.f32 %v264_v11, %v232_v52 }
 0x1b7   : > { %268 = vst.msk [vmem:[%s143_s20 + $0x8] sm:$0xff] %vm215_vm11, %v266_v12 }
 0x1b8 PF: > { %s12_s9 = sadd.s32 1, %s363_s9  }
 0x1b9   : > { %p9_p4 = scmp.ge.s32.totalorder %s12_s9, 4  }
 0x1bb   :  { %11 = sbr.rel (!%p9_p4) target bundleno = 1 (0x1), region = 58 }

// kernel: _lambda_.47
= control target key start
LH: loop header
LB: loop body
LE: loop exit
PB: predicated region body
PF: predicated region fallthrough
CT: control target
= control target key end

     0   :  { %s1110_s18 = smov 0   ;;  %s1204_s0 = inlined_call_operand.vmem [shape: f32[2,8,64], index: 0, kind: input, shape index: {}, may-alias: {0,3}]   ;;  %s1205_s1 = inlined_call_operand.vmem [shape: f32[2,9,8,64], index: 1, kind: input, shape index: {}]   ;;  %s1206_s2 = inlined_call_operand.vmem [shape: f32[2,8,64], index: 2, kind: input, shape index: {}]   ;;  %s1207_s3 = inlined_call_operand.vmem [shape: f32[2,8,64], index: 3, kind: input, shape index: {}, may-alias: {0,3}]   ;;  %s1208_s4 = inlined_call_operand.vmem [shape: f32[2,8,64], index: 4, kind: input, shape index: {}]   ;;  %s1209_s5 = inlined_call_operand.vmem [shape: f32[4,8], index: 5, kind: input, shape index: {}]   ;;  %s1210_s6 = inlined_call_operand.vmem [shape: f32[4,8], index: 6, kind: input, shape index: {}]   ;;  %s1211_s7 = inlined_call_operand.vmem [shape: f32[4,8], index: 7, kind: input, shape index: {}]   ;;  %s1212_s8 = inlined_call_operand.vmem [shape: f32[4,1], index: 8, kind: input, shape index: {}]   ;;  %s1213_s9 = inlined_call_operand.vmem [shape: f32[8,4], index: 9, kind: input, shape index: {}]   ;;  %s1214_s10 = inlined_call_operand.vmem [shape: f32[8,4], index: 10, kind: input, shape index: {}]   ;;  %s1215_s11 = inlined_call_operand.vmem [shape: f32[8,4], index: 11, kind: input, shape index: {}]   ;;  %s1216_s12 = inlined_call_operand.vmem [shape: f32[8,1], index: 12, kind: input, shape index: {}]   ;;  %s1217_s13 = inlined_call_operand.vmem [shape: f32[8,1], index: 13, kind: input, shape index: {}]   ;;  %s1218_s14 = inlined_call_operand.vmem [shape: f32[8,1], index: 14, kind: input, shape index: {}]   ;;  %s1219_s15 = inlined_call_operand.vmem [shape: f32[2,3,8,64], index: 15, kind: output, shape index: {}]  }
   0x1 LB: > { %s956_s19 = sadd.s32 4294967295, %s1026_s18   ;;  %p960_p0 = scmp.ge.s32.totalorder %s1026_s18, 1  ;;  %s1026_s18 = sphi %s1110_s18, %s25_s18  }
   0x2   : > { %p473_p1 = scmp.lt.s32.totalorder %s1026_s18, 3 }
   0x4   : > { %p474_p2 = pnand %p960_p0, %p473_p1 }
   0x5   : > { %p537_p3 = scmp.lt.s32.totalorder (!%p474_p2), %s956_s19, 1 }
   0x6   : > { %477 = sbr.rel (%p474_p2) target bundleno = 571 (0x23b), region = 80 }
   0xb   : > { %s1223_s19 = smov (!%p537_p3, %s956_s19), 1  ;;  %vm596_vm0 = vcmask 523264   ;;  %v1028_v27 = vmov 64.0   ;;  %vm609_vm2 = vcmask 64512   ;;  %v667_v36 = vld [vmem:[%s1211_s7] sm:$0xf] }
   0xc   : > { %s1121_s20 = sshll.u32 %s1223_s19, 3  ;;  %s991_s21 = smul.u32 72, %s1223_s19  ;;  %1006 = vrcp.f32 %v1028_v27  ;;  %v638_v39 = vld [vmem:[%s1210_s6] sm:$0xf]  ;;  %vm699_vm3 = vcmask 1043456   ;;  %vm695_vm4 = vcmask 31744  }
   0xd   : > { %s557_s24 = scalar_lea.vmem %s1208_s4, %s1121_s20  ;;  %s549_s30 = scalar_lea.vmem %s1206_s2, %s1121_s20  ;;  %v608_v42 = vld [vmem:[%s1209_s5] sm:$0xf]  ;;  %v1029_v54 = vmov 0  }
   0xe   : > { %s545_s27 = scalar_lea.vmem %s1205_s1, %s991_s21  ;;  %v1131_v0 = vld [vmem:[%s557_s24] sm:$0xff]  ;;  %s553_s22 = scalar_lea.vmem %s1207_s3, %s1121_s20  ;;  %1003 = vset.pattern.permute.xlu1 %v1029_v54  ;;  %1004 = vset.pattern.permute.xlu2 %v1029_v54 }
   0xf   : > { %v663_v1 = vsel %vm596_vm0, %v1131_v0, 0.0  ;;  %v564_v2 = vld [vmem:[%s545_s27] sm:$0xff]  ;;  %v967_v3 = vld [vmem:[%s545_s27 + $0x8] sm:$0xff]  ;;  %v968_v4 = vld [vmem:[%s545_s27 + $0x10] sm:$0xff]  ;;  %s540_s24 = scalar_lea.vmem %s1204_s0, %s1121_s20  ;;  %1005 = vset.pattern.permute.xlu0 %v1029_v54  ;;  %s992_s16 = smul.u32 24, %s1223_s19 }
  0x10   : > { %664 = vadd.xlane.f32.xlu0 %v663_v1  ;;  %v567_v5 = vadd.f32 %v967_v3, %v564_v2  ;;  %v969_v6 = vld [vmem:[%s545_s27 + $0x18] sm:$0xff]  ;;  %v591_v8 = vld [vmem:[%s549_s30] sm:$0xff]  ;;  %v971_v13 = vld [vmem:[%s545_s27 + $0x28] sm:$0xff] }
  0x11   : > { %v592_v9 = vld [vmem:[%s553_s22] sm:$0xff]  ;;  %v972_v16 = vld [vmem:[%s545_s27 + $0x30] sm:$0xff]  ;;  %v973_v18 = vld [vmem:[%s545_s27 + $0x38] sm:$0xff]  ;;  %s562_s21 = scalar_lea.vmem %s1219_s15, %s992_s16 }
  0x12   : > { %v570_v7 = vadd.f32 %v968_v4, %v567_v5  ;;  %v970_v10 = vld [vmem:[%s545_s27 + $0x20] sm:$0xff]  ;;  %v1143_v11 = vadd.f32 %v592_v9, %v591_v8  ;;  %v1007_v28 = vpop.eup %1006 }
  0x13   : > { %v974_v20 = vld [vmem:[%s545_s27 + $0x40] sm:$0xff]  ;;  %v601_v29 = vmul.f32 64.0, %v1007_v28  ;;  %vm605_vm1 = vweird.f32 %v1007_v28 }
  0x14   : > { %v573_v12 = vadd.f32 %v969_v6, %v570_v7  ;;  %v634_v14 = vsel %vm596_vm0, %v1143_v11, 0.0  ;;  %v563_v23 = vld [vmem:[%s540_s24] sm:$0xff] }
  0x15   : > { %635 = vadd.xlane.f32.xlu1 %v634_v14  ;;  %v602_v30 = vsub.f32 1.0, %v601_v29  ;;  %v595_v43 = vld [vmem:[%s1212_s8] sm:$0xf] }
  0x16   : > { %v576_v15 = vadd.f32 %v970_v10, %v573_v12  ;;  %v693_v51 = vld [vmem:[%s1213_s9] sm:$0xff] }
  0x17   : > { %v603_v31 = vmul.f32 %v1007_v28, %v602_v30  ;;  %v749_v52 = vld [vmem:[%s1214_s10] sm:$0xff] }
  0x18   : > { %v579_v17 = vadd.f32 %v971_v13, %v576_v15  ;;  %v801_v53 = vld [vmem:[%s1215_s11] sm:$0xff] }
  0x19   : > { %v604_v32 = vadd.f32 %v1007_v28, %v603_v31  ;;  %v750_v55 = vld [vmem:[%s1217_s13] sm:$0xff] }
  0x1a   : > { %v582_v19 = vadd.f32 %v972_v16, %v579_v17  ;;  %v802_v56 = vld [vmem:[%s1218_s14] sm:$0xff] }
  0x1b   : > { %v606_v33 = vsel %vm605_vm1, %v1007_v28, %v604_v32  ;;  %v694_v61 = vld [vmem:[%s1216_s12] sm:$0xff] }
  0x1c   : > { %v585_v21 = vadd.f32 %v973_v18, %v582_v19 }
  0x1e   : > { %v588_v22 = vadd.f32 %v974_v20, %v585_v21 }
  0x20   : > { %v589_v24 = vmul.f32 0.11111111, %v588_v22 }
  0x22   : > { %v1151_v25 = vadd.f32 %v589_v24, %v563_v23 }
  0x24   : > { %v597_v26 = vsel %vm596_vm0, %v1151_v25, 0.0 }
  0x25   : > { %598 = vadd.xlane.f32.xlu0 %v597_v26 }
  0x83   : > { %v665_v34 = vpop.xlane.xlu0 %664 }
  0x84   : > { %v666_v35 = vmul.f32 %v665_v34, %v606_v33 }
  0x86   : > { %686 = vmatpush.msra.mxu2 %v666_v35 }
  0x87   : > { %977 = vmatmul.msk.f32.vlgmr.msra.gmra.mxu2 %vm609_vm2, %v667_v36 }
  0x88   : > { %v636_v37 = vpop.xlane.xlu1 %635 }
  0x89   : > { %v637_v38 = vmul.f32 %v636_v37, %v606_v33 }
  0x8b   : > { %657 = vmatpush.msra.mxu1 %v637_v38 }
  0x8c   : > { %976 = vmatmul.msk.f32.vlgmr.msra.gmra.mxu1 %vm609_vm2, %v638_v39 }
  0x98   : > { %v599_v40 = vpop.xlane.xlu0 %598 }
  0x99   : > { %v607_v41 = vmul.f32 %v606_v33, %v599_v40 }
  0x9b   : > { %628 = vmatpush.msra.mxu0 %v607_v41 }
  0x9c   : > { %975 = vmatmul.msk.f32.vlgmr.msra.gmra.mxu0 %vm609_vm2, %v608_v42 }
 0x109   : > { %v659_v45 = vpop.f32.mrf.mxu1 }
 0x10a   : > { %v688_v47 = vpop.f32.mrf.mxu2 }
 0x119   : > { %v630_v44 = vpop.f32.mrf.mxu0 }
 0x11a   : > { %v633_v46 = vadd.f32 %v630_v44, %v595_v43 }
 0x11c   : > { %v662_v48 = vadd.f32 %v659_v45, %v633_v46 }
 0x11e   : > { %v691_v49 = vadd.f32 %v688_v47, %v662_v48 }
 0x120   : > { %v692_v50 = vmax.f32 %v691_v49, 0.0 }
 0x122   : > { %978 = vmatpush.msk.msra.mxu3 %vm699_vm3, %v692_v50  ;;  %981 = vmatpush.msk.msrb.mxu0 %vm699_vm3, %v692_v50 }
 0x123   : > { %985 = vmatpush.msk.msrb.mxu1 %vm699_vm3, %v692_v50  ;;  %979 = vmatmul.msk.f32.vlgmr.msra.gmra.mxu3 %vm695_vm4, %v693_v51 }
 0x124   : > { %982 = vmatmul.msk.f32.vlgmr.msrb.gmra.mxu0 %vm695_vm4, %v749_v52  ;;  %986 = vmatmul.msk.f32.vlgmr.msrb.gmra.mxu1 %vm695_vm4, %v801_v53 }
 0x1a1   : > { %v771_v57 = vpop.f32.mrf.mxu0  ;;  %v823_v58 = vpop.f32.mrf.mxu1 }
 0x1a2   : > { %v772_v59 = vadd.f32 %v771_v57, %v750_v55  ;;  %v824_v60 = vadd.f32 %v823_v58, %v802_v56 }
 0x1a4   : > { %v983_v62 = vmul.f32 -1.442695, %v772_v59  ;;  %v987_v63 = vmul.f32 -1.442695, %v824_v60 }
 0x1a6   : > { %v720_v1 = vpop.f32.mrf.mxu3  ;;  %1008 = vpow2.f32 %v983_v62 }
 0x1a7   : > { %v721_v2 = vadd.f32 %v720_v1, %v694_v61  ;;  %1010 = vpow2.f32 %v987_v63 }
 0x1a9   : > { %v980_v3 = vmul.f32 -1.442695, %v721_v2 }
 0x1ab   : > { %1012 = vpow2.f32 %v980_v3 }
 0x1ac   : > { %v1009_v4 = vpop.eup %1008 }
 0x1ad   : > { %v1011_v5 = vpop.eup %1010  ;;  %v777_v6 = vadd.f32 1.0, %v1009_v4 }
 0x1ae   : > { %v829_v7 = vadd.f32 1.0, %v1011_v5 }
 0x1af   : > { %1014 = vrcp.f32 %v777_v6  ;;  %v789_v14 = vand.u32 2147483648, %v777_v6  ;;  %vm783_vm5 = vweird.f32 %v777_v6  ;;  %v787_v17 = vand.u32 2147483647, %v777_v6 }
 0x1b0   : > { %1016 = vrcp.f32 %v829_v7  ;;  %vm835_vm9 = vweird.f32 %v829_v7  ;;  %v841_v28 = vand.u32 2147483648, %v829_v7  ;;  %v839_v32 = vand.u32 2147483647, %v829_v7 }
 0x1b1   : > { %v1013_v8 = vpop.eup %1012  ;;  %v790_v23 = vor.u32 1.1754944e-38, %v789_v14  ;;  %vm788_vm8 = vcmp.eq.f32.partialorder %v787_v17, 8.507059e+37 }
 0x1b2   : > { %v726_v9 = vadd.f32 1.0, %v1013_v8  ;;  %v842_v37 = vor.u32 1.1754944e-38, %v841_v28  ;;  %vm840_vm15 = vcmp.eq.f32.partialorder %v839_v32, 8.507059e+37 }
 0x1b4   : > { %1018 = vrcp.f32 %v726_v9  ;;  %v738_v29 = vand.u32 2147483648, %v726_v9  ;;  %v736_v34 = vand.u32 2147483647, %v726_v9  ;;  %vm732_vm13 = vweird.f32 %v726_v9 }
 0x1b5   : > { %v1015_v10 = vpop.eup %1014 }
 0x1b6   : > { %v1017_v12 = vpop.eup %1016  ;;  %v779_v13 = vmul.f32 %v1015_v10, %v777_v6  ;;  %vm784_vm6 = vweird.f32 %v1015_v10  ;;  %v739_v38 = vor.u32 1.1754944e-38, %v738_v29  ;;  %vm737_vm1 = vcmp.eq.f32.partialorder %v736_v34, 8.507059e+37 }
 0x1b7   : > { %v831_v15 = vmul.f32 %v1017_v12, %v829_v7  ;;  %vm1185_vm7 = vmor %vm783_vm5, %vm784_vm6  ;;  %vm836_vm10 = vweird.f32 %v1017_v12 }
 0x1b8   : > { %v780_v16 = vsub.f32 1.0, %v779_v13  ;;  %vm837_vm12 = vmor %vm835_vm9, %vm836_vm10 }
 0x1b9   : > { %v832_v18 = vsub.f32 1.0, %v831_v15 }
 0x1ba   : > { %v1019_v19 = vpop.eup %1018  ;;  %v781_v20 = vmul.f32 %v1015_v10, %v780_v16 }
 0x1bb   : > { %v728_v21 = vmul.f32 %v1019_v19, %v726_v9  ;;  %v833_v24 = vmul.f32 %v1017_v12, %v832_v18  ;;  %vm733_vm11 = vweird.f32 %v1019_v19 }
 0x1bc   : > { %v782_v26 = vadd.f32 %v1015_v10, %v781_v20  ;;  %vm734_vm14 = vmor %vm732_vm13, %vm733_vm11 }
 0x1bd   : > { %v729_v27 = vsub.f32 1.0, %v728_v21  ;;  %v834_v31 = vadd.f32 %v1017_v12, %v833_v24 }
 0x1be   : > { %v786_v30 = vsel %vm1185_vm7, %v1015_v10, %v782_v26 }
 0x1bf   : > { %v730_v33 = vmul.f32 %v1019_v19, %v729_v27  ;;  %v791_v35 = vsel %vm788_vm8, %v790_v23, %v786_v30  ;;  %v838_v39 = vsel %vm837_vm12, %v1017_v12, %v834_v31 }
 0x1c0   : > { %795 = vperm.xlu2 %1004, %v791_v35   ;;  %v843_v42 = vsel %vm840_vm15, %v842_v37, %v838_v39 }
 0x1c1   : > { %v731_v36 = vadd.f32 %v1019_v19, %v730_v33 }
 0x1c3   : > { %v735_v40 = vsel %vm734_vm14, %v1019_v19, %v731_v36 }
 0x1c4   : > { %v740_v41 = vsel %vm737_vm1, %v739_v38, %v735_v40 }
 0x1c5   : > { %744 = vperm.xlu1 %1003, %v740_v41  }
 0x1c8   : > { %847 = vperm.xlu2 %1004, %v843_v42  }
 0x21a   : > { %v796_v43 = vpop.permute.xlu2 %795 }
 0x21b   : > { %v798_v44 = vmul.f32 %v796_v43, %v1143_v11 }
 0x21d   : > { %984 = vst.msk [vmem:[%s562_s21 + $0x8] sm:$0xff] %vm596_vm0, %v798_v44 }
 0x222   : > { %v848_v45 = vpop.permute.xlu2 %847 }
 0x223   : > { %v850_v46 = vmul.f32 %v848_v45, %v1131_v0 }
 0x225   : > { %988 = vst.msk [vmem:[%s562_s21 + $0x10] sm:$0xff] %vm596_vm0, %v850_v46 }
 0x237   : > { %v745_v47 = vpop.permute.xlu1 %744 }
 0x238   : > { %v747_v48 = vmul.f32 %v745_v47, %v1151_v25 }
 0x23a   : > { %748 = vst.msk [vmem:[%s562_s21] sm:$0xff] %vm596_vm0, %v747_v48 }
 0x23b PF: > { %s25_s18 = sadd.s32 1, %s1026_s18  }
 0x23c   : > { %p22_p4 = scmp.ge.s32.totalorder %s25_s18, 4  }
 0x23e   :  { %24 = sbr.rel (!%p22_p4) target bundleno = 1 (0x1), region = 132 }

// kernel: _lambda_.57
= control target key start
LH: loop header
LB: loop body
LE: loop exit
PB: predicated region body
PF: predicated region fallthrough
CT: control target
= control target key end

     0   :  { %s359_s9 = smov 0   ;;  %s390_s0 = inlined_call_operand.vmem [shape: f32[2,24,256], index: 0, kind: input, shape index: {}]   ;;  %s391_s1 = inlined_call_operand.vmem [shape: bf16[4,24], index: 1, kind: input, shape index: {}]   ;;  %s392_s2 = inlined_call_operand.vmem [shape: f32[2,4,256], index: 2, kind: output, shape index: {}]  }
   0x1 LB: > { %s308_s10 = sadd.s32 4294967295, %s341_s9   ;;  %p312_p0 = scmp.ge.s32.totalorder %s341_s9, 1  ;;  %s341_s9 = sphi %s359_s9, %s12_s9  }
   0x2   : > { %p112_p1 = scmp.lt.s32.totalorder %s341_s9, 3 }
   0x4   : > { %p113_p2 = pnand %p312_p0, %p112_p1 }
   0x5   : > { %p134_p3 = scmp.lt.s32.totalorder (!%p113_p2), %s308_s10, 1 }
   0x6   : > { %116 = sbr.rel (%p113_p2) target bundleno = 428 (0x1ac), region = 28 }
   0xb   : > { %s394_s10 = smov (!%p134_p3, %s308_s10), 1  ;;  %vm178_vm0 = vcmask 1043456   ;;  %v169_v24 = vld [vmem:[%s391_s1] sm:$0x3]  ;;  %vm174_vm7 = vcmask 195584   ;;  %v343_v32 = vmov 256.0  }
   0xc   : > { %s321_s11 = smul.u32 48, %s394_s10  ;;  %331 = vrcp.f32 %v343_v32  ;;  %s320_s17 = sshll.u32 %s394_s10, 3 }
   0xd   : > { %s143_s20 = scalar_lea.vmem %s392_s2, %s320_s17 }
   0xe   : > { %s138_s14 = scalar_lea.vmem %s390_s0, %s321_s11 }
   0xf   : > { %v149_v0 = vld [vmem:[%s138_s14 + $0x20] sm:$0xff]  ;;  %v150_v1 = vld [vmem:[%s138_s14 + $0x28] sm:$0xff]  ;;  %v147_v5 = vld [vmem:[%s138_s14 + $0x10] sm:$0xff] }
  0x10   : > { %v145_v2 = vld [vmem:[%s138_s14] sm:$0xff]  ;;  %vm155_vm1 = vcmp.ge.f32.partialorder %v149_v0, 0.0  ;;  %v161_v3 = vmul.f32 0.01, %v149_v0  ;;  %vm156_vm2 = vcmp.ge.f32.partialorder %v150_v1, 0.0  ;;  %v146_v7 = vld [vmem:[%s138_s14 + $0x8] sm:$0xff] }
  0x11   : > { %v162_v4 = vmul.f32 0.01, %v150_v1  ;;  %vm151_vm3 = vcmp.ge.f32.partialorder %v145_v2, 0.0  ;;  %v157_v6 = vmul.f32 0.01, %v145_v2  ;;  %v148_v8 = vld [vmem:[%s138_s14 + $0x18] sm:$0xff] }
  0x12   : > { %v167_v9 = vsel %vm155_vm1, %v149_v0, %v161_v3  ;;  %vm153_vm4 = vcmp.ge.f32.partialorder %v147_v5, 0.0  ;;  %v159_v11 = vmul.f32 0.01, %v147_v5  ;;  %vm152_vm5 = vcmp.ge.f32.partialorder %v146_v7, 0.0  ;;  %v332_v33 = vpop.eup %331 }
  0x13   : > { %v168_v10 = vsel %vm156_vm2, %v150_v1, %v162_v4  ;;  %v172_v12 = vpack.c.bf16 %v167_v9, %v167_v9  ;;  %v163_v14 = vsel %vm151_vm3, %v145_v2, %v157_v6  ;;  %vm154_vm6 = vcmp.ge.f32.partialorder %v148_v8, 0.0 }
  0x14   : > { %v173_v13 = vpack.c.bf16 %v168_v10, %v168_v10  ;;  %v165_v15 = vsel %vm153_vm4, %v147_v5, %v159_v11  ;;  %v158_v16 = vmul.f32 0.01, %v146_v7  ;;  %v160_v17 = vmul.f32 0.01, %v148_v8 }
  0x15   : > { %v180_v18 = vsel %vm178_vm0, %v172_v12, 0  ;;  %v170_v20 = vpack.c.bf16 %v165_v15, %v163_v14  ;;  %v217_v34 = vmul.f32 256.0, %v332_v33  ;;  %vm221_vm8 = vweird.f32 %v332_v33 }
  0x16   : > { %v183_v19 = vsel %vm178_vm0, %v173_v13, 0  ;;  %191 = vmatpush.bf16.msra.mxu0 %v180_v18  ;;  %v164_v21 = vsel %vm152_vm5, %v146_v7, %v158_v16  ;;  %v166_v22 = vsel %vm154_vm6, %v148_v8, %v160_v17 }
  0x17   : > { %204 = vmatpush.bf16.msra.mxu1 %v183_v19  ;;  %v171_v23 = vpack.c.bf16 %v166_v22, %v164_v21  ;;  %v218_v35 = vsub.f32 1.0, %v217_v34 }
  0x19   : > { %v219_v36 = vmul.f32 %v332_v33, %v218_v35 }
  0x1a   : > { %192 = vmatpush.bf16.msra.mxu0 %v170_v20 }
  0x1b   : > { %205 = vmatpush.bf16.msra.mxu1 %v171_v23  ;;  %v220_v37 = vadd.f32 %v332_v33, %v219_v36 }
  0x1d   : > { %316 = vmatmul.msk.bf16.vlgmr.msra.gmra.mxu0 %vm174_vm7, %v169_v24  ;;  %v222_v38 = vsel %vm221_vm8, %v332_v33, %v220_v37 }
  0x1e   : > { %317 = vmatmul.msk.bf16.vlgmr.msra.gmra.mxu1 %vm174_vm7, %v169_v24 }
  0x9a   : > { %v194_v25 = vpop.f32.mrf.mxu0 }
  0x9b   : > { %v207_v26 = vpop.f32.mrf.mxu1  ;;  %v211_v27 = vsel %vm178_vm0, %v194_v25, 0.0 }
  0x9c   : > { %v212_v28 = vsel %vm178_vm0, %v207_v26, 0.0 }
  0x9d   : > { %v213_v29 = vadd.f32 %v212_v28, %v211_v27 }
  0x9f   : > { %214 = vadd.xlane.f32.xlu0 %v213_v29 }
  0xa2   : > { %v196_v30 = vpop.f32.mrf.mxu0 }
  0xa3   : > { %v209_v31 = vpop.f32.mrf.mxu1 }
 0x112   : > { %v215_v39 = vpop.xlane.xlu0 %214 }
 0x113   : > { %v223_v40 = vmul.f32 %v222_v38, %v215_v39 }
 0x115   : > { %v224_v41 = vsub.f32 %v194_v25, %v223_v40  ;;  %v225_v42 = vsub.f32 %v207_v26, %v223_v40 }
 0x117   : > { %v226_v43 = vmul.f32 %v224_v41, %v224_v41  ;;  %v227_v44 = vmul.f32 %v225_v42, %v225_v42 }
 0x119   : > { %v228_v45 = vsel %vm178_vm0, %v226_v43, 0.0  ;;  %v229_v46 = vsel %vm178_vm0, %v227_v44, 0.0 }
 0x11a   : > { %v230_v47 = vadd.f32 %v229_v46, %v228_v45 }
 0x11c   : > { %231 = vadd.xlane.f32.xlu0 %v230_v47 }
 0x18f   : > { %v232_v48 = vpop.xlane.xlu0 %231 }
 0x190   : > { %v233_v49 = vmul.f32 %v232_v48, %v222_v38 }
 0x192   : > { %v234_v50 = vadd.f32 1e-05, %v233_v49 }
 0x194   : > { %333 = vrsqrt.f32 %v234_v50  ;;  %vm241_vm10 = vweird.f32 %v234_v50 }
 0x19a   : > { %v334_v51 = vpop.eup %333 }
 0x19b   : > { %v236_v52 = vmul.f32 %v334_v51, %v234_v50  ;;  %vm242_vm9 = vweird.f32 %v334_v51 }
 0x19c   : > { %vm243_vm11 = vmor %vm241_vm10, %vm242_vm9 }
 0x19d   : > { %v237_v53 = vmul.f32 %v334_v51, %v236_v52 }
 0x19f   : > { %v238_v54 = vmul.f32 0.5, %v237_v53 }
 0x1a1   : > { %v239_v55 = vsub.f32 1.5, %v238_v54 }
 0x1a3   : > { %v240_v56 = vmul.f32 %v334_v51, %v239_v55 }
 0x1a5   : > { %v244_v57 = vsel %vm243_vm11, %v334_v51, %v240_v56 }
 0x1a6   : > { %v246_v58 = vmul.f32 %v244_v57, %v225_v42  ;;  %v245_v59 = vmul.f32 %v244_v57, %v224_v41 }
 0x1a8   : > { %v249_v60 = vrot.slane %v246_v58, 4 }
 0x1aa   : > { %v250_v61 = vsel %vm178_vm0, %v245_v59, %v249_v60 }
 0x1ab   : > { %252 = vst [vmem:[%s143_s20] sm:$0xff] %v250_v61 }
 0x1ac PF: > { %s12_s9 = sadd.s32 1, %s341_s9  }
 0x1ad   : > { %p9_p4 = scmp.ge.s32.totalorder %s12_s9, 4  }
 0x1af   :  { %11 = sbr.rel (!%p9_p4) target bundleno = 1 (0x1), region = 58 }

// kernel: _lambda_.59
= control target key start
LH: loop header
LB: loop body
LE: loop exit
PB: predicated region body
PF: predicated region fallthrough
CT: control target
= control target key end

     0   :  { %s378_s9 = smov 0   ;;  %s409_s0 = inlined_call_operand.vmem [shape: f32[2,36,256], index: 0, kind: input, shape index: {}]   ;;  %s410_s1 = inlined_call_operand.vmem [shape: bf16[4,36], index: 1, kind: input, shape index: {}]   ;;  %s411_s2 = inlined_call_operand.vmem [shape: f32[2,4,256], index: 2, kind: output, shape index: {}]  }
   0x1 LB: > { %s327_s10 = sadd.s32 4294967295, %s360_s9   ;;  %p331_p0 = scmp.ge.s32.totalorder %s360_s9, 1  ;;  %s360_s9 = sphi %s378_s9, %s12_s9  }
   0x2   : > { %p112_p1 = scmp.lt.s32.totalorder %s360_s9, 3 }
   0x4   : > { %p113_p2 = pnand %p331_p0, %p112_p1 }
   0x5   : > { %p134_p3 = scmp.lt.s32.totalorder (!%p113_p2), %s327_s10, 1 }
   0x6   : > { %116 = sbr.rel (%p113_p2) target bundleno = 432 (0x1b0), region = 28 }
   0xb   : > { %s413_s10 = smov (!%p134_p3, %s327_s10), 1  ;;  %vm196_vm0 = vcmask 1041408   ;;  %v185_v38 = vld [vmem:[%s410_s1] sm:$0x3]  ;;  %vm192_vm11 = vcmask 293888   ;;  %vm229_vm12 = vcmask 1043456  }
   0xc   : > { %s340_s11 = smul.u32 80, %s413_s10  ;;  %v362_v46 = vmov 256.0   ;;  %s339_s17 = sshll.u32 %s413_s10, 3 }
   0xd   : > { %350 = vrcp.f32 %v362_v46  ;;  %s143_s20 = scalar_lea.vmem %s411_s2, %s339_s17 }
   0xe   : > { %s138_s14 = scalar_lea.vmem %s409_s0, %s340_s11 }
   0xf   : > { %v153_v0 = vld [vmem:[%s138_s14 + $0x40] sm:$0xf]  ;;  %v154_v1 = vld [vmem:[%s138_s14 + $0x48] sm:$0xf]  ;;  %v151_v5 = vld [vmem:[%s138_s14 + $0x30] sm:$0xff] }
  0x10   : > { %v149_v2 = vld [vmem:[%s138_s14 + $0x20] sm:$0xff]  ;;  %vm163_vm1 = vcmp.ge.f32.partialorder %v153_v0, 0.0  ;;  %v173_v3 = vmul.f32 0.01, %v153_v0  ;;  %vm164_vm2 = vcmp.ge.f32.partialorder %v154_v1, 0.0  ;;  %v150_v7 = vld [vmem:[%s138_s14 + $0x28] sm:$0xff] }
  0x11   : > { %v174_v4 = vmul.f32 0.01, %v154_v1  ;;  %vm159_vm3 = vcmp.ge.f32.partialorder %v149_v2, 0.0  ;;  %v169_v6 = vmul.f32 0.01, %v149_v2  ;;  %v152_v8 = vld [vmem:[%s138_s14 + $0x38] sm:$0xff] }
  0x12   : > { %v183_v9 = vsel %vm163_vm1, %v153_v0, %v173_v3  ;;  %vm161_vm4 = vcmp.ge.f32.partialorder %v151_v5, 0.0  ;;  %v171_v11 = vmul.f32 0.01, %v151_v5  ;;  %v145_v12 = vld [vmem:[%s138_s14] sm:$0xff]  ;;  %vm160_vm5 = vcmp.ge.f32.partialorder %v150_v7, 0.0  ;;  %v147_v16 = vld [vmem:[%s138_s14 + $0x10] sm:$0xff] }
  0x13   : > { %v184_v10 = vsel %vm164_vm2, %v154_v1, %v174_v4  ;;  %v190_v13 = vpack.c.bf16 %v183_v9, %v183_v9  ;;  %v179_v15 = vsel %vm159_vm3, %v149_v2, %v169_v6  ;;  %v146_v17 = vld [vmem:[%s138_s14 + $0x8] sm:$0xff]  ;;  %vm162_vm6 = vcmp.ge.f32.partialorder %v152_v8, 0.0  ;;  %v148_v21 = vld [vmem:[%s138_s14 + $0x18] sm:$0xff]  ;;  %v351_v47 = vpop.eup %350 }
  0x14   : > { %v191_v14 = vpack.c.bf16 %v184_v10, %v184_v10  ;;  %v181_v18 = vsel %vm161_vm4, %v151_v5, %v171_v11  ;;  %v170_v19 = vmul.f32 0.01, %v150_v7  ;;  %v172_v20 = vmul.f32 0.01, %v152_v8 }
  0x15   : > { %v198_v22 = vsel %vm196_vm0, %v190_v13, 0  ;;  %v188_v24 = vpack.c.bf16 %v181_v18, %v179_v15  ;;  %vm155_vm7 = vcmp.ge.f32.partialorder %v145_v12, 0.0  ;;  %vm157_vm8 = vcmp.ge.f32.partialorder %v147_v16, 0.0 }
  0x16   : > { %v201_v23 = vsel %vm196_vm0, %v191_v14, 0  ;;  %208 = vmatpush.bf16.msra.mxu0 %v198_v22  ;;  %v180_v25 = vsel %vm160_vm5, %v150_v7, %v170_v19  ;;  %v182_v26 = vsel %vm162_vm6, %v152_v8, %v172_v20  ;;  %v165_v27 = vmul.f32 0.01, %v145_v12 }
  0x17   : > { %221 = vmatpush.bf16.msra.mxu1 %v201_v23  ;;  %v189_v28 = vpack.c.bf16 %v182_v26, %v180_v25  ;;  %v167_v29 = vmul.f32 0.01, %v147_v16  ;;  %vm156_vm9 = vcmp.ge.f32.partialorder %v146_v17, 0.0  ;;  %vm158_vm10 = vcmp.ge.f32.partialorder %v148_v21, 0.0 }
  0x18   : > { %v175_v30 = vsel %vm155_vm7, %v145_v12, %v165_v27  ;;  %v166_v31 = vmul.f32 0.01, %v146_v17  ;;  %v168_v32 = vmul.f32 0.01, %v148_v21  ;;  %v236_v48 = vmul.f32 256.0, %v351_v47 }
  0x19   : > { %v177_v33 = vsel %vm157_vm8, %v147_v16, %v167_v29  ;;  %vm240_vm13 = vweird.f32 %v351_v47 }
  0x1a   : > { %209 = vmatpush.bf16.msra.mxu0 %v188_v24  ;;  %v186_v34 = vpack.c.bf16 %v177_v33, %v175_v30  ;;  %v176_v35 = vsel %vm156_vm9, %v146_v17, %v166_v31  ;;  %v178_v36 = vsel %vm158_vm10, %v148_v21, %v168_v32  ;;  %v237_v49 = vsub.f32 1.0, %v236_v48 }
  0x1b   : > { %222 = vmatpush.bf16.msra.mxu1 %v189_v28  ;;  %v187_v37 = vpack.c.bf16 %v178_v36, %v176_v35 }
  0x1c   : > { %v238_v50 = vmul.f32 %v351_v47, %v237_v49 }
  0x1e   : > { %210 = vmatpush.bf16.msra.mxu0 %v186_v34  ;;  %v239_v51 = vadd.f32 %v351_v47, %v238_v50 }
  0x1f   : > { %223 = vmatpush.bf16.msra.mxu1 %v187_v37 }
  0x20   : > { %v241_v52 = vsel %vm240_vm13, %v351_v47, %v239_v51 }
  0x21   : > { %335 = vmatmul.msk.bf16.vlgmr.msra.gmra.mxu0 %vm192_vm11, %v185_v38 }
  0x22   : > { %336 = vmatmul.msk.bf16.vlgmr.msra.gmra.mxu1 %vm192_vm11, %v185_v38 }
  0x9e   : > { %v212_v39 = vpop.f32.mrf.mxu0 }
  0x9f   : > { %v225_v40 = vpop.f32.mrf.mxu1  ;;  %v230_v41 = vsel %vm229_vm12, %v212_v39, 0.0 }
  0xa0   : > { %v231_v42 = vsel %vm229_vm12, %v225_v40, 0.0 }
  0xa1   : > { %v232_v43 = vadd.f32 %v231_v42, %v230_v41 }
  0xa3   : > { %233 = vadd.xlane.f32.xlu0 %v232_v43 }
  0xa6   : > { %v214_v44 = vpop.f32.mrf.mxu0 }
  0xa7   : > { %v227_v45 = vpop.f32.mrf.mxu1 }
 0x116   : > { %v234_v53 = vpop.xlane.xlu0 %233 }
 0x117   : > { %v242_v54 = vmul.f32 %v241_v52, %v234_v53 }
 0x119   : > { %v243_v55 = vsub.f32 %v212_v39, %v242_v54  ;;  %v244_v56 = vsub.f32 %v225_v40, %v242_v54 }
 0x11b   : > { %v245_v57 = vmul.f32 %v243_v55, %v243_v55  ;;  %v246_v58 = vmul.f32 %v244_v56, %v244_v56 }
 0x11d   : > { %v247_v59 = vsel %vm229_vm12, %v245_v57, 0.0  ;;  %v248_v60 = vsel %vm229_vm12, %v246_v58, 0.0 }
 0x11e   : > { %v249_v61 = vadd.f32 %v248_v60, %v247_v59 }
 0x120   : > { %250 = vadd.xlane.f32.xlu0 %v249_v61 }
 0x193   : > { %v251_v62 = vpop.xlane.xlu0 %250 }
 0x194   : > { %v252_v63 = vmul.f32 %v251_v62, %v241_v52 }
 0x196   : > { %v253_v0 = vadd.f32 1e-05, %v252_v63 }
 0x198   : > { %352 = vrsqrt.f32 %v253_v0  ;;  %vm260_vm15 = vweird.f32 %v253_v0 }
 0x19e   : > { %v353_v1 = vpop.eup %352 }
 0x19f   : > { %v255_v2 = vmul.f32 %v353_v1, %v253_v0  ;;  %vm261_vm14 = vweird.f32 %v353_v1 }
 0x1a0   : > { %vm262_vm0 = vmor %vm260_vm15, %vm261_vm14 }
 0x1a1   : > { %v256_v3 = vmul.f32 %v353_v1, %v255_v2 }
 0x1a3   : > { %v257_v4 = vmul.f32 0.5, %v256_v3 }
 0x1a5   : > { %v258_v5 = vsub.f32 1.5, %v257_v4 }
 0x1a7   : > { %v259_v6 = vmul.f32 %v353_v1, %v258_v5 }
 0x1a9   : > { %v263_v7 = vsel %vm262_vm0, %v353_v1, %v259_v6 }
 0x1aa   : > { %v265_v8 = vmul.f32 %v263_v7, %v244_v56  ;;  %v264_v9 = vmul.f32 %v263_v7, %v243_v55 }
 0x1ac   : > { %v268_v10 = vrot.slane %v265_v8, 4 }
 0x1ae   : > { %v269_v11 = vsel %vm229_vm12, %v264_v9, %v268_v10 }
 0x1af   : > { %271 = vst [vmem:[%s143_s20] sm:$0xff] %v269_v11 }
 0x1b0 PF: > { %s12_s9 = sadd.s32 1, %s360_s9  }
 0x1b1   : > { %p9_p4 = scmp.ge.s32.totalorder %s12_s9, 4  }
 0x1b3   :  { %11 = sbr.rel (!%p9_p4) target bundleno = 1 (0x1), region = 58 }

// kernel: _lambda_.56
= control target key start
LH: loop header
LB: loop body
LE: loop exit
PB: predicated region body
PF: predicated region fallthrough
CT: control target
= control target key end

     0   :  { %s1313_s27 = smov 0   ;;  %s1418_s0 = inlined_call_operand.vmem [shape: f32[2,8,64], index: 0, kind: input, shape index: {}, may-alias: {0,3}]   ;;  %s1419_s1 = inlined_call_operand.vmem [shape: f32[2,8,64], index: 1, kind: input, shape index: {}, may-alias: {1,4}]   ;;  %s1420_s2 = inlined_call_operand.vmem [shape: f32[2,8,64], index: 2, kind: input, shape index: {}]   ;;  %s1421_s3 = inlined_call_operand.vmem [shape: f32[2,8,64], index: 3, kind: input, shape index: {}, may-alias: {0,3}]   ;;  %s1422_s4 = inlined_call_operand.vmem [shape: f32[2,8,64], index: 4, kind: input, shape index: {}, may-alias: {1,4}]   ;;  %s1423_s5 = inlined_call_operand.vmem [shape: f32[2,8,64], index: 5, kind: input, shape index: {}]   ;;  %s1424_s6 = inlined_call_operand.vmem [shape: f32[2,9,8,64], index: 6, kind: input, shape index: {}]   ;;  %s1425_s7 = inlined_call_operand.vmem [shape: f32[4,8], index: 7, kind: input, shape index: {}]   ;;  %s1426_s8 = inlined_call_operand.vmem [shape: f32[4,8], index: 8, kind: input, shape index: {}]   ;;  %s1427_s9 = inlined_call_operand.vmem [shape: f32[4,8], index: 9, kind: input, shape index: {}]   ;;  %s1428_s10 = inlined_call_operand.vmem [shape: f32[4,1], index: 10, kind: input, shape index: {}]   ;;  %s1429_s11 = inlined_call_operand.vmem [shape: f32[8,4], index: 11, kind: input, shape index: {}]   ;;  %s1430_s12 = inlined_call_operand.vmem [shape: f32[8,4], index: 12, kind: input, shape index: {}]   ;;  %s1431_s13 = inlined_call_operand.vmem [shape: f32[8,4], index: 13, kind: input, shape index: {}]   ;;  %s1432_s14 = inlined_call_operand.vmem [shape: f32[8,1], index: 14, kind: input, shape index: {}]   ;;  %s1433_s15 = inlined_call_operand.vmem [shape: f32[8,1], index: 15, kind: input, shape index: {}]   ;;  %s1434_s16 = inlined_call_operand.vmem [shape: f32[8,1], index: 16, kind: input, shape index: {}]   ;;  %s1435_s17 = inlined_call_operand.vmem [shape: f32[2,3,8,64], index: 17, kind: input, shape index: {}]   ;;  %s1436_s18 = inlined_call_operand.vmem [shape: f32[2,3,8,64], index: 18, kind: output, shape index: {}]  }
   0x1   :  { %1438 = sst [smem:[#allocation3_spill]] %s1418_s0 }
   0x2   :  { %1439 = sst [smem:[#allocation4_spill]] %s1419_s1 }
   0x3   :  { %1440 = sst [smem:[#allocation5_spill]] %s1420_s2 }
   0x4 LB: > { %1441 = sst [smem:[#allocation2_spill]] %s1214_s27  ;;  %s1139_s28 = sadd.s32 4294967295, %s1214_s27   ;;  %s1214_s27 = sphi %s1313_s27, %s28_s27  }
   0x5   : > { %p1143_p0 = scmp.ge.s32.totalorder %s1214_s27, 1  ;;  %p576_p1 = scmp.lt.s32.totalorder %s1214_s27, 3 }
   0x7   : > { %p577_p2 = pnand %p1143_p0, %p576_p1 }
   0x8   : > { %p659_p3 = scmp.lt.s32.totalorder (!%p577_p2), %s1139_s28, 1  ;;  %s1442_s22 = sld [smem:[#allocation5_spill]] (!%p577_p2) }
   0x9   : > { %580 = sbr.rel (%p577_p2) target bundleno = 584 (0x248), region = 92 }
   0xe   : > { %s1449_s28 = smov (!%p659_p3, %s1139_s28), 1  ;;  %vm735_vm0 = vcmask 523264   ;;  %v1216_v31 = vmov 64.0   ;;  %v777_v40 = vld [vmem:[%s1426_s8] sm:$0xf]  ;;  %vm748_vm2 = vcmask 64512  }
   0xf   : > { %s1179_s29 = smul.u32 72, %s1449_s28  ;;  %s1325_s30 = sshll.u32 %s1449_s28, 3  ;;  %1194 = vrcp.f32 %v1216_v31  ;;  %v806_v43 = vld [vmem:[%s1427_s9] sm:$0xf]  ;;  %vm838_vm3 = vcmask 1043456   ;;  %vm834_vm4 = vcmask 31744  }
  0x10   : > { %s670_s2 = scalar_lea.vmem %s1442_s22, %s1325_s30  ;;  %s674_s25 = scalar_lea.vmem %s1421_s3, %s1325_s30  ;;  %v747_v46 = vld [vmem:[%s1425_s7] sm:$0xf]  ;;  %v1217_v58 = vmov 0  }
  0x11   : > { %s687_s1 = scalar_lea.vmem %s1424_s6, %s1179_s29  ;;  %s678_s0 = scalar_lea.vmem %s1422_s4, %s1325_s30  ;;  %v701_v6 = vld [vmem:[%s670_s2] sm:$0xff]  ;;  %1191 = vset.pattern.permute.xlu1 %v1217_v58  ;;  %1192 = vset.pattern.permute.xlu2 %v1217_v58 }
  0x12   : > { %v707_v0 = vld [vmem:[%s687_s1] sm:$0xff]  ;;  %v1153_v1 = vld [vmem:[%s687_s1 + $0x8] sm:$0xff]  ;;  %v1154_v2 = vld [vmem:[%s687_s1 + $0x10] sm:$0xff]  ;;  %s682_s19 = scalar_lea.vmem %s1423_s5, %s1325_s30  ;;  %s1443_s22 = sld [smem:[#allocation3_spill]]  ;;  %1193 = vset.pattern.permute.xlu0 %v1217_v58 }
  0x13   : > { %v710_v3 = vadd.f32 %v1153_v1, %v707_v0  ;;  %v1155_v4 = vld [vmem:[%s687_s1 + $0x18] sm:$0xff]  ;;  %v702_v7 = vld [vmem:[%s674_s25] sm:$0xff]  ;;  %v1157_v12 = vld [vmem:[%s687_s1 + $0x28] sm:$0xff]  ;;  %s1444_s25 = sld [smem:[#allocation4_spill]]  ;;  %s1180_s20 = smul.u32 24, %s1449_s28 }
  0x14   : > { %v1156_v8 = vld [vmem:[%s687_s1 + $0x20] sm:$0xff]  ;;  %v703_v9 = vadd.f32 %v702_v7, %v701_v6  ;;  %v1158_v15 = vld [vmem:[%s687_s1 + $0x30] sm:$0xff]  ;;  %v1159_v18 = vld [vmem:[%s687_s1 + $0x38] sm:$0xff] }
  0x15   : > { %v713_v5 = vadd.f32 %v1154_v2, %v710_v3  ;;  %v704_v10 = vld [vmem:[%s678_s0] sm:$0xff]  ;;  %v1195_v32 = vpop.eup %1194 }
  0x16   : > { %v1342_v13 = vadd.f32 %v704_v10, %v703_v9  ;;  %v1160_v20 = vld [vmem:[%s687_s1 + $0x40] sm:$0xff]  ;;  %v740_v33 = vmul.f32 64.0, %v1195_v32  ;;  %vm744_vm1 = vweird.f32 %v1195_v32 }
  0x17   : > { %v716_v11 = vadd.f32 %v1155_v4, %v713_v5  ;;  %v706_v23 = vld [vmem:[%s682_s19] sm:$0xff] }
  0x18   : > { %v773_v16 = vsel %vm735_vm0, %v1342_v13, 0.0  ;;  %s662_s2 = scalar_lea.vmem %s1443_s22, %s1325_s30  ;;  %v741_v34 = vsub.f32 1.0, %v740_v33  ;;  %v734_v47 = vld [vmem:[%s1428_s10] sm:$0xf] }
  0x19   : > { %v719_v14 = vadd.f32 %v1156_v8, %v716_v11  ;;  %774 = vadd.xlane.f32.xlu1 %v773_v16  ;;  %s666_s26 = scalar_lea.vmem %s1444_s25, %s1325_s30  ;;  %v698_v26 = vld [vmem:[%s662_s2] sm:$0xff]  ;;  %s692_s2 = scalar_lea.vmem %s1435_s17, %s1180_s20 }
  0x1a   : > { %v699_v27 = vld [vmem:[%s666_s26] sm:$0xff]  ;;  %v742_v35 = vmul.f32 %v1195_v32, %v741_v34  ;;  %s697_s25 = scalar_lea.vmem %s1436_s18, %s1180_s20 }
  0x1b   : > { %v722_v17 = vadd.f32 %v1157_v12, %v719_v14  ;;  %v1362_v29 = vadd.f32 %v699_v27, %v698_v26  ;;  %v832_v55 = vld [vmem:[%s1429_s11] sm:$0xff] }
  0x1c   : > { %v743_v36 = vadd.f32 %v1195_v32, %v742_v35  ;;  %v890_v56 = vld [vmem:[%s1430_s12] sm:$0xff] }
  0x1d   : > { %v725_v19 = vadd.f32 %v1158_v15, %v722_v17  ;;  %v736_v30 = vsel %vm735_vm0, %v1362_v29, 0.0  ;;  %v945_v57 = vld [vmem:[%s1431_s13] sm:$0xff] }
  0x1e   : > { %v745_v37 = vsel %vm744_vm1, %v1195_v32, %v743_v36  ;;  %v891_v59 = vld [vmem:[%s1433_s15] sm:$0xff] }
  0x1f   : > { %v728_v21 = vadd.f32 %v1159_v18, %v725_v19  ;;  %v946_v60 = vld [vmem:[%s1434_s16] sm:$0xff] }
  0x20   : > { %v833_v1 = vld [vmem:[%s1432_s14] sm:$0xff] }
  0x21   : > { %v731_v22 = vadd.f32 %v1160_v20, %v728_v21 }
  0x23   : > { %v732_v24 = vmul.f32 0.11111111, %v731_v22 }
  0x25   : > { %v1358_v25 = vadd.f32 %v732_v24, %v706_v23 }
  0x27   : > { %v802_v28 = vsel %vm735_vm0, %v1358_v25, 0.0 }
  0x28   : > { %803 = vadd.xlane.f32.xlu0 %v802_v28 }
  0x30   : > { %737 = vadd.xlane.f32.xlu0 %v736_v30 }
  0x8c   : > { %v775_v38 = vpop.xlane.xlu1 %774 }
  0x8d   : > { %v776_v39 = vmul.f32 %v775_v38, %v745_v37 }
  0x8f   : > { %796 = vmatpush.msra.mxu1 %v776_v39 }
  0x90   : > { %1162 = vmatmul.msk.f32.vlgmr.msra.gmra.mxu1 %vm748_vm2, %v777_v40 }
  0x9b   : > { %v804_v41 = vpop.xlane.xlu0 %803 }
  0x9c   : > { %v805_v42 = vmul.f32 %v804_v41, %v745_v37 }
  0x9e   : > { %825 = vmatpush.msra.mxu2 %v805_v42 }
  0x9f   : > { %1163 = vmatmul.msk.f32.vlgmr.msra.gmra.mxu2 %vm748_vm2, %v806_v43 }
  0xa3   : > { %v738_v44 = vpop.xlane.xlu0 %737 }
  0xa4   : > { %v746_v45 = vmul.f32 %v745_v37, %v738_v44 }
  0xa6   : > { %767 = vmatpush.msra.mxu0 %v746_v45 }
  0xa7   : > { %1161 = vmatmul.msk.f32.vlgmr.msra.gmra.mxu0 %vm748_vm2, %v747_v46 }
 0x10d   : > { %v798_v49 = vpop.f32.mrf.mxu1 }
 0x122   : > { %v827_v51 = vpop.f32.mrf.mxu2 }
 0x124   : > { %v769_v48 = vpop.f32.mrf.mxu0 }
 0x125   : > { %v772_v50 = vadd.f32 %v769_v48, %v734_v47  ;;  %v1170_v47 = vld [vmem:[%s692_s2 + $0x8] sm:$0xff] }
 0x127   : > { %v801_v52 = vadd.f32 %v798_v49, %v772_v50 }
 0x129   : > { %v830_v53 = vadd.f32 %v827_v51, %v801_v52  ;;  %v1175_v51 = vld [vmem:[%s692_s2 + $0x10] sm:$0xff] }
 0x12b   : > { %v831_v54 = vmax.f32 %v830_v53, 0.0 }
 0x12d   : > { %1164 = vmatpush.msk.msra.mxu3 %vm838_vm3, %v831_v54  ;;  %1167 = vmatpush.msk.msrb.mxu0 %vm838_vm3, %v831_v54 }
 0x12e   : > { %1172 = vmatpush.msk.msrb.mxu1 %vm838_vm3, %v831_v54  ;;  %1165 = vmatmul.msk.f32.vlgmr.msra.gmra.mxu3 %vm834_vm4, %v832_v55  ;;  %v887_v55 = vld [vmem:[%s692_s2] sm:$0xff] }
 0x12f   : > { %1168 = vmatmul.msk.f32.vlgmr.msrb.gmra.mxu0 %vm834_vm4, %v890_v56  ;;  %1173 = vmatmul.msk.f32.vlgmr.msrb.gmra.mxu1 %vm834_vm4, %v945_v57 }
 0x1ac   : > { %v912_v61 = vpop.f32.mrf.mxu0  ;;  %v967_v62 = vpop.f32.mrf.mxu1 }
 0x1ad   : > { %v913_v63 = vadd.f32 %v912_v61, %v891_v59  ;;  %v968_v0 = vadd.f32 %v967_v62, %v946_v60 }
 0x1af   : > { %v1169_v2 = vmul.f32 -1.442695, %v913_v63  ;;  %v1174_v3 = vmul.f32 -1.442695, %v968_v0 }
 0x1b1   : > { %v859_v4 = vpop.f32.mrf.mxu3  ;;  %1196 = vpow2.f32 %v1169_v2 }
 0x1b2   : > { %v860_v5 = vadd.f32 %v859_v4, %v833_v1  ;;  %1198 = vpow2.f32 %v1174_v3 }
 0x1b4   : > { %v1166_v6 = vmul.f32 -1.442695, %v860_v5 }
 0x1b6   : > { %1200 = vpow2.f32 %v1166_v6 }
 0x1b7   : > { %v1197_v7 = vpop.eup %1196 }
 0x1b8   : > { %v1199_v8 = vpop.eup %1198  ;;  %v918_v9 = vadd.f32 1.0, %v1197_v7 }
 0x1b9   : > { %v973_v10 = vadd.f32 1.0, %v1199_v8 }
 0x1ba   : > { %1202 = vrcp.f32 %v918_v9  ;;  %v930_v17 = vand.u32 2147483648, %v918_v9  ;;  %vm924_vm5 = vweird.f32 %v918_v9  ;;  %v928_v20 = vand.u32 2147483647, %v918_v9 }
 0x1bb   : > { %1204 = vrcp.f32 %v973_v10  ;;  %vm979_vm9 = vweird.f32 %v973_v10  ;;  %v985_v32 = vand.u32 2147483648, %v973_v10  ;;  %v983_v36 = vand.u32 2147483647, %v973_v10 }
 0x1bc   : > { %v1201_v11 = vpop.eup %1200  ;;  %v931_v27 = vor.u32 1.1754944e-38, %v930_v17  ;;  %vm929_vm8 = vcmp.eq.f32.partialorder %v928_v20, 8.507059e+37 }
 0x1bd   : > { %v865_v12 = vadd.f32 1.0, %v1201_v11  ;;  %v986_v41 = vor.u32 1.1754944e-38, %v985_v32  ;;  %vm984_vm15 = vcmp.eq.f32.partialorder %v983_v36, 8.507059e+37 }
 0x1bf   : > { %1206 = vrcp.f32 %v865_v12  ;;  %v877_v33 = vand.u32 2147483648, %v865_v12  ;;  %v875_v38 = vand.u32 2147483647, %v865_v12  ;;  %vm871_vm13 = vweird.f32 %v865_v12 }
 0x1c0   : > { %v1203_v14 = vpop.eup %1202 }
 0x1c1   : > { %v1205_v15 = vpop.eup %1204  ;;  %v920_v16 = vmul.f32 %v1203_v14, %v918_v9  ;;  %vm925_vm6 = vweird.f32 %v1203_v14  ;;  %v878_v42 = vor.u32 1.1754944e-38, %v877_v33  ;;  %vm876_vm1 = vcmp.eq.f32.partialorder %v875_v38, 8.507059e+37 }
 0x1c2   : > { %v975_v18 = vmul.f32 %v1205_v15, %v973_v10  ;;  %vm1396_vm7 = vmor %vm924_vm5, %vm925_vm6  ;;  %vm980_vm10 = vweird.f32 %v1205_v15 }
 0x1c3   : > { %v921_v19 = vsub.f32 1.0, %v920_v16  ;;  %vm981_vm12 = vmor %vm979_vm9, %vm980_vm10 }
 0x1c4   : > { %v976_v21 = vsub.f32 1.0, %v975_v18 }
 0x1c5   : > { %v1207_v22 = vpop.eup %1206  ;;  %v922_v23 = vmul.f32 %v1203_v14, %v921_v19 }
 0x1c6   : > { %v867_v24 = vmul.f32 %v1207_v22, %v865_v12  ;;  %v977_v28 = vmul.f32 %v1205_v15, %v976_v21  ;;  %vm872_vm11 = vweird.f32 %v1207_v22 }
 0x1c7   : > { %v923_v30 = vadd.f32 %v1203_v14, %v922_v23  ;;  %vm873_vm14 = vmor %vm871_vm13, %vm872_vm11 }
 0x1c8   : > { %v868_v31 = vsub.f32 1.0, %v867_v24  ;;  %v978_v35 = vadd.f32 %v1205_v15, %v977_v28 }
 0x1c9   : > { %v927_v34 = vsel %vm1396_vm7, %v1203_v14, %v923_v30 }
 0x1ca   : > { %v869_v37 = vmul.f32 %v1207_v22, %v868_v31  ;;  %v932_v39 = vsel %vm929_vm8, %v931_v27, %v927_v34  ;;  %v982_v43 = vsel %vm981_vm12, %v1205_v15, %v978_v35 }
 0x1cb   : > { %936 = vperm.xlu2 %1192, %v932_v39   ;;  %v987_v46 = vsel %vm984_vm15, %v986_v41, %v982_v43 }
 0x1cc   : > { %v870_v40 = vadd.f32 %v1207_v22, %v869_v37 }
 0x1ce   : > { %v874_v44 = vsel %vm873_vm14, %v1207_v22, %v870_v40 }
 0x1cf   : > { %v879_v45 = vsel %vm876_vm1, %v878_v42, %v874_v44 }
 0x1d0   : > { %883 = vperm.xlu1 %1191, %v879_v45  }
 0x1d3   : > { %991 = vperm.xlu2 %1192, %v987_v46  }
 0x225   : > { %v937_v48 = vpop.permute.xlu2 %936 }
 0x226   : > { %v939_v49 = vmul.f32 %v937_v48, %v1342_v13 }
 0x228   : > { %v942_v50 = vadd.f32 %v1170_v47, %v939_v49 }
 0x22a   : > { %1171 = vst.msk [vmem:[%s697_s25 + $0x8] sm:$0xff] %vm735_vm0, %v942_v50 }
 0x22d   : > { %v992_v52 = vpop.permute.xlu2 %991 }
 0x22e   : > { %v994_v53 = vmul.f32 %v992_v52, %v1358_v25 }
 0x230   : > { %v997_v54 = vadd.f32 %v1175_v51, %v994_v53 }
 0x232   : > { %1176 = vst.msk [vmem:[%s697_s25 + $0x10] sm:$0xff] %vm735_vm0, %v997_v54 }
 0x242   : > { %v884_v56 = vpop.permute.xlu1 %883 }
 0x243   : > { %v886_v57 = vmul.f32 %v884_v56, %v1362_v29 }
 0x245   : > { %v888_v58 = vadd.f32 %v887_v55, %v886_v57 }
 0x247   : > { %889 = vst.msk [vmem:[%s697_s25] sm:$0xff] %vm735_vm0, %v888_v58 }
 0x248 PF: > { %s1447_s28 = sld [smem:[#allocation2_spill]] }
 0x24e   : > { %s28_s27 = sadd.s32 1, %s1447_s28  }
 0x24f   : > { %p25_p4 = scmp.ge.s32.totalorder %s28_s27, 4  }
 0x251   :  { %27 = sbr.rel (!%p25_p4) target bundleno = 4 (0x4), region = 155 }

// kernel: _lambda_.60
= control target key start
LH: loop header
LB: loop body
LE: loop exit
PB: predicated region body
PF: predicated region fallthrough
CT: control target
= control target key end

     0   :  { %s454_s12 = smov 0   ;;  %s492_s0 = inlined_call_operand.vmem [shape: f32[2,36,256], index: 0, kind: input, shape index: {}]   ;;  %s493_s1 = inlined_call_operand.vmem [shape: bf16[4,36], index: 1, kind: input, shape index: {}]   ;;  %s494_s2 = inlined_call_operand.vmem [shape: f32[2,4,256], index: 2, kind: input, shape index: {}]   ;;  %s495_s3 = inlined_call_operand.vmem [shape: f32[2,4,256], index: 3, kind: output, shape index: {}]  }
   0x1 LB: > { %s395_s13 = sadd.s32 4294967295, %s431_s12   ;;  %p399_p0 = scmp.ge.s32.totalorder %s431_s12, 1  ;;  %s431_s12 = sphi %s454_s12, %s13_s12  }
   0x2   : > { %p147_p1 = scmp.lt.s32.totalorder %s431_s12, 3 }
   0x4   : > { %p148_p2 = pnand %p399_p0, %p147_p1 }
   0x5   : > { %p176_p3 = scmp.lt.s32.totalorder (!%p148_p2), %s395_s13, 1 }
   0x6   : > { %151 = sbr.rel (%p148_p2) target bundleno = 434 (0x1b2), region = 32 }
   0xb   : > { %s497_s13 = smov (!%p176_p3, %s395_s13), 1  ;;  %vm243_vm0 = vcmask 1041408   ;;  %v232_v38 = vld [vmem:[%s493_s1] sm:$0x3]  ;;  %vm239_vm11 = vcmask 293888   ;;  %vm276_vm12 = vcmask 1043456  }
   0xc   : > { %s411_s14 = smul.u32 80, %s497_s13  ;;  %s409_s20 = sshll.u32 %s497_s13, 3  ;;  %v433_v46 = vmov 256.0  }
   0xd   : > { %421 = vrcp.f32 %v433_v46  ;;  %s185_s23 = scalar_lea.vmem %s494_s2, %s409_s20  ;;  %s190_s26 = scalar_lea.vmem %s495_s3, %s409_s20 }
   0xe   : > { %s180_s17 = scalar_lea.vmem %s492_s0, %s411_s14  ;;  %v313_v47 = vld [vmem:[%s185_s23] sm:$0xff] }
   0xf   : > { %v200_v0 = vld [vmem:[%s180_s17 + $0x40] sm:$0xf]  ;;  %v201_v1 = vld [vmem:[%s180_s17 + $0x48] sm:$0xf]  ;;  %v198_v5 = vld [vmem:[%s180_s17 + $0x30] sm:$0xff] }
  0x10   : > { %v196_v2 = vld [vmem:[%s180_s17 + $0x20] sm:$0xff]  ;;  %vm210_vm1 = vcmp.ge.f32.partialorder %v200_v0, 0.0  ;;  %v220_v3 = vmul.f32 0.01, %v200_v0  ;;  %vm211_vm2 = vcmp.ge.f32.partialorder %v201_v1, 0.0  ;;  %v197_v7 = vld [vmem:[%s180_s17 + $0x28] sm:$0xff] }
  0x11   : > { %v221_v4 = vmul.f32 0.01, %v201_v1  ;;  %vm206_vm3 = vcmp.ge.f32.partialorder %v196_v2, 0.0  ;;  %v216_v6 = vmul.f32 0.01, %v196_v2  ;;  %v199_v8 = vld [vmem:[%s180_s17 + $0x38] sm:$0xff] }
  0x12   : > { %v230_v9 = vsel %vm210_vm1, %v200_v0, %v220_v3  ;;  %vm208_vm4 = vcmp.ge.f32.partialorder %v198_v5, 0.0  ;;  %v218_v11 = vmul.f32 0.01, %v198_v5  ;;  %v192_v12 = vld [vmem:[%s180_s17] sm:$0xff]  ;;  %vm207_vm5 = vcmp.ge.f32.partialorder %v197_v7, 0.0  ;;  %v194_v16 = vld [vmem:[%s180_s17 + $0x10] sm:$0xff] }
  0x13   : > { %v231_v10 = vsel %vm211_vm2, %v201_v1, %v221_v4  ;;  %v237_v13 = vpack.c.bf16 %v230_v9, %v230_v9  ;;  %v226_v15 = vsel %vm206_vm3, %v196_v2, %v216_v6  ;;  %v193_v17 = vld [vmem:[%s180_s17 + $0x8] sm:$0xff]  ;;  %vm209_vm6 = vcmp.ge.f32.partialorder %v199_v8, 0.0  ;;  %v195_v21 = vld [vmem:[%s180_s17 + $0x18] sm:$0xff]  ;;  %v422_v48 = vpop.eup %421  ;;  %315 = vst [vmem:[#allocation1] ss:$2 sm:$0xff] %v313_v47 }
  0x14   : > { %v238_v14 = vpack.c.bf16 %v231_v10, %v231_v10  ;;  %v228_v18 = vsel %vm208_vm4, %v198_v5, %v218_v11  ;;  %v217_v19 = vmul.f32 0.01, %v197_v7  ;;  %v219_v20 = vmul.f32 0.01, %v199_v8 }
  0x15   : > { %v245_v22 = vsel %vm243_vm0, %v237_v13, 0  ;;  %v235_v24 = vpack.c.bf16 %v228_v18, %v226_v15  ;;  %vm202_vm7 = vcmp.ge.f32.partialorder %v192_v12, 0.0  ;;  %vm204_vm8 = vcmp.ge.f32.partialorder %v194_v16, 0.0 }
  0x16   : > { %v248_v23 = vsel %vm243_vm0, %v238_v14, 0  ;;  %255 = vmatpush.bf16.msra.mxu0 %v245_v22  ;;  %v227_v25 = vsel %vm207_vm5, %v197_v7, %v217_v19  ;;  %v229_v26 = vsel %vm209_vm6, %v199_v8, %v219_v20  ;;  %v212_v27 = vmul.f32 0.01, %v192_v12 }
  0x17   : > { %268 = vmatpush.bf16.msra.mxu1 %v248_v23  ;;  %v236_v28 = vpack.c.bf16 %v229_v26, %v227_v25  ;;  %v214_v29 = vmul.f32 0.01, %v194_v16  ;;  %vm203_vm9 = vcmp.ge.f32.partialorder %v193_v17, 0.0  ;;  %vm205_vm10 = vcmp.ge.f32.partialorder %v195_v21, 0.0 }
  0x18   : > { %v222_v30 = vsel %vm202_vm7, %v192_v12, %v212_v27  ;;  %v213_v31 = vmul.f32 0.01, %v193_v17  ;;  %v215_v32 = vmul.f32 0.01, %v195_v21  ;;  %v283_v49 = vmul.f32 256.0, %v422_v48 }
  0x19   : > { %v224_v33 = vsel %vm204_vm8, %v194_v16, %v214_v29  ;;  %vm287_vm13 = vweird.f32 %v422_v48 }
  0x1a   : > { %256 = vmatpush.bf16.msra.mxu0 %v235_v24  ;;  %v233_v34 = vpack.c.bf16 %v224_v33, %v222_v30  ;;  %v223_v35 = vsel %vm203_vm9, %v193_v17, %v213_v31  ;;  %v225_v36 = vsel %vm205_vm10, %v195_v21, %v215_v32  ;;  %v284_v50 = vsub.f32 1.0, %v283_v49  ;;  %v317_v8 = vld.sshfl [vmem:[#allocation1 + $0x8] sm:$0xff pattern:$0x75316420] }
  0x1b   : > { %269 = vmatpush.bf16.msra.mxu1 %v236_v28  ;;  %v234_v37 = vpack.c.bf16 %v225_v36, %v223_v35  ;;  %v316_v12 = vld.sshfl [vmem:[#allocation1] sm:$0xff pattern:$0x75316420] }
  0x1c   : > { %v285_v51 = vmul.f32 %v422_v48, %v284_v50 }
  0x1e   : > { %257 = vmatpush.bf16.msra.mxu0 %v233_v34  ;;  %v286_v52 = vadd.f32 %v422_v48, %v285_v51 }
  0x1f   : > { %270 = vmatpush.bf16.msra.mxu1 %v234_v37 }
  0x20   : > { %v288_v53 = vsel %vm287_vm13, %v422_v48, %v286_v52 }
  0x21   : > { %405 = vmatmul.msk.bf16.vlgmr.msra.gmra.mxu0 %vm239_vm11, %v232_v38 }
  0x22   : > { %406 = vmatmul.msk.bf16.vlgmr.msra.gmra.mxu1 %vm239_vm11, %v232_v38 }
  0x9e   : > { %v259_v39 = vpop.f32.mrf.mxu0 }
  0x9f   : > { %v272_v40 = vpop.f32.mrf.mxu1  ;;  %v277_v41 = vsel %vm276_vm12, %v259_v39, 0.0 }
  0xa0   : > { %v278_v42 = vsel %vm276_vm12, %v272_v40, 0.0 }
  0xa1   : > { %v279_v43 = vadd.f32 %v278_v42, %v277_v41 }
  0xa3   : > { %280 = vadd.xlane.f32.xlu0 %v279_v43 }
  0xa6   : > { %v261_v44 = vpop.f32.mrf.mxu0 }
  0xa7   : > { %v274_v45 = vpop.f32.mrf.mxu1 }
 0x116   : > { %v281_v54 = vpop.xlane.xlu0 %280 }
 0x117   : > { %v289_v55 = vmul.f32 %v288_v53, %v281_v54 }
 0x119   : > { %v290_v56 = vsub.f32 %v259_v39, %v289_v55  ;;  %v291_v57 = vsub.f32 %v272_v40, %v289_v55 }
 0x11b   : > { %v292_v58 = vmul.f32 %v290_v56, %v290_v56  ;;  %v293_v59 = vmul.f32 %v291_v57, %v291_v57 }
 0x11d   : > { %v294_v60 = vsel %vm276_vm12, %v292_v58, 0.0  ;;  %v295_v61 = vsel %vm276_vm12, %v293_v59, 0.0 }
 0x11e   : > { %v296_v62 = vadd.f32 %v295_v61, %v294_v60 }
 0x120   : > { %297 = vadd.xlane.f32.xlu0 %v296_v62 }
 0x193   : > { %v298_v63 = vpop.xlane.xlu0 %297 }
 0x194   : > { %v299_v0 = vmul.f32 %v298_v63, %v288_v53 }
 0x196   : > { %v300_v1 = vadd.f32 1e-05, %v299_v0 }
 0x198   : > { %423 = vrsqrt.f32 %v300_v1  ;;  %vm307_vm15 = vweird.f32 %v300_v1 }
 0x19e   : > { %v424_v2 = vpop.eup %423 }
 0x19f   : > { %v302_v3 = vmul.f32 %v424_v2, %v300_v1  ;;  %vm308_vm14 = vweird.f32 %v424_v2 }
 0x1a0   : > { %vm309_vm0 = vmor %vm307_vm15, %vm308_vm14 }
 0x1a1   : > { %v303_v4 = vmul.f32 %v424_v2, %v302_v3 }
 0x1a3   : > { %v304_v5 = vmul.f32 0.5, %v303_v4 }
 0x1a5   : > { %v305_v6 = vsub.f32 1.5, %v304_v5 }
 0x1a7   : > { %v306_v7 = vmul.f32 %v424_v2, %v305_v6 }
 0x1a9   : > { %v310_v9 = vsel %vm309_vm0, %v424_v2, %v306_v7 }
 0x1aa   : > { %v311_v10 = vmul.f32 %v310_v9, %v290_v56  ;;  %v312_v11 = vmul.f32 %v310_v9, %v291_v57 }
 0x1ac   : > { %v321_v13 = vadd.f32 %v317_v8, %v312_v11  ;;  %v320_v14 = vadd.f32 %v316_v12, %v311_v10 }
 0x1ae   : > { %v324_v15 = vrot.slane %v321_v13, 4 }
 0x1b0   : > { %v325_v16 = vsel %vm276_vm12, %v320_v14, %v324_v15 }
 0x1b1   : > { %327 = vst [vmem:[%s190_s26] sm:$0xff] %v325_v16 }
 0x1b2 PF: > { %s13_s12 = sadd.s32 1, %s431_s12  }
 0x1b3   : > { %p10_p4 = scmp.ge.s32.totalorder %s13_s12, 4  }
 0x1b5   :  { %12 = sbr.rel (!%p10_p4) target bundleno = 1 (0x1), region = 65 }

// kernel: _lambda_.61
= control target key start
LH: loop header
LB: loop body
LE: loop exit
PB: predicated region body
PF: predicated region fallthrough
CT: control target
= control target key end

     0   :  { %s530_s15 = smov 0   ;;  %s572_s0 = inlined_call_operand.vmem [shape: f32[2,36,256], index: 0, kind: input, shape index: {}]   ;;  %s573_s1 = inlined_call_operand.vmem [shape: bf16[4,36], index: 1, kind: input, shape index: {}]   ;;  %s574_s2 = inlined_call_operand.vmem [shape: f32[2,4,256], index: 2, kind: input, shape index: {}]   ;;  %s575_s3 = inlined_call_operand.vmem [shape: f32[2,4,256], index: 3, kind: input, shape index: {}]   ;;  %s576_s4 = inlined_call_operand.vmem [shape: f32[2,4,256], index: 4, kind: output, shape index: {}]  }
   0x1 LB: > { %s463_s16 = sadd.s32 4294967295, %s502_s15   ;;  %p467_p0 = scmp.ge.s32.totalorder %s502_s15, 1  ;;  %s502_s15 = sphi %s530_s15, %s14_s15  }
   0x2   : > { %p182_p1 = scmp.lt.s32.totalorder %s502_s15, 3 }
   0x4   : > { %p183_p2 = pnand %p467_p0, %p182_p1 }
   0x5   : > { %p218_p3 = scmp.lt.s32.totalorder (!%p183_p2), %s463_s16, 1 }
   0x6   : > { %186 = sbr.rel (%p183_p2) target bundleno = 436 (0x1b4), region = 36 }
   0xb   : > { %s578_s16 = smov (!%p218_p3, %s463_s16), 1  ;;  %vm290_vm0 = vcmask 1041408   ;;  %v279_v38 = vld [vmem:[%s573_s1] sm:$0x3]  ;;  %vm286_vm11 = vcmask 293888   ;;  %vm323_vm12 = vcmask 1043456  }
   0xc   : > { %s482_s17 = smul.u32 80, %s578_s16  ;;  %v504_v46 = vmov 256.0   ;;  %s552_s23 = sshll.u32 %s578_s16, 3 }
   0xd   : > { %492 = vrcp.f32 %v504_v46  ;;  %s227_s26 = scalar_lea.vmem %s574_s2, %s552_s23  ;;  %s232_s29 = scalar_lea.vmem %s575_s3, %s552_s23 }
   0xe   : > { %s222_s20 = scalar_lea.vmem %s572_s0, %s482_s17  ;;  %v360_v48 = vld [vmem:[%s227_s26] sm:$0xff]  ;;  %s237_s6 = scalar_lea.vmem %s576_s4, %s552_s23 }
   0xf   : > { %v247_v0 = vld [vmem:[%s222_s20 + $0x40] sm:$0xf]  ;;  %v248_v1 = vld [vmem:[%s222_s20 + $0x48] sm:$0xf]  ;;  %v245_v5 = vld [vmem:[%s222_s20 + $0x30] sm:$0xff] }
  0x10   : > { %v243_v2 = vld [vmem:[%s222_s20 + $0x20] sm:$0xff]  ;;  %vm257_vm1 = vcmp.ge.f32.partialorder %v247_v0, 0.0  ;;  %v267_v3 = vmul.f32 0.01, %v247_v0  ;;  %vm258_vm2 = vcmp.ge.f32.partialorder %v248_v1, 0.0  ;;  %v244_v7 = vld [vmem:[%s222_s20 + $0x28] sm:$0xff] }
  0x11   : > { %v268_v4 = vmul.f32 0.01, %v248_v1  ;;  %vm253_vm3 = vcmp.ge.f32.partialorder %v243_v2, 0.0  ;;  %v263_v6 = vmul.f32 0.01, %v243_v2  ;;  %v246_v8 = vld [vmem:[%s222_s20 + $0x38] sm:$0xff] }
  0x12   : > { %v277_v9 = vsel %vm257_vm1, %v247_v0, %v267_v3  ;;  %vm255_vm4 = vcmp.ge.f32.partialorder %v245_v5, 0.0  ;;  %v265_v11 = vmul.f32 0.01, %v245_v5  ;;  %v239_v12 = vld [vmem:[%s222_s20] sm:$0xff]  ;;  %vm254_vm5 = vcmp.ge.f32.partialorder %v244_v7, 0.0  ;;  %v241_v16 = vld [vmem:[%s222_s20 + $0x10] sm:$0xff] }
  0x13   : > { %v278_v10 = vsel %vm258_vm2, %v248_v1, %v268_v4  ;;  %v284_v13 = vpack.c.bf16 %v277_v9, %v277_v9  ;;  %v273_v15 = vsel %vm253_vm3, %v243_v2, %v263_v6  ;;  %v240_v17 = vld [vmem:[%s222_s20 + $0x8] sm:$0xff]  ;;  %vm256_vm6 = vcmp.ge.f32.partialorder %v246_v8, 0.0  ;;  %v242_v21 = vld [vmem:[%s222_s20 + $0x18] sm:$0xff]  ;;  %v493_v47 = vpop.eup %492  ;;  %362 = vst [vmem:[#allocation1] ss:$2 sm:$0xff] %v360_v48  ;;  %v369_v50 = vld [vmem:[%s232_s29] sm:$0xff] }
  0x14   : > { %v285_v14 = vpack.c.bf16 %v278_v10, %v278_v10  ;;  %v275_v18 = vsel %vm255_vm4, %v245_v5, %v265_v11  ;;  %v264_v19 = vmul.f32 0.01, %v244_v7  ;;  %v266_v20 = vmul.f32 0.01, %v246_v8 }
  0x15   : > { %v292_v22 = vsel %vm290_vm0, %v284_v13, 0  ;;  %v282_v24 = vpack.c.bf16 %v275_v18, %v273_v15  ;;  %vm249_vm7 = vcmp.ge.f32.partialorder %v239_v12, 0.0  ;;  %vm251_vm8 = vcmp.ge.f32.partialorder %v241_v16, 0.0 }
  0x16   : > { %v295_v23 = vsel %vm290_vm0, %v285_v14, 0  ;;  %302 = vmatpush.bf16.msra.mxu0 %v292_v22  ;;  %v274_v25 = vsel %vm254_vm5, %v244_v7, %v264_v19  ;;  %v276_v26 = vsel %vm256_vm6, %v246_v8, %v266_v20  ;;  %v259_v27 = vmul.f32 0.01, %v239_v12 }
  0x17   : > { %315 = vmatpush.bf16.msra.mxu1 %v295_v23  ;;  %v283_v28 = vpack.c.bf16 %v276_v26, %v274_v25  ;;  %v261_v29 = vmul.f32 0.01, %v241_v16  ;;  %vm250_vm9 = vcmp.ge.f32.partialorder %v240_v17, 0.0  ;;  %vm252_vm10 = vcmp.ge.f32.partialorder %v242_v21, 0.0 }
  0x18   : > { %v269_v30 = vsel %vm249_vm7, %v239_v12, %v259_v27  ;;  %v260_v31 = vmul.f32 0.01, %v240_v17  ;;  %v262_v32 = vmul.f32 0.01, %v242_v21  ;;  %v330_v49 = vmul.f32 256.0, %v493_v47 }
  0x19   : > { %v271_v33 = vsel %vm251_vm8, %v241_v16, %v261_v29  ;;  %vm334_vm13 = vweird.f32 %v493_v47 }
  0x1a   : > { %303 = vmatpush.bf16.msra.mxu0 %v282_v24  ;;  %v280_v34 = vpack.c.bf16 %v271_v33, %v269_v30  ;;  %v270_v35 = vsel %vm250_vm9, %v240_v17, %v260_v31  ;;  %v272_v36 = vsel %vm252_vm10, %v242_v21, %v262_v32  ;;  %v331_v51 = vsub.f32 1.0, %v330_v49  ;;  %v363_v52 = vld.sshfl [vmem:[#allocation1] sm:$0xff pattern:$0x75316420] }
  0x1b   : > { %316 = vmatpush.bf16.msra.mxu1 %v283_v28  ;;  %v281_v37 = vpack.c.bf16 %v272_v36, %v270_v35  ;;  %v364_v53 = vld.sshfl [vmem:[#allocation1 + $0x8] sm:$0xff pattern:$0x75316420] }
  0x1c   : > { %371 = vst [vmem:[#allocation1] ss:$2 sm:$0xff] %v369_v50  ;;  %v332_v54 = vmul.f32 %v493_v47, %v331_v51 }
  0x1e   : > { %304 = vmatpush.bf16.msra.mxu0 %v280_v34  ;;  %v333_v55 = vadd.f32 %v493_v47, %v332_v54 }
  0x1f   : > { %317 = vmatpush.bf16.msra.mxu1 %v281_v37 }
  0x20   : > { %v335_v56 = vsel %vm334_vm13, %v493_v47, %v333_v55 }
  0x21   : > { %475 = vmatmul.msk.bf16.vlgmr.msra.gmra.mxu0 %vm286_vm11, %v279_v38 }
  0x22   : > { %476 = vmatmul.msk.bf16.vlgmr.msra.gmra.mxu1 %vm286_vm11, %v279_v38 }
  0x23   : > { %v373_v14 = vld.sshfl [vmem:[#allocation1 + $0x8] sm:$0xff pattern:$0x75316420]  ;;  %v372_v17 = vld.sshfl [vmem:[#allocation1] sm:$0xff pattern:$0x75316420] }
  0x9e   : > { %v306_v39 = vpop.f32.mrf.mxu0 }
  0x9f   : > { %v319_v40 = vpop.f32.mrf.mxu1  ;;  %v324_v41 = vsel %vm323_vm12, %v306_v39, 0.0 }
  0xa0   : > { %v325_v42 = vsel %vm323_vm12, %v319_v40, 0.0 }
  0xa1   : > { %v326_v43 = vadd.f32 %v325_v42, %v324_v41 }
  0xa3   : > { %327 = vadd.xlane.f32.xlu0 %v326_v43 }
  0xa6   : > { %v308_v44 = vpop.f32.mrf.mxu0 }
  0xa7   : > { %v321_v45 = vpop.f32.mrf.mxu1 }
 0x116   : > { %v328_v57 = vpop.xlane.xlu0 %327 }
 0x117   : > { %v336_v58 = vmul.f32 %v335_v56, %v328_v57 }
 0x119   : > { %v337_v59 = vsub.f32 %v306_v39, %v336_v58  ;;  %v338_v60 = vsub.f32 %v319_v40, %v336_v58 }
 0x11b   : > { %v339_v61 = vmul.f32 %v337_v59, %v337_v59  ;;  %v340_v62 = vmul.f32 %v338_v60, %v338_v60 }
 0x11d   : > { %v341_v63 = vsel %vm323_vm12, %v339_v61, 0.0  ;;  %v342_v0 = vsel %vm323_vm12, %v340_v62, 0.0 }
 0x11e   : > { %v343_v1 = vadd.f32 %v342_v0, %v341_v63 }
 0x120   : > { %344 = vadd.xlane.f32.xlu0 %v343_v1 }
 0x193   : > { %v345_v2 = vpop.xlane.xlu0 %344 }
 0x194   : > { %v346_v3 = vmul.f32 %v345_v2, %v335_v56 }
 0x196   : > { %v347_v4 = vadd.f32 1e-05, %v346_v3 }
 0x198   : > { %494 = vrsqrt.f32 %v347_v4  ;;  %vm354_vm15 = vweird.f32 %v347_v4 }
 0x19e   : > { %v495_v5 = vpop.eup %494 }
 0x19f   : > { %v349_v6 = vmul.f32 %v495_v5, %v347_v4  ;;  %vm355_vm14 = vweird.f32 %v495_v5 }
 0x1a0   : > { %vm356_vm0 = vmor %vm354_vm15, %vm355_vm14 }
 0x1a1   : > { %v350_v7 = vmul.f32 %v495_v5, %v349_v6 }
 0x1a3   : > { %v351_v8 = vmul.f32 0.5, %v350_v7 }
 0x1a5   : > { %v352_v9 = vsub.f32 1.5, %v351_v8 }
 0x1a7   : > { %v353_v10 = vmul.f32 %v495_v5, %v352_v9 }
 0x1a9   : > { %v357_v11 = vsel %vm356_vm0, %v495_v5, %v353_v10 }
 0x1aa   : > { %v358_v12 = vmul.f32 %v357_v11, %v337_v59  ;;  %v359_v13 = vmul.f32 %v357_v11, %v338_v60 }
 0x1ac   : > { %v367_v15 = vadd.f32 %v363_v52, %v358_v12  ;;  %v368_v16 = vadd.f32 %v364_v53, %v359_v13 }
 0x1ae   : > { %v377_v18 = vadd.f32 %v373_v14, %v368_v16  ;;  %v376_v19 = vadd.f32 %v372_v17, %v367_v15 }
 0x1b0   : > { %v380_v20 = vrot.slane %v377_v18, 4 }
 0x1b2   : > { %v381_v21 = vsel %vm323_vm12, %v376_v19, %v380_v20 }
 0x1b3   : > { %383 = vst [vmem:[%s237_s6] sm:$0xff] %v381_v21 }
 0x1b4 PF: > { %s14_s15 = sadd.s32 1, %s502_s15  }
 0x1b5   : > { %p11_p4 = scmp.ge.s32.totalorder %s14_s15, 4  }
 0x1b7   :  { %13 = sbr.rel (!%p11_p4) target bundleno = 1 (0x1), region = 72 }

// kernel: _lambda_.63
= control target key start
LH: loop header
LB: loop body
LE: loop exit
PB: predicated region body
PF: predicated region fallthrough
CT: control target
= control target key end

     0   :  { %s338_s12 = smov 0   ;;  %s361_s0 = inlined_call_operand.vmem [shape: f32[2,12,256], index: 0, kind: input, shape index: {}]   ;;  %s362_s1 = inlined_call_operand.vmem [shape: bf16[2,12], index: 1, kind: input, shape index: {}]   ;;  %s363_s2 = inlined_call_operand.vmem [shape: f32[2,1], index: 2, kind: input, shape index: {}]   ;;  %s364_s3 = inlined_call_operand.vmem [shape: f32[2,2,256], index: 3, kind: output, shape index: {}]  }
   0x1 LB: > { %s284_s13 = sadd.s32 4294967295, %s315_s12   ;;  %p288_p0 = scmp.ge.s32.totalorder %s315_s12, 1  ;;  %s315_s12 = sphi %s338_s12, %s13_s12  }
   0x2   : > { %p137_p1 = scmp.lt.s32.totalorder %s315_s12, 3 }
   0x4   : > { %p138_p2 = pnand %p288_p0, %p137_p1 }
   0x5   : > { %p161_p3 = scmp.lt.s32.totalorder (!%p138_p2), %s284_s13, 1 }
   0x6   : > { %141 = sbr.rel (%p138_p2) target bundleno = 156 (0x9c), region = 32 }
   0xb   : > { %v317_v0 = vmov 0   ;;  %v179_v1 = vld [vmem:[%s363_s2] sm:$0x3]  ;;  %s366_s13 = smov (!%p161_p3, %s284_s13), 1  ;;  %vm189_vm0 = vcmask 1045504   ;;  %vm185_vm1 = vcmask 97280  }
   0xc   : > { %308 = vset.pattern.permute.xlu0 %v317_v0  ;;  %s297_s16 = sshll.u32 %s366_s13, 5  ;;  %v176_v10 = vld [vmem:[%s362_s1] sm:$0x1]  ;;  %s298_s22 = sshll.u32 %s366_s13, 2  ;;  %vm225_vm2 = vcmask 1041408  }
   0xd   : > { %182 = vperm.xlu0 %308, %v179_v1   ;;  %s165_s19 = scalar_lea.vmem %s361_s0, %s297_s16  ;;  %s170_s25 = scalar_lea.vmem %s364_s3, %s298_s22 }
   0xe   : > { %v172_v2 = vld [vmem:[%s165_s19] sm:$0xff]  ;;  %v174_v3 = vld [vmem:[%s165_s19 + $0x10] sm:$0xf]  ;;  %v173_v4 = vld [vmem:[%s165_s19 + $0x8] sm:$0xff] }
   0xf   : > { %v177_v5 = vpack.c.bf16 %v174_v3, %v172_v2  ;;  %v175_v6 = vld [vmem:[%s165_s19 + $0x18] sm:$0xf] }
  0x10   : > { %v178_v7 = vpack.c.bf16 %v175_v6, %v173_v4 }
  0x11   : > { %v191_v8 = vsel %vm189_vm0, %v177_v5, 0 }
  0x12   : > { %203 = vmatpush.bf16.msra.mxu0 %v191_v8  ;;  %v194_v9 = vsel %vm189_vm0, %v178_v7, 0 }
  0x13   : > { %216 = vmatpush.bf16.msra.mxu1 %v194_v9 }
  0x15   : > { %293 = vmatmul.msk.bf16.vlgmr.msra.gmra.mxu0 %vm185_vm1, %v176_v10 }
  0x16   : > { %294 = vmatmul.msk.bf16.vlgmr.msra.gmra.mxu1 %vm185_vm1, %v176_v10 }
  0x7f   : > { %v183_v11 = vpop.permute.xlu0 %182 }
  0x92   : > { %v205_v12 = vpop.f32.mrf.mxu0 }
  0x93   : > { %v218_v13 = vpop.f32.mrf.mxu1  ;;  %v206_v15 = vadd.f32 %v205_v12, %v183_v11 }
  0x94   : > { %v219_v14 = vadd.f32 %v218_v13, %v183_v11 }
  0x96   : > { %v224_v16 = vrot.slane %v219_v14, 6 }
  0x98   : > { %v226_v17 = vsel %vm225_vm2, %v206_v15, %v224_v16 }
  0x99   : > { %228 = vst [vmem:[%s170_s25] sm:$0xf] %v226_v17 }
  0x9a   : > { %v207_v18 = vpop.f32.mrf.mxu0 }
  0x9b   : > { %v220_v19 = vpop.f32.mrf.mxu1 }
  0x9c PF: > { %s13_s12 = sadd.s32 1, %s315_s12  }
  0x9d   : > { %p10_p4 = scmp.ge.s32.totalorder %s13_s12, 4  }
  0x9f   :  { %12 = sbr.rel (!%p10_p4) target bundleno = 1 (0x1), region = 62 }

// kernel: _lambda_.62
= control target key start
LH: loop header
LB: loop body
LE: loop exit
PB: predicated region body
PF: predicated region fallthrough
CT: control target
= control target key end

     0   :  { %s1255_s21 = smov 0   ;;  %s1355_s0 = inlined_call_operand.vmem [shape: f32[2,4,256], index: 0, kind: input, shape index: {}, may-alias: {0,3}]   ;;  %s1356_s1 = inlined_call_operand.vmem [shape: f32[2,4,256], index: 1, kind: input, shape index: {}]   ;;  %s1357_s2 = inlined_call_operand.vmem [shape: f32[2,4,256], index: 2, kind: input, shape index: {}]   ;;  %s1358_s3 = inlined_call_operand.vmem [shape: f32[2,4,256], index: 3, kind: input, shape index: {}, may-alias: {0,3}]   ;;  %s1359_s4 = inlined_call_operand.vmem [shape: f32[2,9,4,256], index: 4, kind: input, shape index: {}]   ;;  %s1360_s5 = inlined_call_operand.vmem [shape: f32[2,4], index: 5, kind: input, shape index: {}]   ;;  %s1361_s6 = inlined_call_operand.vmem [shape: f32[2,4], index: 6, kind: input, shape index: {}]   ;;  %s1362_s7 = inlined_call_operand.vmem [shape: f32[2,4], index: 7, kind: input, shape index: {}]   ;;  %s1363_s8 = inlined_call_operand.vmem [shape: f32[2,1], index: 8, kind: input, shape index: {}]   ;;  %s1364_s9 = inlined_call_operand.vmem [shape: f32[4,2], index: 9, kind: input, shape index: {}]   ;;  %s1365_s10 = inlined_call_operand.vmem [shape: f32[4,2], index: 10, kind: input, shape index: {}]   ;;  %s1366_s11 = inlined_call_operand.vmem [shape: f32[4,2], index: 11, kind: input, shape index: {}]   ;;  %s1367_s12 = inlined_call_operand.vmem [shape: f32[4,1], index: 12, kind: input, shape index: {}]   ;;  %s1368_s13 = inlined_call_operand.vmem [shape: f32[4,1], index: 13, kind: input, shape index: {}]   ;;  %s1369_s14 = inlined_call_operand.vmem [shape: f32[4,1], index: 14, kind: input, shape index: {}]   ;;  %s1370_s15 = inlined_call_operand.vmem [shape: f32[2,3,4,256], index: 15, kind: input, shape index: {}]   ;;  %s1371_s16 = inlined_call_operand.vmem [shape: f32[2,3,4,256], index: 16, kind: output, shape index: {}]  }
   0x1   :  { %1372 = sst [smem:[#allocation2_spill]] %s1355_s0 }
   0x2 LB: > { %s1080_s22 = sadd.s32 4294967295, %s1165_s21   ;;  %p1084_p0 = scmp.ge.s32.totalorder %s1165_s21, 1  ;;  %s1165_s21 = sphi %s1255_s21, %s26_s21  }
   0x3   : > { %p512_p1 = scmp.lt.s32.totalorder %s1165_s21, 3 }
   0x5   : > { %p513_p2 = pnand %p1084_p0, %p512_p1 }
   0x6   : > { %p587_p3 = scmp.lt.s32.totalorder (!%p513_p2), %s1080_s22, 1  ;;  %s1373_s27 = sld [smem:[#allocation2_spill]] (!%p513_p2) }
   0x7   : > { %516 = sbr.rel (%p513_p2) target bundleno = 596 (0x254), region = 84 }
   0xc   : > { %s1377_s22 = smov (!%p587_p3, %s1080_s22), 1  ;;  %vm661_vm0 = vcmask 1043456   ;;  %v1167_v39 = vmov 256.0   ;;  %v716_v48 = vld [vmem:[%s1361_s6] sm:$0x3]  ;;  %vm676_vm2 = vcmask 31744  }
   0xd   : > { %s1266_s23 = sshll.u32 %s1377_s22, 3  ;;  %s1129_s24 = smul.u32 72, %s1377_s22  ;;  %1145 = vrcp.f32 %v1167_v39  ;;  %v756_v51 = vld [vmem:[%s1362_s7] sm:$0x3]  ;;  %vm791_vm3 = vcmask 1041408   ;;  %vm787_vm4 = vcmask 15360  }
   0xe   : > { %s591_s28 = scalar_lea.vmem %s1373_s27, %s1266_s23  ;;  %s596_s0 = scalar_lea.vmem %s1356_s1, %s1266_s23  ;;  %v675_v54 = vld [vmem:[%s1360_s5] sm:$0x3] }
   0xf   : > { %v622_v0 = vld [vmem:[%s591_s28] sm:$0xff]  ;;  %s611_s19 = scalar_lea.vmem %s1359_s4, %s1129_s24  ;;  %s601_s26 = scalar_lea.vmem %s1357_s2, %s1266_s23 }
  0x10   : > { %v623_v1 = vld [vmem:[%s596_s0] sm:$0xff]  ;;  %v1096_v4 = vld [vmem:[%s611_s19 + $0x8] sm:$0xff]  ;;  %v1097_v5 = vld [vmem:[%s611_s19 + $0x10] sm:$0xff]  ;;  %s606_s28 = scalar_lea.vmem %s1358_s3, %s1266_s23  ;;  %s1130_s20 = smul.u32 24, %s1377_s22 }
  0x11   : > { %v1280_v2 = vadd.f32 %v623_v1, %v622_v0  ;;  %v627_v3 = vld [vmem:[%s611_s19] sm:$0xff]  ;;  %v1098_v7 = vld [vmem:[%s611_s19 + $0x18] sm:$0xff]  ;;  %v1100_v12 = vld [vmem:[%s611_s19 + $0x28] sm:$0xff] }
  0x12   : > { %v630_v6 = vadd.f32 %v1096_v4, %v627_v3  ;;  %v1099_v9 = vld [vmem:[%s611_s19 + $0x20] sm:$0xff]  ;;  %v1101_v14 = vld [vmem:[%s611_s19 + $0x30] sm:$0xff]  ;;  %v1102_v18 = vld [vmem:[%s611_s19 + $0x38] sm:$0xff]  ;;  %v1168_v3 = vmov 0   ;;  %s616_s24 = scalar_lea.vmem %s1370_s15, %s1130_s20  ;;  %s621_s23 = scalar_lea.vmem %s1371_s16, %s1130_s20 }
  0x13   : > { %656 = vst [vmem:[#allocation1] ss:$2 sm:$0xff] %v1280_v2  ;;  %v1287_v11 = vld [vmem:[%s601_s26] sm:$0xff]  ;;  %v1146_v40 = vpop.eup %1145  ;;  %1142 = vset.pattern.permute.xlu1 %v1168_v3  ;;  %1143 = vset.pattern.permute.xlu2 %v1168_v3 }
  0x14   : > { %v633_v8 = vadd.f32 %v1097_v5, %v630_v6  ;;  %v1103_v20 = vld [vmem:[%s611_s19 + $0x40] sm:$0xff]  ;;  %v668_v41 = vmul.f32 256.0, %v1146_v40  ;;  %vm672_vm1 = vweird.f32 %v1146_v40  ;;  %1144 = vset.pattern.permute.xlu0 %v1168_v3 }
  0x15   : > { %v626_v22 = vld [vmem:[%s606_s28] sm:$0xff] }
  0x16   : > { %v636_v10 = vadd.f32 %v1098_v7, %v633_v8  ;;  %v669_v42 = vsub.f32 1.0, %v668_v41  ;;  %v654_v55 = vld [vmem:[%s1363_s8] sm:$0x3] }
  0x17   : > { %v785_v63 = vld [vmem:[%s1364_s9] sm:$0xf] }
  0x18   : > { %v639_v13 = vadd.f32 %v1099_v9, %v636_v10  ;;  %v670_v43 = vmul.f32 %v1146_v40, %v669_v42  ;;  %v847_v0 = vld [vmem:[%s1365_s10] sm:$0xf] }
  0x19   : > { %v906_v1 = vld [vmem:[%s1366_s11] sm:$0xf] }
  0x1a   : > { %v657_v15 = vld.sshfl [vmem:[#allocation1] sm:$0xff pattern:$0x75316420]  ;;  %v658_v16 = vld.sshfl [vmem:[#allocation1 + $0x8] sm:$0xff pattern:$0x75316420]  ;;  %v642_v17 = vadd.f32 %v1100_v12, %v639_v13  ;;  %v671_v44 = vadd.f32 %v1146_v40, %v670_v43 }
  0x1b   : > { %705 = vst [vmem:[#allocation1] ss:$2 sm:$0xff] %v1287_v11  ;;  %v662_v36 = vsel %vm661_vm0, %v657_v15, 0.0  ;;  %v663_v37 = vsel %vm661_vm0, %v658_v16, 0.0  ;;  %v848_v4 = vld [vmem:[%s1368_s13] sm:$0xf] }
  0x1c   : > { %v645_v19 = vadd.f32 %v1101_v14, %v642_v17  ;;  %v664_v38 = vadd.f32 %v663_v37, %v662_v36  ;;  %v673_v45 = vsel %vm672_vm1, %v1146_v40, %v671_v44  ;;  %v907_v5 = vld [vmem:[%s1369_s14] sm:$0xf] }
  0x1d   : > { %v786_v10 = vld [vmem:[%s1367_s12] sm:$0xf] }
  0x1e   : > { %v648_v21 = vadd.f32 %v1102_v18, %v645_v19 }
  0x20   : > { %v651_v23 = vadd.f32 %v1103_v20, %v648_v21 }
  0x22   : > { %v706_v24 = vld.sshfl [vmem:[#allocation1] sm:$0xff pattern:$0x75316420]  ;;  %v707_v25 = vld.sshfl [vmem:[#allocation1 + $0x8] sm:$0xff pattern:$0x75316420] }
  0x23   : > { %v652_v26 = vmul.f32 0.11111111, %v651_v23  ;;  %v710_v27 = vsel %vm661_vm0, %v706_v24, 0.0  ;;  %v711_v28 = vsel %vm661_vm0, %v707_v25, 0.0 }
  0x24   : > { %v712_v29 = vadd.f32 %v711_v28, %v710_v27 }
  0x25   : > { %v1296_v30 = vadd.f32 %v652_v26, %v626_v22 }
  0x26   : > { %713 = vadd.xlane.f32.xlu1 %v712_v29 }
  0x27   : > { %745 = vst [vmem:[#allocation1] ss:$2 sm:$0xff] %v1296_v30 }
  0x2e   : > { %v746_v31 = vld.sshfl [vmem:[#allocation1] sm:$0xff pattern:$0x75316420]  ;;  %v747_v32 = vld.sshfl [vmem:[#allocation1 + $0x8] sm:$0xff pattern:$0x75316420] }
  0x2f   : > { %v750_v33 = vsel %vm661_vm0, %v746_v31, 0.0  ;;  %v751_v34 = vsel %vm661_vm0, %v747_v32, 0.0 }
  0x30   : > { %v752_v35 = vadd.f32 %v751_v34, %v750_v33 }
  0x32   : > { %753 = vadd.xlane.f32.xlu0 %v752_v35 }
  0x3a   : > { %665 = vadd.xlane.f32.xlu0 %v664_v38 }
  0x99   : > { %v714_v46 = vpop.xlane.xlu1 %713 }
  0x9a   : > { %v715_v47 = vmul.f32 %v714_v46, %v673_v45 }
  0x9c   : > { %1106 = vmatpush.msk.msra.mxu1 %vm661_vm0, %v715_v47 }
  0x9d   : > { %1107 = vmatmul.msk.f32.vlgmr.msra.gmra.mxu1 %vm676_vm2, %v716_v48 }
  0xa5   : > { %v754_v49 = vpop.xlane.xlu0 %753 }
  0xa6   : > { %v755_v50 = vmul.f32 %v754_v49, %v673_v45 }
  0xa8   : > { %1108 = vmatpush.msk.msra.mxu2 %vm661_vm0, %v755_v50 }
  0xa9   : > { %1109 = vmatmul.msk.f32.vlgmr.msra.gmra.mxu2 %vm676_vm2, %v756_v51 }
  0xad   : > { %v666_v52 = vpop.xlane.xlu0 %665 }
  0xae   : > { %v674_v53 = vmul.f32 %v673_v45, %v666_v52 }
  0xb0   : > { %1104 = vmatpush.msk.msra.mxu0 %vm661_vm0, %v674_v53 }
  0xb1   : > { %1105 = vmatmul.msk.f32.vlgmr.msra.gmra.mxu0 %vm676_vm2, %v675_v54 }
 0x11a   : > { %v740_v57 = vpop.f32.mrf.mxu1 }
 0x12c   : > { %v780_v59 = vpop.f32.mrf.mxu2 }
 0x12e   : > { %v700_v56 = vpop.f32.mrf.mxu0 }
 0x12f   : > { %v703_v58 = vadd.f32 %v700_v56, %v654_v55  ;;  %v1169_v55 = vmov 839922192  }
 0x130   : > { %v839_v56 = vunpack.c.l.s4 %v1169_v55 }
 0x131   : > { %v743_v60 = vadd.f32 %v740_v57, %v703_v58 }
 0x132   : > { %v840_v57 = vunpack.c.0.s8 %v839_v56 }
 0x133   : > { %v783_v61 = vadd.f32 %v780_v59, %v743_v60  ;;  %v1116_v60 = vld [vmem:[%s616_s24 + $0x8] sm:$0xff] }
 0x135   : > { %v784_v62 = vmax.f32 %v783_v61, 0.0 }
 0x137   : > { %1110 = vmatpush.msk.msra.mxu3 %vm791_vm3, %v784_v62  ;;  %1113 = vmatpush.msk.msrb.mxu0 %vm791_vm3, %v784_v62 }
 0x138   : > { %1118 = vmatpush.msk.msrb.mxu1 %vm791_vm3, %v784_v62  ;;  %1111 = vmatmul.msk.f32.vlgmr.msra.gmra.mxu3 %vm787_vm4, %v785_v63 }
 0x139   : > { %1114 = vmatmul.msk.f32.vlgmr.msrb.gmra.mxu0 %vm787_vm4, %v847_v0  ;;  %1119 = vmatmul.msk.f32.vlgmr.msrb.gmra.mxu1 %vm787_vm4, %v906_v1  ;;  %v1121_v1 = vld [vmem:[%s616_s24 + $0x10] sm:$0xff] }
 0x1b6   : > { %v869_v6 = vpop.f32.mrf.mxu0  ;;  %v928_v7 = vpop.f32.mrf.mxu1 }
 0x1b7   : > { %v870_v8 = vadd.f32 %v869_v6, %v848_v4  ;;  %v929_v9 = vadd.f32 %v928_v7, %v907_v5  ;;  %v844_v7 = vld [vmem:[%s616_s24] sm:$0xff] }
 0x1b9   : > { %v1115_v12 = vmul.f32 -1.442695, %v870_v8  ;;  %v1120_v13 = vmul.f32 -1.442695, %v929_v9 }
 0x1bb   : > { %v812_v14 = vpop.f32.mrf.mxu3  ;;  %1147 = vpow2.f32 %v1115_v12 }
 0x1bc   : > { %v813_v15 = vadd.f32 %v812_v14, %v786_v10  ;;  %1149 = vpow2.f32 %v1120_v13 }
 0x1be   : > { %v1112_v16 = vmul.f32 -1.442695, %v813_v15 }
 0x1c0   : > { %1151 = vpow2.f32 %v1112_v16 }
 0x1c1   : > { %v1148_v17 = vpop.eup %1147 }
 0x1c2   : > { %v1150_v18 = vpop.eup %1149  ;;  %v875_v19 = vadd.f32 1.0, %v1148_v17 }
 0x1c3   : > { %v934_v20 = vadd.f32 1.0, %v1150_v18 }
 0x1c4   : > { %1153 = vrcp.f32 %v875_v19  ;;  %v887_v26 = vand.u32 2147483648, %v875_v19  ;;  %vm881_vm5 = vweird.f32 %v875_v19  ;;  %v885_v29 = vand.u32 2147483647, %v875_v19 }
 0x1c5   : > { %1155 = vrcp.f32 %v934_v20  ;;  %vm940_vm9 = vweird.f32 %v934_v20  ;;  %v946_v40 = vand.u32 2147483648, %v934_v20  ;;  %v944_v44 = vand.u32 2147483647, %v934_v20 }
 0x1c6   : > { %v1152_v21 = vpop.eup %1151  ;;  %v888_v36 = vor.u32 1.1754944e-38, %v887_v26  ;;  %vm886_vm8 = vcmp.eq.f32.partialorder %v885_v29, 8.507059e+37 }
 0x1c7   : > { %v818_v22 = vadd.f32 1.0, %v1152_v21  ;;  %v947_v49 = vor.u32 1.1754944e-38, %v946_v40  ;;  %vm945_vm15 = vcmp.eq.f32.partialorder %v944_v44, 8.507059e+37 }
 0x1c9   : > { %1157 = vrcp.f32 %v818_v22  ;;  %v830_v41 = vand.u32 2147483648, %v818_v22  ;;  %v828_v46 = vand.u32 2147483647, %v818_v22  ;;  %vm824_vm13 = vweird.f32 %v818_v22 }
 0x1ca   : > { %v1154_v23 = vpop.eup %1153 }
 0x1cb   : > { %v1156_v24 = vpop.eup %1155  ;;  %v877_v25 = vmul.f32 %v1154_v23, %v875_v19  ;;  %vm882_vm6 = vweird.f32 %v1154_v23  ;;  %v831_v50 = vor.u32 1.1754944e-38, %v830_v41  ;;  %vm829_vm0 = vcmp.eq.f32.partialorder %v828_v46, 8.507059e+37 }
 0x1cc   : > { %v936_v27 = vmul.f32 %v1156_v24, %v934_v20  ;;  %vm1336_vm7 = vmor %vm881_vm5, %vm882_vm6  ;;  %vm941_vm10 = vweird.f32 %v1156_v24 }
 0x1cd   : > { %v878_v28 = vsub.f32 1.0, %v877_v25  ;;  %vm942_vm12 = vmor %vm940_vm9, %vm941_vm10 }
 0x1ce   : > { %v937_v31 = vsub.f32 1.0, %v936_v27 }
 0x1cf   : > { %v1158_v32 = vpop.eup %1157  ;;  %v879_v33 = vmul.f32 %v1154_v23, %v878_v28 }
 0x1d0   : > { %v820_v34 = vmul.f32 %v1158_v32, %v818_v22  ;;  %v938_v37 = vmul.f32 %v1156_v24, %v937_v31  ;;  %vm825_vm11 = vweird.f32 %v1158_v32 }
 0x1d1   : > { %v880_v38 = vadd.f32 %v1154_v23, %v879_v33  ;;  %vm826_vm14 = vmor %vm824_vm13, %vm825_vm11 }
 0x1d2   : > { %v821_v39 = vsub.f32 1.0, %v820_v34  ;;  %v939_v43 = vadd.f32 %v1156_v24, %v938_v37 }
 0x1d3   : > { %v884_v42 = vsel %vm1336_vm7, %v1154_v23, %v880_v38 }
 0x1d4   : > { %v822_v45 = vmul.f32 %v1158_v32, %v821_v39  ;;  %v889_v47 = vsel %vm886_vm8, %v888_v36, %v884_v42  ;;  %v943_v51 = vsel %vm942_vm12, %v1156_v24, %v939_v43 }
 0x1d5   : > { %893 = vperm.xlu2 %1143, %v889_v47   ;;  %v948_v54 = vsel %vm945_vm15, %v947_v49, %v943_v51 }
 0x1d6   : > { %v823_v48 = vadd.f32 %v1158_v32, %v822_v45 }
 0x1d8   : > { %v827_v52 = vsel %vm826_vm14, %v1158_v32, %v823_v48 }
 0x1d9   : > { %v832_v53 = vsel %vm829_vm0, %v831_v50, %v827_v52 }
 0x1da   : > { %836 = vperm.xlu1 %1142, %v832_v53  }
 0x1dd   : > { %952 = vperm.xlu2 %1143, %v948_v54  }
 0x22f   : > { %v894_v58 = vpop.permute.xlu2 %893 }
 0x230   : > { %v898_v59 = vperm.slane %v894_v58, %v840_v57 }
 0x232   : > { %v900_v61 = vmul.f32 %v898_v59, %v1287_v11 }
 0x234   : > { %v903_v62 = vadd.f32 %v1116_v60, %v900_v61 }
 0x236   : > { %1117 = vst [vmem:[%s621_s23 + $0x8] sm:$0xff] %v903_v62 }
 0x237   : > { %v953_v63 = vpop.permute.xlu2 %952 }
 0x238   : > { %v957_v0 = vperm.slane %v953_v63, %v840_v57 }
 0x23a   : > { %v959_v3 = vmul.f32 %v957_v0, %v1296_v30 }
 0x23c   : > { %v962_v4 = vadd.f32 %v1121_v1, %v959_v3 }
 0x23e   : > { %1122 = vst [vmem:[%s621_s23 + $0x10] sm:$0xff] %v962_v4 }
 0x24c   : > { %v837_v5 = vpop.permute.xlu1 %836 }
 0x24d   : > { %v841_v6 = vperm.slane %v837_v5, %v840_v57 }
 0x24f   : > { %v843_v8 = vmul.f32 %v841_v6, %v1280_v2 }
 0x251   : > { %v845_v9 = vadd.f32 %v844_v7, %v843_v8 }
 0x253   : > { %846 = vst [vmem:[%s621_s23] sm:$0xff] %v845_v9 }
 0x254 PF: > { %s26_s21 = sadd.s32 1, %s1165_s21  }
 0x255   : > { %p23_p4 = scmp.ge.s32.totalorder %s26_s21, 4  }
 0x257   :  { %25 = sbr.rel (!%p23_p4) target bundleno = 2 (0x2), region = 141 }

</bundles_post_ra>
